<compile_context>
chip_gen: v5e
topology: v5e:2x2
jax: 0.10.0
libtpu: 0.0.40
codegen_flags: <defaults>
</compile_context>

<pallas_src>
import functools

import jax
import jax.numpy as jnp
from jax import lax
from jax.experimental import pallas as pl
from jax.experimental.pallas import tpu as pltpu


def _round_up(x, m):
    return (x + m - 1) // m * m


def _pick_tm(m):
    # rows per tile: multiple of 8, and >= 2 tiles whenever possible so a
    # "parallel" grid axis can be split across the two TensorCores of v7x.
    if m >= 256:
        return 128
    if m >= 16:
        return _round_up((m + 1) // 2, 8)
    return _round_up(max(m, 1), 8)


# ----------------------------------------------------------------------------
# Pallas kernels
# ----------------------------------------------------------------------------
def _mm_bias_relu_kernel(x_ref, w_ref, b_ref, o_ref):
    # x: (TM, Cin) bf16, w: (Cin, Cout) bf16 (BN scale pre-folded), b: (1, Cout) f32.
    acc = jnp.dot(x_ref[...], w_ref[...], preferred_element_type=jnp.float32)
    o_ref[...] = jnp.maximum(acc + b_ref[...], 0.0).astype(o_ref.dtype)


def _final_residual_kernel(b1_ref, b2_ref, id_ref, w1_ref, w2_ref, b_ref,
                           o_ref, *, scale, activate):
    # Fused: conv1x1([b1|b2]) + bias, residual scale-add, optional ReLU.
    acc = jnp.dot(b1_ref[...], w1_ref[...], preferred_element_type=jnp.float32)
    acc = acc + jnp.dot(b2_ref[...], w2_ref[...],
                        preferred_element_type=jnp.float32)
    y = scale * (acc + b_ref[...]) + id_ref[...]
    if activate:
        y = jnp.maximum(y, 0.0)
    o_ref[...] = y.astype(o_ref.dtype)


# ----------------------------------------------------------------------------
# Wrappers
# ----------------------------------------------------------------------------
def matmul_bias_relu(x2d, w_mat, bias):
    """(M, Cin) @ (Cin, Cout) + bias + ReLU; BN scale already folded into w."""
    M, Cin = x2d.shape
    Cout = w_mat.shape[1]
    tm = _pick_tm(M)
    Mp = _round_up(M, tm)
    xb = x2d.astype(jnp.bfloat16)
    if Mp != M:
        xb = jnp.pad(xb, ((0, Mp - M), (0, 0)))
    out = pl.pallas_call(
        _mm_bias_relu_kernel,
        out_shape=jax.ShapeDtypeStruct((Mp, Cout), jnp.bfloat16),
        grid=(Mp // tm,),
        in_specs=[
            pl.BlockSpec((tm, Cin), lambda i: (i, 0)),
            pl.BlockSpec((Cin, Cout), lambda i: (0, 0)),
            pl.BlockSpec((1, Cout), lambda i: (0, 0)),
        ],
        out_specs=pl.BlockSpec((tm, Cout), lambda i: (i, 0)),
        compiler_params=pltpu.CompilerParams(
            dimension_semantics=("parallel",)),
    )(xb, w_mat.astype(jnp.bfloat16),
      bias.reshape(1, Cout).astype(jnp.float32))
    return out[:M]


def conv3_bn_relu(x_nhwc, w_hwio, bias, axis):
    """3-tap conv along `axis` (2 -> (1,3) kernel, pad (0,1); 1 -> (3,1) kernel,
    pad (1,0)), stride 1, folded-BN bias + ReLU.

    The three shifted taps are concatenated along channels by XLA (operand has
    only 192 channels, so ~150 KB of extra traffic), turning the conv into one
    matmul with a 3*C-deep contraction.  This replaces the previous 24-step
    tap-streaming grid per conv (whose per-grid-step overhead dominated) and
    removes every HBM transpose around the convs."""
    N, H, W, C = x_nhwc.shape
    if axis == 2:
        taps = w_hwio[0]                                   # (3, C, F)
        xp = jnp.pad(x_nhwc, ((0, 0), (0, 0), (1, 1), (0, 0)))
        shifted = [xp[:, :, j:j + W, :] for j in range(3)]
    else:
        taps = w_hwio[:, 0]                                # (3, C, F)
        xp = jnp.pad(x_nhwc, ((0, 0), (1, 1), (0, 0), (0, 0)))
        shifted = [xp[:, j:j + H, :, :] for j in range(3)]
    F = taps.shape[-1]
    xcat = jnp.concatenate(shifted, axis=-1).reshape(N * H * W, 3 * C)
    wcat = taps.reshape(3 * C, F)        # tap-major rows match xcat's channel blocks
    y2d = matmul_bias_relu(xcat, wcat, bias)
    return y2d.reshape(N, H, W, F)


def final_conv_residual(b1_2d, b2_2d, identity_2d, w_mat, bias, *, scale,
                        activate):
    """Fused 1x1 conv (384->1792, bias) + scale*(.) + identity + ReLU."""
    M, Cb = b1_2d.shape
    Cout = w_mat.shape[1]
    tm = _pick_tm(M)
    Mp = _round_up(M, tm)

    def pad_rows(a):
        return a if Mp == M else jnp.pad(a, ((0, Mp - M), (0, 0)))

    b1 = pad_rows(b1_2d.astype(jnp.bfloat16))
    b2 = pad_rows(b2_2d.astype(jnp.bfloat16))
    idn = pad_rows(identity_2d.astype(jnp.float32))
    w1 = w_mat[:Cb].astype(jnp.bfloat16)
    w2 = w_mat[Cb:].astype(jnp.bfloat16)
    kern = functools.partial(_final_residual_kernel, scale=scale,
                             activate=activate)
    out = pl.pallas_call(
        kern,
        out_shape=jax.ShapeDtypeStruct((Mp, Cout), jnp.float32),
        grid=(Mp // tm,),
        in_specs=[
            pl.BlockSpec((tm, Cb), lambda i: (i, 0)),
            pl.BlockSpec((tm, Cb), lambda i: (i, 0)),
            pl.BlockSpec((tm, Cout), lambda i: (i, 0)),
            pl.BlockSpec((Cb, Cout), lambda i: (0, 0)),
            pl.BlockSpec((Cb, Cout), lambda i: (0, 0)),
            pl.BlockSpec((1, Cout), lambda i: (0, 0)),
        ],
        out_specs=pl.BlockSpec((tm, Cout), lambda i: (i, 0)),
        compiler_params=pltpu.CompilerParams(
            dimension_semantics=("parallel",)),
    )(b1, b2, idn, w1, w2, bias.reshape(1, Cout).astype(jnp.float32))
    return out[:M]


# ----------------------------------------------------------------------------
# InceptionCUnit
# ----------------------------------------------------------------------------
def make_conv_block_params(key, kh, kw, cin, cout, eps):
    """Conv weight (HWIO) + eval-mode BatchNorm folded into (scale, bias)."""
    k_w, k_g, k_b, k_m, k_v = jax.random.split(key, 5)
    w = jax.random.normal(k_w, (kh, kw, cin, cout), jnp.float32) * 0.05
    gamma = 1.0 + 0.1 * jax.random.normal(k_g, (cout,), jnp.float32)
    beta = 0.1 * jax.random.normal(k_b, (cout,), jnp.float32)
    mean = 0.1 * jax.random.normal(k_m, (cout,), jnp.float32)
    var = 1.0 + 0.1 * jnp.abs(jax.random.normal(k_v, (cout,), jnp.float32))
    scale = gamma / jnp.sqrt(var + eps)
    bias = beta - mean * scale
    return (w, scale, bias)


def init_inception_c_params(key, bn_eps=1e-5, in_channels=1792):
    keys = jax.random.split(key, 6)
    return {
        # branch1: 1x1 conv block, 1792 -> 192
        "b1": make_conv_block_params(keys[0], 1, 1, in_channels, 192, bn_eps),
        # branch2: 1x1 (1792->192), (1,3) pad (0,1), (3,1) pad (1,0)
        "b2c1": make_conv_block_params(keys[1], 1, 1, in_channels, 192, bn_eps),
        "b2c2": make_conv_block_params(keys[2], 1, 3, 192, 192, bn_eps),
        "b2c3": make_conv_block_params(keys[3], 3, 1, 192, 192, bn_eps),
        # final 1x1 conv, 384 -> 1792, bias=True (no BN, no activation)
        "conv": (jax.random.normal(keys[4], (1, 1, 384, in_channels),
                                   jnp.float32) * 0.05,
                 0.1 * jax.random.normal(keys[5], (in_channels,), jnp.float32)),
    }


@functools.partial(jax.jit, static_argnames=("scale", "activate"))
def inception_c_unit(x_nchw, params, scale=0.2, activate=True):
    x = jnp.transpose(x_nchw, (0, 2, 3, 1))           # NCHW -> NHWC
    N, H, W, Cin = x.shape
    M = N * H * W
    x2d = x.reshape(M, Cin)

    w_b1, s_b1, bi_b1 = params["b1"]
    w_21, s_21, bi_21 = params["b2c1"]
    w_22, s_22, bi_22 = params["b2c2"]
    w_23, s_23, bi_23 = params["b2c3"]
    w_fin, bi_fin = params["conv"]

    # branch1's 1x1 and branch2's first 1x1 fused into ONE matmul (Cout = 384),
    # BN scales folded into the weight columns -> the 1792-channel input is
    # read from HBM exactly once for both branches.
    w_cat = jnp.concatenate([w_b1[0, 0] * s_b1, w_21[0, 0] * s_21], axis=1)
    b_cat = jnp.concatenate([bi_b1, bi_21], axis=0)
    y = matmul_bias_relu(x2d, w_cat, b_cat)           # (M, 384) bf16

    nb1 = w_b1.shape[-1]
    b1_2d = y[:, :nb1]                                # (M, 192)
    b2 = y[:, nb1:].reshape(N, H, W, -1)              # (N, H, W, 192)

    # branch2 tail: (1,3) conv then (3,1) conv, each as a single 576-deep matmul.
    b2 = conv3_bn_relu(b2, w_22 * s_22, bi_22, axis=2)
    b2 = conv3_bn_relu(b2, w_23 * s_23, bi_23, axis=1)
    b2_2d = b2.reshape(M, -1)

    # final 1x1 conv + bias + residual scale-add + ReLU, concat-free.
    out2d = final_conv_residual(b1_2d, b2_2d, x2d, w_fin[0, 0], bi_fin,
                                scale=scale, activate=activate)
    out = out2d.reshape(N, H, W, -1)
    # TODO(synk): if the surrounding model stays NHWC end-to-end, drop the
    # boundary transposes (kept here to match the PyTorch NCHW semantics).
    return jnp.transpose(out, (0, 3, 1, 2))           # NHWC -> NCHW


# ----------------------------------------------------------------------------
# Pure-JAX f32 reference (same folded-BN parameters), for a sanity check.
# ----------------------------------------------------------------------------
def _ref_conv_block(x, w, s, b, pad):
    y = lax.conv_general_dilated(
        x, w, (1, 1), [(pad[0], pad[0]), (pad[1], pad[1])],
        dimension_numbers=("NHWC", "HWIO", "NHWC"))
    return jnp.maximum(y * s + b, 0.0)


def _ref_forward(x_nchw, params, scale=0.2, activate=True):
    x = jnp.transpose(x_nchw, (0, 2, 3, 1))
    b1 = _ref_conv_block(x, *params["b1"], (0, 0))
    b2 = _ref_conv_block(x, *params["b2c1"], (0, 0))
    b2 = _ref_conv_block(b2, *params["b2c2"], (0, 1))
    b2 = _ref_conv_block(b2, *params["b2c3"], (1, 0))
    cat = jnp.concatenate([b1, b2], axis=-1)
    w_fin, bi_fin = params["conv"]
    y = lax.conv_general_dilated(
        cat, w_fin, (1, 1), [(0, 0), (0, 0)],
        dimension_numbers=("NHWC", "HWIO", "NHWC")) + bi_fin
    y = scale * y + x
    if activate:
        y = jnp.maximum(y, 0.0)
    return jnp.transpose(y, (0, 3, 1, 2))


if __name__ == "__main__":
    key = jax.random.PRNGKey(0)
    k_x, k_p = jax.random.split(key)

    # in_channels is fixed at 1792 by the module; keep batch/spatial small.
    N, C, H, W = 2, 1792, 8, 8
    x = jax.random.normal(k_x, (N, C, H, W), jnp.float32)
    params = init_inception_c_params(k_p, bn_eps=1e-5, in_channels=C)

    out = jax.block_until_ready(inception_c_unit(x, params))
    assert out.shape == (N, C, H, W), out.shape

    ref = jax.block_until_ready(_ref_forward(x, params))
    max_err = float(jnp.max(jnp.abs(out - ref)))
    assert jnp.allclose(out, ref, rtol=5e-2, atol=2.5e-1), max_err

    print("KERNEL_OK")
</pallas_src>

<mosaic_0001>
module attributes {stable_mosaic.version = 11 : i64} {
  func.func @_mm_bias_relu_kernel(%arg0: i32, %arg1: memref<64x1792xbf16, #tpu.memory_space<vmem>>, %arg2: memref<1792x384xbf16, #tpu.memory_space<vmem>>, %arg3: memref<1x384xf32, #tpu.memory_space<vmem>>, %arg4: memref<64x384xbf16, #tpu.memory_space<vmem>>) attributes {dimension_semantics = [#tpu.dimension_semantics<parallel>], iteration_bounds = array<i64: 2>, scalar_prefetch = 0 : i64, scratch_operands = 0 : i64, tpu.core_type = #tpu.core_type<tc>, window_params = [{transform_indices = @transform_0, window_bounds = array<i64: 64, 1792>}, {pipeline_mode = #tpu.pipeline_mode<synchronous>, transform_indices = @transform_1, window_bounds = array<i64: 1792, 384>}, {pipeline_mode = #tpu.pipeline_mode<synchronous>, transform_indices = @transform_2, window_bounds = array<i64: 1, 384>}, {transform_indices = @transform_3, window_bounds = array<i64: 64, 384>}]} {
    %c0 = arith.constant 0 : index
    %c0_0 = arith.constant 0 : index
    %0 = vector.load %arg1[%c0, %c0_0] : memref<64x1792xbf16, #tpu.memory_space<vmem>>, vector<64x1792xbf16>
    %c0_1 = arith.constant 0 : index
    %c0_2 = arith.constant 0 : index
    %1 = vector.load %arg2[%c0_1, %c0_2] : memref<1792x384xbf16, #tpu.memory_space<vmem>>, vector<1792x384xbf16>
    %cst = arith.constant dense<0.000000e+00> : vector<64x384xf32>
    %2 = tpu.matmul %0, %1, %cst {dimension_numbers = #tpu.dot_dimension_numbers<[1], [0], [0], [1], [0, 0, 1, 1], [], []>} : vector<64x1792xbf16>, vector<1792x384xbf16>, vector<64x384xf32> -> vector<64x384xf32>
    %c0_3 = arith.constant 0 : index
    %c0_4 = arith.constant 0 : index
    %3 = vector.load %arg3[%c0_3, %c0_4] : memref<1x384xf32, #tpu.memory_space<vmem>>, vector<1x384xf32>
    %4 = vector.broadcast %3 : vector<1x384xf32> to vector<64x384xf32>
    %5 = arith.addf %2, %4 : vector<64x384xf32>
    %cst_5 = arith.constant 0.000000e+00 : f32
    %6 = vector.broadcast %cst_5 : f32 to vector<64x384xf32>
    %7 = arith.maximumf %5, %6 : vector<64x384xf32>
    %8 = arith.truncf %7 : vector<64x384xf32> to vector<64x384xbf16>
    %c0_6 = arith.constant 0 : index
    %c0_7 = arith.constant 0 : index
    %9 = vector.load %arg4[%c0_6, %c0_7] : memref<64x384xbf16, #tpu.memory_space<vmem>>, vector<64x384xbf16>
    tpu.vector_store %arg4[%c0_6, %c0_7], %8 {strides = array<i32>} : memref<64x384xbf16, #tpu.memory_space<vmem>>, vector<64x384xbf16>,
    return
  }
  func.func @transform_0(%arg0: i32) -> (i32, i32) {
    %c0_i32 = arith.constant 0 : i32
    %c0_i32_0 = arith.constant 0 : i32
    return %arg0, %c0_i32 : i32, i32
  }
  func.func @transform_1(%arg0: i32) -> (i32, i32) {
    %c0_i32 = arith.constant 0 : i32
    %c0_i32_0 = arith.constant 0 : i32
    %c0_i32_1 = arith.constant 0 : i32
    return %c0_i32, %c0_i32_0 : i32, i32
  }
  func.func @transform_2(%arg0: i32) -> (i32, i32) {
    %c0_i32 = arith.constant 0 : i32
    %c0_i32_0 = arith.constant 0 : i32
    %c0_i32_1 = arith.constant 0 : i32
    return %c0_i32, %c0_i32_0 : i32, i32
  }
  func.func @transform_3(%arg0: i32) -> (i32, i32) {
    %c0_i32 = arith.constant 0 : i32
    %c0_i32_0 = arith.constant 0 : i32
    return %arg0, %c0_i32 : i32, i32
  }
}

module attributes {stable_mosaic.version = 11 : i64} {
  func.func @_mm_bias_relu_kernel(%arg0: i32, %arg1: memref<64x576xbf16, #tpu.memory_space<vmem>>, %arg2: memref<576x192xbf16, #tpu.memory_space<vmem>>, %arg3: memref<1x192xf32, #tpu.memory_space<vmem>>, %arg4: memref<64x192xbf16, #tpu.memory_space<vmem>>) attributes {dimension_semantics = [#tpu.dimension_semantics<parallel>], iteration_bounds = array<i64: 2>, scalar_prefetch = 0 : i64, scratch_operands = 0 : i64, tpu.core_type = #tpu.core_type<tc>, window_params = [{transform_indices = @transform_0, window_bounds = array<i64: 64, 576>}, {pipeline_mode = #tpu.pipeline_mode<synchronous>, transform_indices = @transform_1, window_bounds = array<i64: 576, 192>}, {pipeline_mode = #tpu.pipeline_mode<synchronous>, transform_indices = @transform_2, window_bounds = array<i64: 1, 192>}, {transform_indices = @transform_3, window_bounds = array<i64: 64, 192>}]} {
    %c0 = arith.constant 0 : index
    %c0_0 = arith.constant 0 : index
    %0 = vector.load %arg1[%c0, %c0_0] : memref<64x576xbf16, #tpu.memory_space<vmem>>, vector<64x576xbf16>
    %c0_1 = arith.constant 0 : index
    %c0_2 = arith.constant 0 : index
    %1 = vector.load %arg2[%c0_1, %c0_2] : memref<576x192xbf16, #tpu.memory_space<vmem>>, vector<576x192xbf16>
    %cst = arith.constant dense<0.000000e+00> : vector<64x192xf32>
    %2 = tpu.matmul %0, %1, %cst {dimension_numbers = #tpu.dot_dimension_numbers<[1], [0], [0], [1], [0, 0, 1, 1], [], []>} : vector<64x576xbf16>, vector<576x192xbf16>, vector<64x192xf32> -> vector<64x192xf32>
    %c0_3 = arith.constant 0 : index
    %c0_4 = arith.constant 0 : index
    %3 = vector.load %arg3[%c0_3, %c0_4] : memref<1x192xf32, #tpu.memory_space<vmem>>, vector<1x192xf32>
    %4 = vector.broadcast %3 : vector<1x192xf32> to vector<64x192xf32>
    %5 = arith.addf %2, %4 : vector<64x192xf32>
    %cst_5 = arith.constant 0.000000e+00 : f32
    %6 = vector.broadcast %cst_5 : f32 to vector<64x192xf32>
    %7 = arith.maximumf %5, %6 : vector<64x192xf32>
    %8 = arith.truncf %7 : vector<64x192xf32> to vector<64x192xbf16>
    %c0_6 = arith.constant 0 : index
    %c0_7 = arith.constant 0 : index
    %9 = vector.load %arg4[%c0_6, %c0_7] : memref<64x192xbf16, #tpu.memory_space<vmem>>, vector<64x192xbf16>
    tpu.vector_store %arg4[%c0_6, %c0_7], %8 {strides = array<i32>} : memref<64x192xbf16, #tpu.memory_space<vmem>>, vector<64x192xbf16>,
    return
  }
  func.func @transform_0(%arg0: i32) -> (i32, i32) {
    %c0_i32 = arith.constant 0 : i32
    %c0_i32_0 = arith.constant 0 : i32
    return %arg0, %c0_i32 : i32, i32
  }
  func.func @transform_1(%arg0: i32) -> (i32, i32) {
    %c0_i32 = arith.constant 0 : i32
    %c0_i32_0 = arith.constant 0 : i32
    %c0_i32_1 = arith.constant 0 : i32
    return %c0_i32, %c0_i32_0 : i32, i32
  }
  func.func @transform_2(%arg0: i32) -> (i32, i32) {
    %c0_i32 = arith.constant 0 : i32
    %c0_i32_0 = arith.constant 0 : i32
    %c0_i32_1 = arith.constant 0 : i32
    return %c0_i32, %c0_i32_0 : i32, i32
  }
  func.func @transform_3(%arg0: i32) -> (i32, i32) {
    %c0_i32 = arith.constant 0 : i32
    %c0_i32_0 = arith.constant 0 : i32
    return %arg0, %c0_i32 : i32, i32
  }
}

module attributes {stable_mosaic.version = 11 : i64} {
  func.func @_final_residual_kernel(%arg0: i32, %arg1: memref<64x192xbf16, #tpu.memory_space<vmem>>, %arg2: memref<64x192xbf16, #tpu.memory_space<vmem>>, %arg3: memref<64x1792xf32, #tpu.memory_space<vmem>>, %arg4: memref<192x1792xbf16, #tpu.memory_space<vmem>>, %arg5: memref<192x1792xbf16, #tpu.memory_space<vmem>>, %arg6: memref<1x1792xf32, #tpu.memory_space<vmem>>, %arg7: memref<64x1792xf32, #tpu.memory_space<vmem>>) attributes {dimension_semantics = [#tpu.dimension_semantics<parallel>], iteration_bounds = array<i64: 2>, scalar_prefetch = 0 : i64, scratch_operands = 0 : i64, tpu.core_type = #tpu.core_type<tc>, window_params = [{transform_indices = @transform_0, window_bounds = array<i64: 64, 192>}, {transform_indices = @transform_1, window_bounds = array<i64: 64, 192>}, {transform_indices = @transform_2, window_bounds = array<i64: 64, 1792>}, {pipeline_mode = #tpu.pipeline_mode<synchronous>, transform_indices = @transform_3, window_bounds = array<i64: 192, 1792>}, {pipeline_mode = #tpu.pipeline_mode<synchronous>, transform_indices = @transform_4, window_bounds = array<i64: 192, 1792>}, {pipeline_mode = #tpu.pipeline_mode<synchronous>, transform_indices = @transform_5, window_bounds = array<i64: 1, 1792>}, {transform_indices = @transform_6, window_bounds = array<i64: 64, 1792>}]} {
    %c0 = arith.constant 0 : index
    %c0_0 = arith.constant 0 : index
    %0 = vector.load %arg1[%c0, %c0_0] : memref<64x192xbf16, #tpu.memory_space<vmem>>, vector<64x192xbf16>
    %c0_1 = arith.constant 0 : index
    %c0_2 = arith.constant 0 : index
    %1 = vector.load %arg4[%c0_1, %c0_2] : memref<192x1792xbf16, #tpu.memory_space<vmem>>, vector<192x1792xbf16>
    %cst = arith.constant dense<0.000000e+00> : vector<64x1792xf32>
    %2 = tpu.matmul %0, %1, %cst {dimension_numbers = #tpu.dot_dimension_numbers<[1], [0], [0], [1], [0, 0, 1, 1], [], []>} : vector<64x192xbf16>, vector<192x1792xbf16>, vector<64x1792xf32> -> vector<64x1792xf32>
    %c0_3 = arith.constant 0 : index
    %c0_4 = arith.constant 0 : index
    %3 = vector.load %arg2[%c0_3, %c0_4] : memref<64x192xbf16, #tpu.memory_space<vmem>>, vector<64x192xbf16>
    %c0_5 = arith.constant 0 : index
    %c0_6 = arith.constant 0 : index
    %4 = vector.load %arg5[%c0_5, %c0_6] : memref<192x1792xbf16, #tpu.memory_space<vmem>>, vector<192x1792xbf16>
    %cst_7 = arith.constant dense<0.000000e+00> : vector<64x1792xf32>
    %5 = tpu.matmul %3, %4, %cst_7 {dimension_numbers = #tpu.dot_dimension_numbers<[1], [0], [0], [1], [0, 0, 1, 1], [], []>} : vector<64x192xbf16>, vector<192x1792xbf16>, vector<64x1792xf32> -> vector<64x1792xf32>
    %6 = arith.addf %2, %5 : vector<64x1792xf32>
    %c0_8 = arith.constant 0 : index
    %c0_9 = arith.constant 0 : index
    %7 = vector.load %arg6[%c0_8, %c0_9] : memref<1x1792xf32, #tpu.memory_space<vmem>>, vector<1x1792xf32>
    %8 = vector.broadcast %7 : vector<1x1792xf32> to vector<64x1792xf32>
    %9 = arith.addf %6, %8 : vector<64x1792xf32>
    %cst_10 = arith.constant 2.000000e-01 : f32
    %10 = vector.broadcast %cst_10 : f32 to vector<64x1792xf32>
    %11 = arith.mulf %10, %9 : vector<64x1792xf32>
    %c0_11 = arith.constant 0 : index
    %c0_12 = arith.constant 0 : index
    %12 = vector.load %arg3[%c0_11, %c0_12] : memref<64x1792xf32, #tpu.memory_space<vmem>>, vector<64x1792xf32>
    %13 = arith.addf %11, %12 : vector<64x1792xf32>
    %cst_13 = arith.constant 0.000000e+00 : f32
    %14 = vector.broadcast %cst_13 : f32 to vector<64x1792xf32>
    %15 = arith.maximumf %13, %14 : vector<64x1792xf32>
    %c0_14 = arith.constant 0 : index
    %c0_15 = arith.constant 0 : index
    %16 = vector.load %arg7[%c0_14, %c0_15] : memref<64x1792xf32, #tpu.memory_space<vmem>>, vector<64x1792xf32>
    tpu.vector_store %arg7[%c0_14, %c0_15], %15 {strides = array<i32>} : memref<64x1792xf32, #tpu.memory_space<vmem>>, vector<64x1792xf32>,
    return
  }
  func.func @transform_0(%arg0: i32) -> (i32, i32) {
    %c0_i32 = arith.constant 0 : i32
    %c0_i32_0 = arith.constant 0 : i32
    return %arg0, %c0_i32 : i32, i32
  }
  func.func @transform_1(%arg0: i32) -> (i32, i32) {
    %c0_i32 = arith.constant 0 : i32
    %c0_i32_0 = arith.constant 0 : i32
    return %arg0, %c0_i32 : i32, i32
  }
  func.func @transform_2(%arg0: i32) -> (i32, i32) {
    %c0_i32 = arith.constant 0 : i32
    %c0_i32_0 = arith.constant 0 : i32
    return %arg0, %c0_i32 : i32, i32
  }
  func.func @transform_3(%arg0: i32) -> (i32, i32) {
    %c0_i32 = arith.constant 0 : i32
    %c0_i32_0 = arith.constant 0 : i32
    %c0_i32_1 = arith.constant 0 : i32
    return %c0_i32, %c0_i32_0 : i32, i32
  }
  func.func @transform_4(%arg0: i32) -> (i32, i32) {
    %c0_i32 = arith.constant 0 : i32
    %c0_i32_0 = arith.constant 0 : i32
    %c0_i32_1 = arith.constant 0 : i32
    return %c0_i32, %c0_i32_0 : i32, i32
  }
  func.func @transform_5(%arg0: i32) -> (i32, i32) {
    %c0_i32 = arith.constant 0 : i32
    %c0_i32_0 = arith.constant 0 : i32
    %c0_i32_1 = arith.constant 0 : i32
    return %c0_i32, %c0_i32_0 : i32, i32
  }
  func.func @transform_6(%arg0: i32) -> (i32, i32) {
    %c0_i32 = arith.constant 0 : i32
    %c0_i32_0 = arith.constant 0 : i32
    return %arg0, %c0_i32 : i32, i32
  }
}

</mosaic_0001>

<bundles_post_ra>
// kernel: inception_c_unit.5
= control target key start
LH: loop header
LB: loop body
LE: loop exit
PB: predicated region body
PF: predicated region fallthrough
CT: control target
= control target key end

     0   :  { %s1672_s12 = smov 0   ;;  %s2322_s0 = inlined_call_operand.vmem [shape: bf16[128,576], index: 0, kind: input, shape index: {}]   ;;  %s2323_s1 = inlined_call_operand.vmem [shape: bf16[576,192], index: 1, kind: input, shape index: {}]   ;;  %s2324_s2 = inlined_call_operand.vmem [shape: f32[1,192], index: 2, kind: input, shape index: {}]   ;;  %s2325_s3 = inlined_call_operand.vmem [shape: bf16[128,192], index: 3, kind: output, shape index: {}]  }
   0x1 LB: > { %s1138_s13 = sadd.s32 4294967295, %s1650_s12   ;;  %p1142_p0 = scmp.ge.s32.totalorder %s1650_s12, 1  ;;  %s1650_s12 = sphi %s1672_s12, %s13_s12  }
   0x2   : > { %p139_p1 = scmp.lt.s32.totalorder %s1650_s12, 3 }
   0x4   : > { %p140_p2 = pnand %p1142_p0, %p139_p1 }
   0x5   : > { %s1143_s21 = sshll.u32 (!%p140_p2), %s1138_s13, 3 }
   0x6   : > { %143 = sbr.rel (%p140_p2) target bundleno = 342 (0x156), region = 32  ;;  %p166_p3 = scmp.lt.s32.totalorder (!%p140_p2), %s1143_s21, 15 }
   0xb   : > { %v1286_v0 = vld [vmem:[%s2323_s1 + $0x70] sm:$0xf]  ;;  %v1562_v1 = vld [vmem:[%s2323_s1 + $0x74] sm:$0xf0]  ;;  %v1278_v5 = vld [vmem:[%s2323_s1 + $0x60] sm:$0xf] }
   0xc   : > { %v1350_v2 = vld [vmem:[%s2323_s1 + $0xf0] sm:$0xf]  ;;  %v1287_v3 = vor.u32 %v1562_v1, %v1286_v0  ;;  %v1578_v4 = vld [vmem:[%s2323_s1 + $0xf4] sm:$0xf0]  ;;  %v1560_v6 = vld [vmem:[%s2323_s1 + $0x64] sm:$0xf0] }
   0xd   : > { %v1351_v7 = vor.u32 %v1578_v4, %v1350_v2  ;;  %v1342_v8 = vld [vmem:[%s2323_s1 + $0xe0] sm:$0xf]  ;;  %v1576_v9 = vld [vmem:[%s2323_s1 + $0xe4] sm:$0xf0]  ;;  %v1279_v10 = vor.u32 %v1560_v6, %v1278_v5  ;;  %v1270_v12 = vld [vmem:[%s2323_s1 + $0x50] sm:$0xf] }
   0xe   : > { %1619 = vmatpush.bf16.msra.mxu2 %v1287_v3  ;;  %755 = vmatpush.bf16.msra.mxu0 %v1287_v3  ;;  %v1343_v11 = vor.u32 %v1576_v9, %v1342_v8  ;;  %v1558_v13 = vld [vmem:[%s2323_s1 + $0x54] sm:$0xf0]  ;;  %v1334_v14 = vld [vmem:[%s2323_s1 + $0xd0] sm:$0xf]  ;;  %v1262_v18 = vld [vmem:[%s2323_s1 + $0x40] sm:$0xf] }
   0xf   : > { %1627 = vmatpush.bf16.msra.mxu3 %v1351_v7  ;;  %784 = vmatpush.bf16.msra.mxu1 %v1351_v7  ;;  %v1574_v15 = vld [vmem:[%s2323_s1 + $0xd4] sm:$0xf0]  ;;  %v1271_v16 = vor.u32 %v1558_v13, %v1270_v12  ;;  %v1556_v19 = vld [vmem:[%s2323_s1 + $0x44] sm:$0xf0]  ;;  %v1326_v20 = vld [vmem:[%s2323_s1 + $0xc0] sm:$0xf] }
  0x10   : > { %v1335_v17 = vor.u32 %v1574_v15, %v1334_v14  ;;  %v1572_v21 = vld [vmem:[%s2323_s1 + $0xc4] sm:$0xf0]  ;;  %v1263_v22 = vor.u32 %v1556_v19, %v1262_v18  ;;  %v1254_v24 = vld [vmem:[%s2323_s1 + $0x30] sm:$0xf]  ;;  %v1554_v25 = vld [vmem:[%s2323_s1 + $0x34] sm:$0xf0] }
  0x11   : > { %v1327_v23 = vor.u32 %v1572_v21, %v1326_v20  ;;  %v1318_v26 = vld [vmem:[%s2323_s1 + $0xb0] sm:$0xf]  ;;  %v1570_v27 = vld [vmem:[%s2323_s1 + $0xb4] sm:$0xf0]  ;;  %v1255_v28 = vor.u32 %v1554_v25, %v1254_v24  ;;  %s2329_s21 = smov (!%p166_p3, %s1143_s21), 15  ;;  %vm742_vm0 = vcmask 523264  }
  0x12   : > { %1620 = vmatpush.bf16.msra.mxu2 %v1279_v10  ;;  %756 = vmatpush.bf16.msra.mxu0 %v1279_v10  ;;  %v1319_v29 = vor.u32 %v1570_v27, %v1318_v26  ;;  %v1246_v30 = vld [vmem:[%s2323_s1 + $0x20] sm:$0xf]  ;;  %v1552_v31 = vld [vmem:[%s2323_s1 + $0x24] sm:$0xf0]  ;;  %s1635_s10 = smul.u32 20, %s2329_s21  ;;  %s1526_s16 = sshll.u32 %s2329_s21, 3 }
  0x13   : > { %1628 = vmatpush.bf16.msra.mxu3 %v1343_v11  ;;  %785 = vmatpush.bf16.msra.mxu1 %v1343_v11  ;;  %v1310_v32 = vld [vmem:[%s2323_s1 + $0xa0] sm:$0xf]  ;;  %v1568_v33 = vld [vmem:[%s2323_s1 + $0xa4] sm:$0xf0]  ;;  %v1247_v34 = vor.u32 %v1552_v31, %v1246_v30  ;;  %v1238_v36 = vld [vmem:[%s2323_s1 + $0x10] sm:$0xf]  ;;  %s2270_s19 = scalar_lea.vmem %s2325_s3, %s1526_s16 }
  0x14   : > { %v1311_v35 = vor.u32 %v1568_v33, %v1310_v32  ;;  %v1550_v37 = vld [vmem:[%s2323_s1 + $0x14] sm:$0xf0]  ;;  %v1302_v38 = vld [vmem:[%s2323_s1 + $0x90] sm:$0xf]  ;;  %v1230_v41 = vld [vmem:[%s2323_s1] sm:$0xf]  ;;  %s1775_s26 = scalar_lea.vmem %s2322_s0, %s1635_s10 }
  0x15   : > { %v1566_v39 = vld [vmem:[%s2323_s1 + $0x94] sm:$0xf0]  ;;  %v1239_v40 = vor.u32 %v1550_v37, %v1238_v36  ;;  %v1548_v43 = vld [vmem:[%s2323_s1 + $0x4] sm:$0xf0]  ;;  %v1294_v44 = vld [vmem:[%s2323_s1 + $0x80] sm:$0xf] }
  0x16   : > { %1621 = vmatpush.bf16.msra.mxu2 %v1271_v16  ;;  %757 = vmatpush.bf16.msra.mxu0 %v1271_v16  ;;  %v1303_v42 = vor.u32 %v1566_v39, %v1302_v38  ;;  %v1564_v45 = vld [vmem:[%s2323_s1 + $0x84] sm:$0xf0]  ;;  %v1414_v46 = vld [vmem:[%s2323_s1 + $0x170] sm:$0xf]  ;;  %v1594_v47 = vld [vmem:[%s2323_s1 + $0x174] sm:$0xf0]  ;;  %v1231_v52 = vor.u32 %v1548_v43, %v1230_v41 }
  0x17   : > { %1629 = vmatpush.bf16.msra.mxu3 %v1335_v17  ;;  %786 = vmatpush.bf16.msra.mxu1 %v1335_v17  ;;  %v1478_v48 = vld [vmem:[%s2323_s1 + $0x1f0] sm:$0xf]  ;;  %v1610_v50 = vld [vmem:[%s2323_s1 + $0x1f4] sm:$0xf0]  ;;  %v1561_v51 = vld [vmem:[%s2323_s1 + $0x74] sm:$0xf]  ;;  %v1295_v58 = vor.u32 %v1564_v45, %v1294_v44  ;;  %v1415_v61 = vor.u32 %v1594_v47, %v1414_v46 }
  0x18   : > { %v1190_v49 = vld [vmem:[%s1775_s26 + $0x50] sm:$0xf]  ;;  %v1539_v53 = vld [vmem:[%s1775_s26 + $0x60] sm:$0xf0]  ;;  %v1150_v54 = vld [vmem:[%s1775_s26] sm:$0xf]  ;;  %v1479_v63 = vor.u32 %v1610_v50, %v1478_v48 }
  0x19   : > { %v1529_v55 = vld [vmem:[%s1775_s26 + $0x10] sm:$0xf0]  ;;  %v1406_v56 = vld [vmem:[%s2323_s1 + $0x160] sm:$0xf]  ;;  %v1592_v57 = vld [vmem:[%s2323_s1 + $0x164] sm:$0xf0]  ;;  %v1821_v3 = vor.u32 %v1539_v53, %v1190_v49 }
  0x1a   : > { %1622 = vmatpush.bf16.msra.mxu2 %v1263_v22  ;;  %758 = vmatpush.bf16.msra.mxu0 %v1263_v22  ;;  %v1537_v59 = vld [vmem:[%s1775_s26 + $0x54] sm:$0xf]  ;;  %v1192_v60 = vld [vmem:[%s1775_s26 + $0x64] sm:$0xf0]  ;;  %v1288_v62 = vld [vmem:[%s2323_s1 + $0x78] sm:$0xf0]  ;;  %v1823_v4 = vor.u32 %v1529_v55, %v1150_v54  ;;  %v1407_v11 = vor.u32 %v1592_v57, %v1406_v56 }
  0x1b   : > { %1630 = vmatpush.bf16.msra.mxu3 %v1327_v23  ;;  %787 = vmatpush.bf16.msra.mxu1 %v1327_v23  ;;  %v1527_v0 = vld [vmem:[%s1775_s26 + $0x4] sm:$0xf]  ;;  %v1152_v1 = vld [vmem:[%s1775_s26 + $0x14] sm:$0xf0]  ;;  %v1470_v2 = vld [vmem:[%s2323_s1 + $0x1e0] sm:$0xf]  ;;  %v1834_v8 = vor.u32 %v1537_v59, %v1192_v60  ;;  %v1291_v9 = vor.u32 %v1561_v51, %v1288_v62 }
  0x1c   : > { %v1608_v5 = vld [vmem:[%s2323_s1 + $0x1e4] sm:$0xf0]  ;;  %v1510_v6 = vld [vmem:[%s2323_s1 + $0x230] sm:$0xf]  ;;  %v1618_v7 = vld [vmem:[%s2323_s1 + $0x234] sm:$0xf0]  ;;  %v1836_v10 = vor.u32 %v1527_v0, %v1152_v1 }
  0x1d   : > { %v1559_v12 = vld [vmem:[%s2323_s1 + $0x64] sm:$0xf]  ;;  %v1280_v13 = vld [vmem:[%s2323_s1 + $0x68] sm:$0xf0]  ;;  %v1471_v14 = vor.u32 %v1608_v5, %v1470_v2  ;;  %v1398_v15 = vld [vmem:[%s2323_s1 + $0x150] sm:$0xf]  ;;  %v1511_v18 = vor.u32 %v1618_v7, %v1510_v6 }
  0x1e   : > { %1623 = vmatpush.bf16.msra.mxu2 %v1255_v28  ;;  %759 = vmatpush.bf16.msra.mxu0 %v1255_v28  ;;  %v1590_v16 = vld [vmem:[%s2323_s1 + $0x154] sm:$0xf0]  ;;  %v1462_v17 = vld [vmem:[%s2323_s1 + $0x1d0] sm:$0xf]  ;;  %v1502_v20 = vld [vmem:[%s2323_s1 + $0x220] sm:$0xf]  ;;  %v1283_v22 = vor.u32 %v1559_v12, %v1280_v13 }
  0x1f   : > { %1631 = vmatpush.bf16.msra.mxu3 %v1319_v29  ;;  %788 = vmatpush.bf16.msra.mxu1 %v1319_v29  ;;  %v1606_v19 = vld [vmem:[%s2323_s1 + $0x1d4] sm:$0xf0]  ;;  %v1616_v21 = vld [vmem:[%s2323_s1 + $0x224] sm:$0xf0]  ;;  %v1399_v23 = vor.u32 %v1590_v16, %v1398_v15  ;;  %v1557_v24 = vld [vmem:[%s2323_s1 + $0x54] sm:$0xf] }
  0x20   : > { %v1272_v25 = vld [vmem:[%s2323_s1 + $0x58] sm:$0xf0]  ;;  %v1463_v26 = vor.u32 %v1606_v19, %v1462_v17  ;;  %v1390_v27 = vld [vmem:[%s2323_s1 + $0x140] sm:$0xf]  ;;  %v1588_v28 = vld [vmem:[%s2323_s1 + $0x144] sm:$0xf0]  ;;  %v1503_v30 = vor.u32 %v1616_v21, %v1502_v20 }
  0x21   : > { %v1454_v29 = vld [vmem:[%s2323_s1 + $0x1c0] sm:$0xf]  ;;  %v1604_v31 = vld [vmem:[%s2323_s1 + $0x1c4] sm:$0xf0]  ;;  %v1494_v32 = vld [vmem:[%s2323_s1 + $0x210] sm:$0xf] }
  0x22   : > { %1624 = vmatpush.bf16.msra.mxu2 %v1247_v34  ;;  %760 = vmatpush.bf16.msra.mxu0 %v1247_v34  ;;  %v1614_v33 = vld [vmem:[%s2323_s1 + $0x214] sm:$0xf0]  ;;  %v1275_v34 = vor.u32 %v1557_v24, %v1272_v25  ;;  %v1555_v36 = vld [vmem:[%s2323_s1 + $0x44] sm:$0xf]  ;;  %v1264_v37 = vld [vmem:[%s2323_s1 + $0x48] sm:$0xf0]  ;;  %v1455_v38 = vor.u32 %v1604_v31, %v1454_v29 }
  0x23   : > { %1632 = vmatpush.bf16.msra.mxu3 %v1311_v35  ;;  %789 = vmatpush.bf16.msra.mxu1 %v1311_v35  ;;  %v1391_v35 = vor.u32 %v1588_v28, %v1390_v27  ;;  %v1210_v39 = vld [vmem:[%s1775_s26 + $0x78] sm:$0xf]  ;;  %v1382_v41 = vld [vmem:[%s2323_s1 + $0x130] sm:$0xf]  ;;  %v1495_v44 = vor.u32 %v1614_v33, %v1494_v32  ;;  %v1542_v45 = vld [vmem:[%s1775_s26 + $0x7c] sm:$0xf]  ;;  %v1267_v50 = vor.u32 %v1555_v36, %v1264_v37 }
  0x24   : > { %v1446_v43 = vld [vmem:[%s2323_s1 + $0x1b0] sm:$0xf]  ;;  %v1602_v47 = vld [vmem:[%s2323_s1 + $0x1b4] sm:$0xf0]  ;;  %v1486_v48 = vld [vmem:[%s2323_s1 + $0x200] sm:$0xf] }
  0x25   : > { %v1212_v46 = vld [vmem:[%s1775_s26 + $0x8c] sm:$0xf0]  ;;  %v1612_v49 = vld [vmem:[%s2323_s1 + $0x204] sm:$0xf0]  ;;  %v1532_v53 = vld [vmem:[%s1775_s26 + $0x2c] sm:$0xf] }
  0x26   : > { %1625 = vmatpush.bf16.msra.mxu2 %v1239_v40  ;;  %761 = vmatpush.bf16.msra.mxu0 %v1239_v40  ;;  %v1544_v40 = vld [vmem:[%s1775_s26 + $0x88] sm:$0xf0]  ;;  %v1170_v51 = vld [vmem:[%s1775_s26 + $0x28] sm:$0xf]  ;;  %v1172_v55 = vld [vmem:[%s1775_s26 + $0x3c] sm:$0xf0]  ;;  %v1487_v62 = vor.u32 %v1612_v49, %v1486_v48  ;;  %v1950_v6 = vor.u32 %v1542_v45, %v1212_v46 }
  0x27   : > { %1633 = vmatpush.bf16.msra.mxu3 %v1303_v42  ;;  %790 = vmatpush.bf16.msra.mxu1 %v1303_v42  ;;  %v1586_v42 = vld [vmem:[%s2323_s1 + $0x134] sm:$0xf0]  ;;  %v1553_v56 = vld [vmem:[%s2323_s1 + $0x34] sm:$0xf]  ;;  %v1256_v57 = vld [vmem:[%s2323_s1 + $0x38] sm:$0xf0] }
  0x28   : > { %v1383_v54 = vor.u32 %v1586_v42, %v1382_v41  ;;  %v1374_v59 = vld [vmem:[%s2323_s1 + $0x120] sm:$0xf]  ;;  %v1584_v60 = vld [vmem:[%s2323_s1 + $0x124] sm:$0xf0]  ;;  %v1609_v2 = vld [vmem:[%s2323_s1 + $0x1f4] sm:$0xf]  ;;  %v1259_v7 = vor.u32 %v1553_v56, %v1256_v57 }
  0x29   : > { %v1600_v1 = vld [vmem:[%s2323_s1 + $0x1a4] sm:$0xf0]  ;;  %v1480_v5 = vld [vmem:[%s2323_s1 + $0x1f8] sm:$0xf0]  ;;  %v1551_v12 = vld [vmem:[%s2323_s1 + $0x24] sm:$0xf] }
  0x2a   : > { %1626 = vmatpush.bf16.msra.mxu2 %v1231_v52  ;;  %762 = vmatpush.bf16.msra.mxu0 %v1231_v52  ;;  %v1534_v52 = vld [vmem:[%s1775_s26 + $0x38] sm:$0xf0]  ;;  %v1248_v13 = vld [vmem:[%s2323_s1 + $0x28] sm:$0xf0]  ;;  %v1366_v15 = vld [vmem:[%s2323_s1 + $0x110] sm:$0xf]  ;;  %v1483_v17 = vor.u32 %v1609_v2, %v1480_v5 }
  0x2b   : > { %1634 = vmatpush.bf16.msra.mxu3 %v1295_v58  ;;  %791 = vmatpush.bf16.msra.mxu1 %v1295_v58  ;;  %v1447_v58 = vor.u32 %v1602_v47, %v1446_v43  ;;  %v1939_v0 = vor.u32 %v1534_v52, %v1170_v51  ;;  %v1582_v16 = vld [vmem:[%s2323_s1 + $0x114] sm:$0xf0]  ;;  %v1251_v20 = vor.u32 %v1551_v12, %v1248_v13  ;;  %v1358_v21 = vld [vmem:[%s2323_s1 + $0x100] sm:$0xf]  ;;  %v1240_v24 = vld [vmem:[%s2323_s1 + $0x18] sm:$0xf0] }
  0x2c   : > { %v1598_v19 = vld [vmem:[%s2323_s1 + $0x194] sm:$0xf0]  ;;  %v1607_v25 = vld [vmem:[%s2323_s1 + $0x1e4] sm:$0xf]  ;;  %v1580_v28 = vld [vmem:[%s2323_s1 + $0x104] sm:$0xf0] }
  0x2d   : > { %773 = vmatmul.bf16.vlgmr.msra.gmra.mxu2 %v1821_v3  ;;  %763 = vmatmul.bf16.vlgmr.msra.gmra.mxu0 %v1823_v4  ;;  %v1422_v29 = vld [vmem:[%s2323_s1 + $0x180] sm:$0xf]  ;;  %v1577_v32 = vld [vmem:[%s2323_s1 + $0xf4] sm:$0xf]  ;;  %v1352_v33 = vld [vmem:[%s2323_s1 + $0xf8] sm:$0xf0] }
  0x2e   : > { %813 = vmatpush.bf16.msrb.mxu2 %v1415_v61  ;;  %802 = vmatmul.bf16.vlgmr.msra.gmra.mxu3 %v1834_v8  ;;  %v1438_v61 = vld [vmem:[%s2323_s1 + $0x1a0] sm:$0xf]  ;;  %v1416_v36 = vld [vmem:[%s2323_s1 + $0x178] sm:$0xf0]  ;;  %v1605_v37 = vld [vmem:[%s2323_s1 + $0x1d4] sm:$0xf]  ;;  %v1355_v43 = vor.u32 %v1577_v32, %v1352_v33 }
  0x2f   : > { %842 = vmatpush.bf16.msrb.mxu3 %v1479_v63  ;;  %900 = vmatpush.bf16.msrb.mxu1 %v1291_v9  ;;  %v1937_v63 = vor.u32 %v1544_v40, %v1210_v39  ;;  %v1952_v9 = vor.u32 %v1532_v53, %v1172_v55  ;;  %v1359_v39 = vor.u32 %v1580_v28, %v1358_v21  ;;  %v1547_v40 = vld [vmem:[%s2323_s1 + $0x4] sm:$0xf]  ;;  %v1232_v41 = vld [vmem:[%s2323_s1 + $0x8] sm:$0xf0]  ;;  %v1512_v45 = vld [vmem:[%s2323_s1 + $0x238] sm:$0xf0] }
  0x30   : > { %792 = vmatmul.bf16.vlgmr.msra.gmra.mxu1 %v1836_v10  ;;  %875 = vmatpush.bf16.msrb.mxu0 %v1511_v18  ;;  %v1430_v18 = vld [vmem:[%s2323_s1 + $0x190] sm:$0xf]  ;;  %v1158_v46 = vld [vmem:[%s1775_s26 + $0x8] sm:$0xf]  ;;  %v1575_v48 = vld [vmem:[%s2323_s1 + $0xe4] sm:$0xf]  ;;  %v1235_v52 = vor.u32 %v1547_v40, %v1232_v41 }
  0x31   : > { %v1431_v27 = vor.u32 %v1598_v19, %v1430_v18  ;;  %v1344_v49 = vld [vmem:[%s2323_s1 + $0xe8] sm:$0xf0]  ;;  %v1530_v51 = vld [vmem:[%s1775_s26 + $0x18] sm:$0xf0]  ;;  %v1166_v53 = vld [vmem:[%s1775_s26 + $0x10] sm:$0xf] }
  0x32   : > { %814 = vmatpush.bf16.msrb.mxu2 %v1407_v11  ;;  %v1375_v11 = vor.u32 %v1584_v60, %v1374_v59  ;;  %v1528_v55 = vld [vmem:[%s1775_s26 + $0xc] sm:$0xf]  ;;  %v1160_v56 = vld [vmem:[%s1775_s26 + $0x1c] sm:$0xf0]  ;;  %v1591_v59 = vld [vmem:[%s2323_s1 + $0x164] sm:$0xf] }
  0x33   : > { %843 = vmatpush.bf16.msrb.mxu3 %v1471_v14  ;;  %901 = vmatpush.bf16.msrb.mxu1 %v1283_v22  ;;  %v1439_v14 = vor.u32 %v1600_v1, %v1438_v61  ;;  %v1549_v22 = vld [vmem:[%s2323_s1 + $0x14] sm:$0xf]  ;;  %v1408_v60 = vld [vmem:[%s2323_s1 + $0x168] sm:$0xf0]  ;;  %v1336_v2 = vld [vmem:[%s2323_s1 + $0xd8] sm:$0xf0] }
  0x34   : > { %876 = vmatpush.bf16.msrb.mxu0 %v1503_v30  ;;  %v1596_v30 = vld [vmem:[%s2323_s1 + $0x184] sm:$0xf0]  ;;  %v1573_v61 = vld [vmem:[%s2323_s1 + $0xd4] sm:$0xf]  ;;  %v1615_v5 = vld [vmem:[%s2323_s1 + $0x224] sm:$0xf]  ;;  %v1411_v12 = vor.u32 %v1591_v59, %v1408_v60 }
  0x35   : > { %v1423_v42 = vor.u32 %v1596_v30, %v1422_v29  ;;  %v1339_v13 = vor.u32 %v1573_v61, %v1336_v2  ;;  %v1328_v18 = vld [vmem:[%s2323_s1 + $0xc8] sm:$0xf0]  ;;  %v1448_v28 = vld [vmem:[%s2323_s1 + $0x1b8] sm:$0xf0]  ;;  %v1613_v30 = vld [vmem:[%s2323_s1 + $0x214] sm:$0xf] }
  0x36   : > { %815 = vmatpush.bf16.msrb.mxu2 %v1399_v23  ;;  %v1367_v23 = vor.u32 %v1582_v16, %v1366_v15  ;;  %v1400_v15 = vld [vmem:[%s2323_s1 + $0x158] sm:$0xf0]  ;;  %v1456_v21 = vld [vmem:[%s2323_s1 + $0x1c8] sm:$0xf0]  ;;  %v1535_v40 = vld [vmem:[%s1775_s26 + $0x40] sm:$0xf0] }
  0x37   : > { %844 = vmatpush.bf16.msrb.mxu3 %v1463_v26  ;;  %902 = vmatpush.bf16.msrb.mxu1 %v1275_v34  ;;  %v1472_v26 = vld [vmem:[%s2323_s1 + $0x1e8] sm:$0xf0]  ;;  %v1593_v34 = vld [vmem:[%s2323_s1 + $0x174] sm:$0xf]  ;;  %v1186_v41 = vld [vmem:[%s1775_s26 + $0x38] sm:$0xf] }
  0x38   : > { %877 = vmatpush.bf16.msrb.mxu0 %v1495_v44  ;;  %v1475_v31 = vor.u32 %v1607_v25, %v1472_v26  ;;  %v1617_v44 = vld [vmem:[%s2323_s1 + $0x234] sm:$0xf]  ;;  %v1419_v47 = vor.u32 %v1593_v34, %v1416_v36  ;;  %v1320_v26 = vld [vmem:[%s2323_s1 + $0xb8] sm:$0xf0]  ;;  %v1440_v59 = vld [vmem:[%s2323_s1 + $0x1a8] sm:$0xf0] }
  0x39   : > { %v1515_v57 = vor.u32 %v1617_v44, %v1512_v45  ;;  %v1384_v36 = vld [vmem:[%s2323_s1 + $0x138] sm:$0xf0]  ;;  %v1180_v44 = vld [vmem:[%s1775_s26 + $0x44] sm:$0xf0]  ;;  %v1296_v2 = vld [vmem:[%s2323_s1 + $0x88] sm:$0xf0] }
  0x3a   : > { %816 = vmatpush.bf16.msrb.mxu2 %v1391_v35  ;;  %v1243_v35 = vor.u32 %v1549_v22, %v1240_v24  ;;  %v1569_v24 = vld [vmem:[%s2323_s1 + $0xb4] sm:$0xf]  ;;  %vm1069_vm1 = vcmask 1043456   ;;  %vm1070_vm2 = vcmask 523268  }
  0x3b   : > { %845 = vmatpush.bf16.msrb.mxu3 %v1455_v38  ;;  %903 = vmatpush.bf16.msrb.mxu1 %v1267_v50  ;;  %v1464_v38 = vld [vmem:[%s2323_s1 + $0x1d8] sm:$0xf0]  ;;  %v1323_v34 = vor.u32 %v1569_v24, %v1320_v26  ;;  %v1541_v24 = vld [vmem:[%s1775_s26 + $0x70] sm:$0xf0]  ;;  %vm2272_vm3 = vmor %vm1070_vm2, %vm1069_vm1 }
  0x3c   : > { %878 = vmatpush.bf16.msrb.mxu0 %v1487_v62  ;;  %v1467_v50 = vor.u32 %v1605_v37, %v1464_v38  ;;  %v2051_v62 = vor.u32 %v1530_v51, %v1158_v46  ;;  %v1178_v37 = vld [vmem:[%s1775_s26 + $0x30] sm:$0xf]  ;;  %v1567_v38 = vld [vmem:[%s2323_s1 + $0xa4] sm:$0xf]  ;;  %v1538_v26 = vld [vmem:[%s1775_s26 + $0x5c] sm:$0xf] }
  0x3d   : > { %778 = vmatmul.bf16.gmra.mxu2 %v1937_v63  ;;  %768 = vmatmul.bf16.gmra.mxu0 %v1939_v0 }
  0x3e   : > { %817 = vmatpush.bf16.msrb.mxu2 %v1383_v54  ;;  %807 = vmatmul.bf16.gmra.mxu3 %v1950_v6  ;;  %v1531_v54 = vld [vmem:[%s1775_s26 + $0x20] sm:$0xf0] }
  0x3f   : > { %846 = vmatpush.bf16.msrb.mxu3 %v1447_v58  ;;  %904 = vmatpush.bf16.msrb.mxu1 %v1259_v7  ;;  %v1347_v58 = vor.u32 %v1575_v48, %v1344_v49  ;;  %v2053_v1 = vor.u32 %v1531_v54, %v1166_v53  ;;  %v1504_v7 = vld [vmem:[%s2323_s1 + $0x228] sm:$0xf0]  ;;  %v2137_v49 = vor.u32 %v1535_v40, %v1178_v37  ;;  %v1565_v53 = vld [vmem:[%s2323_s1 + $0x94] sm:$0xf]  ;;  %v1304_v54 = vld [vmem:[%s2323_s1 + $0x98] sm:$0xf0] }
  0x40   : > { %797 = vmatmul.bf16.gmra.mxu1 %v1952_v9  ;;  %987 = vmatpush.bf16.msra.mxu0 %v1483_v17  ;;  %v1507_v16 = vor.u32 %v1615_v5, %v1504_v7  ;;  %v1571_v17 = vld [vmem:[%s2323_s1 + $0xc4] sm:$0xf]  ;;  %v1376_v48 = vld [vmem:[%s2323_s1 + $0x128] sm:$0xf0] }
  0x41   : > { %v1331_v22 = vor.u32 %v1571_v17, %v1328_v18  ;;  %v1579_v5 = vld [vmem:[%s2323_s1 + $0x104] sm:$0xf]  ;;  %v1488_v17 = vld [vmem:[%s2323_s1 + $0x208] sm:$0xf0] }
  0x42   : > { %818 = vmatpush.bf16.msrb.mxu2 %v1375_v11  ;;  %v2064_v11 = vor.u32 %v1528_v55, %v1160_v56  ;;  %v1581_v55 = vld [vmem:[%s2323_s1 + $0x114] sm:$0xf]  ;;  %v1307_v56 = vor.u32 %v1565_v53, %v1304_v54 }
  0x43   : > { %847 = vmatpush.bf16.msrb.mxu3 %v1439_v14  ;;  %905 = vmatpush.bf16.msrb.mxu1 %v1251_v20  ;;  %v1589_v14 = vld [vmem:[%s2323_s1 + $0x154] sm:$0xf]  ;;  %v1603_v20 = vld [vmem:[%s2323_s1 + $0x1c4] sm:$0xf] }
  0x44   : > { %988 = vmatpush.bf16.msra.mxu0 %v1475_v31  ;;  %v1403_v19 = vor.u32 %v1589_v14, %v1400_v15  ;;  %v1459_v25 = vor.u32 %v1603_v20, %v1456_v21  ;;  %v1496_v31 = vld [vmem:[%s2323_s1 + $0x218] sm:$0xf0]  ;;  %v1595_v20 = vld [vmem:[%s2323_s1 + $0x184] sm:$0xf]  ;;  %v1424_v21 = vld [vmem:[%s2323_s1 + $0x188] sm:$0xf0] }
  0x45   : > { %v1499_v33 = vor.u32 %v1613_v30, %v1496_v31  ;;  %v1432_v14 = vld [vmem:[%s2323_s1 + $0x198] sm:$0xf0]  ;;  %v1218_v31 = vld [vmem:[%s1775_s26 + $0x80] sm:$0xf] }
  0x46   : > { %819 = vmatpush.bf16.msrb.mxu2 %v1367_v23  ;;  %v1587_v23 = vld [vmem:[%s2323_s1 + $0x144] sm:$0xf] }
  0x47   : > { %848 = vmatpush.bf16.msrb.mxu3 %v1431_v27  ;;  %906 = vmatpush.bf16.msrb.mxu1 %v1243_v35  ;;  %v1601_v27 = vld [vmem:[%s2323_s1 + $0x1b4] sm:$0xf] }
  0x48   : > { %989 = vmatpush.bf16.msra.mxu0 %v1467_v50  ;;  %v1451_v29 = vor.u32 %v1601_v27, %v1448_v28  ;;  %v1585_v35 = vld [vmem:[%s2323_s1 + $0x134] sm:$0xf]  ;;  %v1200_v27 = vld [vmem:[%s1775_s26 + $0x6c] sm:$0xf0] }
  0x49   : > { %v1387_v45 = vor.u32 %v1585_v35, %v1384_v36  ;;  %v1203_v30 = vor.u32 %v1538_v26, %v1200_v27  ;;  %v1543_v35 = vld [vmem:[%s1775_s26 + $0x84] sm:$0xf]  ;;  %v1220_v36 = vld [vmem:[%s1775_s26 + $0x94] sm:$0xf0] }
  0x4a   : > { %820 = vmatpush.bf16.msrb.mxu2 %v1359_v39  ;;  %v1312_v39 = vld [vmem:[%s2323_s1 + $0xa8] sm:$0xf0] }
  0x4b   : > { %849 = vmatpush.bf16.msrb.mxu3 %v1423_v42  ;;  %907 = vmatpush.bf16.msrb.mxu1 %v1235_v52  ;;  %v1536_v42 = vld [vmem:[%s1775_s26 + $0x48] sm:$0xf0]  ;;  %v1315_v46 = vor.u32 %v1567_v38, %v1312_v39  ;;  %v1223_v39 = vor.u32 %v1543_v35, %v1220_v36 }
  0x4c   : > { %990 = vmatpush.bf16.msra.mxu0 %v1459_v25  ;;  %v2139_v50 = vor.u32 %v1536_v42, %v1186_v41  ;;  %v1427_v25 = vor.u32 %v1595_v20, %v1424_v21 }
  0x4d   : > { %821 = vmatmul.bf16.vlgmr.msrb.gmra.mxu2 %v2051_v62  ;;  %1516 = vmatmul.msk.bf16.vlgmr.msrb.gmra.mxu0 %vm742_vm0, %v2053_v1 }
  0x4e   : > { %929 = vmatpush.bf16.msra.mxu2 %v1355_v43  ;;  %850 = vmatmul.bf16.vlgmr.msrb.gmra.mxu3 %v2064_v11  ;;  %v1533_v43 = vld [vmem:[%s1775_s26 + $0x34] sm:$0xf] }
  0x4f   : > { %958 = vmatpush.bf16.msra.mxu3 %v1419_v47  ;;  %1020 = vmatpush.bf16.msra.mxu1 %v1515_v57  ;;  %v1583_v47 = vld [vmem:[%s2323_s1 + $0x124] sm:$0xf]  ;;  %v2141_v51 = vor.u32 %v1533_v43, %v1180_v44  ;;  %v1368_v57 = vld [vmem:[%s2323_s1 + $0x118] sm:$0xf0] }
  0x50   : > { %908 = vmatmul.bf16.vlgmr.msrb.gmra.mxu1 %v1823_v4  ;;  %v1392_v4 = vld [vmem:[%s2323_s1 + $0x148] sm:$0xf0]  ;;  %991 = vmatpush.bf16.msra.mxu0 %v1451_v29  ;;  %v1379_v52 = vor.u32 %v1583_v47, %v1376_v48  ;;  %v1371_v60 = vor.u32 %v1581_v55, %v1368_v57 }
  0x51   : > { %v1395_v32 = vor.u32 %v1587_v23, %v1392_v4  ;;  %v1540_v23 = vld [vmem:[%s1775_s26 + $0x68] sm:$0xf0]  ;;  %v1206_v4 = vld [vmem:[%s1775_s26 + $0x60] sm:$0xf] }
  0x52   : > { %930 = vmatpush.bf16.msra.mxu2 %v1347_v58  ;;  %v1599_v58 = vld [vmem:[%s2323_s1 + $0x1a4] sm:$0xf]  ;;  %v1207_v29 = vor.u32 %v1541_v24, %v1206_v4 }
  0x53   : > { %959 = vmatpush.bf16.msra.mxu3 %v1411_v12  ;;  %1021 = vmatpush.bf16.msra.mxu1 %v1507_v16  ;;  %v1443_v61 = vor.u32 %v1599_v58, %v1440_v59  ;;  %v1360_v12 = vld [vmem:[%s2323_s1 + $0x108] sm:$0xf0]  ;;  %v1611_v16 = vld [vmem:[%s2323_s1 + $0x204] sm:$0xf] }
  0x54   : > { %v1363_v18 = vor.u32 %v1579_v5, %v1360_v12 }
  0x55   : > { %992 = vmatpush.bf16.msra.mxu0 %v1443_v61 }
  0x56   : > { %931 = vmatpush.bf16.msra.mxu2 %v1339_v13  ;;  %v1597_v13 = vld [vmem:[%s2323_s1 + $0x194] sm:$0xf] }
  0x57   : > { %960 = vmatpush.bf16.msra.mxu3 %v1403_v19  ;;  %1022 = vmatpush.bf16.msra.mxu1 %v1499_v33  ;;  %v1435_v15 = vor.u32 %v1597_v13, %v1432_v14  ;;  %v1491_v19 = vor.u32 %v1611_v16, %v1488_v17  ;;  %v1226_v33 = vld [vmem:[%s1775_s26 + $0x88] sm:$0xf] }
  0x59   : > { %993 = vmatpush.bf16.msra.mxu0 %v1435_v15 }
  0x5a   : > { %932 = vmatpush.bf16.msra.mxu2 %v1331_v22  ;;  %v1198_v22 = vld [vmem:[%s1775_s26 + $0x58] sm:$0xf] }
  0x5b   : > { %961 = vmatpush.bf16.msra.mxu3 %v1395_v32  ;;  %1023 = vmatpush.bf16.msra.mxu1 %v1491_v19  ;;  %v1199_v28 = vor.u32 %v1540_v23, %v1198_v22  ;;  %v1545_v32 = vld [vmem:[%s1775_s26 + $0x90] sm:$0xf0] }
  0x5c   : > { %v1219_v37 = vor.u32 %v1545_v32, %v1218_v31 }
  0x5d   : > { %826 = vmatmul.bf16.gmra.mxu2 %v2137_v49  ;;  %1517 = vmatmul.msk.bf16.gmra.mxu0 %vm742_vm0, %v2139_v50 }
  0x5e   : > { %933 = vmatpush.bf16.msra.mxu2 %v1323_v34  ;;  %855 = vmatmul.bf16.gmra.mxu3 %v2141_v51  ;;  %v1546_v34 = vld [vmem:[%s1775_s26 + $0x98] sm:$0xf0] }
  0x5f   : > { %962 = vmatpush.bf16.msra.mxu3 %v1387_v45  ;;  %994 = vmatpush.bf16.msra.mxu0 %v1427_v25  ;;  %v1227_v38 = vor.u32 %v1546_v34, %v1226_v33 }
  0x60   : > { %913 = vmatmul.bf16.gmra.mxu1 %v1939_v0  ;;  %v1563_v0 = vld [vmem:[%s2323_s1 + $0x84] sm:$0xf] }
  0x61   : > { %v1299_v7 = vor.u32 %v1563_v0, %v1296_v2 }
  0x62   : > { %934 = vmatpush.bf16.msra.mxu2 %v1315_v46 }
  0x63   : > { %963 = vmatpush.bf16.msra.mxu3 %v1379_v52 }
  0x66   : > { %935 = vmatpush.bf16.msra.mxu2 %v1307_v56 }
  0x67   : > { %964 = vmatpush.bf16.msra.mxu3 %v1371_v60 }
  0x6a   : > { %936 = vmatpush.bf16.msra.mxu2 %v1299_v7 }
  0x6b   : > { %965 = vmatpush.bf16.msra.mxu3 %v1363_v18 }
  0x6d   : > { %831 = vmatmul.bf16.gmra.mxu2 %v1199_v28  ;;  %1518 = vmatmul.msk.bf16.gmra.mxu0 %vm742_vm0, %v1207_v29 }
  0x6e   : > { %860 = vmatmul.bf16.gmra.mxu3 %v1203_v30 }
  0x70   : > { %918 = vmatmul.bf16.gmra.mxu1 %v1821_v3  ;;  %v2225_v3 = vld [vmem:[%s2324_s2] sm:$0x3] }
  0x7d   : > { %836 = vmatmul.bf16.gmra.mxu2 %v1219_v37  ;;  %1519 = vmatmul.msk.bf16.gmra.mxu0 %vm742_vm0, %v1227_v38 }
  0x7e   : > { %865 = vmatmul.bf16.gmra.mxu3 %v1223_v39 }
  0x80   : > { %923 = vmatmul.bf16.gmra.mxu1 %v1937_v63 }
  0x8d   : > { %937 = vmatmul.bf16.vlgmr.msra.gmra.mxu2 %v1836_v10  ;;  %995 = vmatmul.bf16.vlgmr.msra.gmra.mxu0 %v2064_v11  ;;  %v278_v10 = vperm.slane %v2225_v3, 0 }
  0x8e   : > { %966 = vmatmul.bf16.vlgmr.msra.gmra.mxu3 %v2051_v62 }
  0x90   : > { %1520 = vmatmul.msk.bf16.vlgmr.msra.gmra.mxu1 %vm742_vm0, %v2053_v1 }
  0x9d   : > { %942 = vmatmul.bf16.gmra.mxu2 %v1952_v9  ;;  %1000 = vmatmul.bf16.gmra.mxu0 %v2141_v51 }
  0x9e   : > { %971 = vmatmul.bf16.gmra.mxu3 %v2137_v49 }
  0xa0   : > { %1521 = vmatmul.msk.bf16.gmra.mxu1 %vm742_vm0, %v2139_v50 }
  0xaa   : > { %v764_v63 = vpop.f32.mrf.mxu0 }
  0xab   : > { %v765_v62 = vadd.f32 %v764_v63, %v278_v10 }
  0xad   : > { %v793_v11 = vpop.f32.mrf.mxu1  ;;  %947 = vmatmul.bf16.gmra.mxu2 %v1834_v8  ;;  %1005 = vmatmul.bf16.gmra.mxu0 %v1203_v30 }
  0xae   : > { %v794_v9 = vadd.f32 %v793_v11, %v765_v62  ;;  %976 = vmatmul.bf16.gmra.mxu3 %v1199_v28 }
  0xb0   : > { %1522 = vmatmul.msk.bf16.gmra.mxu1 %vm742_vm0, %v1207_v29  ;;  %v774_v1 = vpop.f32.mrf.mxu2 }
  0xb1   : > { %v775_v40 = vadd.f32 %v774_v1, %v278_v10  ;;  %v803_v41 = vpop.f32.mrf.mxu3 }
  0xb2   : > { %v766_v42 = vpop.f32.mrf.mxu0 }
  0xb3   : > { %v804_v43 = vadd.f32 %v803_v41, %v775_v40  ;;  %v767_v44 = vadd.f32 %v766_v42, %v278_v10 }
  0xb5   : > { %v795_v45 = vpop.f32.mrf.mxu1 }
  0xb6   : > { %v796_v46 = vadd.f32 %v795_v45, %v767_v44 }
  0xb8   : > { %v776_v47 = vpop.f32.mrf.mxu2 }
  0xb9   : > { %v777_v48 = vadd.f32 %v776_v47, %v278_v10  ;;  %v805_v49 = vpop.f32.mrf.mxu3 }
  0xba   : > { %v769_v50 = vpop.f32.mrf.mxu0 }
  0xbb   : > { %v806_v51 = vadd.f32 %v805_v49, %v777_v48  ;;  %v770_v52 = vadd.f32 %v769_v50, %v278_v10 }
  0xbd   : > { %v798_v8 = vpop.f32.mrf.mxu1  ;;  %952 = vmatmul.bf16.gmra.mxu2 %v1950_v6  ;;  %1010 = vmatmul.bf16.gmra.mxu0 %v1223_v39 }
  0xbe   : > { %v799_v53 = vadd.f32 %v798_v8, %v770_v52  ;;  %981 = vmatmul.bf16.gmra.mxu3 %v1219_v37 }
  0xc0   : > { %1523 = vmatmul.msk.bf16.gmra.mxu1 %vm742_vm0, %v1227_v38  ;;  %v779_v54 = vpop.f32.mrf.mxu2 }
  0xc1   : > { %v780_v55 = vadd.f32 %v779_v54, %v278_v10  ;;  %v808_v56 = vpop.f32.mrf.mxu3 }
  0xc2   : > { %v771_v57 = vpop.f32.mrf.mxu0 }
  0xc3   : > { %v809_v58 = vadd.f32 %v808_v56, %v780_v55  ;;  %v772_v59 = vadd.f32 %v771_v57, %v278_v10 }
  0xc5   : > { %v800_v60 = vpop.f32.mrf.mxu1 }
  0xc6   : > { %v801_v61 = vadd.f32 %v800_v60, %v772_v59  ;;  %v2259_v59 = vperm.slane %v2225_v3, 1 }
  0xc8   : > { %v781_v0 = vpop.f32.mrf.mxu2 }
  0xc9   : > { %v782_v2 = vadd.f32 %v781_v0, %v278_v10  ;;  %v810_v5 = vpop.f32.mrf.mxu3 }
  0xca   : > { %v880_v7 = vpop.f32.mrf.mxu0 }
  0xcb   : > { %v811_v12 = vadd.f32 %v810_v5, %v782_v2 }
  0xcd   : > { %v909_v13 = vpop.f32.mrf.mxu1 }
  0xd0   : > { %v822_v6 = vpop.f32.mrf.mxu2 }
  0xd1   : > { %v823_v14 = vadd.f32 %v822_v6, %v794_v9  ;;  %v851_v15 = vpop.f32.mrf.mxu3 }
  0xd2   : > { %v882_v16 = vpop.f32.mrf.mxu0 }
  0xd3   : > { %v852_v17 = vadd.f32 %v851_v15, %v823_v14 }
  0xd5   : > { %v911_v18 = vpop.f32.mrf.mxu1  ;;  %v2232_v19 = vadd.f32 %v880_v7, %v852_v17 }
  0xd8   : > { %v824_v20 = vpop.f32.mrf.mxu2 }
  0xd9   : > { %v825_v21 = vadd.f32 %v824_v20, %v796_v46  ;;  %v853_v22 = vpop.f32.mrf.mxu3  ;;  %v1045_v20 = vmax.f32 %v2232_v19, 0.0 }
  0xda   : > { %v885_v23 = vpop.f32.mrf.mxu0 }
  0xdb   : > { %v854_v4 = vadd.f32 %v853_v22, %v825_v21 }
  0xdd   : > { %v2234_v24 = vpop.f32.mrf.mxu1  ;;  %v2236_v25 = vadd.f32 %v882_v16, %v854_v4 }
  0xe0   : > { %v827_v26 = vpop.f32.mrf.mxu2 }
  0xe1   : > { %v828_v27 = vadd.f32 %v827_v26, %v799_v53  ;;  %v856_v28 = vpop.f32.mrf.mxu3 }
  0xe2   : > { %v887_v29 = vpop.f32.mrf.mxu0 }
  0xe3   : > { %v857_v30 = vadd.f32 %v856_v28, %v828_v27  ;;  %v915_v28 = vadd.f32 %v2234_v24, %v2259_v59 }
  0xe5   : > { %v2238_v31 = vpop.f32.mrf.mxu1  ;;  %v2240_v32 = vadd.f32 %v885_v23, %v857_v30 }
  0xe8   : > { %v829_v33 = vpop.f32.mrf.mxu2 }
  0xe9   : > { %v830_v34 = vadd.f32 %v829_v33, %v801_v61  ;;  %v858_v35 = vpop.f32.mrf.mxu3  ;;  %v1047_v33 = vmax.f32 %v2236_v25, 0.0 }
  0xea   : > { %v890_v36 = vpop.f32.mrf.mxu0 }
  0xeb   : > { %v859_v37 = vadd.f32 %v858_v35, %v830_v34 }
  0xed   : > { %v2242_v38 = vpop.f32.mrf.mxu1  ;;  %v2244_v39 = vadd.f32 %v887_v29, %v859_v37 }
  0xf0   : > { %v832_v10 = vpop.f32.mrf.mxu2 }
  0xf1   : > { %v833_v63 = vadd.f32 %v832_v10, %v804_v43  ;;  %v861_v62 = vpop.f32.mrf.mxu3 }
  0xf2   : > { %v892_v11 = vpop.f32.mrf.mxu0 }
  0xf3   : > { %v862_v9 = vadd.f32 %v861_v62, %v833_v63 }
  0xf5   : > { %v2246_v1 = vpop.f32.mrf.mxu1  ;;  %v2248_v40 = vadd.f32 %v890_v36, %v862_v9  ;;  %v917_v9 = vadd.f32 %v2238_v31, %v2259_v59 }
  0xf8   : > { %v834_v41 = vpop.f32.mrf.mxu2 }
  0xf9   : > { %v835_v42 = vadd.f32 %v834_v41, %v806_v51  ;;  %v863_v44 = vpop.f32.mrf.mxu3 }
  0xfa   : > { %v895_v45 = vpop.f32.mrf.mxu0 }
  0xfb   : > { %v864_v46 = vadd.f32 %v863_v44, %v835_v42  ;;  %v1049_v42 = vmax.f32 %v2240_v32, 0.0 }
  0xfd   : > { %v2250_v47 = vpop.f32.mrf.mxu1  ;;  %v2252_v48 = vadd.f32 %v892_v11, %v864_v46 }
 0x100   : > { %v837_v49 = vpop.f32.mrf.mxu2 }
 0x101   : > { %v838_v50 = vadd.f32 %v837_v49, %v809_v58  ;;  %v866_v52 = vpop.f32.mrf.mxu3  ;;  %v910_v58 = vadd.f32 %v909_v13, %v2259_v59 }
 0x102   : > { %v897_v43 = vpop.f32.mrf.mxu0 }
 0x103   : > { %v867_v8 = vadd.f32 %v866_v52, %v838_v50 }
 0x105   : > { %v2254_v53 = vpop.f32.mrf.mxu1  ;;  %v2256_v54 = vadd.f32 %v895_v45, %v867_v8 }
 0x108   : > { %v839_v55 = vpop.f32.mrf.mxu2 }
 0x109   : > { %v840_v56 = vadd.f32 %v839_v55, %v811_v12  ;;  %v868_v51 = vpop.f32.mrf.mxu3  ;;  %v912_v12 = vadd.f32 %v911_v18, %v2259_v59 }
 0x10a   : > { %v996_v57 = vpop.f32.mrf.mxu0 }
 0x10b   : > { %v869_v60 = vadd.f32 %v868_v51, %v840_v56  ;;  %v1051_v56 = vmax.f32 %v2244_v39, 0.0 }
 0x10d   : > { %v1025_v61 = vpop.f32.mrf.mxu1  ;;  %v2261_v0 = vadd.f32 %v897_v43, %v869_v60  ;;  %v920_v43 = vadd.f32 %v2242_v38, %v2259_v59 }
 0x110   : > { %v938_v2 = vpop.f32.mrf.mxu2 }
 0x111   : > { %v939_v5 = vadd.f32 %v938_v2, %v910_v58  ;;  %v967_v7 = vpop.f32.mrf.mxu3  ;;  %v922_v2 = vadd.f32 %v2246_v1, %v2259_v59 }
 0x112   : > { %v998_v6 = vpop.f32.mrf.mxu0 }
 0x113   : > { %v968_v14 = vadd.f32 %v967_v7, %v939_v5 }
 0x115   : > { %v1027_v15 = vpop.f32.mrf.mxu1  ;;  %v997_v16 = vadd.f32 %v996_v57, %v968_v14 }
 0x117   : > { %v1026_v17 = vadd.f32 %v1025_v61, %v997_v16 }
 0x118   : > { %v940_v3 = vpop.f32.mrf.mxu2 }
 0x119   : > { %v1046_v21 = vmax.f32 %v1026_v17, 0.0  ;;  %v941_v22 = vadd.f32 %v940_v3, %v912_v12  ;;  %v969_v23 = vpop.f32.mrf.mxu3 }
 0x11a   : > { %v1001_v18 = vpop.f32.mrf.mxu0 }
 0x11b   : > { %v1061_v4 = vpack.c.bf16 %v1046_v21, %v1045_v20  ;;  %v970_v26 = vadd.f32 %v969_v23, %v941_v22  ;;  %v925_v20 = vadd.f32 %v2250_v47, %v2259_v59  ;;  %v1055_v22 = vmax.f32 %v2252_v48, 0.0 }
 0x11c   : > { %v1057_v48 = vmax.f32 %v2256_v54, 0.0 }
 0x11d   : > { %v1030_v27 = vpop.f32.mrf.mxu1  ;;  %1072 = vst.msk [vmem:[%s2270_s19] sm:$0xff] %vm2272_vm3, %v1061_v4  ;;  %v999_v19 = vadd.f32 %v998_v6, %v970_v26  ;;  %v1053_v6 = vmax.f32 %v2248_v40, 0.0 }
 0x11f   : > { %v1028_v29 = vadd.f32 %v1027_v15, %v999_v19 }
 0x120   : > { %v943_v30 = vpop.f32.mrf.mxu2 }
 0x121   : > { %v1048_v34 = vmax.f32 %v1028_v29, 0.0  ;;  %v944_v35 = vadd.f32 %v943_v30, %v915_v28  ;;  %v972_v36 = vpop.f32.mrf.mxu3  ;;  %v927_v29 = vadd.f32 %v2254_v53, %v2259_v59 }
 0x122   : > { %v1003_v63 = vpop.f32.mrf.mxu0 }
 0x123   : > { %v1062_v37 = vpack.c.bf16 %v1048_v34, %v1047_v33  ;;  %v973_v10 = vadd.f32 %v972_v36, %v944_v35 }
 0x125   : > { %1073 = vst.msk [vmem:[%s2270_s19 + $0x8] sm:$0xff] %vm2272_vm3, %v1062_v37  ;;  %v1002_v62 = vadd.f32 %v1001_v18, %v973_v10  ;;  %v1032_v11 = vpop.f32.mrf.mxu1 }
 0x127   : > { %v1031_v24 = vadd.f32 %v1030_v27, %v1002_v62 }
 0x128   : > { %v945_v41 = vpop.f32.mrf.mxu2 }
 0x129   : > { %v1050_v25 = vmax.f32 %v1031_v24, 0.0  ;;  %v946_v44 = vadd.f32 %v945_v41, %v917_v9  ;;  %v974_v45 = vpop.f32.mrf.mxu3  ;;  %v1059_v9 = vmax.f32 %v2261_v0, 0.0 }
 0x12a   : > { %v1006_v52 = vpop.f32.mrf.mxu0 }
 0x12b   : > { %v1063_v46 = vpack.c.bf16 %v1050_v25, %v1049_v42  ;;  %v975_v49 = vadd.f32 %v974_v45, %v946_v44 }
 0x12d   : > { %1074 = vst.msk [vmem:[%s2270_s19 + $0x10] sm:$0xff] %vm2272_vm3, %v1063_v46  ;;  %v1004_v50 = vadd.f32 %v1003_v63, %v975_v49  ;;  %v1035_v31 = vpop.f32.mrf.mxu1 }
 0x12f   : > { %v1033_v8 = vadd.f32 %v1032_v11, %v1004_v50 }
 0x130   : > { %v948_v55 = vpop.f32.mrf.mxu2 }
 0x131   : > { %v1052_v32 = vmax.f32 %v1033_v8, 0.0  ;;  %v949_v51 = vadd.f32 %v948_v55, %v920_v43  ;;  %v977_v57 = vpop.f32.mrf.mxu3 }
 0x132   : > { %v1008_v38 = vpop.f32.mrf.mxu0 }
 0x133   : > { %v1064_v60 = vpack.c.bf16 %v1052_v32, %v1051_v56  ;;  %v978_v61 = vadd.f32 %v977_v57, %v949_v51 }
 0x135   : > { %1075 = vst.msk [vmem:[%s2270_s19 + $0x18] sm:$0xff] %vm2272_vm3, %v1064_v60  ;;  %v1007_v58 = vadd.f32 %v1006_v52, %v978_v61  ;;  %v1037_v16 = vpop.f32.mrf.mxu1 }
 0x137   : > { %v1036_v5 = vadd.f32 %v1035_v31, %v1007_v58 }
 0x138   : > { %v950_v7 = vpop.f32.mrf.mxu2 }
 0x139   : > { %v1054_v14 = vmax.f32 %v1036_v5, 0.0  ;;  %v951_v39 = vadd.f32 %v950_v7, %v922_v2  ;;  %v979_v15 = vpop.f32.mrf.mxu3 }
 0x13a   : > { %v1011_v4 = vpop.f32.mrf.mxu0 }
 0x13b   : > { %v1065_v12 = vpack.c.bf16 %v1054_v14, %v1053_v6  ;;  %v980_v17 = vadd.f32 %v979_v15, %v951_v39 }
 0x13d   : > { %1076 = vst.msk [vmem:[%s2270_s19 + $0x20] sm:$0xff] %vm2272_vm3, %v1065_v12  ;;  %v1009_v3 = vadd.f32 %v1008_v38, %v980_v17  ;;  %v1040_v19 = vpop.f32.mrf.mxu1 }
 0x13f   : > { %v1038_v1 = vadd.f32 %v1037_v16, %v1009_v3 }
 0x140   : > { %v953_v21 = vpop.f32.mrf.mxu2 }
 0x141   : > { %v1056_v23 = vmax.f32 %v1038_v1, 0.0  ;;  %v954_v40 = vadd.f32 %v953_v21, %v925_v20  ;;  %v982_v18 = vpop.f32.mrf.mxu3 }
 0x142   : > { %v1013_v10 = vpop.f32.mrf.mxu0 }
 0x143   : > { %v1066_v26 = vpack.c.bf16 %v1056_v23, %v1055_v22  ;;  %v983_v27 = vadd.f32 %v982_v18, %v954_v40 }
 0x145   : > { %1077 = vst.msk [vmem:[%s2270_s19 + $0x28] sm:$0xff] %vm2272_vm3, %v1066_v26  ;;  %v1012_v28 = vadd.f32 %v1011_v4, %v983_v27  ;;  %v1042_v62 = vpop.f32.mrf.mxu1 }
 0x147   : > { %v1041_v47 = vadd.f32 %v1040_v19, %v1012_v28 }
 0x148   : > { %v955_v30 = vpop.f32.mrf.mxu2 }
 0x149   : > { %v1058_v33 = vmax.f32 %v1041_v47, 0.0  ;;  %v956_v34 = vadd.f32 %v955_v30, %v927_v29  ;;  %v984_v35 = vpop.f32.mrf.mxu3 }
 0x14b   : > { %v1067_v36 = vpack.c.bf16 %v1058_v33, %v1057_v48  ;;  %v985_v37 = vadd.f32 %v984_v35, %v956_v34 }
 0x14d   : > { %1078 = vst.msk [vmem:[%s2270_s19 + $0x30] sm:$0xff] %vm2272_vm3, %v1067_v36  ;;  %v1014_v63 = vadd.f32 %v1013_v10, %v985_v37 }
 0x14f   : > { %v1043_v11 = vadd.f32 %v1042_v62, %v1014_v63 }
 0x151   : > { %v1060_v53 = vmax.f32 %v1043_v11, 0.0 }
 0x153   : > { %v1068_v59 = vpack.c.bf16 %v1060_v53, %v1059_v9 }
 0x155   : > { %1079 = vst.msk [vmem:[%s2270_s19 + $0x38] sm:$0xff] %vm2272_vm3, %v1068_v59 }
 0x156 PF: > { %s13_s12 = sadd.s32 1, %s1650_s12  }
 0x157   : > { %p10_p4 = scmp.ge.s32.totalorder %s13_s12, 4  }
 0x159   :  { %12 = sbr.rel (!%p10_p4) target bundleno = 1 (0x1), region = 62 }

// kernel: inception_c_unit.4
= control target key start
LH: loop header
LB: loop body
LE: loop exit
PB: predicated region body
PF: predicated region fallthrough
CT: control target
= control target key end

     0   :  { %s6122_s12 = smov 0   ;;  %s8947_s0 = inlined_call_operand.vmem [shape: bf16[128,1792], index: 0, kind: input, shape index: {}]   ;;  %s8948_s1 = inlined_call_operand.vmem [shape: bf16[1792,384], index: 1, kind: input, shape index: {}]   ;;  %s8949_s2 = inlined_call_operand.vmem [shape: f32[1,384], index: 2, kind: input, shape index: {}]   ;;  %s8950_s3 = inlined_call_operand.vmem [shape: bf16[128,384], index: 3, kind: output, shape index: {}]  }
   0x1 LB: > { %s4095_s13 = sadd.s32 4294967295, %s6100_s12   ;;  %p4099_p0 = scmp.ge.s32.totalorder %s6100_s12, 1  ;;  %s6100_s12 = sphi %s6122_s12, %s13_s12  }
   0x2   : > { %p139_p1 = scmp.lt.s32.totalorder %s6100_s12, 3 }
   0x4   : > { %p140_p2 = pnand %p4099_p0, %p139_p1 }
   0x6   : > { %143 = sbr.rel (%p140_p2) target bundleno = 855 (0x357), region = 32 }
   0xb   : > { %v4414_v0 = vld [vmem:[%s8948_s1 + $0xa8] sm:$0xf]  ;;  %v5752_v1 = vld [vmem:[%s8948_s1 + $0xb0] sm:$0xf0]  ;;  %v4402_v5 = vld [vmem:[%s8948_s1 + $0x90] sm:$0xf] }
   0xc   : > { %v4510_v2 = vld [vmem:[%s8948_s1 + $0x168] sm:$0xf]  ;;  %v4415_v3 = vor.u32 %v5752_v1, %v4414_v0  ;;  %v5776_v4 = vld [vmem:[%s8948_s1 + $0x170] sm:$0xf0]  ;;  %v5749_v6 = vld [vmem:[%s8948_s1 + $0x98] sm:$0xf0] }
   0xd   : > { %v4511_v7 = vor.u32 %v5776_v4, %v4510_v2  ;;  %v4498_v8 = vld [vmem:[%s8948_s1 + $0x150] sm:$0xf]  ;;  %v5773_v9 = vld [vmem:[%s8948_s1 + $0x158] sm:$0xf0]  ;;  %v4403_v10 = vor.u32 %v5749_v6, %v4402_v5  ;;  %v4390_v12 = vld [vmem:[%s8948_s1 + $0x78] sm:$0xf] }
   0xe   : > { %6066 = vmatpush.bf16.msra.mxu2 %v4415_v3  ;;  %2763 = vmatpush.bf16.msra.mxu0 %v4415_v3  ;;  %v4499_v11 = vor.u32 %v5773_v9, %v4498_v8  ;;  %v5746_v13 = vld [vmem:[%s8948_s1 + $0x80] sm:$0xf0]  ;;  %v4486_v14 = vld [vmem:[%s8948_s1 + $0x138] sm:$0xf]  ;;  %v4378_v18 = vld [vmem:[%s8948_s1 + $0x60] sm:$0xf] }
   0xf   : > { %6074 = vmatpush.bf16.msra.mxu3 %v4511_v7  ;;  %2792 = vmatpush.bf16.msra.mxu1 %v4511_v7  ;;  %v5770_v15 = vld [vmem:[%s8948_s1 + $0x140] sm:$0xf0]  ;;  %v4391_v16 = vor.u32 %v5746_v13, %v4390_v12  ;;  %v5743_v19 = vld [vmem:[%s8948_s1 + $0x68] sm:$0xf0]  ;;  %v4474_v20 = vld [vmem:[%s8948_s1 + $0x120] sm:$0xf] }
  0x10   : > { %v4487_v17 = vor.u32 %v5770_v15, %v4486_v14  ;;  %v5767_v21 = vld [vmem:[%s8948_s1 + $0x128] sm:$0xf0]  ;;  %s4100_s21 = sshll.u32 %s4095_s13, 3  ;;  %v4379_v22 = vor.u32 %v5743_v19, %v4378_v18  ;;  %v4366_v24 = vld [vmem:[%s8948_s1 + $0x48] sm:$0xf] }
  0x11   : > { %p166_p3 = scmp.lt.s32.totalorder %s4100_s21, 15  ;;  %v4475_v23 = vor.u32 %v5767_v21, %v4474_v20  ;;  %v5740_v25 = vld [vmem:[%s8948_s1 + $0x50] sm:$0xf0]  ;;  %v4462_v26 = vld [vmem:[%s8948_s1 + $0x108] sm:$0xf] }
  0x12   : > { %6067 = vmatpush.bf16.msra.mxu2 %v4403_v10  ;;  %2764 = vmatpush.bf16.msra.mxu0 %v4403_v10  ;;  %v5764_v27 = vld [vmem:[%s8948_s1 + $0x110] sm:$0xf0]  ;;  %v4367_v28 = vor.u32 %v5740_v25, %v4366_v24  ;;  %v4354_v30 = vld [vmem:[%s8948_s1 + $0x30] sm:$0xf]  ;;  %v5737_v31 = vld [vmem:[%s8948_s1 + $0x38] sm:$0xf0] }
  0x13   : > { %6075 = vmatpush.bf16.msra.mxu3 %v4499_v11  ;;  %2793 = vmatpush.bf16.msra.mxu1 %v4499_v11  ;;  %s9088_s21 = smov (!%p166_p3, %s4100_s21), 15  ;;  %v4463_v29 = vor.u32 %v5764_v27, %v4462_v26  ;;  %v4450_v32 = vld [vmem:[%s8948_s1 + $0xf0] sm:$0xf]  ;;  %v5761_v33 = vld [vmem:[%s8948_s1 + $0xf8] sm:$0xf0]  ;;  %v4355_v34 = vor.u32 %v5737_v31, %v4354_v30 }
  0x14   : > { %s6082_s10 = smul.u32 56, %s9088_s21  ;;  %v4451_v35 = vor.u32 %v5761_v33, %v4450_v32  ;;  %v4342_v36 = vld [vmem:[%s8948_s1 + $0x18] sm:$0xf]  ;;  %v5734_v37 = vld [vmem:[%s8948_s1 + $0x20] sm:$0xf0] }
  0x15   : > { %v4438_v38 = vld [vmem:[%s8948_s1 + $0xd8] sm:$0xf]  ;;  %v5758_v39 = vld [vmem:[%s8948_s1 + $0xe0] sm:$0xf0]  ;;  %v4343_v40 = vor.u32 %v5734_v37, %v4342_v36  ;;  %v4330_v41 = vld [vmem:[%s8948_s1] sm:$0xf] }
  0x16   : > { %6068 = vmatpush.bf16.msra.mxu2 %v4391_v16  ;;  %2765 = vmatpush.bf16.msra.mxu0 %v4391_v16  ;;  %v5731_v42 = vld [vmem:[%s8948_s1 + $0x8] sm:$0xf0]  ;;  %s6228_s13 = scalar_lea.vmem %s8947_s0, %s6082_s10  ;;  %v4439_v43 = vor.u32 %v5758_v39, %v4438_v38  ;;  %v4426_v44 = vld [vmem:[%s8948_s1 + $0xc0] sm:$0xf]  ;;  %v4606_v46 = vld [vmem:[%s8948_s1 + $0x228] sm:$0xf] }
  0x17   : > { %6076 = vmatpush.bf16.msra.mxu3 %v4487_v17  ;;  %2794 = vmatpush.bf16.msra.mxu1 %v4487_v17  ;;  %v5755_v45 = vld [vmem:[%s8948_s1 + $0xc8] sm:$0xf0]  ;;  %v5800_v47 = vld [vmem:[%s8948_s1 + $0x230] sm:$0xf0]  ;;  %v4702_v48 = vld [vmem:[%s8948_s1 + $0x2e8] sm:$0xf]  ;;  %v4331_v53 = vor.u32 %v5731_v42, %v4330_v41 }
  0x18   : > { %v5824_v49 = vld [vmem:[%s8948_s1 + $0x2f0] sm:$0xf0]  ;;  %v4218_v50 = vld [vmem:[%s6228_s13 + $0xe0] sm:$0xf]  ;;  %v4798_v51 = vld [vmem:[%s8948_s1 + $0x3a8] sm:$0xf]  ;;  %v4427_v58 = vor.u32 %v5755_v45, %v4426_v44  ;;  %v4607_v61 = vor.u32 %v5800_v47, %v4606_v46 }
  0x19   : > { %v5848_v52 = vld [vmem:[%s8948_s1 + $0x3b0] sm:$0xf0]  ;;  %v5709_v54 = vld [vmem:[%s6228_s13 + $0x114] sm:$0xf0]  ;;  %v4106_v55 = vld [vmem:[%s6228_s13] sm:$0xf]  ;;  %v4703_v63 = vor.u32 %v5824_v49, %v4702_v48 }
  0x1a   : > { %6069 = vmatpush.bf16.msra.mxu2 %v4379_v22  ;;  %2766 = vmatpush.bf16.msra.mxu0 %v4379_v22  ;;  %v5681_v56 = vld [vmem:[%s6228_s13 + $0x34] sm:$0xf0]  ;;  %v4594_v57 = vld [vmem:[%s8948_s1 + $0x210] sm:$0xf]  ;;  %v5702_v59 = vld [vmem:[%s6228_s13 + $0xe4] sm:$0xf]  ;;  %v6271_v3 = vor.u32 %v5709_v54, %v4218_v50  ;;  %v4799_v9 = vor.u32 %v5848_v52, %v4798_v51 }
  0x1b   : > { %6077 = vmatpush.bf16.msra.mxu3 %v4475_v23  ;;  %2795 = vmatpush.bf16.msra.mxu1 %v4475_v23  ;;  %v4220_v60 = vld [vmem:[%s6228_s13 + $0x118] sm:$0xf0]  ;;  %v5674_v0 = vld [vmem:[%s6228_s13 + $0x4] sm:$0xf]  ;;  %v4690_v2 = vld [vmem:[%s8948_s1 + $0x2d0] sm:$0xf]  ;;  %v6273_v4 = vor.u32 %v5681_v56, %v4106_v55 }
  0x1c   : > { %v5797_v62 = vld [vmem:[%s8948_s1 + $0x218] sm:$0xf0]  ;;  %v4894_v6 = vld [vmem:[%s8948_s1 + $0x468] sm:$0xf]  ;;  %v5872_v7 = vld [vmem:[%s8948_s1 + $0x470] sm:$0xf0]  ;;  %v6284_v8 = vor.u32 %v5702_v59, %v4220_v60 }
  0x1d   : > { %v4108_v1 = vld [vmem:[%s6228_s13 + $0x38] sm:$0xf0]  ;;  %v4595_v11 = vor.u32 %v5797_v62, %v4594_v57  ;;  %v4786_v12 = vld [vmem:[%s8948_s1 + $0x390] sm:$0xf]  ;;  %v4895_v15 = vor.u32 %v5872_v7, %v4894_v6  ;;  %v4582_v16 = vld [vmem:[%s8948_s1 + $0x1f8] sm:$0xf] }
  0x1e   : > { %6070 = vmatpush.bf16.msra.mxu2 %v4367_v28  ;;  %2767 = vmatpush.bf16.msra.mxu0 %v4367_v28  ;;  %v5821_v5 = vld [vmem:[%s8948_s1 + $0x2d8] sm:$0xf0]  ;;  %v6286_v10 = vor.u32 %v5674_v0, %v4108_v1  ;;  %v5794_v17 = vld [vmem:[%s8948_s1 + $0x200] sm:$0xf0]  ;;  %v4678_v18 = vld [vmem:[%s8948_s1 + $0x2b8] sm:$0xf] }
  0x1f   : > { %6078 = vmatpush.bf16.msra.mxu3 %v4463_v29  ;;  %2796 = vmatpush.bf16.msra.mxu1 %v4463_v29  ;;  %v5845_v13 = vld [vmem:[%s8948_s1 + $0x398] sm:$0xf0]  ;;  %v4691_v14 = vor.u32 %v5821_v5, %v4690_v2  ;;  %v5818_v19 = vld [vmem:[%s8948_s1 + $0x2c0] sm:$0xf0]  ;;  %v4882_v20 = vld [vmem:[%s8948_s1 + $0x450] sm:$0xf]  ;;  %v4583_v23 = vor.u32 %v5794_v17, %v4582_v16 }
  0x20   : > { %v5869_v21 = vld [vmem:[%s8948_s1 + $0x458] sm:$0xf0]  ;;  %v4787_v22 = vor.u32 %v5845_v13, %v4786_v12  ;;  %v4774_v24 = vld [vmem:[%s8948_s1 + $0x378] sm:$0xf]  ;;  %v5842_v25 = vld [vmem:[%s8948_s1 + $0x380] sm:$0xf0]  ;;  %v4679_v26 = vor.u32 %v5818_v19, %v4678_v18 }
  0x21   : > { %v4883_v27 = vor.u32 %v5869_v21, %v4882_v20  ;;  %v4570_v28 = vld [vmem:[%s8948_s1 + $0x1e0] sm:$0xf]  ;;  %v5791_v29 = vld [vmem:[%s8948_s1 + $0x1e8] sm:$0xf0]  ;;  %v4870_v32 = vld [vmem:[%s8948_s1 + $0x438] sm:$0xf] }
  0x22   : > { %6071 = vmatpush.bf16.msra.mxu2 %v4355_v34  ;;  %2768 = vmatpush.bf16.msra.mxu0 %v4355_v34  ;;  %v4666_v30 = vld [vmem:[%s8948_s1 + $0x2a0] sm:$0xf]  ;;  %v5815_v31 = vld [vmem:[%s8948_s1 + $0x2a8] sm:$0xf0]  ;;  %v5866_v33 = vld [vmem:[%s8948_s1 + $0x440] sm:$0xf0]  ;;  %v4775_v34 = vor.u32 %v5842_v25, %v4774_v24 }
  0x23   : > { %6079 = vmatpush.bf16.msra.mxu3 %v4451_v35  ;;  %2797 = vmatpush.bf16.msra.mxu1 %v4451_v35  ;;  %v4571_v35 = vor.u32 %v5791_v29, %v4570_v28  ;;  %v4762_v36 = vld [vmem:[%s8948_s1 + $0x360] sm:$0xf]  ;;  %v5839_v37 = vld [vmem:[%s8948_s1 + $0x368] sm:$0xf0]  ;;  %v4667_v38 = vor.u32 %v5815_v31, %v4666_v30  ;;  %v4871_v39 = vor.u32 %v5866_v33, %v4870_v32  ;;  %v5723_v41 = vld [vmem:[%s6228_s13 + $0x184] sm:$0xf0] }
  0x24   : > { %v4558_v42 = vld [vmem:[%s8948_s1 + $0x1c8] sm:$0xf]  ;;  %v5716_v45 = vld [vmem:[%s6228_s13 + $0x154] sm:$0xf]  ;;  %v4276_v46 = vld [vmem:[%s6228_s13 + $0x188] sm:$0xf0]  ;;  %v4763_v50 = vor.u32 %v5839_v37, %v4762_v36 }
  0x25   : > { %v4654_v44 = vld [vmem:[%s8948_s1 + $0x288] sm:$0xf]  ;;  %v5812_v47 = vld [vmem:[%s8948_s1 + $0x290] sm:$0xf0]  ;;  %v4858_v48 = vld [vmem:[%s8948_s1 + $0x420] sm:$0xf]  ;;  %v6400_v6 = vor.u32 %v5716_v45, %v4276_v46 }
  0x26   : > { %6072 = vmatpush.bf16.msra.mxu2 %v4343_v40  ;;  %2769 = vmatpush.bf16.msra.mxu0 %v4343_v40  ;;  %v4274_v40 = vld [vmem:[%s6228_s13 + $0x150] sm:$0xf]  ;;  %v5863_v49 = vld [vmem:[%s8948_s1 + $0x428] sm:$0xf0]  ;;  %v5695_v52 = vld [vmem:[%s6228_s13 + $0xa4] sm:$0xf0] }
  0x27   : > { %6080 = vmatpush.bf16.msra.mxu3 %v4439_v43  ;;  %2798 = vmatpush.bf16.msra.mxu1 %v4439_v43  ;;  %v5788_v43 = vld [vmem:[%s8948_s1 + $0x1d0] sm:$0xf0]  ;;  %v4162_v51 = vld [vmem:[%s6228_s13 + $0x70] sm:$0xf]  ;;  %v4164_v57 = vld [vmem:[%s6228_s13 + $0xa8] sm:$0xf0]  ;;  %v4859_v59 = vor.u32 %v5863_v49, %v4858_v48 }
  0x28   : > { %v4559_v54 = vor.u32 %v5788_v43, %v4558_v42  ;;  %v5836_v55 = vld [vmem:[%s8948_s1 + $0x350] sm:$0xf0]  ;;  %v4546_v60 = vld [vmem:[%s8948_s1 + $0x1b0] sm:$0xf]  ;;  %v6389_v0 = vor.u32 %v5695_v52, %v4162_v51  ;;  %v5809_v1 = vld [vmem:[%s8948_s1 + $0x278] sm:$0xf0] }
  0x29   : > { %v5688_v56 = vld [vmem:[%s6228_s13 + $0x74] sm:$0xf]  ;;  %v4642_v62 = vld [vmem:[%s8948_s1 + $0x270] sm:$0xf]  ;;  %v4846_v2 = vld [vmem:[%s8948_s1 + $0x408] sm:$0xf] }
  0x2a   : > { %6073 = vmatpush.bf16.msra.mxu2 %v4331_v53  ;;  %2770 = vmatpush.bf16.msra.mxu0 %v4331_v53  ;;  %v4750_v53 = vld [vmem:[%s8948_s1 + $0x348] sm:$0xf]  ;;  %v5860_v5 = vld [vmem:[%s8948_s1 + $0x410] sm:$0xf0]  ;;  %v4738_v12 = vld [vmem:[%s8948_s1 + $0x330] sm:$0xf] }
  0x2b   : > { %6081 = vmatpush.bf16.msra.mxu3 %v4427_v58  ;;  %2799 = vmatpush.bf16.msra.mxu1 %v4427_v58  ;;  %v4655_v58 = vor.u32 %v5812_v47, %v4654_v44  ;;  %v4751_v7 = vor.u32 %v5836_v55, %v4750_v53  ;;  %v5833_v13 = vld [vmem:[%s8948_s1 + $0x338] sm:$0xf0]  ;;  %v4534_v16 = vld [vmem:[%s8948_s1 + $0x198] sm:$0xf]  ;;  %v5782_v17 = vld [vmem:[%s8948_s1 + $0x1a0] sm:$0xf0] }
  0x2c   : > { %v4630_v18 = vld [vmem:[%s8948_s1 + $0x258] sm:$0xf]  ;;  %v5806_v19 = vld [vmem:[%s8948_s1 + $0x260] sm:$0xf0]  ;;  %v4834_v20 = vld [vmem:[%s8948_s1 + $0x3f0] sm:$0xf] }
  0x2d   : > { %2781 = vmatmul.bf16.vlgmr.msra.gmra.mxu2 %v6271_v3  ;;  %2771 = vmatmul.bf16.vlgmr.msra.gmra.mxu0 %v6273_v4  ;;  %v5857_v21 = vld [vmem:[%s8948_s1 + $0x3f8] sm:$0xf0]  ;;  %v4726_v24 = vld [vmem:[%s8948_s1 + $0x318] sm:$0xf]  ;;  %v5830_v25 = vld [vmem:[%s8948_s1 + $0x320] sm:$0xf0] }
  0x2e   : > { %2821 = vmatpush.bf16.msrb.mxu2 %v4607_v61  ;;  %2810 = vmatmul.bf16.vlgmr.msra.gmra.mxu3 %v6284_v8  ;;  %v5785_v61 = vld [vmem:[%s8948_s1 + $0x1b8] sm:$0xf0]  ;;  %v4835_v28 = vor.u32 %v5857_v21, %v4834_v20  ;;  %v5779_v29 = vld [vmem:[%s8948_s1 + $0x188] sm:$0xf0]  ;;  %v4618_v30 = vld [vmem:[%s8948_s1 + $0x240] sm:$0xf] }
  0x2f   : > { %2850 = vmatpush.bf16.msrb.mxu3 %v4703_v63  ;;  %2879 = vmatpush.bf16.msrb.mxu0 %v4799_v9  ;;  %v6387_v63 = vor.u32 %v5723_v41, %v4274_v40  ;;  %v6402_v9 = vor.u32 %v5688_v56, %v4164_v57  ;;  %v5803_v31 = vld [vmem:[%s8948_s1 + $0x248] sm:$0xf0]  ;;  %v4822_v32 = vld [vmem:[%s8948_s1 + $0x3d8] sm:$0xf]  ;;  %v5854_v33 = vld [vmem:[%s8948_s1 + $0x3e0] sm:$0xf0] }
  0x30   : > { %2800 = vmatmul.bf16.vlgmr.msra.gmra.mxu1 %v6286_v10  ;;  %v5896_v36 = vld [vmem:[%s8948_s1 + $0x530] sm:$0xf0]  ;;  %v5086_v37 = vld [vmem:[%s8948_s1 + $0x5e8] sm:$0xf]  ;;  %v4714_v40 = vld [vmem:[%s8948_s1 + $0x300] sm:$0xf]  ;;  %v4619_v42 = vor.u32 %v5803_v31, %v4618_v30  ;;  %v4823_v43 = vor.u32 %v5854_v33, %v4822_v32 }
  0x31   : > { %2908 = vmatpush.bf16.msrb.mxu1 %v4895_v15  ;;  %v4847_v15 = vor.u32 %v5860_v5, %v4846_v2  ;;  %v5827_v41 = vld [vmem:[%s8948_s1 + $0x308] sm:$0xf0]  ;;  %v4114_v44 = vld [vmem:[%s6228_s13 + $0x8] sm:$0xf]  ;;  %v5682_v45 = vld [vmem:[%s6228_s13 + $0x3c] sm:$0xf0] }
  0x32   : > { %2822 = vmatpush.bf16.msrb.mxu2 %v4595_v11  ;;  %v4547_v11 = vor.u32 %v5785_v61, %v4546_v60  ;;  %v5182_v46 = vld [vmem:[%s8948_s1 + $0x6a8] sm:$0xf]  ;;  %v5944_v47 = vld [vmem:[%s8948_s1 + $0x6b0] sm:$0xf0]  ;;  %v5675_v48 = vld [vmem:[%s6228_s13 + $0xc] sm:$0xf] }
  0x33   : > { %2851 = vmatpush.bf16.msrb.mxu3 %v4691_v14  ;;  %2880 = vmatpush.bf16.msrb.mxu0 %v4787_v22  ;;  %v4643_v14 = vor.u32 %v5809_v1, %v4642_v62  ;;  %v4739_v22 = vor.u32 %v5833_v13, %v4738_v12  ;;  %v4116_v49 = vld [vmem:[%s6228_s13 + $0x40] sm:$0xf0]  ;;  %v4810_v51 = vld [vmem:[%s8948_s1 + $0x3c0] sm:$0xf]  ;;  %v5851_v52 = vld [vmem:[%s8948_s1 + $0x3c8] sm:$0xf0]  ;;  %v5183_v61 = vor.u32 %v5944_v47, %v5182_v46 }
  0x34   : > { %v4122_v55 = vld [vmem:[%s6228_s13 + $0x10] sm:$0xf]  ;;  %v5683_v56 = vld [vmem:[%s6228_s13 + $0x44] sm:$0xf0]  ;;  %v5676_v57 = vld [vmem:[%s6228_s13 + $0x14] sm:$0xf]  ;;  %v4811_v62 = vor.u32 %v5851_v52, %v4810_v51 }
  0x35   : > { %2909 = vmatpush.bf16.msrb.mxu1 %v4883_v27  ;;  %v4631_v27 = vor.u32 %v5806_v19, %v4630_v18  ;;  %v5893_v60 = vld [vmem:[%s8948_s1 + $0x518] sm:$0xf0]  ;;  %v5074_v1 = vld [vmem:[%s8948_s1 + $0x5d0] sm:$0xf]  ;;  %v5278_v5 = vld [vmem:[%s8948_s1 + $0x768] sm:$0xf] }
  0x36   : > { %2823 = vmatpush.bf16.msrb.mxu2 %v4583_v23  ;;  %v4535_v23 = vor.u32 %v5782_v17, %v4534_v16  ;;  %v5917_v2 = vld [vmem:[%s8948_s1 + $0x5d8] sm:$0xf0]  ;;  %v5968_v12 = vld [vmem:[%s8948_s1 + $0x770] sm:$0xf0]  ;;  %v5170_v13 = vld [vmem:[%s8948_s1 + $0x690] sm:$0xf] }
  0x37   : > { %2852 = vmatpush.bf16.msrb.mxu3 %v4679_v26  ;;  %2881 = vmatpush.bf16.msrb.mxu0 %v4775_v34  ;;  %v4522_v26 = vld [vmem:[%s8948_s1 + $0x180] sm:$0xf]  ;;  %v4990_v34 = vld [vmem:[%s8948_s1 + $0x528] sm:$0xf]  ;;  %v5075_v18 = vor.u32 %v5917_v2, %v5074_v1  ;;  %v4966_v19 = vld [vmem:[%s8948_s1 + $0x4f8] sm:$0xf]  ;;  %v5279_v21 = vor.u32 %v5968_v12, %v5278_v5 }
  0x38   : > { %v5890_v20 = vld [vmem:[%s8948_s1 + $0x500] sm:$0xf0]  ;;  %v4954_v31 = vld [vmem:[%s8948_s1 + $0x4e0] sm:$0xf]  ;;  %v5887_v32 = vld [vmem:[%s8948_s1 + $0x4e8] sm:$0xf0] }
  0x39   : > { %2910 = vmatpush.bf16.msrb.mxu1 %v4871_v39  ;;  %v4523_v39 = vor.u32 %v5779_v29, %v4522_v26  ;;  %v5965_v26 = vld [vmem:[%s8948_s1 + $0x758] sm:$0xf0]  ;;  %v4967_v29 = vor.u32 %v5890_v20, %v4966_v19  ;;  %v5696_v46 = vld [vmem:[%s6228_s13 + $0xac] sm:$0xf0]  ;;  %v5242_v51 = vld [vmem:[%s8948_s1 + $0x720] sm:$0xf] }
  0x3a   : > { %2824 = vmatpush.bf16.msrb.mxu2 %v4571_v35  ;;  %v4727_v35 = vor.u32 %v5830_v25, %v4726_v24  ;;  %v5266_v25 = vld [vmem:[%s8948_s1 + $0x750] sm:$0xf]  ;;  %v5689_v52 = vld [vmem:[%s6228_s13 + $0x7c] sm:$0xf]  ;;  %v5230_v19 = vld [vmem:[%s8948_s1 + $0x708] sm:$0xf] }
  0x3b   : > { %2853 = vmatpush.bf16.msrb.mxu3 %v4667_v38  ;;  %2882 = vmatpush.bf16.msrb.mxu0 %v4763_v50  ;;  %v5920_v38 = vld [vmem:[%s8948_s1 + $0x5f0] sm:$0xf0]  ;;  %v4991_v50 = vor.u32 %v5896_v36, %v4990_v34  ;;  %v5267_v33 = vor.u32 %v5965_v26, %v5266_v25  ;;  %v5050_v34 = vld [vmem:[%s8948_s1 + $0x5a0] sm:$0xf]  ;;  %v5881_v1 = vld [vmem:[%s8948_s1 + $0x4b8] sm:$0xf0] }
  0x3c   : > { %v5087_v53 = vor.u32 %v5920_v38, %v5086_v37  ;;  %v5254_v37 = vld [vmem:[%s8948_s1 + $0x738] sm:$0xf]  ;;  %v5962_v38 = vld [vmem:[%s8948_s1 + $0x740] sm:$0xf0]  ;;  %v4180_v2 = vld [vmem:[%s6228_s13 + $0xb8] sm:$0xf0] }
  0x3d   : > { %2911 = vmatpush.bf16.msrb.mxu1 %v4859_v59  ;;  %2786 = vmatmul.bf16.gmra.mxu2 %v6387_v63  ;;  %v4978_v59 = vld [vmem:[%s8948_s1 + $0x510] sm:$0xf]  ;;  %v5255_v47 = vor.u32 %v5962_v38, %v5254_v37  ;;  %v5956_v20 = vld [vmem:[%s8948_s1 + $0x710] sm:$0xf0]  ;;  %v4918_v26 = vld [vmem:[%s8948_s1 + $0x498] sm:$0xf] }
  0x3e   : > { %2825 = vmatpush.bf16.msrb.mxu2 %v4559_v54  ;;  %2776 = vmatmul.bf16.gmra.mxu0 %v6389_v0  ;;  %v4715_v54 = vor.u32 %v5827_v41, %v4714_v40  ;;  %v4979_v16 = vor.u32 %v5893_v60, %v4978_v59  ;;  %v5935_v40 = vld [vmem:[%s8948_s1 + $0x668] sm:$0xf0]  ;;  %v4955_v41 = vor.u32 %v5887_v32, %v4954_v31  ;;  %v5690_v60 = vld [vmem:[%s6228_s13 + $0x84] sm:$0xf]  ;;  %v5026_v12 = vld [vmem:[%s8948_s1 + $0x570] sm:$0xf] }
  0x3f   : > { %2854 = vmatpush.bf16.msrb.mxu3 %v4655_v58  ;;  %2883 = vmatpush.bf16.msrb.mxu0 %v4751_v7  ;;  %v4124_v58 = vld [vmem:[%s6228_s13 + $0x48] sm:$0xf0]  ;;  %v6509_v7 = vor.u32 %v5682_v45, %v4114_v44  ;;  %v5884_v44 = vld [vmem:[%s8948_s1 + $0x4d0] sm:$0xf0]  ;;  %v4170_v45 = vld [vmem:[%s6228_s13 + $0x78] sm:$0xf]  ;;  %v5231_v25 = vor.u32 %v5956_v20, %v5230_v19 }
  0x40   : > { %2815 = vmatmul.bf16.gmra.mxu3 %v6400_v6  ;;  %2805 = vmatmul.bf16.gmra.mxu1 %v6402_v9  ;;  %v6524_v17 = vor.u32 %v5676_v57, %v4124_v58  ;;  %v4178_v57 = vld [vmem:[%s6228_s13 + $0x80] sm:$0xf]  ;;  %v5697_v58 = vld [vmem:[%s6228_s13 + $0xb4] sm:$0xf0]  ;;  %v5122_v31 = vld [vmem:[%s8948_s1 + $0x630] sm:$0xf] }
  0x41   : > { %2912 = vmatpush.bf16.msrb.mxu1 %v4847_v15  ;;  %v6522_v15 = vor.u32 %v5675_v48, %v4116_v49  ;;  %v5038_v48 = vld [vmem:[%s8948_s1 + $0x588] sm:$0xf]  ;;  %v5908_v49 = vld [vmem:[%s8948_s1 + $0x590] sm:$0xf0]  ;;  %v5929_v32 = vld [vmem:[%s8948_s1 + $0x638] sm:$0xf0] }
  0x42   : > { %2826 = vmatpush.bf16.msrb.mxu2 %v4547_v11  ;;  %v6511_v11 = vor.u32 %v5683_v56, %v4122_v55  ;;  %v5932_v55 = vld [vmem:[%s8948_s1 + $0x650] sm:$0xf0]  ;;  %v4906_v37 = vld [vmem:[%s8948_s1 + $0x480] sm:$0xf]  ;;  %v5875_v38 = vld [vmem:[%s8948_s1 + $0x488] sm:$0xf0] }
  0x43   : > { %2855 = vmatpush.bf16.msrb.mxu3 %v4643_v14  ;;  %2884 = vmatpush.bf16.msrb.mxu0 %v4739_v22  ;;  %v5941_v14 = vld [vmem:[%s8948_s1 + $0x698] sm:$0xf0]  ;;  %v5062_v22 = vld [vmem:[%s8948_s1 + $0x5b8] sm:$0xf]  ;;  %v4172_v56 = vld [vmem:[%s6228_s13 + $0xb0] sm:$0xf0] }
  0x44   : > { %v5171_v24 = vor.u32 %v5941_v14, %v5170_v13  ;;  %v5905_v13 = vld [vmem:[%s8948_s1 + $0x578] sm:$0xf0]  ;;  %v5992_v19 = vld [vmem:[%s8948_s1 + $0x830] sm:$0xf0]  ;;  %v5470_v20 = vld [vmem:[%s8948_s1 + $0x8e8] sm:$0xf] }
  0x45   : > { %2913 = vmatpush.bf16.msrb.mxu1 %v4835_v28  ;;  %v5938_v28 = vld [vmem:[%s8948_s1 + $0x680] sm:$0xf0]  ;;  %s6083_s11 = smul.u32 12, %s9088_s21 }
  0x46   : > { %2827 = vmatpush.bf16.msrb.mxu2 %v4535_v23  ;;  %v5914_v23 = vld [vmem:[%s8948_s1 + $0x5c0] sm:$0xf0] }
  0x47   : > { %2856 = vmatpush.bf16.msrb.mxu3 %v4631_v27  ;;  %2885 = vmatpush.bf16.msrb.mxu0 %v4727_v35  ;;  %v5158_v27 = vld [vmem:[%s8948_s1 + $0x678] sm:$0xf]  ;;  %v5063_v30 = vor.u32 %v5914_v23, %v5062_v22  ;;  %v5911_v35 = vld [vmem:[%s8948_s1 + $0x5a8] sm:$0xf0]  ;;  %v6634_v23 = vor.u32 %v5690_v60, %v4180_v2  ;;  %s8678_s6 = scalar_lea.vmem %s8950_s3, %s6083_s11 }
  0x48   : > { %v5159_v36 = vor.u32 %v5938_v28, %v5158_v27  ;;  %v5878_v27 = vld [vmem:[%s8948_s1 + $0x4a0] sm:$0xf0]  ;;  %v5014_v28 = vld [vmem:[%s8948_s1 + $0x558] sm:$0xf]  ;;  %v4236_v60 = vld [vmem:[%s6228_s13 + $0x128] sm:$0xf0] }
  0x49   : > { %2914 = vmatpush.bf16.msrb.mxu1 %v4823_v43  ;;  %v4942_v43 = vld [vmem:[%s8948_s1 + $0x4c8] sm:$0xf] }
  0x4a   : > { %2828 = vmatpush.bf16.msrb.mxu2 %v4523_v39  ;;  %v5146_v39 = vld [vmem:[%s8948_s1 + $0x660] sm:$0xf]  ;;  %v4943_v59 = vor.u32 %v5884_v44, %v4942_v43  ;;  %v5110_v43 = vld [vmem:[%s8948_s1 + $0x618] sm:$0xf] }
  0x4b   : > { %2857 = vmatpush.bf16.msrb.mxu3 %v4619_v42  ;;  %2886 = vmatpush.bf16.msrb.mxu0 %v4715_v54  ;;  %v5051_v42 = vor.u32 %v5911_v35, %v5050_v34  ;;  %v5134_v54 = vld [vmem:[%s8948_s1 + $0x648] sm:$0xf]  ;;  %v5123_v34 = vor.u32 %v5929_v32, %v5122_v31  ;;  %v5218_v35 = vld [vmem:[%s8948_s1 + $0x6f0] sm:$0xf]  ;;  %v6040_v32 = vld [vmem:[%s8948_s1 + $0x9b0] sm:$0xf0] }
  0x4c   : > { %v5135_v14 = vor.u32 %v5932_v55, %v5134_v54  ;;  %v4234_v54 = vld [vmem:[%s6228_s13 + $0xf0] sm:$0xf]  ;;  %v5711_v55 = vld [vmem:[%s6228_s13 + $0x124] sm:$0xf0] }
  0x4d   : > { %2915 = vmatpush.bf16.msrb.mxu1 %v4811_v62  ;;  %2829 = vmatmul.bf16.vlgmr.msrb.gmra.mxu2 %v6509_v7  ;;  %v4930_v62 = vld [vmem:[%s8948_s1 + $0x4b0] sm:$0xf]  ;;  %v5566_v31 = vld [vmem:[%s8948_s1 + $0x9a8] sm:$0xf] }
  0x4e   : > { %2937 = vmatpush.bf16.msra.mxu2 %v4991_v50  ;;  %2887 = vmatmul.bf16.vlgmr.msrb.gmra.mxu0 %v6511_v11  ;;  %v5147_v50 = vor.u32 %v5935_v40, %v5146_v39  ;;  %v4931_v22 = vor.u32 %v5881_v1, %v4930_v62  ;;  %v4907_v40 = vor.u32 %v5875_v38, %v4906_v37  ;;  %v4282_v38 = vld [vmem:[%s6228_s13 + $0x158] sm:$0xf] }
  0x4f   : > { %2966 = vmatpush.bf16.msra.mxu3 %v5087_v53  ;;  %2995 = vmatpush.bf16.msra.mxu0 %v5183_v61  ;;  %v5959_v53 = vld [vmem:[%s8948_s1 + $0x728] sm:$0xf0]  ;;  %v5039_v61 = vor.u32 %v5908_v49, %v5038_v48  ;;  %v6704_v62 = vor.u32 %v5711_v55, %v4234_v54  ;;  %v6010_v54 = vld [vmem:[%s8948_s1 + $0x8c0] sm:$0xf0]  ;;  %v5554_v55 = vld [vmem:[%s8948_s1 + $0x990] sm:$0xf] }
  0x50   : > { %2858 = vmatmul.bf16.vlgmr.msrb.gmra.mxu3 %v6522_v15  ;;  %2916 = vmatmul.bf16.vlgmr.msrb.gmra.mxu1 %v6524_v17  ;;  %v5243_v5 = vor.u32 %v5959_v53, %v5242_v51  ;;  %v5923_v51 = vld [vmem:[%s8948_s1 + $0x608] sm:$0xf0]  ;;  %v5710_v53 = vld [vmem:[%s6228_s13 + $0x11c] sm:$0xf0] }
  0x51   : > { %3024 = vmatpush.bf16.msra.mxu1 %v5279_v21  ;;  %v6632_v21 = vor.u32 %v5689_v52, %v4172_v56  ;;  %v4226_v52 = vld [vmem:[%s6228_s13 + $0xe8] sm:$0xf] }
  0x52   : > { %2938 = vmatpush.bf16.msra.mxu2 %v4979_v16  ;;  %v6622_v16 = vor.u32 %v5696_v46, %v4170_v45  ;;  %v5926_v45 = vld [vmem:[%s8948_s1 + $0x620] sm:$0xf0]  ;;  %v5206_v46 = vld [vmem:[%s8948_s1 + $0x6d8] sm:$0xf] }
  0x53   : > { %2967 = vmatpush.bf16.msra.mxu3 %v5075_v18  ;;  %2996 = vmatpush.bf16.msra.mxu0 %v5171_v24  ;;  %v6624_v18 = vor.u32 %v5697_v58, %v4178_v57  ;;  %v5027_v24 = vor.u32 %v5905_v13, %v5026_v12  ;;  %v5111_v48 = vor.u32 %v5926_v45, %v5110_v43  ;;  %v5703_v57 = vld [vmem:[%s6228_s13 + $0xec] sm:$0xf]  ;;  %v4228_v58 = vld [vmem:[%s6228_s13 + $0x120] sm:$0xf0]  ;;  %v4284_v43 = vld [vmem:[%s6228_s13 + $0x190] sm:$0xf0] }
  0x54   : > { %v6706_v1 = vor.u32 %v5703_v57, %v4228_v58  ;;  %v5947_v12 = vld [vmem:[%s8948_s1 + $0x6c8] sm:$0xf0]  ;;  %v4292_v45 = vld [vmem:[%s6228_s13 + $0x198] sm:$0xf0] }
  0x55   : > { %3025 = vmatpush.bf16.msra.mxu1 %v5267_v33 }
  0x56   : > { %2939 = vmatpush.bf16.msra.mxu2 %v4967_v29  ;;  %v4919_v29 = vor.u32 %v5878_v27, %v4918_v26  ;;  %v5362_v26 = vld [vmem:[%s8948_s1 + $0x810] sm:$0xf]  ;;  %v5989_v27 = vld [vmem:[%s8948_s1 + $0x818] sm:$0xf0] }
  0x57   : > { %2968 = vmatpush.bf16.msra.mxu3 %v5063_v30  ;;  %2997 = vmatpush.bf16.msra.mxu0 %v5159_v36  ;;  %v5902_v30 = vld [vmem:[%s8948_s1 + $0x560] sm:$0xf0]  ;;  %v5953_v36 = vld [vmem:[%s8948_s1 + $0x6f8] sm:$0xf0] }
  0x58   : > { %v5015_v33 = vor.u32 %v5902_v30, %v5014_v28  ;;  %v5219_v39 = vor.u32 %v5953_v36, %v5218_v35  ;;  %v5458_v28 = vld [vmem:[%s8948_s1 + $0x8d0] sm:$0xf]  ;;  %v6013_v30 = vld [vmem:[%s8948_s1 + $0x8d8] sm:$0xf0]  ;;  %v5662_v35 = vld [vmem:[%s8948_s1 + $0xa68] sm:$0xf] }
  0x59   : > { %3026 = vmatpush.bf16.msra.mxu1 %v5255_v47  ;;  %v5950_v47 = vld [vmem:[%s8948_s1 + $0x6e0] sm:$0xf0]  ;;  %v6064_v36 = vld [vmem:[%s8948_s1 + $0xa70] sm:$0xf0] }
  0x5a   : > { %2940 = vmatpush.bf16.msra.mxu2 %v4955_v41  ;;  %v5002_v41 = vld [vmem:[%s8948_s1 + $0x540] sm:$0xf]  ;;  %v5207_v49 = vor.u32 %v5950_v47, %v5206_v46  ;;  %v5663_v37 = vor.u32 %v6064_v36, %v5662_v35  ;;  %v4132_v35 = vld [vmem:[%s6228_s13 + $0x50] sm:$0xf0]  ;;  %v5678_v36 = vld [vmem:[%s6228_s13 + $0x24] sm:$0xf] }
  0x5b   : > { %2969 = vmatpush.bf16.msra.mxu3 %v5051_v42  ;;  %2998 = vmatpush.bf16.msra.mxu0 %v5147_v50  ;;  %v5899_v42 = vld [vmem:[%s8948_s1 + $0x548] sm:$0xf0]  ;;  %v5098_v50 = vld [vmem:[%s8948_s1 + $0x600] sm:$0xf] }
  0x5c   : > { %v5003_v44 = vor.u32 %v5899_v42, %v5002_v41  ;;  %v5099_v56 = vor.u32 %v5923_v51, %v5098_v50  ;;  %v5725_v41 = vld [vmem:[%s6228_s13 + $0x194] sm:$0xf0]  ;;  %v5717_v42 = vld [vmem:[%s6228_s13 + $0x15c] sm:$0xf]  ;;  %v5986_v51 = vld [vmem:[%s8948_s1 + $0x800] sm:$0xf0] }
  0x5d   : > { %3027 = vmatpush.bf16.msra.mxu1 %v5243_v5  ;;  %2834 = vmatmul.bf16.gmra.mxu2 %v6622_v16  ;;  %v5194_v5 = vld [vmem:[%s8948_s1 + $0x6c0] sm:$0xf]  ;;  %v5350_v50 = vld [vmem:[%s8948_s1 + $0x7f8] sm:$0xf] }
  0x5e   : > { %2941 = vmatpush.bf16.msra.mxu2 %v4943_v59  ;;  %2892 = vmatmul.bf16.gmra.mxu0 %v6624_v18  ;;  %v5704_v59 = vld [vmem:[%s6228_s13 + $0xf4] sm:$0xf]  ;;  %v5195_v13 = vor.u32 %v5947_v12, %v5194_v5  ;;  %v5338_v5 = vld [vmem:[%s8948_s1 + $0x7e0] sm:$0xf]  ;;  %v5983_v12 = vld [vmem:[%s8948_s1 + $0x7e8] sm:$0xf0] }
  0x5f   : > { %2970 = vmatpush.bf16.msra.mxu3 %v5039_v61  ;;  %2999 = vmatpush.bf16.msra.mxu0 %v5135_v14  ;;  %v6702_v61 = vor.u32 %v5710_v53, %v4226_v52  ;;  %v6708_v2 = vor.u32 %v5704_v59, %v4236_v60  ;;  %v5374_v14 = vld [vmem:[%s8948_s1 + $0x828] sm:$0xf]  ;;  %v5446_v52 = vld [vmem:[%s8948_s1 + $0x8b8] sm:$0xf]  ;;  %v5351_v53 = vor.u32 %v5986_v51, %v5350_v50  ;;  %v5650_v59 = vld [vmem:[%s8948_s1 + $0xa50] sm:$0xf] }
  0x60   : > { %2863 = vmatmul.bf16.gmra.mxu3 %v6632_v21  ;;  %2921 = vmatmul.bf16.gmra.mxu1 %v6634_v23  ;;  %v5447_v57 = vor.u32 %v6010_v54, %v5446_v52  ;;  %v6061_v60 = vld [vmem:[%s8948_s1 + $0xa58] sm:$0xf0]  ;;  %v6004_v50 = vld [vmem:[%s8948_s1 + $0x890] sm:$0xf0]  ;;  %v5530_v51 = vld [vmem:[%s8948_s1 + $0x960] sm:$0xf] }
  0x61   : > { %3028 = vmatpush.bf16.msra.mxu1 %v5231_v25  ;;  %v6031_v52 = vld [vmem:[%s8948_s1 + $0x968] sm:$0xf0] }
  0x62   : > { %2942 = vmatpush.bf16.msra.mxu2 %v4931_v22  ;;  %v5375_v22 = vor.u32 %v5992_v19, %v5374_v14  ;;  %v5339_v14 = vor.u32 %v5983_v12, %v5338_v5  ;;  %v5434_v19 = vld [vmem:[%s8948_s1 + $0x8a0] sm:$0xf]  ;;  %v5531_v54 = vor.u32 %v6031_v52, %v5530_v51  ;;  %v5977_v5 = vld [vmem:[%s8948_s1 + $0x7b8] sm:$0xf0]  ;;  %v5506_v51 = vld [vmem:[%s8948_s1 + $0x930] sm:$0xf] }
  0x63   : > { %2971 = vmatpush.bf16.msra.mxu3 %v5027_v24  ;;  %3000 = vmatpush.bf16.msra.mxu0 %v5123_v34  ;;  %v6016_v24 = vld [vmem:[%s8948_s1 + $0x8f0] sm:$0xf0]  ;;  %v5567_v34 = vor.u32 %v6040_v32, %v5566_v31  ;;  %v5684_v31 = vld [vmem:[%s6228_s13 + $0x4c] sm:$0xf0]  ;;  %v4138_v32 = vld [vmem:[%s6228_s13 + $0x20] sm:$0xf] }
  0x64   : > { %v5471_v25 = vor.u32 %v6016_v24, %v5470_v20  ;;  %v6007_v20 = vld [vmem:[%s8948_s1 + $0x8a8] sm:$0xf0]  ;;  %v6025_v52 = vld [vmem:[%s8948_s1 + $0x938] sm:$0xf0] }
  0x65   : > { %3029 = vmatpush.bf16.msra.mxu1 %v5219_v39  ;;  %v5724_v39 = vld [vmem:[%s6228_s13 + $0x18c] sm:$0xf0]  ;;  %v5435_v24 = vor.u32 %v6007_v20, %v5434_v19  ;;  %v5518_v19 = vld [vmem:[%s8948_s1 + $0x948] sm:$0xf] }
  0x66   : > { %2943 = vmatpush.bf16.msra.mxu2 %v4919_v29  ;;  %v5363_v29 = vor.u32 %v5989_v27, %v5362_v26  ;;  %v6764_v46 = vor.u32 %v5724_v39, %v4282_v38  ;;  %v5638_v26 = vld [vmem:[%s8948_s1 + $0xa38] sm:$0xf]  ;;  %v6058_v27 = vld [vmem:[%s8948_s1 + $0xa40] sm:$0xf0]  ;;  %v4194_v20 = vld [vmem:[%s6228_s13 + $0x90] sm:$0xf] }
  0x67   : > { %2972 = vmatpush.bf16.msra.mxu3 %v5015_v33  ;;  %3001 = vmatpush.bf16.msra.mxu0 %v5111_v48  ;;  %v5459_v33 = vor.u32 %v6013_v30, %v5458_v28  ;;  %v6768_v48 = vor.u32 %v5717_v42, %v4284_v43  ;;  %v4130_v30 = vld [vmem:[%s6228_s13 + $0x18] sm:$0xf]  ;;  %v5326_v42 = vld [vmem:[%s8948_s1 + $0x7c8] sm:$0xf]  ;;  %v5980_v43 = vld [vmem:[%s8948_s1 + $0x7d0] sm:$0xf0] }
  0x68   : > { %v6832_v38 = vor.u32 %v5684_v31, %v4130_v30  ;;  %v4196_v30 = vld [vmem:[%s6228_s13 + $0xc8] sm:$0xf0] }
  0x69   : > { %3030 = vmatpush.bf16.msra.mxu1 %v5207_v49 }
  0x6a   : > { %2944 = vmatpush.bf16.msra.mxu2 %v4907_v40  ;;  %v4290_v40 = vld [vmem:[%s6228_s13 + $0x160] sm:$0xf] }
  0x6b   : > { %2973 = vmatpush.bf16.msra.mxu3 %v5003_v44  ;;  %3002 = vmatpush.bf16.msra.mxu0 %v5099_v56  ;;  %v5718_v44 = vld [vmem:[%s6228_s13 + $0x164] sm:$0xf]  ;;  %v6766_v47 = vor.u32 %v5725_v41, %v4290_v40  ;;  %v6037_v56 = vld [vmem:[%s8948_s1 + $0x998] sm:$0xf0] }
  0x6c   : > { %v6770_v49 = vor.u32 %v5718_v44, %v4292_v45  ;;  %v5555_v58 = vor.u32 %v6037_v56, %v5554_v55  ;;  %v5422_v44 = vld [vmem:[%s8948_s1 + $0x888] sm:$0xf]  ;;  %v5327_v45 = vor.u32 %v5980_v43, %v5326_v42  ;;  %v5626_v55 = vld [vmem:[%s8948_s1 + $0xa20] sm:$0xf]  ;;  %v6055_v56 = vld [vmem:[%s8948_s1 + $0xa28] sm:$0xf0] }
  0x6d   : > { %2839 = vmatmul.bf16.gmra.mxu2 %v6702_v61  ;;  %3031 = vmatpush.bf16.msra.mxu1 %v5195_v13  ;;  %v5651_v13 = vor.u32 %v6061_v60, %v5650_v59  ;;  %v5698_v59 = vld [vmem:[%s6228_s13 + $0xbc] sm:$0xf0]  ;;  %v5627_v60 = vor.u32 %v6055_v56, %v5626_v55  ;;  %v5302_v42 = vld [vmem:[%s8948_s1 + $0x798] sm:$0xf]  ;;  %v5974_v43 = vld [vmem:[%s8948_s1 + $0x7a0] sm:$0xf0] }
  0x6e   : > { %2897 = vmatmul.bf16.gmra.mxu0 %v6704_v62  ;;  %3053 = vmatpush.bf16.msrb.mxu2 %v5375_v22  ;;  %9002 = vst [vmem:[#allocation2_spill] sm:$0xff] %v6770_v49  ;;  %v5542_v22 = vld [vmem:[%s8948_s1 + $0x978] sm:$0xf]  ;;  %v5602_v55 = vld [vmem:[%s8948_s1 + $0x9f0] sm:$0xf] }
  0x6f   : > { %3082 = vmatpush.bf16.msrb.mxu3 %v5471_v25  ;;  %3111 = vmatpush.bf16.msrb.mxu0 %v5567_v34  ;;  %v6034_v25 = vld [vmem:[%s8948_s1 + $0x980] sm:$0xf0]  ;;  %v5677_v34 = vld [vmem:[%s6228_s13 + $0x1c] sm:$0xf] }
  0x70   : > { %2868 = vmatmul.bf16.gmra.mxu3 %v6706_v1  ;;  %2926 = vmatmul.bf16.gmra.mxu1 %v6708_v2  ;;  %v5543_v28 = vor.u32 %v6034_v25, %v5542_v22  ;;  %v6836_v40 = vor.u32 %v5677_v34, %v4132_v35  ;;  %v5699_v22 = vld [vmem:[%s6228_s13 + $0xc4] sm:$0xf0]  ;;  %v6028_v25 = vld [vmem:[%s8948_s1 + $0x950] sm:$0xf0]  ;;  %v6049_v56 = vld [vmem:[%s8948_s1 + $0x9f8] sm:$0xf0] }
  0x71   : > { %3140 = vmatpush.bf16.msrb.mxu1 %v5663_v37  ;;  %v4140_v37 = vld [vmem:[%s6228_s13 + $0x58] sm:$0xf0]  ;;  %v5614_v35 = vld [vmem:[%s8948_s1 + $0xa08] sm:$0xf] }
  0x72   : > { %3054 = vmatpush.bf16.msrb.mxu2 %v5363_v29  ;;  %v5639_v29 = vor.u32 %v6058_v27, %v5638_v26  ;;  %v6838_v41 = vor.u32 %v5678_v36, %v4140_v37  ;;  %v5691_v26 = vld [vmem:[%s6228_s13 + $0x8c] sm:$0xf]  ;;  %v4188_v27 = vld [vmem:[%s6228_s13 + $0xc0] sm:$0xf0]  ;;  %v6052_v36 = vld [vmem:[%s8948_s1 + $0xa10] sm:$0xf0] }
  0x73   : > { %3083 = vmatpush.bf16.msrb.mxu3 %v5459_v33  ;;  %3112 = vmatpush.bf16.msrb.mxu0 %v5555_v58  ;;  %v5685_v33 = vld [vmem:[%s6228_s13 + $0x54] sm:$0xf0]  ;;  %v4186_v58 = vld [vmem:[%s6228_s13 + $0x88] sm:$0xf]  ;;  %v5615_v37 = vor.u32 %v6052_v36, %v5614_v35  ;;  %v4252_v35 = vld [vmem:[%s6228_s13 + $0x138] sm:$0xf0] }
  0x74   : > { %v6834_v39 = vor.u32 %v5685_v33, %v4138_v32  ;;  %9004 = vst [vmem:[#allocation4_spill] sm:$0xff] %v6838_v41  ;;  %v6894_v31 = vor.u32 %v5698_v59, %v4186_v58  ;;  %v6896_v32 = vor.u32 %v5699_v22, %v4194_v20  ;;  %v6898_v33 = vor.u32 %v5691_v26, %v4188_v27  ;;  %v683_v58 = vld [vmem:[%s8949_s2] sm:$0x7]  ;;  %v4242_v59 = vld [vmem:[%s6228_s13 + $0xf8] sm:$0xf] }
  0x75   : > { %3141 = vmatpush.bf16.msrb.mxu1 %v5651_v13  ;;  %v5410_v13 = vld [vmem:[%s8948_s1 + $0x870] sm:$0xf]  ;;  %v5494_v20 = vld [vmem:[%s8948_s1 + $0x918] sm:$0xf]  ;;  %v4250_v22 = vld [vmem:[%s6228_s13 + $0x100] sm:$0xf] }
  0x76   : > { %3055 = vmatpush.bf16.msrb.mxu2 %v5351_v53  ;;  %9003 = vst [vmem:[#allocation3_spill] sm:$0xff] %v6834_v39  ;;  %v5423_v53 = vor.u32 %v6004_v50, %v5422_v44  ;;  %v5398_v44 = vld [vmem:[%s8948_s1 + $0x858] sm:$0xf]  ;;  %v5998_v50 = vld [vmem:[%s8948_s1 + $0x860] sm:$0xf0] }
  0x77   : > { %3084 = vmatpush.bf16.msrb.mxu3 %v5447_v57  ;;  %3113 = vmatpush.bf16.msrb.mxu0 %v5543_v28  ;;  %v5314_v57 = vld [vmem:[%s8948_s1 + $0x7b0] sm:$0xf]  ;;  %v5519_v28 = vor.u32 %v6028_v25, %v5518_v19  ;;  %9005 = vst [vmem:[#allocation5_spill] sm:$0xff] %v6896_v32  ;;  %v5995_v19 = vld [vmem:[%s8948_s1 + $0x848] sm:$0xf0] }
  0x78   : > { %v5315_v12 = vor.u32 %v5977_v5, %v5314_v57  ;;  %v5290_v57 = vld [vmem:[%s8948_s1 + $0x780] sm:$0xf]  ;;  %v5603_v5 = vor.u32 %v6049_v56, %v5602_v55  ;;  %v6022_v26 = vld [vmem:[%s8948_s1 + $0x920] sm:$0xf0]  ;;  %v5705_v27 = vld [vmem:[%s6228_s13 + $0xfc] sm:$0xf] }
  0x79   : > { %3142 = vmatpush.bf16.msrb.mxu1 %v5639_v29  ;;  %v5692_v29 = vld [vmem:[%s6228_s13 + $0x94] sm:$0xf]  ;;  %v5590_v36 = vld [vmem:[%s8948_s1 + $0x9d8] sm:$0xf] }
  0x7a   : > { %3056 = vmatpush.bf16.msrb.mxu2 %v5339_v14  ;;  %v6001_v14 = vld [vmem:[%s8948_s1 + $0x878] sm:$0xf0]  ;;  %v6900_v34 = vor.u32 %v5692_v29, %v4196_v30  ;;  %v5706_v29 = vld [vmem:[%s6228_s13 + $0x104] sm:$0xf]  ;;  %v5495_v30 = vor.u32 %v6022_v26, %v5494_v20  ;;  %v4512_v20 = vld [vmem:[%s8948_s1 + $0x174] sm:$0xf0] }
  0x7b   : > { %3085 = vmatpush.bf16.msrb.mxu3 %v5435_v24  ;;  %3114 = vmatpush.bf16.msrb.mxu0 %v5531_v54  ;;  %v5411_v24 = vor.u32 %v6001_v14, %v5410_v13  ;;  %v5507_v54 = vor.u32 %v6025_v52, %v5506_v51  ;;  %v5386_v14 = vld [vmem:[%s8948_s1 + $0x840] sm:$0xf]  ;;  %v6986_v55 = vor.u32 %v5706_v29, %v4252_v35  ;;  %v4298_v35 = vld [vmem:[%s6228_s13 + $0x168] sm:$0xf] }
  0x7c   : > { %9006 = vst [vmem:[#allocation6_spill] sm:$0xff] %v6900_v34  ;;  %v5387_v25 = vor.u32 %v5995_v19, %v5386_v14  ;;  %v5482_v52 = vld [vmem:[%s8948_s1 + $0x900] sm:$0xf]  ;;  %v5775_v14 = vld [vmem:[%s8948_s1 + $0x16c] sm:$0xf] }
  0x7d   : > { %2844 = vmatmul.bf16.gmra.mxu2 %v6764_v46  ;;  %3143 = vmatpush.bf16.msrb.mxu1 %v5627_v60  ;;  %v5712_v60 = vld [vmem:[%s6228_s13 + $0x12c] sm:$0xf0]  ;;  %9010 = vst [vmem:[#allocation10_spill] sm:$0xff] %v6986_v55 }
  0x7e   : > { %2902 = vmatmul.bf16.gmra.mxu0 %v6766_v47  ;;  %3057 = vmatpush.bf16.msrb.mxu2 %v5327_v45  ;;  %v5303_v45 = vor.u32 %v5974_v43, %v5302_v42  ;;  %v6971_v42 = vperm.slane %v683_v58, 0  ;;  %v6973_v43 = vor.u32 %v5712_v60, %v4242_v59  ;;  %v5578_v58 = vld [vmem:[%s8948_s1 + $0x9c0] sm:$0xf]  ;;  %v6043_v59 = vld [vmem:[%s8948_s1 + $0x9c8] sm:$0xf0] }
  0x7f   : > { %3086 = vmatpush.bf16.msrb.mxu3 %v5423_v53  ;;  %3115 = vmatpush.bf16.msrb.mxu0 %v5519_v28  ;;  %v5399_v53 = vor.u32 %v5998_v50, %v5398_v44  ;;  %v4244_v28 = vld [vmem:[%s6228_s13 + $0x130] sm:$0xf0] }
  0x80   : > { %2873 = vmatmul.bf16.gmra.mxu3 %v6768_v48  ;;  %2931 = vmatmul.bf16.gmra.mxu1 %v6770_v49  ;;  %9007 = vst [vmem:[#allocation7_spill] sm:$0xff] %v6973_v43  ;;  %v6977_v51 = vor.u32 %v5705_v27, %v4244_v28 }
  0x81   : > { %3144 = vmatpush.bf16.msrb.mxu1 %v5615_v37  ;;  %v6046_v37 = vld [vmem:[%s8948_s1 + $0x9e0] sm:$0xf0] }
  0x82   : > { %3058 = vmatpush.bf16.msrb.mxu2 %v5315_v12  ;;  %v5971_v12 = vld [vmem:[%s8948_s1 + $0x788] sm:$0xf0]  ;;  %9009 = vst [vmem:[#allocation9_spill] sm:$0xff] %v6977_v51 }
  0x83   : > { %3087 = vmatpush.bf16.msrb.mxu3 %v5411_v24  ;;  %3116 = vmatpush.bf16.msrb.mxu0 %v5507_v54  ;;  %v5291_v13 = vor.u32 %v5971_v12, %v5290_v57  ;;  %v5713_v24 = vld [vmem:[%s6228_s13 + $0x134] sm:$0xf0]  ;;  %v5751_v12 = vld [vmem:[%s8948_s1 + $0xac] sm:$0xf] }
  0x84   : > { %v6975_v44 = vor.u32 %v5713_v24, %v4250_v22  ;;  %v4515_v24 = vor.u32 %v5775_v14, %v4512_v20  ;;  %v5720_v20 = vld [vmem:[%s6228_s13 + $0x174] sm:$0xf] }
  0x85   : > { %3145 = vmatpush.bf16.msrb.mxu1 %v5603_v5  ;;  %v5579_v5 = vor.u32 %v6043_v59, %v5578_v58  ;;  %v5799_v58 = vld [vmem:[%s8948_s1 + $0x22c] sm:$0xf]  ;;  %v4608_v59 = vld [vmem:[%s8948_s1 + $0x234] sm:$0xf0] }
  0x86   : > { %3059 = vmatpush.bf16.msrb.mxu2 %v5303_v45  ;;  %9008 = vst [vmem:[#allocation8_spill] sm:$0xff] %v6975_v44  ;;  %v5591_v45 = vor.u32 %v6046_v37, %v5590_v36  ;;  %v5726_v36 = vld [vmem:[%s6228_s13 + $0x19c] sm:$0xf0]  ;;  %v4306_v37 = vld [vmem:[%s6228_s13 + $0x170] sm:$0xf]  ;;  %v4611_v14 = vor.u32 %v5799_v58, %v4608_v59 }
  0x87   : > { %3088 = vmatpush.bf16.msrb.mxu3 %v5399_v53  ;;  %3117 = vmatpush.bf16.msrb.mxu0 %v5495_v30  ;;  %v6019_v53 = vld [vmem:[%s8948_s1 + $0x908] sm:$0xf0]  ;;  %v4392_v58 = vld [vmem:[%s8948_s1 + $0x84] sm:$0xf0] }
  0x88   : > { %v5483_v56 = vor.u32 %v6019_v53, %v5482_v52  ;;  %v5748_v52 = vld [vmem:[%s8948_s1 + $0x94] sm:$0xf]  ;;  %v4404_v53 = vld [vmem:[%s8948_s1 + $0x9c] sm:$0xf0] }
  0x89   : > { %3146 = vmatpush.bf16.msrb.mxu1 %v5591_v45  ;;  %v5727_v45 = vld [vmem:[%s6228_s13 + $0x1a4] sm:$0xf0] }
  0x8a   : > { %3060 = vmatpush.bf16.msrb.mxu2 %v5291_v13  ;;  %v4416_v13 = vld [vmem:[%s8948_s1 + $0xb4] sm:$0xf0] }
  0x8b   : > { %3089 = vmatpush.bf16.msrb.mxu3 %v5387_v25  ;;  %3118 = vmatpush.bf16.msrb.mxu0 %v5483_v56  ;;  %v4419_v19 = vor.u32 %v5751_v12, %v4416_v13  ;;  %v4407_v56 = vor.u32 %v5748_v52, %v4404_v53  ;;  %v4300_v12 = vld [vmem:[%s6228_s13 + $0x1a0] sm:$0xf0] }
  0x8d   : > { %2945 = vmatmul.bf16.vlgmr.msra.gmra.mxu2 %v6832_v38  ;;  %3147 = vmatpush.bf16.msrb.mxu1 %v5579_v5  ;;  %v5719_v5 = vld [vmem:[%s6228_s13 + $0x16c] sm:$0xf] }
  0x8e   : > { %3003 = vmatmul.bf16.vlgmr.msra.gmra.mxu0 %v6834_v39  ;;  %3169 = vmatpush.bf16.msra.mxu2 %v4419_v19 }
  0x8f   : > { %3227 = vmatpush.bf16.msra.mxu0 %v4611_v14 }
  0x90   : > { %2974 = vmatmul.bf16.vlgmr.msra.gmra.mxu3 %v6836_v40  ;;  %3032 = vmatmul.bf16.vlgmr.msra.gmra.mxu1 %v6838_v41 }
  0x91   : > { %3198 = vmatpush.bf16.msra.mxu3 %v4515_v24 }
  0x92   : > { %3170 = vmatpush.bf16.msra.mxu2 %v4407_v56 }
  0x9d   : > { %2950 = vmatmul.bf16.gmra.mxu2 %v6894_v31 }
  0x9e   : > { %3008 = vmatmul.bf16.gmra.mxu0 %v6896_v32 }
  0xa0   : > { %2979 = vmatmul.bf16.gmra.mxu3 %v6898_v33  ;;  %3037 = vmatmul.bf16.gmra.mxu1 %v6900_v34 }
  0xaa   : > { %v2772_v50 = vpop.f32.mrf.mxu0 }
  0xab   : > { %v2773_v54 = vadd.f32 %v2772_v50, %v6971_v42 }
  0xad   : > { %v2801_v57 = vpop.f32.mrf.mxu1  ;;  %2955 = vmatmul.bf16.gmra.mxu2 %v6973_v43 }
  0xae   : > { %v6995_v60 = vadd.f32 %v2801_v57, %v2773_v54  ;;  %3013 = vmatmul.bf16.gmra.mxu0 %v6975_v44  ;;  %v5772_v54 = vld [vmem:[%s8948_s1 + $0x154] sm:$0xf]  ;;  %v4500_v57 = vld [vmem:[%s8948_s1 + $0x15c] sm:$0xf0] }
  0xaf   : > { %v4503_v13 = vor.u32 %v5772_v54, %v4500_v57 }
  0xb0   : > { %2984 = vmatmul.bf16.gmra.mxu3 %v6977_v51  ;;  %3042 = vmatmul.bf16.gmra.mxu1 %v6986_v55  ;;  %v2782_v22 = vpop.f32.mrf.mxu2 }
  0xb1   : > { %v2783_v25 = vadd.f32 %v2782_v22, %v6971_v42  ;;  %v2811_v26 = vpop.f32.mrf.mxu3  ;;  %v4308_v22 = vld [vmem:[%s6228_s13 + $0x1a8] sm:$0xf0]  ;;  %3199 = vmatpush.bf16.msra.mxu3 %v4503_v13  ;;  %v5796_v13 = vld [vmem:[%s8948_s1 + $0x214] sm:$0xf] }
  0xb2   : > { %v2774_v27 = vpop.f32.mrf.mxu0  ;;  %v7054_v54 = vor.u32 %v5720_v20, %v4308_v22  ;;  %v4596_v20 = vld [vmem:[%s8948_s1 + $0x21c] sm:$0xf0] }
  0xb3   : > { %v7013_v28 = vadd.f32 %v2811_v26, %v2783_v25  ;;  %v2775_v29 = vadd.f32 %v2774_v27, %v6971_v42  ;;  %v7045_v26 = vor.u32 %v5726_v36, %v4298_v35  ;;  %v7047_v27 = vor.u32 %v5727_v45, %v4306_v37  ;;  %v5823_v35 = vld [vmem:[%s8948_s1 + $0x2ec] sm:$0xf]  ;;  %v4704_v36 = vld [vmem:[%s8948_s1 + $0x2f4] sm:$0xf0]  ;;  %v5745_v45 = vld [vmem:[%s8948_s1 + $0x7c] sm:$0xf] }
  0xb4   : > { %9014 = vst [vmem:[#allocation14_spill] sm:$0xff] %v7054_v54  ;;  %v4707_v37 = vor.u32 %v5823_v35, %v4704_v36  ;;  %v4395_v59 = vor.u32 %v5745_v45, %v4392_v58  ;;  %v4146_v36 = vld [vmem:[%s6228_s13 + $0x28] sm:$0xf]  ;;  %v4154_v45 = vld [vmem:[%s6228_s13 + $0x30] sm:$0xf] }
  0xb5   : > { %v2803_v30 = vpop.f32.mrf.mxu1  ;;  %9011 = vst [vmem:[#allocation11_spill] sm:$0xff] %v7045_v26  ;;  %v5687_v58 = vld [vmem:[%s6228_s13 + $0x64] sm:$0xf0] }
  0xb6   : > { %v7020_v50 = vadd.f32 %v2803_v30, %v2775_v29  ;;  %9012 = vst [vmem:[#allocation12_spill] sm:$0xff] %v7047_v27  ;;  %v7049_v30 = vor.u32 %v5719_v5, %v4300_v12  ;;  %v5769_v5 = vld [vmem:[%s8948_s1 + $0x13c] sm:$0xf]  ;;  %v4488_v12 = vld [vmem:[%s8948_s1 + $0x144] sm:$0xf0]  ;;  %3256 = vmatpush.bf16.msra.mxu1 %v4707_v37  ;;  %3171 = vmatpush.bf16.msra.mxu2 %v4395_v59 }
  0xb7   : > { %v5686_v37 = vld [vmem:[%s6228_s13 + $0x5c] sm:$0xf0]  ;;  %v5820_v59 = vld [vmem:[%s8948_s1 + $0x2d4] sm:$0xf] }
  0xb8   : > { %v2784_v19 = vpop.f32.mrf.mxu2  ;;  %9013 = vst [vmem:[#allocation13_spill] sm:$0xff] %v7049_v30  ;;  %v7125_v32 = vor.u32 %v5686_v37, %v4146_v36  ;;  %v4680_v36 = vld [vmem:[%s8948_s1 + $0x2c4] sm:$0xf0]  ;;  %v4464_v37 = vld [vmem:[%s8948_s1 + $0x114] sm:$0xf0] }
  0xb9   : > { %v2785_v24 = vadd.f32 %v2784_v19, %v6971_v42  ;;  %v2813_v25 = vpop.f32.mrf.mxu3  ;;  %v4491_v19 = vor.u32 %v5769_v5, %v4488_v12  ;;  %v5679_v12 = vld [vmem:[%s6228_s13 + $0x2c] sm:$0xf] }
  0xba   : > { %9015 = vst [vmem:[#allocation15_spill] sm:$0xff] %v7125_v32 }
  0xbb   : > { %v2777_v29 = vpop.f32.mrf.mxu0  ;;  %v7051_v52 = vadd.f32 %v2813_v25, %v2785_v24  ;;  %v4599_v25 = vor.u32 %v5796_v13, %v4596_v20  ;;  %3200 = vmatpush.bf16.msra.mxu3 %v4491_v19  ;;  %v4692_v13 = vld [vmem:[%s8948_s1 + $0x2dc] sm:$0xf0]  ;;  %v4380_v20 = vld [vmem:[%s8948_s1 + $0x6c] sm:$0xf0] }
  0xbc   : > { %v2778_v53 = vadd.f32 %v2777_v29, %v6971_v42  ;;  %v4695_v19 = vor.u32 %v5820_v59, %v4692_v13  ;;  %v4584_v59 = vld [vmem:[%s8948_s1 + $0x204] sm:$0xf0] }
  0xbd   : > { %v2806_v57 = vpop.f32.mrf.mxu1  ;;  %2960 = vmatmul.bf16.gmra.mxu2 %v7045_v26  ;;  %3228 = vmatpush.bf16.msra.mxu0 %v4599_v25  ;;  %v4148_v25 = vld [vmem:[%s6228_s13 + $0x60] sm:$0xf0] }
  0xbe   : > { %v7057_v56 = vadd.f32 %v2806_v57, %v2778_v53  ;;  %3018 = vmatmul.bf16.gmra.mxu0 %v7047_v27  ;;  %v4156_v27 = vld [vmem:[%s6228_s13 + $0x68] sm:$0xf0]  ;;  %3257 = vmatpush.bf16.msra.mxu1 %v4695_v19  ;;  %v4572_v19 = vld [vmem:[%s8948_s1 + $0x1ec] sm:$0xf0] }
  0xc0   : > { %2989 = vmatmul.bf16.gmra.mxu3 %v7049_v30  ;;  %3047 = vmatmul.bf16.gmra.mxu1 %v7054_v54  ;;  %v2787_v14 = vpop.f32.mrf.mxu2  ;;  %v5680_v54 = vld [vmem:[%s6228_s13 + $0x34] sm:$0xf] }
  0xc1   : > { %v2788_v22 = vadd.f32 %v2787_v14, %v6971_v42  ;;  %v5742_v14 = vld [vmem:[%s8948_s1 + $0x64] sm:$0xf]  ;;  %v7133_v41 = vor.u32 %v5680_v54, %v4156_v27  ;;  %v5763_v54 = vld [vmem:[%s8948_s1 + $0x10c] sm:$0xf] }
  0xc3   : > { %v2816_v24 = vpop.f32.mrf.mxu3  ;;  %v2779_v29 = vpop.f32.mrf.mxu0  ;;  %9018 = vst [vmem:[#allocation18_spill] sm:$0xff] %v7133_v41 }
  0xc4   : > { %v7087_v53 = vadd.f32 %v2816_v24, %v2788_v22  ;;  %v2780_v57 = vadd.f32 %v2779_v29, %v6971_v42  ;;  %v5766_v22 = vld [vmem:[%s8948_s1 + $0x124] sm:$0xf]  ;;  %v4476_v24 = vld [vmem:[%s8948_s1 + $0x12c] sm:$0xf0]  ;;  %v4383_v29 = vor.u32 %v5742_v14, %v4380_v20  ;;  %v7127_v14 = vor.u32 %v5687_v58, %v4154_v45 }
  0xc5   : > { %v2808_v35 = vpop.f32.mrf.mxu1  ;;  %v5790_v45 = vld [vmem:[%s8948_s1 + $0x1e4] sm:$0xf] }
  0xc6   : > { %v7094_v5 = vadd.f32 %v2808_v35, %v2780_v57  ;;  %v4479_v57 = vor.u32 %v5766_v22, %v4476_v24  ;;  %v5793_v35 = vld [vmem:[%s8948_s1 + $0x1fc] sm:$0xf]  ;;  %9016 = vst [vmem:[#allocation16_spill] sm:$0xff] %v7127_v14  ;;  %3172 = vmatpush.bf16.msra.mxu2 %v4383_v29  ;;  %v7129_v22 = vor.u32 %v5679_v12, %v4148_v25 }
  0xc7   : > { %v4587_v55 = vor.u32 %v5793_v35, %v4584_v59  ;;  %v4467_v12 = vor.u32 %v5763_v54, %v4464_v37  ;;  %v5693_v54 = vld [vmem:[%s6228_s13 + $0x9c] sm:$0xf]  ;;  %v5736_v37 = vld [vmem:[%s8948_s1 + $0x34] sm:$0xf] }
  0xc8   : > { %v2789_v13 = vpop.f32.mrf.mxu2  ;;  %3201 = vmatpush.bf16.msra.mxu3 %v4479_v57  ;;  %9017 = vst [vmem:[#allocation17_spill] sm:$0xff] %v7129_v22  ;;  %v4575_v57 = vor.u32 %v5790_v45, %v4572_v19  ;;  %v4204_v19 = vld [vmem:[%s6228_s13 + $0xd0] sm:$0xf0] }
  0xc9   : > { %v2790_v44 = vadd.f32 %v2789_v13, %v6971_v42  ;;  %3229 = vmatpush.bf16.msra.mxu0 %v4587_v55  ;;  %v5817_v42 = vld [vmem:[%s8948_s1 + $0x2bc] sm:$0xf] }
  0xca   : > { %v4683_v55 = vor.u32 %v5817_v42, %v4680_v36  ;;  %v4202_v42 = vld [vmem:[%s6228_s13 + $0x98] sm:$0xf]  ;;  %v5700_v36 = vld [vmem:[%s6228_s13 + $0xcc] sm:$0xf0] }
  0xcb   : > { %v2818_v34 = vpop.f32.mrf.mxu3  ;;  %v2888_v20 = vpop.f32.mrf.mxu0 }
  0xcc   : > { %v7131_v24 = vadd.f32 %v2818_v34, %v2790_v44  ;;  %v5739_v34 = vld [vmem:[%s8948_s1 + $0x4c] sm:$0xf]  ;;  %v4368_v44 = vld [vmem:[%s8948_s1 + $0x54] sm:$0xf0]  ;;  %3258 = vmatpush.bf16.msra.mxu1 %v4683_v55  ;;  %3202 = vmatpush.bf16.msra.mxu3 %v4467_v12  ;;  %v4210_v55 = vld [vmem:[%s6228_s13 + $0xa0] sm:$0xf] }
  0xcd   : > { %v2917_v39 = vpop.f32.mrf.mxu1  ;;  %3061 = vmatmul.bf16.vlgmr.msrb.gmra.mxu2 %v7125_v32  ;;  %v4371_v27 = vor.u32 %v5739_v34, %v4368_v44  ;;  %3230 = vmatpush.bf16.msra.mxu0 %v4575_v57  ;;  %v5701_v34 = vld [vmem:[%s6228_s13 + $0xd4] sm:$0xf0]  ;;  %v4452_v12 = vld [vmem:[%s8948_s1 + $0xfc] sm:$0xf0]  ;;  %v5787_v57 = vld [vmem:[%s8948_s1 + $0x1cc] sm:$0xf] }
  0xce   : > { %3119 = vmatmul.bf16.vlgmr.msrb.gmra.mxu0 %v7127_v14  ;;  %v4212_v14 = vld [vmem:[%s6228_s13 + $0xd8] sm:$0xf0] }
  0xcf   : > { %3173 = vmatpush.bf16.msra.mxu2 %v4371_v27  ;;  %v4668_v27 = vld [vmem:[%s8948_s1 + $0x2ac] sm:$0xf0] }
  0xd0   : > { %3090 = vmatmul.bf16.vlgmr.msrb.gmra.mxu3 %v7129_v22  ;;  %3148 = vmatmul.bf16.vlgmr.msrb.gmra.mxu1 %v7133_v41  ;;  %v2830_v58 = vpop.f32.mrf.mxu2  ;;  %v5694_v41 = vld [vmem:[%s6228_s13 + $0xa4] sm:$0xf] }
  0xd1   : > { %v2831_v25 = vadd.f32 %v2830_v58, %v6995_v60  ;;  %v5814_v60 = vld [vmem:[%s8948_s1 + $0x2a4] sm:$0xf]  ;;  %v5760_v58 = vld [vmem:[%s8948_s1 + $0xf4] sm:$0xf] }
  0xd2   : > { %v4671_v45 = vor.u32 %v5814_v60, %v4668_v27 }
  0xd3   : > { %v2859_v29 = vpop.f32.mrf.mxu3  ;;  %v2890_v35 = vpop.f32.mrf.mxu0 }
  0xd4   : > { %v2860_v59 = vadd.f32 %v2859_v29, %v2831_v25  ;;  %v4455_v29 = vor.u32 %v5760_v58, %v4452_v12  ;;  %3259 = vmatpush.bf16.msra.mxu1 %v4671_v45  ;;  %v7203_v12 = vor.u32 %v5693_v54, %v4204_v19  ;;  %v4548_v45 = vld [vmem:[%s8948_s1 + $0x1bc] sm:$0xf0] }
  0xd5   : > { %v2919_v13 = vpop.f32.mrf.mxu1 }
  0xd6   : > { %v2889_v44 = vadd.f32 %v2888_v20, %v2860_v59  ;;  %v4356_v20 = vld [vmem:[%s8948_s1 + $0x3c] sm:$0xf0]  ;;  %v4560_v59 = vld [vmem:[%s8948_s1 + $0x1d4] sm:$0xf0]  ;;  %3203 = vmatpush.bf16.msra.mxu3 %v4455_v29  ;;  %9021 = vst [vmem:[#allocation21_spill] sm:$0xff] %v7203_v12 }
  0xd7   : > { %v4359_v25 = vor.u32 %v5736_v37, %v4356_v20  ;;  %v4563_v22 = vor.u32 %v5787_v57, %v4560_v59  ;;  %v7199_v37 = vor.u32 %v5700_v36, %v4202_v42  ;;  %v7201_v20 = vor.u32 %v5701_v34, %v4210_v55  ;;  %v4656_v42 = vld [vmem:[%s8948_s1 + $0x294] sm:$0xf0]  ;;  %v5784_v36 = vld [vmem:[%s8948_s1 + $0x1b4] sm:$0xf] }
  0xd8   : > { %v7194_v60 = vadd.f32 %v2917_v39, %v2889_v44  ;;  %v2832_v27 = vpop.f32.mrf.mxu2  ;;  %v7205_v44 = vor.u32 %v5694_v41, %v4212_v14  ;;  %v5733_v41 = vld [vmem:[%s8948_s1 + $0x1c] sm:$0xf]  ;;  %v4551_v29 = vor.u32 %v5784_v36, %v4548_v45  ;;  %v4428_v36 = vld [vmem:[%s8948_s1 + $0xcc] sm:$0xf0]  ;;  %v4260_v45 = vld [vmem:[%s6228_s13 + $0x140] sm:$0xf0] }
  0xd9   : > { %v2833_v32 = vadd.f32 %v2832_v27, %v7020_v50  ;;  %9019 = vst [vmem:[#allocation19_spill] sm:$0xff] %v7199_v37  ;;  %3174 = vmatpush.bf16.msra.mxu2 %v4359_v25  ;;  %3231 = vmatpush.bf16.msra.mxu0 %v4563_v22  ;;  %v5811_v50 = vld [vmem:[%s8948_s1 + $0x28c] sm:$0xf]  ;;  %v5757_v14 = vld [vmem:[%s8948_s1 + $0xdc] sm:$0xf] }
  0xda   : > { %9020 = vst [vmem:[#allocation20_spill] sm:$0xff] %v7201_v20  ;;  %v4659_v22 = vor.u32 %v5811_v50, %v4656_v42  ;;  %v4258_v27 = vld [vmem:[%s6228_s13 + $0x108] sm:$0xf]  ;;  %v5808_v42 = vld [vmem:[%s8948_s1 + $0x274] sm:$0xf] }
  0xdb   : > { %v2861_v30 = vpop.f32.mrf.mxu3  ;;  %v2893_v58 = vpop.f32.mrf.mxu0  ;;  %9022 = vst [vmem:[#allocation22_spill] sm:$0xff] %v7205_v44  ;;  %v5715_v50 = vld [vmem:[%s6228_s13 + $0x144] sm:$0xf0] }
  0xdc   : > { %v2862_v39 = vadd.f32 %v2861_v30, %v2833_v32  ;;  %v4344_v32 = vld [vmem:[%s8948_s1 + $0x24] sm:$0xf0]  ;;  %3260 = vmatpush.bf16.msra.mxu1 %v4659_v22 }
  0xdd   : > { %v2922_v49 = vpop.f32.mrf.mxu1  ;;  %3066 = vmatmul.bf16.gmra.mxu2 %v7199_v37  ;;  %v4347_v30 = vor.u32 %v5733_v41, %v4344_v32  ;;  %3232 = vmatpush.bf16.msra.mxu0 %v4551_v29  ;;  %v5730_v32 = vld [vmem:[%s8948_s1 + $0x4] sm:$0xf] }
  0xde   : > { %v2891_v26 = vadd.f32 %v2890_v35, %v2862_v39  ;;  %3124 = vmatmul.bf16.gmra.mxu0 %v7201_v20  ;;  %v4440_v35 = vld [vmem:[%s8948_s1 + $0xe4] sm:$0xf0]  ;;  %v4266_v39 = vld [vmem:[%s6228_s13 + $0x110] sm:$0xf] }
  0xdf   : > { %v4443_v54 = vor.u32 %v5757_v14, %v4440_v35  ;;  %3175 = vmatpush.bf16.msra.mxu2 %v4347_v30  ;;  %v4332_v30 = vld [vmem:[%s8948_s1 + $0xc] sm:$0xf0]  ;;  %v5754_v14 = vld [vmem:[%s8948_s1 + $0xc4] sm:$0xf] }
  0xe0   : > { %3095 = vmatmul.bf16.gmra.mxu3 %v7203_v12  ;;  %3153 = vmatmul.bf16.gmra.mxu1 %v7205_v44  ;;  %v7232_v55 = vadd.f32 %v2919_v13, %v2891_v26  ;;  %v2835_v34 = vpop.f32.mrf.mxu2  ;;  %v5714_v26 = vld [vmem:[%s6228_s13 + $0x13c] sm:$0xf0]  ;;  %v4335_v35 = vor.u32 %v5730_v32, %v4332_v30  ;;  %v4268_v32 = vld [vmem:[%s6228_s13 + $0x148] sm:$0xf0]  ;;  %v5805_v30 = vld [vmem:[%s8948_s1 + $0x25c] sm:$0xf] }
  0xe1   : > { %v2836_v19 = vadd.f32 %v2835_v34, %v7057_v56  ;;  %3204 = vmatpush.bf16.msra.mxu3 %v4443_v54  ;;  %v4644_v56 = vld [vmem:[%s8948_s1 + $0x27c] sm:$0xf0]  ;;  %v4536_v34 = vld [vmem:[%s8948_s1 + $0x1a4] sm:$0xf0]  ;;  %v5707_v54 = vld [vmem:[%s6228_s13 + $0x10c] sm:$0xf] }
  0xe2   : > { %v4647_v41 = vor.u32 %v5808_v42, %v4644_v56  ;;  %v7271_v56 = vor.u32 %v5714_v26, %v4258_v27  ;;  %v4632_v44 = vld [vmem:[%s8948_s1 + $0x264] sm:$0xf0]  ;;  %v7283_v26 = vor.u32 %v5707_v54, %v4260_v45  ;;  %v4800_v45 = vld [vmem:[%s8948_s1 + $0x3b4] sm:$0xf0] }
  0xe3   : > { %v2864_v25 = vpop.f32.mrf.mxu3  ;;  %v2895_v57 = vpop.f32.mrf.mxu0  ;;  %3176 = vmatpush.bf16.msra.mxu2 %v4335_v35  ;;  %v4524_v35 = vld [vmem:[%s8948_s1 + $0x18c] sm:$0xf0] }
  0xe4   : > { %v2865_v59 = vadd.f32 %v2864_v25, %v2836_v19  ;;  %v5708_v19 = vld [vmem:[%s6228_s13 + $0x114] sm:$0xf]  ;;  %3261 = vmatpush.bf16.msra.mxu1 %v4647_v41  ;;  %v4431_v25 = vor.u32 %v5754_v14, %v4428_v36  ;;  %9023 = vst [vmem:[#allocation23_spill] sm:$0xff] %v7271_v56  ;;  %v7281_v14 = vor.u32 %v5715_v50, %v4266_v39  ;;  %v4620_v50 = vld [vmem:[%s8948_s1 + $0x24c] sm:$0xf0] }
  0xe5   : > { %v2924_v13 = vpop.f32.mrf.mxu1  ;;  %9025 = vst [vmem:[#allocation25_spill] sm:$0xff] %v7283_v26 }
  0xe6   : > { %v2894_v22 = vadd.f32 %v2893_v58, %v2865_v59  ;;  %v5781_v58 = vld [vmem:[%s8948_s1 + $0x19c] sm:$0xf]  ;;  %9024 = vst [vmem:[#allocation24_spill] sm:$0xff] %v7281_v14  ;;  %3205 = vmatpush.bf16.msra.mxu3 %v4431_v25  ;;  %v4896_v25 = vld [vmem:[%s8948_s1 + $0x474] sm:$0xf0] }
  0xe7   : > { %v4539_v29 = vor.u32 %v5781_v58, %v4536_v34  ;;  %v7291_v58 = vor.u32 %v5708_v19, %v4268_v32 }
  0xe8   : > { %v7269_v59 = vadd.f32 %v2922_v49, %v2894_v22  ;;  %v2837_v42 = vpop.f32.mrf.mxu2  ;;  %v4635_v49 = vor.u32 %v5805_v30, %v4632_v44  ;;  %v5778_v22 = vld [vmem:[%s8948_s1 + $0x184] sm:$0xf] }
  0xe9   : > { %v2838_v20 = vadd.f32 %v2837_v42, %v7094_v5  ;;  %3233 = vmatpush.bf16.msra.mxu0 %v4539_v29  ;;  %9026 = vst [vmem:[#allocation26_spill] sm:$0xff] %v7291_v58  ;;  %v4527_v5 = vor.u32 %v5778_v22, %v4524_v35  ;;  %v5802_v44 = vld [vmem:[%s8948_s1 + $0x244] sm:$0xf] }
  0xea   : > { %3262 = vmatpush.bf16.msra.mxu1 %v4635_v49  ;;  %v4623_v54 = vor.u32 %v5802_v44, %v4620_v50  ;;  %v4322_v44 = vld [vmem:[%s6228_s13 + $0x180] sm:$0xf]  ;;  %v5729_v50 = vld [vmem:[%s6228_s13 + $0x1b4] sm:$0xf0] }
  0xeb   : > { %v2866_v41 = vpop.f32.mrf.mxu3  ;;  %v2898_v27 = vpop.f32.mrf.mxu0 }
  0xec   : > { %v2867_v36 = vadd.f32 %v2866_v41, %v2838_v20  ;;  %v5847_v20 = vld [vmem:[%s8948_s1 + $0x3ac] sm:$0xf] }
  0xed   : > { %v2927_v39 = vpop.f32.mrf.mxu1  ;;  %3071 = vmatmul.bf16.gmra.mxu2 %v7271_v56  ;;  %3234 = vmatpush.bf16.msra.mxu0 %v4527_v5  ;;  %v4803_v19 = vor.u32 %v5847_v20, %v4800_v45  ;;  %v5728_v5 = vld [vmem:[%s6228_s13 + $0x1ac] sm:$0xf0]  ;;  %v4884_v45 = vld [vmem:[%s8948_s1 + $0x45c] sm:$0xf0] }
  0xee   : > { %v2896_v34 = vadd.f32 %v2895_v57, %v2867_v36  ;;  %3129 = vmatmul.bf16.gmra.mxu0 %v7281_v14  ;;  %v5871_v57 = vld [vmem:[%s8948_s1 + $0x46c] sm:$0xf]  ;;  %3263 = vmatpush.bf16.msra.mxu1 %v4623_v54  ;;  %v4314_v36 = vld [vmem:[%s6228_s13 + $0x178] sm:$0xf]  ;;  %v5868_v54 = vld [vmem:[%s8948_s1 + $0x454] sm:$0xf] }
  0xef   : > { %v4899_v32 = vor.u32 %v5871_v57, %v4896_v25  ;;  %3285 = vmatpush.bf16.msrb.mxu2 %v4803_v19  ;;  %v4992_v57 = vld [vmem:[%s8948_s1 + $0x534] sm:$0xf0]  ;;  %v5721_v19 = vld [vmem:[%s6228_s13 + $0x17c] sm:$0xf]  ;;  %v4316_v25 = vld [vmem:[%s6228_s13 + $0x1b0] sm:$0xf0]  ;;  %v7347_v14 = vor.u32 %v5728_v5, %v4314_v36 }
  0xf0   : > { %3100 = vmatmul.bf16.gmra.mxu3 %v7283_v26  ;;  %3158 = vmatmul.bf16.gmra.mxu1 %v7291_v58  ;;  %v7315_v29 = vadd.f32 %v2924_v13, %v2896_v34  ;;  %v2840_v42 = vpop.f32.mrf.mxu2  ;;  %v5844_v34 = vld [vmem:[%s8948_s1 + $0x394] sm:$0xf]  ;;  %v7349_v26 = vor.u32 %v5729_v50, %v4322_v44  ;;  %v7351_v12 = vor.u32 %v5721_v19, %v4316_v25  ;;  %v5088_v36 = vld [vmem:[%s8948_s1 + $0x5f4] sm:$0xf0]  ;;  %v5865_v44 = vld [vmem:[%s8948_s1 + $0x43c] sm:$0xf] }
  0xf1   : > { %v2841_v30 = vadd.f32 %v2840_v42, %v7013_v28  ;;  %3314 = vmatpush.bf16.msrb.mxu3 %v4899_v32  ;;  %v4788_v28 = vld [vmem:[%s8948_s1 + $0x39c] sm:$0xf0]  ;;  %v4887_v42 = vor.u32 %v5868_v54, %v4884_v45  ;;  %9027 = vst [vmem:[#allocation27_spill] sm:$0xff] %v7347_v14 }
  0xf2   : > { %v4791_v20 = vor.u32 %v5844_v34, %v4788_v28  ;;  %v4324_v34 = vld [vmem:[%s6228_s13 + $0x1b8] sm:$0xf0]  ;;  %9028 = vst [vmem:[#allocation28_spill] sm:$0xff] %v7349_v26 }
  0xf3   : > { %v2869_v41 = vpop.f32.mrf.mxu3  ;;  %v2900_v49 = vpop.f32.mrf.mxu0  ;;  %9029 = vst [vmem:[#allocation29_spill] sm:$0xff] %v7351_v12 }
  0xf4   : > { %v2870_v22 = vadd.f32 %v2869_v41, %v2841_v30  ;;  %3286 = vmatpush.bf16.msrb.mxu2 %v4791_v20  ;;  %v4872_v20 = vld [vmem:[%s8948_s1 + $0x444] sm:$0xf0] }
  0xf5   : > { %v2929_v35 = vpop.f32.mrf.mxu1  ;;  %3315 = vmatpush.bf16.msrb.mxu3 %v4887_v42  ;;  %v4875_v42 = vor.u32 %v5865_v44, %v4872_v20  ;;  %v4968_v20 = vld [vmem:[%s8948_s1 + $0x504] sm:$0xf0] }
  0xf6   : > { %v2899_v13 = vadd.f32 %v2898_v27, %v2870_v22  ;;  %v5895_v27 = vld [vmem:[%s8948_s1 + $0x52c] sm:$0xf]  ;;  %v5722_v22 = vld [vmem:[%s6228_s13 + $0x184] sm:$0xf] }
  0xf7   : > { %v4995_v32 = vor.u32 %v5895_v27, %v4992_v57  ;;  %v7353_v45 = vor.u32 %v5722_v22, %v4324_v34  ;;  %v5892_v27 = vld [vmem:[%s8948_s1 + $0x514] sm:$0xf]  ;;  %v4980_v57 = vld [vmem:[%s8948_s1 + $0x51c] sm:$0xf0] }
  0xf8   : > { %v7342_v30 = vadd.f32 %v2927_v39, %v2899_v13  ;;  %v2842_v41 = vpop.f32.mrf.mxu2 }
  0xf9   : > { %v2843_v28 = vadd.f32 %v2842_v41, %v7051_v52  ;;  %3343 = vmatpush.bf16.msrb.mxu0 %v4995_v32  ;;  %9030 = vst [vmem:[#allocation30_spill] sm:$0xff] %v7353_v45  ;;  %v5919_v52 = vld [vmem:[%s8948_s1 + $0x5ec] sm:$0xf]  ;;  %v4983_v32 = vor.u32 %v5892_v27, %v4980_v57  ;;  %3316 = vmatpush.bf16.msrb.mxu3 %v4875_v42 }
  0xfa   : > { %v5091_v5 = vor.u32 %v5919_v52, %v5088_v36  ;;  %v5916_v36 = vld [vmem:[%s8948_s1 + $0x5d4] sm:$0xf] }
  0xfb   : > { %v2871_v58 = vpop.f32.mrf.mxu3  ;;  %v2903_v56 = vpop.f32.mrf.mxu0 }
  0xfc   : > { %v2872_v54 = vadd.f32 %v2871_v58, %v2843_v28  ;;  %v5841_v58 = vld [vmem:[%s8948_s1 + $0x37c] sm:$0xf]  ;;  %3372 = vmatpush.bf16.msrb.mxu1 %v5091_v5  ;;  %v4764_v5 = vld [vmem:[%s8948_s1 + $0x36c] sm:$0xf0] }
  0xfd   : > { %v2932_v39 = vpop.f32.mrf.mxu1  ;;  %3076 = vmatmul.bf16.gmra.mxu2 %v7347_v14  ;;  %3344 = vmatpush.bf16.msrb.mxu0 %v4983_v32 }
  0xfe   : > { %v2901_v13 = vadd.f32 %v2900_v49, %v2872_v54  ;;  %3134 = vmatmul.bf16.gmra.mxu0 %v7349_v26  ;;  %v4776_v49 = vld [vmem:[%s8948_s1 + $0x384] sm:$0xf0] }
  0xff   : > { %v4779_v50 = vor.u32 %v5841_v58, %v4776_v49  ;;  %v4860_v58 = vld [vmem:[%s8948_s1 + $0x42c] sm:$0xf0] }
 0x100   : > { %3105 = vmatmul.bf16.gmra.mxu3 %v7351_v12  ;;  %3163 = vmatmul.bf16.gmra.mxu1 %v7353_v45  ;;  %v7383_v19 = vadd.f32 %v2929_v35, %v2901_v13  ;;  %v2845_v25 = vpop.f32.mrf.mxu2  ;;  %v5076_v35 = vld [vmem:[%s8948_s1 + $0x5dc] sm:$0xf0] }
 0x101   : > { %v2846_v41 = vadd.f32 %v2845_v25, %v7087_v53  ;;  %3287 = vmatpush.bf16.msrb.mxu2 %v4779_v50  ;;  %v5838_v53 = vld [vmem:[%s8948_s1 + $0x364] sm:$0xf]  ;;  %v5079_v13 = vor.u32 %v5916_v36, %v5076_v35  ;;  %v5889_v50 = vld [vmem:[%s8948_s1 + $0x4fc] sm:$0xf]  ;;  %v5835_v35 = vld [vmem:[%s8948_s1 + $0x34c] sm:$0xf] }
 0x102   : > { %v4767_v49 = vor.u32 %v5838_v53, %v4764_v5  ;;  %v4971_v25 = vor.u32 %v5889_v50, %v4968_v20  ;;  %v5859_v53 = vld [vmem:[%s8948_s1 + $0x40c] sm:$0xf]  ;;  %v4848_v5 = vld [vmem:[%s8948_s1 + $0x414] sm:$0xf0] }
 0x103   : > { %v2874_v22 = vpop.f32.mrf.mxu3  ;;  %v2905_v34 = vpop.f32.mrf.mxu0  ;;  %3373 = vmatpush.bf16.msrb.mxu1 %v5079_v13  ;;  %v4851_v50 = vor.u32 %v5859_v53, %v4848_v5  ;;  %v4944_v5 = vld [vmem:[%s8948_s1 + $0x4d4] sm:$0xf0] }
 0x104   : > { %v2875_v28 = vadd.f32 %v2874_v22, %v2846_v41  ;;  %3345 = vmatpush.bf16.msrb.mxu0 %v4971_v25 }
 0x105   : > { %v2934_v54 = vpop.f32.mrf.mxu1  ;;  %3288 = vmatpush.bf16.msrb.mxu2 %v4767_v49 }
 0x106   : > { %v2904_v52 = vadd.f32 %v2903_v56, %v2875_v28  ;;  %v5862_v56 = vld [vmem:[%s8948_s1 + $0x424] sm:$0xf] }
 0x107   : > { %v4863_v44 = vor.u32 %v5862_v56, %v4860_v58  ;;  %v5886_v56 = vld [vmem:[%s8948_s1 + $0x4e4] sm:$0xf]  ;;  %v4956_v58 = vld [vmem:[%s8948_s1 + $0x4ec] sm:$0xf0] }
 0x108   : > { %v7410_v27 = vadd.f32 %v2932_v39, %v2904_v52  ;;  %v2847_v57 = vpop.f32.mrf.mxu2  ;;  %v5913_v39 = vld [vmem:[%s8948_s1 + $0x5bc] sm:$0xf]  ;;  %v4959_v20 = vor.u32 %v5886_v56, %v4956_v58 }
 0x109   : > { %v2848_v42 = vadd.f32 %v2847_v57, %v7131_v24  ;;  %3317 = vmatpush.bf16.msrb.mxu3 %v4863_v44  ;;  %v5064_v24 = vld [vmem:[%s8948_s1 + $0x5c4] sm:$0xf0] }
 0x10a   : > { %v5067_v52 = vor.u32 %v5913_v39, %v5064_v24  ;;  %3346 = vmatpush.bf16.msrb.mxu0 %v4959_v20  ;;  %v5910_v24 = vld [vmem:[%s8948_s1 + $0x5a4] sm:$0xf] }
 0x10b   : > { %v2876_v32 = vpop.f32.mrf.mxu3  ;;  %v3004_v41 = vpop.f32.mrf.mxu0 }
 0x10c   : > { %v2877_v22 = vadd.f32 %v2876_v32, %v2848_v42  ;;  %3374 = vmatpush.bf16.msrb.mxu1 %v5067_v52  ;;  %v4740_v52 = vld [vmem:[%s8948_s1 + $0x33c] sm:$0xf0] }
 0x10d   : > { %v3033_v28 = vpop.f32.mrf.mxu1  ;;  %3177 = vmatmul.bf16.vlgmr.msra.gmra.mxu2 %v6273_v4  ;;  %3318 = vmatpush.bf16.msrb.mxu3 %v4851_v50 }
 0x10e   : > { %v2906_v36 = vadd.f32 %v2905_v34, %v2877_v22  ;;  %3235 = vmatmul.bf16.vlgmr.msra.gmra.mxu0 %v6509_v7  ;;  %v4752_v34 = vld [vmem:[%s8948_s1 + $0x354] sm:$0xf0] }
 0x10f   : > { %v4755_v13 = vor.u32 %v5835_v35, %v4752_v34  ;;  %v4836_v35 = vld [vmem:[%s8948_s1 + $0x3fc] sm:$0xf0] }
 0x110   : > { %3206 = vmatmul.bf16.vlgmr.msra.gmra.mxu3 %v6286_v10  ;;  %3264 = vmatmul.bf16.vlgmr.msra.gmra.mxu1 %v6522_v15  ;;  %v7441_v49 = vadd.f32 %v2934_v54, %v2906_v36  ;;  %v2946_v44 = vpop.f32.mrf.mxu2  ;;  %v5052_v54 = vld [vmem:[%s8948_s1 + $0x5ac] sm:$0xf0] }
 0x111   : > { %v2947_v57 = vadd.f32 %v2946_v44, %v7194_v60  ;;  %3289 = vmatpush.bf16.msrb.mxu2 %v4755_v13  ;;  %v5832_v60 = vld [vmem:[%s8948_s1 + $0x334] sm:$0xf]  ;;  %v5055_v36 = vor.u32 %v5910_v24, %v5052_v54  ;;  %v5883_v13 = vld [vmem:[%s8948_s1 + $0x4cc] sm:$0xf]  ;;  %v5829_v54 = vld [vmem:[%s8948_s1 + $0x31c] sm:$0xf] }
 0x112   : > { %v4743_v34 = vor.u32 %v5832_v60, %v4740_v52  ;;  %v4947_v44 = vor.u32 %v5883_v13, %v4944_v5  ;;  %v5853_v60 = vld [vmem:[%s8948_s1 + $0x3dc] sm:$0xf]  ;;  %v4824_v52 = vld [vmem:[%s8948_s1 + $0x3e4] sm:$0xf0] }
 0x113   : > { %v2975_v25 = vpop.f32.mrf.mxu3  ;;  %v3006_v42 = vpop.f32.mrf.mxu0  ;;  %3375 = vmatpush.bf16.msrb.mxu1 %v5055_v36  ;;  %v4827_v13 = vor.u32 %v5853_v60, %v4824_v52  ;;  %v4812_v60 = vld [vmem:[%s8948_s1 + $0x3cc] sm:$0xf0] }
 0x114   : > { %v2976_v32 = vadd.f32 %v2975_v25, %v2947_v57  ;;  %3347 = vmatpush.bf16.msrb.mxu0 %v4947_v44 }
 0x115   : > { %v3035_v22 = vpop.f32.mrf.mxu1  ;;  %3290 = vmatpush.bf16.msrb.mxu2 %v4743_v34 }
 0x116   : > { %v3005_v39 = vadd.f32 %v3004_v41, %v2976_v32  ;;  %v5856_v41 = vld [vmem:[%s8948_s1 + $0x3f4] sm:$0xf] }
 0x117   : > { %v4839_v53 = vor.u32 %v5856_v41, %v4836_v35  ;;  %v5880_v41 = vld [vmem:[%s8948_s1 + $0x4b4] sm:$0xf]  ;;  %v4932_v35 = vld [vmem:[%s8948_s1 + $0x4bc] sm:$0xf0] }
 0x118   : > { %v7468_v56 = vadd.f32 %v3033_v28, %v3005_v39  ;;  %v2948_v58 = vpop.f32.mrf.mxu2  ;;  %v5907_v28 = vld [vmem:[%s8948_s1 + $0x58c] sm:$0xf]  ;;  %v4935_v5 = vor.u32 %v5880_v41, %v4932_v35 }
 0x119   : > { %v2949_v50 = vadd.f32 %v2948_v58, %v7232_v55  ;;  %3319 = vmatpush.bf16.msrb.mxu3 %v4839_v53  ;;  %v5040_v55 = vld [vmem:[%s8948_s1 + $0x594] sm:$0xf0] }
 0x11a   : > { %v5043_v39 = vor.u32 %v5907_v28, %v5040_v55  ;;  %3348 = vmatpush.bf16.msrb.mxu0 %v4935_v5  ;;  %v5904_v28 = vld [vmem:[%s8948_s1 + $0x574] sm:$0xf]  ;;  %v5016_v5 = vld [vmem:[%s8948_s1 + $0x564] sm:$0xf0] }
 0x11b   : > { %v2977_v20 = vpop.f32.mrf.mxu3  ;;  %v3009_v57 = vpop.f32.mrf.mxu0 }
 0x11c   : > { %v2978_v25 = vadd.f32 %v2977_v20, %v2949_v50  ;;  %3376 = vmatpush.bf16.msrb.mxu1 %v5043_v39  ;;  %v4716_v39 = vld [vmem:[%s8948_s1 + $0x30c] sm:$0xf0] }
 0x11d   : > { %v3038_v32 = vpop.f32.mrf.mxu1  ;;  %3182 = vmatmul.bf16.gmra.mxu2 %v6389_v0  ;;  %3320 = vmatpush.bf16.msrb.mxu3 %v4827_v13  ;;  %v5901_v13 = vld [vmem:[%s8948_s1 + $0x55c] sm:$0xf] }
 0x11e   : > { %v3007_v24 = vadd.f32 %v3006_v42, %v2978_v25  ;;  %3240 = vmatmul.bf16.gmra.mxu0 %v6622_v16  ;;  %v4728_v42 = vld [vmem:[%s8948_s1 + $0x324] sm:$0xf0] }
 0x11f   : > { %v4731_v36 = vor.u32 %v5829_v54, %v4728_v42  ;;  %v5850_v54 = vld [vmem:[%s8948_s1 + $0x3c4] sm:$0xf] }
 0x120   : > { %3211 = vmatmul.bf16.gmra.mxu3 %v6402_v9  ;;  %3269 = vmatmul.bf16.gmra.mxu1 %v6632_v21  ;;  %v7499_v34 = vadd.f32 %v3035_v22, %v3007_v24  ;;  %v2951_v53 = vpop.f32.mrf.mxu2  ;;  %v5028_v22 = vld [vmem:[%s8948_s1 + $0x57c] sm:$0xf0]  ;;  %v4815_v52 = vor.u32 %v5850_v54, %v4812_v60  ;;  %v5943_v60 = vld [vmem:[%s8948_s1 + $0x6ac] sm:$0xf] }
 0x121   : > { %v2952_v58 = vadd.f32 %v2951_v53, %v7269_v59  ;;  %3291 = vmatpush.bf16.msrb.mxu2 %v4731_v36  ;;  %v5031_v55 = vor.u32 %v5904_v28, %v5028_v22  ;;  %v5826_v59 = vld [vmem:[%s8948_s1 + $0x304] sm:$0xf]  ;;  %v4920_v36 = vld [vmem:[%s8948_s1 + $0x4a4] sm:$0xf0]  ;;  %v4908_v22 = vld [vmem:[%s8948_s1 + $0x48c] sm:$0xf0] }
 0x122   : > { %v4719_v42 = vor.u32 %v5826_v59, %v4716_v39  ;;  %3321 = vmatpush.bf16.msrb.mxu3 %v4815_v52  ;;  %v5004_v39 = vld [vmem:[%s8948_s1 + $0x54c] sm:$0xf0]  ;;  %v5280_v52 = vld [vmem:[%s8948_s1 + $0x774] sm:$0xf0] }
 0x123   : > { %v2980_v44 = vpop.f32.mrf.mxu3  ;;  %v3011_v50 = vpop.f32.mrf.mxu0  ;;  %3377 = vmatpush.bf16.msrb.mxu1 %v5031_v55 }
 0x124   : > { %v2981_v20 = vadd.f32 %v2980_v44, %v2952_v58 }
 0x125   : > { %v3040_v25 = vpop.f32.mrf.mxu1  ;;  %3292 = vmatpush.bf16.msrb.mxu2 %v4719_v42 }
 0x126   : > { %v3010_v24 = vadd.f32 %v3009_v57, %v2981_v20  ;;  %v5877_v57 = vld [vmem:[%s8948_s1 + $0x49c] sm:$0xf]  ;;  %v5019_v20 = vor.u32 %v5901_v13, %v5016_v5 }
 0x127   : > { %v4923_v41 = vor.u32 %v5877_v57, %v4920_v36  ;;  %v5184_v57 = vld [vmem:[%s8948_s1 + $0x6b4] sm:$0xf0] }
 0x128   : > { %v7526_v35 = vadd.f32 %v3038_v32, %v3010_v24  ;;  %v2953_v53 = vpop.f32.mrf.mxu2  ;;  %v5874_v32 = vld [vmem:[%s8948_s1 + $0x484] sm:$0xf]  ;;  %3378 = vmatpush.bf16.msrb.mxu1 %v5019_v20  ;;  %v5187_v36 = vor.u32 %v5943_v60, %v5184_v57 }
 0x129   : > { %v2954_v58 = vadd.f32 %v2953_v53, %v7315_v29  ;;  %3349 = vmatpush.bf16.msrb.mxu0 %v4923_v41  ;;  %v4911_v55 = vor.u32 %v5874_v32, %v4908_v22  ;;  %v5898_v29 = vld [vmem:[%s8948_s1 + $0x544] sm:$0xf] }
 0x12a   : > { %v5007_v42 = vor.u32 %v5898_v29, %v5004_v39  ;;  %3401 = vmatpush.bf16.msra.mxu2 %v5187_v36 }
 0x12b   : > { %v2982_v44 = vpop.f32.mrf.mxu3  ;;  %v3014_v28 = vpop.f32.mrf.mxu0 }
 0x12c   : > { %v2983_v24 = vadd.f32 %v2982_v44, %v2954_v58  ;;  %3379 = vmatpush.bf16.msrb.mxu1 %v5007_v42  ;;  %v5376_v42 = vld [vmem:[%s8948_s1 + $0x834] sm:$0xf0] }
 0x12d   : > { %v3043_v59 = vpop.f32.mrf.mxu1  ;;  %3187 = vmatmul.bf16.gmra.mxu2 %v6271_v3  ;;  %3350 = vmatpush.bf16.msrb.mxu0 %v4911_v55  ;;  %v5964_v55 = vld [vmem:[%s8948_s1 + $0x754] sm:$0xf] }
 0x12e   : > { %v3012_v54 = vadd.f32 %v3011_v50, %v2983_v24  ;;  %3245 = vmatmul.bf16.gmra.mxu0 %v6702_v61  ;;  %v5967_v50 = vld [vmem:[%s8948_s1 + $0x76c] sm:$0xf]  ;;  %v5940_v24 = vld [vmem:[%s8948_s1 + $0x694] sm:$0xf] }
 0x12f   : > { %v5283_v13 = vor.u32 %v5967_v50, %v5280_v52 }
 0x130   : > { %3216 = vmatmul.bf16.gmra.mxu3 %v6284_v8  ;;  %3274 = vmatmul.bf16.gmra.mxu1 %v6706_v1  ;;  %v7563_v41 = vadd.f32 %v3040_v25, %v3012_v54  ;;  %v2956_v53 = vpop.f32.mrf.mxu2  ;;  %v5172_v25 = vld [vmem:[%s8948_s1 + $0x69c] sm:$0xf0]  ;;  %v5991_v54 = vld [vmem:[%s8948_s1 + $0x82c] sm:$0xf] }
 0x131   : > { %v2957_v5 = vadd.f32 %v2956_v53, %v7342_v30  ;;  %3430 = vmatpush.bf16.msra.mxu3 %v5283_v13  ;;  %v5175_v39 = vor.u32 %v5940_v24, %v5172_v25  ;;  %v5160_v24 = vld [vmem:[%s8948_s1 + $0x684] sm:$0xf0]  ;;  %v5961_v25 = vld [vmem:[%s8948_s1 + $0x73c] sm:$0xf] }
 0x133   : > { %v2985_v58 = vpop.f32.mrf.mxu3  ;;  %v3016_v44 = vpop.f32.mrf.mxu0  ;;  %3402 = vmatpush.bf16.msra.mxu2 %v5175_v39 }
 0x134   : > { %v2986_v20 = vadd.f32 %v2985_v58, %v2957_v5  ;;  %v5472_v5 = vld [vmem:[%s8948_s1 + $0x8f4] sm:$0xf0]  ;;  %v5937_v58 = vld [vmem:[%s8948_s1 + $0x67c] sm:$0xf] }
 0x135   : > { %v3045_v32 = vpop.f32.mrf.mxu1 }
 0x136   : > { %v3015_v22 = vadd.f32 %v3014_v28, %v2986_v20  ;;  %v5268_v28 = vld [vmem:[%s8948_s1 + $0x75c] sm:$0xf0] }
 0x137   : > { %v5271_v50 = vor.u32 %v5964_v55, %v5268_v28  ;;  %v5256_v55 = vld [vmem:[%s8948_s1 + $0x744] sm:$0xf0]  ;;  %v5163_v28 = vor.u32 %v5937_v58, %v5160_v24  ;;  %v5244_v24 = vld [vmem:[%s8948_s1 + $0x72c] sm:$0xf0] }
 0x138   : > { %v7575_v30 = vadd.f32 %v3043_v59, %v3015_v22  ;;  %v2958_v29 = vpop.f32.mrf.mxu2  ;;  %v5379_v59 = vor.u32 %v5991_v54, %v5376_v42  ;;  %v5988_v54 = vld [vmem:[%s8948_s1 + $0x814] sm:$0xf]  ;;  %v5364_v42 = vld [vmem:[%s8948_s1 + $0x81c] sm:$0xf0] }
 0x139   : > { %v2959_v60 = vadd.f32 %v2958_v29, %v7383_v19  ;;  %3431 = vmatpush.bf16.msra.mxu3 %v5271_v50  ;;  %v6015_v19 = vld [vmem:[%s8948_s1 + $0x8ec] sm:$0xf]  ;;  %3403 = vmatpush.bf16.msra.mxu2 %v5163_v28  ;;  %v5352_v28 = vld [vmem:[%s8948_s1 + $0x804] sm:$0xf0] }
 0x13a   : > { %3459 = vmatpush.bf16.msra.mxu0 %v5379_v59  ;;  %v5475_v22 = vor.u32 %v6015_v19, %v5472_v5  ;;  %v5934_v19 = vld [vmem:[%s8948_s1 + $0x664] sm:$0xf] }
 0x13b   : > { %v2987_v57 = vpop.f32.mrf.mxu3  ;;  %v3019_v36 = vpop.f32.mrf.mxu0 }
 0x13c   : > { %v2988_v52 = vadd.f32 %v2987_v57, %v2959_v60  ;;  %3488 = vmatpush.bf16.msra.mxu1 %v5475_v22  ;;  %v5367_v57 = vor.u32 %v5988_v54, %v5364_v42  ;;  %v5958_v22 = vld [vmem:[%s8948_s1 + $0x724] sm:$0xf] }
 0x13d   : > { %v3048_v53 = vpop.f32.mrf.mxu1  ;;  %3192 = vmatmul.bf16.gmra.mxu2 %v6387_v63 }
 0x13e   : > { %v3017_v13 = vadd.f32 %v3016_v44, %v2988_v52  ;;  %3250 = vmatmul.bf16.gmra.mxu0 %v6764_v46  ;;  %v6012_v52 = vld [vmem:[%s8948_s1 + $0x8d4] sm:$0xf] }
 0x13f   : > { %3460 = vmatpush.bf16.msra.mxu0 %v5367_v57 }
 0x140   : > { %3221 = vmatmul.bf16.gmra.mxu3 %v6400_v6  ;;  %3279 = vmatmul.bf16.gmra.mxu1 %v6768_v48  ;;  %v7600_v44 = vadd.f32 %v3045_v32, %v3017_v13  ;;  %v2961_v20 = vpop.f32.mrf.mxu2  ;;  %v5259_v32 = vor.u32 %v5961_v25, %v5256_v55  ;;  %v5460_v13 = vld [vmem:[%s8948_s1 + $0x8dc] sm:$0xf0] }
 0x141   : > { %v2962_v29 = vadd.f32 %v2961_v20, %v7410_v27  ;;  %v5463_v20 = vor.u32 %v6012_v52, %v5460_v13 }
 0x142   : > { %3432 = vmatpush.bf16.msra.mxu3 %v5259_v32 }
 0x143   : > { %v2990_v39 = vpop.f32.mrf.mxu3  ;;  %v3021_v60 = vpop.f32.mrf.mxu0  ;;  %3489 = vmatpush.bf16.msra.mxu1 %v5463_v20  ;;  %v5955_v20 = vld [vmem:[%s8948_s1 + $0x70c] sm:$0xf] }
 0x144   : > { %v2991_v50 = vadd.f32 %v2990_v39, %v2962_v29  ;;  %v5985_v39 = vld [vmem:[%s8948_s1 + $0x7fc] sm:$0xf] }
 0x145   : > { %v3050_v59 = vpop.f32.mrf.mxu1  ;;  %v5355_v54 = vor.u32 %v5985_v39, %v5352_v28 }
 0x146   : > { %v3020_v27 = vadd.f32 %v3019_v36, %v2991_v50  ;;  %v5148_v36 = vld [vmem:[%s8948_s1 + $0x66c] sm:$0xf0]  ;;  %v6009_v50 = vld [vmem:[%s8948_s1 + $0x8bc] sm:$0xf] }
 0x147   : > { %v5151_v29 = vor.u32 %v5934_v19, %v5148_v36  ;;  %3461 = vmatpush.bf16.msra.mxu0 %v5355_v54  ;;  %v5232_v36 = vld [vmem:[%s8948_s1 + $0x714] sm:$0xf0] }
 0x148   : > { %v7627_v5 = vadd.f32 %v3048_v53, %v3020_v27  ;;  %v2963_v58 = vpop.f32.mrf.mxu2  ;;  %v5247_v53 = vor.u32 %v5958_v22, %v5244_v24  ;;  %v5448_v27 = vld [vmem:[%s8948_s1 + $0x8c4] sm:$0xf0] }
 0x149   : > { %v2964_v25 = vadd.f32 %v2963_v58, %v7441_v49  ;;  %3404 = vmatpush.bf16.msra.mxu2 %v5151_v29  ;;  %v5451_v19 = vor.u32 %v6009_v50, %v5448_v27  ;;  %v5136_v58 = vld [vmem:[%s8948_s1 + $0x654] sm:$0xf0]  ;;  %v5340_v29 = vld [vmem:[%s8948_s1 + $0x7ec] sm:$0xf0]  ;;  %v5928_v27 = vld [vmem:[%s8948_s1 + $0x634] sm:$0xf] }
 0x14a   : > { %3433 = vmatpush.bf16.msra.mxu3 %v5247_v53  ;;  %v5436_v50 = vld [vmem:[%s8948_s1 + $0x8ac] sm:$0xf0] }
 0x14b   : > { %v2992_v55 = vpop.f32.mrf.mxu3  ;;  %v3120_v32 = vpop.f32.mrf.mxu0  ;;  %3490 = vmatpush.bf16.msra.mxu1 %v5451_v19  ;;  %v5220_v19 = vld [vmem:[%s8948_s1 + $0x6fc] sm:$0xf0] }
 0x14c   : > { %v2993_v42 = vadd.f32 %v2992_v55, %v2964_v25  ;;  %v5982_v55 = vld [vmem:[%s8948_s1 + $0x7e4] sm:$0xf] }
 0x14d   : > { %v3149_v57 = vpop.f32.mrf.mxu1  ;;  %3293 = vmatmul.bf16.vlgmr.msrb.gmra.mxu2 %v6511_v11  ;;  %v5343_v39 = vor.u32 %v5982_v55, %v5340_v29 }
 0x14e   : > { %v3022_v49 = vadd.f32 %v3021_v60, %v2993_v42  ;;  %3351 = vmatmul.bf16.vlgmr.msrb.gmra.mxu0 %v6832_v38  ;;  %v5931_v60 = vld [vmem:[%s8948_s1 + $0x64c] sm:$0xf] }
 0x14f   : > { %v5139_v25 = vor.u32 %v5931_v60, %v5136_v58  ;;  %3462 = vmatpush.bf16.msra.mxu0 %v5343_v39 }
 0x150   : > { %3322 = vmatmul.bf16.vlgmr.msrb.gmra.mxu3 %v6524_v17  ;;  %3380 = vmatmul.bf16.vlgmr.msrb.gmra.mxu1 %v6836_v40  ;;  %v7658_v52 = vadd.f32 %v3050_v59, %v3022_v49  ;;  %v3062_v13 = vpop.f32.mrf.mxu2  ;;  %v5235_v59 = vor.u32 %v5955_v20, %v5232_v36  ;;  %v6006_v49 = vld [vmem:[%s8948_s1 + $0x8a4] sm:$0xf] }
 0x151   : > { %v3063_v22 = vadd.f32 %v3062_v13, %v7468_v56  ;;  %3405 = vmatpush.bf16.msra.mxu2 %v5139_v25  ;;  %v5439_v13 = vor.u32 %v6006_v49, %v5436_v50  ;;  %v5328_v25 = vld [vmem:[%s8948_s1 + $0x7d4] sm:$0xf0] }
 0x152   : > { %3434 = vmatpush.bf16.msra.mxu3 %v5235_v59  ;;  %v5424_v49 = vld [vmem:[%s8948_s1 + $0x894] sm:$0xf0] }
 0x153   : > { %v3091_v24 = vpop.f32.mrf.mxu3  ;;  %v3122_v53 = vpop.f32.mrf.mxu0  ;;  %3491 = vmatpush.bf16.msra.mxu1 %v5439_v13  ;;  %v5208_v13 = vld [vmem:[%s8948_s1 + $0x6e4] sm:$0xf0] }
 0x154   : > { %v3092_v28 = vadd.f32 %v3091_v24, %v3063_v22  ;;  %v5979_v24 = vld [vmem:[%s8948_s1 + $0x7cc] sm:$0xf] }
 0x155   : > { %v3151_v54 = vpop.f32.mrf.mxu1  ;;  %v5331_v55 = vor.u32 %v5979_v24, %v5328_v25 }
 0x156   : > { %v3121_v56 = vadd.f32 %v3120_v32, %v3092_v28  ;;  %v5124_v32 = vld [vmem:[%s8948_s1 + $0x63c] sm:$0xf0] }
 0x157   : > { %v5127_v36 = vor.u32 %v5928_v27, %v5124_v32  ;;  %3463 = vmatpush.bf16.msra.mxu0 %v5331_v55 }
 0x158   : > { %v7676_v42 = vadd.f32 %v3149_v57, %v3121_v56  ;;  %v3064_v60 = vpop.f32.mrf.mxu2  ;;  %v5952_v57 = vld [vmem:[%s8948_s1 + $0x6f4] sm:$0xf]  ;;  %v6003_v56 = vld [vmem:[%s8948_s1 + $0x88c] sm:$0xf] }
 0x159   : > { %v3065_v58 = vadd.f32 %v3064_v60, %v7499_v34  ;;  %v5223_v22 = vor.u32 %v5952_v57, %v5220_v19  ;;  %3406 = vmatpush.bf16.msra.mxu2 %v5127_v36  ;;  %v5427_v27 = vor.u32 %v6003_v56, %v5424_v49  ;;  %v5949_v60 = vld [vmem:[%s8948_s1 + $0x6dc] sm:$0xf]  ;;  %v5316_v36 = vld [vmem:[%s8948_s1 + $0x7bc] sm:$0xf0] }
 0x15a   : > { %v5973_v49 = vld [vmem:[%s8948_s1 + $0x79c] sm:$0xf] }
 0x15b   : > { %v3093_v20 = vpop.f32.mrf.mxu3  ;;  %v3125_v59 = vpop.f32.mrf.mxu0  ;;  %3435 = vmatpush.bf16.msra.mxu3 %v5223_v22  ;;  %3492 = vmatpush.bf16.msra.mxu1 %v5427_v27  ;;  %v5922_v27 = vld [vmem:[%s8948_s1 + $0x604] sm:$0xf] }
 0x15c   : > { %v3094_v29 = vadd.f32 %v3093_v20, %v3065_v58  ;;  %v5211_v58 = vor.u32 %v5949_v60, %v5208_v13  ;;  %v5976_v20 = vld [vmem:[%s8948_s1 + $0x7b4] sm:$0xf] }
 0x15d   : > { %v3154_v39 = vpop.f32.mrf.mxu1  ;;  %3298 = vmatmul.bf16.gmra.mxu2 %v6624_v18  ;;  %v5319_v24 = vor.u32 %v5976_v20, %v5316_v36 }
 0x15e   : > { %v3123_v34 = vadd.f32 %v3122_v53, %v3094_v29  ;;  %3356 = vmatmul.bf16.gmra.mxu0 %v6894_v31  ;;  %v5925_v53 = vld [vmem:[%s8948_s1 + $0x61c] sm:$0xf]  ;;  %v5412_v29 = vld [vmem:[%s8948_s1 + $0x87c] sm:$0xf0] }
 0x15f   : > { %3436 = vmatpush.bf16.msra.mxu3 %v5211_v58  ;;  %3464 = vmatpush.bf16.msra.mxu0 %v5319_v24 }
 0x160   : > { %3327 = vmatmul.bf16.gmra.mxu3 %v6634_v23  ;;  %v7706_v28 = vadd.f32 %v3151_v54, %v3123_v34  ;;  %3385 = vmatmul.bf16.gmra.mxu1 %v6898_v33  ;;  %v3067_v50 = vpop.f32.mrf.mxu2  ;;  %v5112_v54 = vld [vmem:[%s8948_s1 + $0x624] sm:$0xf0] }
 0x161   : > { %v3068_v32 = vadd.f32 %v3067_v50, %v7526_v35  ;;  %v5115_v19 = vor.u32 %v5925_v53, %v5112_v54  ;;  %v6000_v35 = vld [vmem:[%s8948_s1 + $0x874] sm:$0xf]  ;;  %v5304_v53 = vld [vmem:[%s8948_s1 + $0x7a4] sm:$0xf0]  ;;  %v5946_v54 = vld [vmem:[%s8948_s1 + $0x6c4] sm:$0xf] }
 0x162   : > { %v5415_v56 = vor.u32 %v6000_v35, %v5412_v29  ;;  %v5307_v60 = vor.u32 %v5973_v49, %v5304_v53  ;;  %v5970_v35 = vld [vmem:[%s8948_s1 + $0x784] sm:$0xf]  ;;  %v5292_v29 = vld [vmem:[%s8948_s1 + $0x78c] sm:$0xf0] }
 0x163   : > { %v3096_v57 = vpop.f32.mrf.mxu3  ;;  %v3127_v22 = vpop.f32.mrf.mxu0  ;;  %3407 = vmatpush.bf16.msra.mxu2 %v5115_v19  ;;  %v5400_v19 = vld [vmem:[%s8948_s1 + $0x864] sm:$0xf0]  ;;  %v5388_v53 = vld [vmem:[%s8948_s1 + $0x84c] sm:$0xf0] }
 0x164   : > { %v3097_v25 = vadd.f32 %v3096_v57, %v3068_v32  ;;  %3493 = vmatpush.bf16.msra.mxu1 %v5415_v56  ;;  %v5997_v57 = vld [vmem:[%s8948_s1 + $0x85c] sm:$0xf]  ;;  %3465 = vmatpush.bf16.msra.mxu0 %v5307_v60  ;;  %v5295_v56 = vor.u32 %v5970_v35, %v5292_v29  ;;  %v6039_v60 = vld [vmem:[%s8948_s1 + $0x9ac] sm:$0xf]  ;;  %v6036_v29 = vld [vmem:[%s8948_s1 + $0x994] sm:$0xf] }
 0x165   : > { %v3156_v55 = vpop.f32.mrf.mxu1  ;;  %v5403_v24 = vor.u32 %v5997_v57, %v5400_v19 }
 0x166   : > { %v3126_v34 = vadd.f32 %v3125_v59, %v3097_v25  ;;  %v5100_v59 = vld [vmem:[%s8948_s1 + $0x60c] sm:$0xf0] }
 0x167   : > { %v5103_v32 = vor.u32 %v5922_v27, %v5100_v59 }
 0x168   : > { %v7746_v50 = vadd.f32 %v3154_v39, %v3126_v34  ;;  %v3069_v13 = vpop.f32.mrf.mxu2  ;;  %v5196_v39 = vld [vmem:[%s8948_s1 + $0x6cc] sm:$0xf0]  ;;  %3494 = vmatpush.bf16.msra.mxu1 %v5403_v24  ;;  %3466 = vmatpush.bf16.msra.mxu0 %v5295_v56 }
 0x169   : > { %v3070_v58 = vadd.f32 %v3069_v13, %v7563_v41  ;;  %v5199_v36 = vor.u32 %v5946_v54, %v5196_v39  ;;  %3408 = vmatpush.bf16.msra.mxu2 %v5103_v32  ;;  %v5994_v41 = vld [vmem:[%s8948_s1 + $0x844] sm:$0xf]  ;;  %v6063_v13 = vld [vmem:[%s8948_s1 + $0xa6c] sm:$0xf] }
 0x16a   : > { %v5391_v59 = vor.u32 %v5994_v41, %v5388_v53  ;;  %v5652_v41 = vld [vmem:[%s8948_s1 + $0xa5c] sm:$0xf0]  ;;  %v5753_v53 = vld [vmem:[%s8948_s1 + $0xb8] sm:$0xf0] }
 0x16b   : > { %v3098_v20 = vpop.f32.mrf.mxu3  ;;  %v3130_v25 = vpop.f32.mrf.mxu0  ;;  %3437 = vmatpush.bf16.msra.mxu3 %v5199_v36 }
 0x16c   : > { %v3099_v34 = vadd.f32 %v3098_v20, %v3070_v58  ;;  %3495 = vmatpush.bf16.msra.mxu1 %v5391_v59 }
 0x16d   : > { %v3159_v49 = vpop.f32.mrf.mxu1  ;;  %3303 = vmatmul.bf16.gmra.mxu2 %v6704_v62 }
 0x16e   : > { %v3128_v27 = vadd.f32 %v3127_v22, %v3099_v34  ;;  %3361 = vmatmul.bf16.gmra.mxu0 %v6973_v43  ;;  %v5568_v22 = vld [vmem:[%s8948_s1 + $0x9b4] sm:$0xf0]  ;;  %v5556_v34 = vld [vmem:[%s8948_s1 + $0x99c] sm:$0xf0] }
 0x16f   : > { %v5571_v39 = vor.u32 %v6039_v60, %v5568_v22  ;;  %v5559_v56 = vor.u32 %v6036_v29, %v5556_v34  ;;  %v6033_v29 = vld [vmem:[%s8948_s1 + $0x97c] sm:$0xf] }
 0x170   : > { %3332 = vmatmul.bf16.gmra.mxu3 %v6708_v2  ;;  %v7782_v54 = vadd.f32 %v3156_v55, %v3128_v27  ;;  %3390 = vmatmul.bf16.gmra.mxu1 %v6977_v51  ;;  %v3072_v32 = vpop.f32.mrf.mxu2  ;;  %v5664_v55 = vld [vmem:[%s8948_s1 + $0xa74] sm:$0xf0]  ;;  %v6057_v34 = vld [vmem:[%s8948_s1 + $0xa3c] sm:$0xf] }
 0x171   : > { %v3073_v57 = vadd.f32 %v3072_v32, %v7575_v30  ;;  %v5667_v58 = vor.u32 %v6063_v13, %v5664_v55  ;;  %3517 = vmatpush.bf16.msrb.mxu2 %v5571_v39  ;;  %v6060_v30 = vld [vmem:[%s8948_s1 + $0xa54] sm:$0xf] }
 0x172   : > { %9031 = vst [vmem:[#allocation31_spill] sm:$0xff] %v7782_v54  ;;  %v5655_v59 = vor.u32 %v6060_v30, %v5652_v41  ;;  %v9050_v54 = vld [vmem:[#allocation12_spill] sm:$0xff] }
 0x173   : > { %v3101_v19 = vpop.f32.mrf.mxu3  ;;  %v3132_v20 = vpop.f32.mrf.mxu0  ;;  %3546 = vmatpush.bf16.msrb.mxu3 %v5667_v58  ;;  %v9033_v58 = vld [vmem:[#allocation11_spill] sm:$0xff] }
 0x174   : > { %v3102_v36 = vadd.f32 %v3101_v19, %v3073_v57 }
 0x175   : > { %v3161_v24 = vpop.f32.mrf.mxu1  ;;  %3518 = vmatpush.bf16.msrb.mxu2 %v5559_v56  ;;  %v9036_v56 = vld [vmem:[#allocation13_spill] sm:$0xff] }
 0x176   : > { %v3131_v35 = vadd.f32 %v3130_v25, %v3102_v36  ;;  %v4422_v25 = vld [vmem:[%s8948_s1 + $0xb0] sm:$0xf]  ;;  %v5777_v36 = vld [vmem:[%s8948_s1 + $0x178] sm:$0xf0] }
 0x177   : > { %v4423_v60 = vor.u32 %v5753_v53, %v4422_v25  ;;  %3547 = vmatpush.bf16.msrb.mxu3 %v5655_v59  ;;  %v5640_v25 = vld [vmem:[%s8948_s1 + $0xa44] sm:$0xf0]  ;;  %v4410_v53 = vld [vmem:[%s8948_s1 + $0x98] sm:$0xf]  ;;  %v5750_v59 = vld [vmem:[%s8948_s1 + $0xa0] sm:$0xf0] }
 0x178   : > { %v7816_v27 = vadd.f32 %v3159_v49, %v3131_v35  ;;  %v3074_v22 = vpop.f32.mrf.mxu2  ;;  %v4518_v49 = vld [vmem:[%s8948_s1 + $0x170] sm:$0xf] }
 0x179   : > { %v3075_v13 = vadd.f32 %v3074_v22, %v7600_v44  ;;  %3575 = vmatpush.bf16.msrb.mxu0 %v4423_v60  ;;  %v9034_v44 = vld [vmem:[#allocation2_spill] sm:$0xff]  ;;  %v4519_v35 = vor.u32 %v5777_v36, %v4518_v49  ;;  %v5643_v22 = vor.u32 %v6057_v34, %v5640_v25  ;;  %v5532_v34 = vld [vmem:[%s8948_s1 + $0x96c] sm:$0xf0] }
 0x17a   : > { %9032 = vst [vmem:[#allocation32_spill] sm:$0xff] %v7816_v27  ;;  %v4458_v27 = vld [vmem:[%s8948_s1 + $0xf8] sm:$0xf] }
 0x17b   : > { %v3103_v32 = vpop.f32.mrf.mxu3  ;;  %v3135_v39 = vpop.f32.mrf.mxu0  ;;  %3604 = vmatpush.bf16.msrb.mxu1 %v4519_v35  ;;  %3548 = vmatpush.bf16.msrb.mxu3 %v5643_v22  ;;  %v5774_v35 = vld [vmem:[%s8948_s1 + $0x160] sm:$0xf0]  ;;  %v5747_v22 = vld [vmem:[%s8948_s1 + $0x88] sm:$0xf0] }
 0x17c   : > { %v3104_v55 = vadd.f32 %v3103_v32, %v3075_v13 }
 0x17d   : > { %v3164_v57 = vpop.f32.mrf.mxu1  ;;  %3308 = vmatmul.bf16.gmra.mxu2 %v6766_v47 }
 0x17e   : > { %v3133_v19 = vadd.f32 %v3132_v20, %v3104_v55  ;;  %3366 = vmatmul.bf16.gmra.mxu0 %v9033_v58  ;;  %v5544_v20 = vld [vmem:[%s8948_s1 + $0x984] sm:$0xf0] }
 0x17f   : > { %v5547_v41 = vor.u32 %v6033_v29, %v5544_v20  ;;  %v4506_v29 = vld [vmem:[%s8948_s1 + $0x158] sm:$0xf] }
 0x180   : > { %3337 = vmatmul.bf16.gmra.mxu3 %v9034_v44  ;;  %v7837_v30 = vadd.f32 %v3161_v24, %v3133_v19  ;;  %3395 = vmatmul.bf16.gmra.mxu1 %v9036_v56  ;;  %v3077_v60 = vpop.f32.mrf.mxu2  ;;  %v4411_v24 = vor.u32 %v5750_v59, %v4410_v53  ;;  %v4507_v20 = vor.u32 %v5774_v35, %v4506_v29  ;;  %v9043_v56 = vld [vmem:[#allocation5_spill] sm:$0xff] }
 0x181   : > { %v3078_v13 = vadd.f32 %v3077_v60, %v7627_v5  ;;  %3519 = vmatpush.bf16.msrb.mxu2 %v5547_v41  ;;  %v6030_v5 = vld [vmem:[%s8948_s1 + $0x964] sm:$0xf]  ;;  %v5628_v41 = vld [vmem:[%s8948_s1 + $0xa2c] sm:$0xf0]  ;;  %v4398_v60 = vld [vmem:[%s8948_s1 + $0x80] sm:$0xf] }
 0x182   : > { %9035 = vst [vmem:[#allocation2_spill] sm:$0xff] %v7837_v30  ;;  %3576 = vmatpush.bf16.msrb.mxu0 %v4411_v24  ;;  %v5535_v53 = vor.u32 %v6030_v5, %v5532_v34  ;;  %3605 = vmatpush.bf16.msrb.mxu1 %v4507_v20  ;;  %v9038_v5 = vld [vmem:[#allocation3_spill] sm:$0xff] }
 0x183   : > { %v3106_v32 = vpop.f32.mrf.mxu3  ;;  %v3137_v55 = vpop.f32.mrf.mxu0  ;;  %v9039_v34 = vld [vmem:[#allocation15_spill] sm:$0xff] }
 0x184   : > { %v3107_v19 = vadd.f32 %v3106_v32, %v3078_v13  ;;  %v4399_v13 = vor.u32 %v5747_v22, %v4398_v60  ;;  %v5520_v60 = vld [vmem:[%s8948_s1 + $0x954] sm:$0xf0]  ;;  %v6051_v22 = vld [vmem:[%s8948_s1 + $0xa0c] sm:$0xf] }
 0x185   : > { %v3166_v49 = vpop.f32.mrf.mxu1  ;;  %3520 = vmatpush.bf16.msrb.mxu2 %v5535_v53  ;;  %v9040_v53 = vld [vmem:[#allocation4_spill] sm:$0xff] }
 0x186   : > { %v3136_v36 = vadd.f32 %v3135_v39, %v3107_v19  ;;  %v6054_v39 = vld [vmem:[%s8948_s1 + $0xa24] sm:$0xf]  ;;  %3577 = vmatpush.bf16.msrb.mxu0 %v4399_v13  ;;  %v9042_v13 = vld [vmem:[#allocation17_spill] sm:$0xff] }
 0x187   : > { %v5631_v59 = vor.u32 %v6054_v39, %v5628_v41  ;;  %v6092_v39 = vld [vmem:[%s8949_s2] sm:$0x7]  ;;  %v5771_v41 = vld [vmem:[%s8948_s1 + $0x148] sm:$0xf0] }
 0x188   : > { %v7868_v25 = vadd.f32 %v3164_v57, %v3136_v36  ;;  %v3079_v24 = vpop.f32.mrf.mxu2  ;;  %v7882_v20 = vperm.slane %v6092_v39, 1  ;;  %v5744_v39 = vld [vmem:[%s8948_s1 + $0x70] sm:$0xf0] }
 0x189   : > { %v3080_v32 = vadd.f32 %v3079_v24, %v7658_v52  ;;  %3549 = vmatpush.bf16.msrb.mxu3 %v5631_v59  ;;  %v4494_v52 = vld [vmem:[%s8948_s1 + $0x140] sm:$0xf]  ;;  %v6027_v59 = vld [vmem:[%s8948_s1 + $0x94c] sm:$0xf] }
 0x18a   : > { %9037 = vst [vmem:[#allocation33_spill] sm:$0xff] %v7868_v25  ;;  %v4482_v25 = vld [vmem:[%s8948_s1 + $0x128] sm:$0xf] }
 0x18b   : > { %v3108_v19 = vpop.f32.mrf.mxu3  ;;  %v3236_v57 = vpop.f32.mrf.mxu0 }
 0x18c   : > { %v3109_v36 = vadd.f32 %v3108_v19, %v3080_v32  ;;  %v5523_v32 = vor.u32 %v6027_v59, %v5520_v60  ;;  %v5616_v19 = vld [vmem:[%s8948_s1 + $0xa14] sm:$0xf0] }
 0x18d   : > { %v3265_v29 = vpop.f32.mrf.mxu1  ;;  %3409 = vmatmul.bf16.vlgmr.msra.gmra.mxu2 %v9038_v5 }
 0x18e   : > { %v3138_v35 = vadd.f32 %v3137_v55, %v3109_v36  ;;  %3467 = vmatmul.bf16.vlgmr.msra.gmra.mxu0 %v9039_v34  ;;  %v4495_v55 = vor.u32 %v5771_v41, %v4494_v52  ;;  %v4386_v36 = vld [vmem:[%s8948_s1 + $0x68] sm:$0xf]  ;;  %v5619_v41 = vor.u32 %v6051_v22, %v5616_v19  ;;  %3521 = vmatpush.bf16.msrb.mxu2 %v5523_v32  ;;  %v6024_v22 = vld [vmem:[%s8948_s1 + $0x934] sm:$0xf]  ;;  %v5508_v32 = vld [vmem:[%s8948_s1 + $0x93c] sm:$0xf0] }
 0x190   : > { %3438 = vmatmul.bf16.vlgmr.msra.gmra.mxu3 %v9040_v53  ;;  %v7900_v24 = vadd.f32 %v3166_v49, %v3138_v35  ;;  %3496 = vmatmul.bf16.vlgmr.msra.gmra.mxu1 %v9042_v13  ;;  %v3178_v52 = vpop.f32.mrf.mxu2  ;;  %v4387_v49 = vor.u32 %v5744_v39, %v4386_v36  ;;  %v5511_v36 = vor.u32 %v6024_v22, %v5508_v32 }
 0x191   : > { %3606 = vmatpush.bf16.msrb.mxu1 %v4495_v55  ;;  %v3179_v35 = vadd.f32 %v3178_v52, %v7882_v20  ;;  %3550 = vmatpush.bf16.msrb.mxu3 %v5619_v41  ;;  %v5768_v55 = vld [vmem:[%s8948_s1 + $0x130] sm:$0xf0]  ;;  %v4374_v52 = vld [vmem:[%s8948_s1 + $0x50] sm:$0xf] }
 0x192   : > { %9041 = vst [vmem:[#allocation3_spill] sm:$0xff] %v7900_v24  ;;  %3578 = vmatpush.bf16.msrb.mxu0 %v4387_v49  ;;  %v4483_v19 = vor.u32 %v5768_v55, %v4482_v25  ;;  %v5741_v25 = vld [vmem:[%s8948_s1 + $0x58] sm:$0xf0]  ;;  %3522 = vmatpush.bf16.msrb.mxu2 %v5511_v36 }
 0x193   : > { %v3207_v13 = vpop.f32.mrf.mxu3  ;;  %v3238_v59 = vpop.f32.mrf.mxu0 }
 0x194   : > { %v3208_v60 = vadd.f32 %v3207_v13, %v3179_v35  ;;  %v5604_v13 = vld [vmem:[%s8948_s1 + $0x9fc] sm:$0xf0]  ;;  %v4375_v35 = vor.u32 %v5741_v25, %v4374_v52  ;;  %v6045_v52 = vld [vmem:[%s8948_s1 + $0x9dc] sm:$0xf] }
 0x195   : > { %v3267_v34 = vpop.f32.mrf.mxu1  ;;  %3607 = vmatpush.bf16.msrb.mxu1 %v4483_v19  ;;  %v9044_v19 = vld [vmem:[#allocation6_spill] sm:$0xff]  ;;  %v9045_v25 = vld [vmem:[#allocation21_spill] sm:$0xff] }
 0x196   : > { %v3237_v24 = vadd.f32 %v3236_v57, %v3208_v60  ;;  %v6048_v57 = vld [vmem:[%s8948_s1 + $0x9f4] sm:$0xf]  ;;  %3579 = vmatpush.bf16.msrb.mxu0 %v4375_v35  ;;  %v5592_v35 = vld [vmem:[%s8948_s1 + $0x9e4] sm:$0xf0] }
 0x197   : > { %v5607_v39 = vor.u32 %v6048_v57, %v5604_v13 }
 0x198   : > { %v7937_v41 = vadd.f32 %v3265_v29, %v3237_v24  ;;  %v3180_v49 = vpop.f32.mrf.mxu2  ;;  %v4470_v29 = vld [vmem:[%s8948_s1 + $0x110] sm:$0xf]  ;;  %v5765_v24 = vld [vmem:[%s8948_s1 + $0x118] sm:$0xf0] }
 0x199   : > { %v3181_v60 = vadd.f32 %v3180_v49, %v7882_v20  ;;  %3551 = vmatpush.bf16.msrb.mxu3 %v5607_v39  ;;  %v4471_v36 = vor.u32 %v5765_v24, %v4470_v29  ;;  %v6021_v39 = vld [vmem:[%s8948_s1 + $0x91c] sm:$0xf]  ;;  %v5595_v24 = vor.u32 %v6045_v52, %v5592_v35  ;;  %v6018_v52 = vld [vmem:[%s8948_s1 + $0x904] sm:$0xf] }
 0x19b   : > { %v3209_v55 = vpop.f32.mrf.mxu3  ;;  %v3241_v22 = vpop.f32.mrf.mxu0  ;;  %3608 = vmatpush.bf16.msrb.mxu1 %v4471_v36 }
 0x19c   : > { %v3210_v32 = vadd.f32 %v3209_v55, %v3181_v60  ;;  %v4362_v60 = vld [vmem:[%s8948_s1 + $0x38] sm:$0xf]  ;;  %v5738_v55 = vld [vmem:[%s8948_s1 + $0x40] sm:$0xf0] }
 0x19d   : > { %v3270_v57 = vpop.f32.mrf.mxu1  ;;  %3414 = vmatmul.bf16.gmra.mxu2 %v9043_v56  ;;  %3552 = vmatpush.bf16.msrb.mxu3 %v5595_v24 }
 0x19e   : > { %v3239_v13 = vadd.f32 %v3238_v59, %v3210_v32  ;;  %3472 = vmatmul.bf16.gmra.mxu0 %v7199_v37  ;;  %v5496_v59 = vld [vmem:[%s8948_s1 + $0x924] sm:$0xf0]  ;;  %v4363_v37 = vor.u32 %v5738_v55, %v4362_v60  ;;  %v5580_v60 = vld [vmem:[%s8948_s1 + $0x9cc] sm:$0xf0] }
 0x19f   : > { %v5499_v49 = vor.u32 %v6021_v39, %v5496_v59 }
 0x1a0   : > { %3443 = vmatmul.bf16.gmra.mxu3 %v9044_v19  ;;  %3501 = vmatmul.bf16.gmra.mxu1 %v9045_v25  ;;  %v7968_v32 = vadd.f32 %v3267_v34, %v3239_v13  ;;  %v3183_v29 = vpop.f32.mrf.mxu2  ;;  %v5762_v34 = vld [vmem:[%s8948_s1 + $0x100] sm:$0xf0] }
 0x1a1   : > { %v3184_v39 = vadd.f32 %v3183_v29, %v7882_v20  ;;  %3523 = vmatpush.bf16.msrb.mxu2 %v5499_v49  ;;  %3580 = vmatpush.bf16.msrb.mxu0 %v4363_v37  ;;  %v4459_v36 = vor.u32 %v5762_v34, %v4458_v27  ;;  %v5484_v37 = vld [vmem:[%s8948_s1 + $0x90c] sm:$0xf0]  ;;  %v6042_v49 = vld [vmem:[%s8948_s1 + $0x9c4] sm:$0xf]  ;;  %v4350_v27 = vld [vmem:[%s8948_s1 + $0x20] sm:$0xf] }
 0x1a2   : > { %v5487_v35 = vor.u32 %v6018_v52, %v5484_v37 }
 0x1a3   : > { %v3212_v59 = vpop.f32.mrf.mxu3  ;;  %v3243_v25 = vpop.f32.mrf.mxu0  ;;  %3609 = vmatpush.bf16.msrb.mxu1 %v4459_v36 }
 0x1a4   : > { %v3213_v58 = vadd.f32 %v3212_v59, %v3184_v39  ;;  %v4446_v39 = vld [vmem:[%s8948_s1 + $0xe0] sm:$0xf]  ;;  %v5759_v59 = vld [vmem:[%s8948_s1 + $0xe8] sm:$0xf0] }
 0x1a5   : > { %v3272_v30 = vpop.f32.mrf.mxu1  ;;  %3524 = vmatpush.bf16.msrb.mxu2 %v5487_v35  ;;  %v4447_v36 = vor.u32 %v5759_v59, %v4446_v39  ;;  %v9048_v59 = vld [vmem:[#allocation10_spill] sm:$0xff] }
 0x1a6   : > { %v3242_v13 = vadd.f32 %v3241_v22, %v3213_v58  ;;  %v5735_v58 = vld [vmem:[%s8948_s1 + $0x28] sm:$0xf0]  ;;  %v5583_v22 = vor.u32 %v6042_v49, %v5580_v60 }
 0x1a7   : > { %v4351_v55 = vor.u32 %v5735_v58, %v4350_v27  ;;  %3610 = vmatpush.bf16.msrb.mxu1 %v4447_v36  ;;  %v4434_v27 = vld [vmem:[%s8948_s1 + $0xc8] sm:$0xf]  ;;  %v5756_v58 = vld [vmem:[%s8948_s1 + $0xd0] sm:$0xf0]  ;;  %v9049_v36 = vld [vmem:[#allocation25_spill] sm:$0xff] }
 0x1a8   : > { %v7995_v29 = vadd.f32 %v3270_v57, %v3242_v13  ;;  %v3185_v24 = vpop.f32.mrf.mxu2  ;;  %3553 = vmatpush.bf16.msrb.mxu3 %v5583_v22  ;;  %v4338_v57 = vld [vmem:[%s8948_s1 + $0x8] sm:$0xf]  ;;  %v5732_v13 = vld [vmem:[%s8948_s1 + $0x10] sm:$0xf0]  ;;  %v4435_v39 = vor.u32 %v5756_v58, %v4434_v27 }
 0x1a9   : > { %v3186_v34 = vadd.f32 %v3185_v24, %v7882_v20  ;;  %3581 = vmatpush.bf16.msrb.mxu0 %v4351_v55  ;;  %v4339_v35 = vor.u32 %v5732_v13, %v4338_v57  ;;  %v9046_v55 = vld [vmem:[#allocation8_spill] sm:$0xff]  ;;  %v9047_v24 = vld [vmem:[#allocation23_spill] sm:$0xff]  ;;  %v5825_v13 = vld [vmem:[%s8948_s1 + $0x2f8] sm:$0xf0] }
 0x1ab   : > { %v3214_v52 = vpop.f32.mrf.mxu3  ;;  %v3246_v37 = vpop.f32.mrf.mxu0  ;;  %3611 = vmatpush.bf16.msrb.mxu1 %v4435_v39 }
 0x1ac   : > { %v3215_v49 = vadd.f32 %v3214_v52, %v3186_v34  ;;  %v4614_v34 = vld [vmem:[%s8948_s1 + $0x230] sm:$0xf]  ;;  %v5801_v52 = vld [vmem:[%s8948_s1 + $0x238] sm:$0xf0] }
 0x1ad   : > { %v3275_v60 = vpop.f32.mrf.mxu1  ;;  %3419 = vmatmul.bf16.gmra.mxu2 %v9046_v55  ;;  %3582 = vmatpush.bf16.msrb.mxu0 %v4339_v35  ;;  %v4615_v57 = vor.u32 %v5801_v52, %v4614_v34  ;;  %v4602_v34 = vld [vmem:[%s8948_s1 + $0x218] sm:$0xf]  ;;  %v5822_v52 = vld [vmem:[%s8948_s1 + $0x2e0] sm:$0xf0] }
 0x1ae   : > { %v3244_v22 = vadd.f32 %v3243_v25, %v3215_v49  ;;  %3477 = vmatmul.bf16.gmra.mxu0 %v9047_v24  ;;  %v4710_v25 = vld [vmem:[%s8948_s1 + $0x2f0] sm:$0xf] }
 0x1af   : > { %v4711_v27 = vor.u32 %v5825_v13, %v4710_v25  ;;  %3633 = vmatpush.bf16.msra.mxu2 %v4615_v57 }
 0x1b0   : > { %3448 = vmatmul.bf16.gmra.mxu3 %v9048_v59  ;;  %3506 = vmatmul.bf16.gmra.mxu1 %v9049_v36  ;;  %v8032_v49 = vadd.f32 %v3272_v30, %v3244_v22  ;;  %v3188_v35 = vpop.f32.mrf.mxu2  ;;  %v5798_v30 = vld [vmem:[%s8948_s1 + $0x220] sm:$0xf0]  ;;  %v4698_v22 = vld [vmem:[%s8948_s1 + $0x2d8] sm:$0xf] }
 0x1b1   : > { %v3189_v58 = vadd.f32 %v3188_v35, %v7882_v20  ;;  %3662 = vmatpush.bf16.msra.mxu3 %v4711_v27  ;;  %v4603_v39 = vor.u32 %v5798_v30, %v4602_v34 }
 0x1b3   : > { %v3217_v24 = vpop.f32.mrf.mxu3  ;;  %v3248_v59 = vpop.f32.mrf.mxu0  ;;  %3634 = vmatpush.bf16.msra.mxu2 %v4603_v39 }
 0x1b4   : > { %v3218_v51 = vadd.f32 %v3217_v24, %v3189_v58  ;;  %v4699_v24 = vor.u32 %v5822_v52, %v4698_v22  ;;  %v9051_v22 = vld [vmem:[#allocation14_spill] sm:$0xff] }
 0x1b5   : > { %v3277_v55 = vpop.f32.mrf.mxu1  ;;  %v4590_v52 = vld [vmem:[%s8948_s1 + $0x200] sm:$0xf] }
 0x1b6   : > { %v3247_v43 = vadd.f32 %v3246_v37, %v3218_v51  ;;  %v4806_v51 = vld [vmem:[%s8948_s1 + $0x3b0] sm:$0xf]  ;;  %v5849_v37 = vld [vmem:[%s8948_s1 + $0x3b8] sm:$0xf0]  ;;  %3663 = vmatpush.bf16.msra.mxu3 %v4699_v24  ;;  %v5819_v24 = vld [vmem:[%s8948_s1 + $0x2c8] sm:$0xf0] }
 0x1b7   : > { %v4807_v25 = vor.u32 %v5849_v37, %v4806_v51  ;;  %v4686_v51 = vld [vmem:[%s8948_s1 + $0x2c0] sm:$0xf] }
 0x1b8   : > { %v8053_v57 = vadd.f32 %v3275_v60, %v3247_v43  ;;  %v3190_v13 = vpop.f32.mrf.mxu2  ;;  %v4902_v43 = vld [vmem:[%s8948_s1 + $0x470] sm:$0xf]  ;;  %v5873_v60 = vld [vmem:[%s8948_s1 + $0x478] sm:$0xf0] }
 0x1b9   : > { %v3191_v35 = vadd.f32 %v3190_v13, %v7882_v20  ;;  %3691 = vmatpush.bf16.msra.mxu0 %v4807_v25  ;;  %v4903_v39 = vor.u32 %v5873_v60, %v4902_v43  ;;  %v4794_v25 = vld [vmem:[%s8948_s1 + $0x398] sm:$0xf]  ;;  %v5846_v13 = vld [vmem:[%s8948_s1 + $0x3a0] sm:$0xf0] }
 0x1ba   : > { %v4795_v43 = vor.u32 %v5846_v13, %v4794_v25  ;;  %v4782_v25 = vld [vmem:[%s8948_s1 + $0x380] sm:$0xf] }
 0x1bb   : > { %v3219_v27 = vpop.f32.mrf.mxu3  ;;  %v3251_v58 = vpop.f32.mrf.mxu0  ;;  %3720 = vmatpush.bf16.msra.mxu1 %v4903_v39 }
 0x1bc   : > { %v3220_v34 = vadd.f32 %v3219_v27, %v3191_v35 }
 0x1bd   : > { %v3280_v30 = vpop.f32.mrf.mxu1  ;;  %3424 = vmatmul.bf16.gmra.mxu2 %v9050_v54  ;;  %3692 = vmatpush.bf16.msra.mxu0 %v4795_v43  ;;  %v4890_v54 = vld [vmem:[%s8948_s1 + $0x458] sm:$0xf] }
 0x1be   : > { %v3249_v36 = vadd.f32 %v3248_v59, %v3220_v34  ;;  %3482 = vmatmul.bf16.gmra.mxu0 %v7347_v14  ;;  %v5795_v59 = vld [vmem:[%s8948_s1 + $0x208] sm:$0xf0]  ;;  %v4687_v34 = vor.u32 %v5819_v24, %v4686_v51  ;;  %v5792_v51 = vld [vmem:[%s8948_s1 + $0x1f0] sm:$0xf0] }
 0x1bf   : > { %v4591_v37 = vor.u32 %v5795_v59, %v4590_v52 }
 0x1c0   : > { %3453 = vmatmul.bf16.gmra.mxu3 %v9051_v22  ;;  %3511 = vmatmul.bf16.gmra.mxu1 %v7351_v12  ;;  %v8084_v35 = vadd.f32 %v3277_v55, %v3249_v36  ;;  %v3193_v27 = vpop.f32.mrf.mxu2  ;;  %v5870_v55 = vld [vmem:[%s8948_s1 + $0x460] sm:$0xf0]  ;;  %v4578_v36 = vld [vmem:[%s8948_s1 + $0x1e8] sm:$0xf] }
 0x1c1   : > { %v3194_v60 = vadd.f32 %v3193_v27, %v7882_v20  ;;  %3635 = vmatpush.bf16.msra.mxu2 %v4591_v37  ;;  %3664 = vmatpush.bf16.msra.mxu3 %v4687_v34  ;;  %v4891_v39 = vor.u32 %v5870_v55, %v4890_v54  ;;  %v4579_v37 = vor.u32 %v5792_v51, %v4578_v36  ;;  %v5843_v54 = vld [vmem:[%s8948_s1 + $0x388] sm:$0xf0] }
 0x1c2   : > { %v4783_v34 = vor.u32 %v5843_v54, %v4782_v25  ;;  %v4770_v25 = vld [vmem:[%s8948_s1 + $0x368] sm:$0xf]  ;;  %v5840_v54 = vld [vmem:[%s8948_s1 + $0x370] sm:$0xf0] }
 0x1c3   : > { %v3222_v52 = vpop.f32.mrf.mxu3  ;;  %v3253_v59 = vpop.f32.mrf.mxu0  ;;  %3721 = vmatpush.bf16.msra.mxu1 %v4891_v39 }
 0x1c4   : > { %v3223_v12 = vadd.f32 %v3222_v52, %v3194_v60  ;;  %3693 = vmatpush.bf16.msra.mxu0 %v4783_v34 }
 0x1c5   : > { %v3282_v14 = vpop.f32.mrf.mxu1  ;;  %3636 = vmatpush.bf16.msra.mxu2 %v4579_v37 }
 0x1c6   : > { %v3252_v22 = vadd.f32 %v3251_v58, %v3223_v12  ;;  %v4674_v12 = vld [vmem:[%s8948_s1 + $0x2a8] sm:$0xf]  ;;  %v5816_v58 = vld [vmem:[%s8948_s1 + $0x2b0] sm:$0xf0] }
 0x1c7   : > { %v4675_v24 = vor.u32 %v5816_v58, %v4674_v12  ;;  %v9052_v12 = vld [vmem:[#allocation16_spill] sm:$0xff] }
 0x1c8   : > { %v8111_v13 = vadd.f32 %v3280_v30, %v3252_v22  ;;  %v3195_v27 = vpop.f32.mrf.mxu2  ;;  %v4878_v30 = vld [vmem:[%s8948_s1 + $0x440] sm:$0xf]  ;;  %v4566_v58 = vld [vmem:[%s8948_s1 + $0x1d0] sm:$0xf] }
 0x1c9   : > { %v3196_v43 = vadd.f32 %v3195_v27, %v7882_v20  ;;  %3665 = vmatpush.bf16.msra.mxu3 %v4675_v24  ;;  %v5867_v20 = vld [vmem:[%s8948_s1 + $0x448] sm:$0xf0]  ;;  %v9053_v22 = vld [vmem:[#allocation18_spill] sm:$0xff]  ;;  %v5813_v24 = vld [vmem:[%s8948_s1 + $0x298] sm:$0xf0] }
 0x1ca   : > { %v4879_v39 = vor.u32 %v5867_v20, %v4878_v30 }
 0x1cb   : > { %v3224_v60 = vpop.f32.mrf.mxu3  ;;  %v3352_v52 = vpop.f32.mrf.mxu0 }
 0x1cc   : > { %v3225_v55 = vadd.f32 %v3224_v60, %v3196_v43  ;;  %3722 = vmatpush.bf16.msra.mxu1 %v4879_v39  ;;  %v4771_v60 = vor.u32 %v5840_v54, %v4770_v25  ;;  %v5786_v39 = vld [vmem:[%s8948_s1 + $0x1c0] sm:$0xf0]  ;;  %v4758_v25 = vld [vmem:[%s8948_s1 + $0x350] sm:$0xf] }
 0x1cd   : > { %v3381_v36 = vpop.f32.mrf.mxu1  ;;  %3525 = vmatmul.bf16.vlgmr.msrb.gmra.mxu2 %v9052_v12 }
 0x1ce   : > { %v3254_v51 = vadd.f32 %v3253_v59, %v3225_v55  ;;  %3583 = vmatmul.bf16.vlgmr.msrb.gmra.mxu0 %v6273_v4  ;;  %v5789_v59 = vld [vmem:[%s8948_s1 + $0x1d8] sm:$0xf0]  ;;  %v4662_v4 = vld [vmem:[%s8948_s1 + $0x290] sm:$0xf] }
 0x1cf   : > { %v4567_v37 = vor.u32 %v5789_v59, %v4566_v58  ;;  %v4663_v43 = vor.u32 %v5813_v24, %v4662_v4  ;;  %3694 = vmatpush.bf16.msra.mxu0 %v4771_v60  ;;  %v5810_v4 = vld [vmem:[%s8948_s1 + $0x280] sm:$0xf0] }
 0x1d0   : > { %3554 = vmatmul.bf16.vlgmr.msrb.gmra.mxu3 %v9053_v22  ;;  %3612 = vmatmul.bf16.vlgmr.msrb.gmra.mxu1 %v6286_v10  ;;  %v8142_v27 = vadd.f32 %v3282_v14, %v3254_v51  ;;  %v3294_v34 = vpop.f32.mrf.mxu2  ;;  %v4866_v22 = vld [vmem:[%s8948_s1 + $0x428] sm:$0xf]  ;;  %v5864_v14 = vld [vmem:[%s8948_s1 + $0x430] sm:$0xf0] }
 0x1d1   : > { %v3295_v10 = vadd.f32 %v3294_v34, %v7937_v41  ;;  %3637 = vmatpush.bf16.msra.mxu2 %v4567_v37  ;;  %3666 = vmatpush.bf16.msra.mxu3 %v4663_v43  ;;  %v4554_v41 = vld [vmem:[%s8948_s1 + $0x1b8] sm:$0xf]  ;;  %v4867_v51 = vor.u32 %v5864_v14, %v4866_v22  ;;  %v5837_v22 = vld [vmem:[%s8948_s1 + $0x358] sm:$0xf0] }
 0x1d2   : > { %v4555_v37 = vor.u32 %v5786_v39, %v4554_v41  ;;  %v4759_v43 = vor.u32 %v5837_v22, %v4758_v25  ;;  %v9054_v39 = vld [vmem:[#allocation20_spill] sm:$0xff]  ;;  %v5834_v25 = vld [vmem:[%s8948_s1 + $0x340] sm:$0xf0] }
 0x1d3   : > { %v3323_v55 = vpop.f32.mrf.mxu3  ;;  %v3354_v30 = vpop.f32.mrf.mxu0  ;;  %3723 = vmatpush.bf16.msra.mxu1 %v4867_v51 }
 0x1d4   : > { %v3324_v20 = vadd.f32 %v3323_v55, %v3295_v10  ;;  %3695 = vmatpush.bf16.msra.mxu0 %v4759_v43 }
 0x1d5   : > { %v3383_v58 = vpop.f32.mrf.mxu1  ;;  %3638 = vmatpush.bf16.msra.mxu2 %v4555_v37  ;;  %v5807_v37 = vld [vmem:[%s8948_s1 + $0x268] sm:$0xf0] }
 0x1d6   : > { %v3353_v59 = vadd.f32 %v3352_v52, %v3324_v20  ;;  %v4650_v52 = vld [vmem:[%s8948_s1 + $0x278] sm:$0xf] }
 0x1d7   : > { %v4651_v24 = vor.u32 %v5810_v4, %v4650_v52  ;;  %v4542_v52 = vld [vmem:[%s8948_s1 + $0x1a0] sm:$0xf] }
 0x1d8   : > { %v8169_v54 = vadd.f32 %v3381_v36, %v3353_v59  ;;  %v3296_v34 = vpop.f32.mrf.mxu2  ;;  %v4854_v36 = vld [vmem:[%s8948_s1 + $0x410] sm:$0xf]  ;;  %v9055_v59 = vld [vmem:[#allocation22_spill] sm:$0xff] }
 0x1d9   : > { %v3297_v60 = vadd.f32 %v3296_v34, %v7968_v32  ;;  %3667 = vmatpush.bf16.msra.mxu3 %v4651_v24  ;;  %v5861_v32 = vld [vmem:[%s8948_s1 + $0x418] sm:$0xf0]  ;;  %v4746_v24 = vld [vmem:[%s8948_s1 + $0x338] sm:$0xf] }
 0x1da   : > { %v4855_v51 = vor.u32 %v5861_v32, %v4854_v36 }
 0x1db   : > { %v3325_v10 = vpop.f32.mrf.mxu3  ;;  %v3357_v55 = vpop.f32.mrf.mxu0 }
 0x1dc   : > { %v3326_v20 = vadd.f32 %v3325_v10, %v3297_v60  ;;  %3724 = vmatpush.bf16.msra.mxu1 %v4855_v51  ;;  %v4747_v60 = vor.u32 %v5834_v25, %v4746_v24  ;;  %v5831_v24 = vld [vmem:[%s8948_s1 + $0x328] sm:$0xf0] }
 0x1dd   : > { %v3386_v14 = vpop.f32.mrf.mxu1  ;;  %3530 = vmatmul.bf16.gmra.mxu2 %v9054_v39 }
 0x1de   : > { %v3355_v41 = vadd.f32 %v3354_v30, %v3326_v20  ;;  %3588 = vmatmul.bf16.gmra.mxu0 %v6389_v0  ;;  %v5783_v30 = vld [vmem:[%s8948_s1 + $0x1a8] sm:$0xf0]  ;;  %v4638_v0 = vld [vmem:[%s8948_s1 + $0x260] sm:$0xf] }
 0x1df   : > { %v4543_v4 = vor.u32 %v5783_v30, %v4542_v52  ;;  %v4639_v43 = vor.u32 %v5807_v37, %v4638_v0  ;;  %3696 = vmatpush.bf16.msra.mxu0 %v4747_v60  ;;  %v4842_v52 = vld [vmem:[%s8948_s1 + $0x3f8] sm:$0xf]  ;;  %v5780_v30 = vld [vmem:[%s8948_s1 + $0x190] sm:$0xf0]  ;;  %v4626_v0 = vld [vmem:[%s8948_s1 + $0x248] sm:$0xf] }
 0x1e0   : > { %3559 = vmatmul.bf16.gmra.mxu3 %v9055_v59  ;;  %3617 = vmatmul.bf16.gmra.mxu1 %v6402_v9  ;;  %v8200_v22 = vadd.f32 %v3383_v58, %v3355_v41  ;;  %v3299_v34 = vpop.f32.mrf.mxu2  ;;  %v5858_v58 = vld [vmem:[%s8948_s1 + $0x400] sm:$0xf0]  ;;  %v5804_v37 = vld [vmem:[%s8948_s1 + $0x250] sm:$0xf0] }
 0x1e1   : > { %v3300_v9 = vadd.f32 %v3299_v34, %v7995_v29  ;;  %3639 = vmatpush.bf16.msra.mxu2 %v4543_v4  ;;  %3668 = vmatpush.bf16.msra.mxu3 %v4639_v43  ;;  %v4843_v51 = vor.u32 %v5858_v58, %v4842_v52  ;;  %v4530_v29 = vld [vmem:[%s8948_s1 + $0x188] sm:$0xf]  ;;  %v4627_v25 = vor.u32 %v5804_v37, %v4626_v0 }
 0x1e2   : > { %v4531_v4 = vor.u32 %v5780_v30, %v4530_v29 }
 0x1e3   : > { %v3328_v10 = vpop.f32.mrf.mxu3  ;;  %v3359_v20 = vpop.f32.mrf.mxu0  ;;  %3725 = vmatpush.bf16.msra.mxu1 %v4843_v51 }
 0x1e4   : > { %v3329_v36 = vadd.f32 %v3328_v10, %v3300_v9  ;;  %v4830_v9 = vld [vmem:[%s8948_s1 + $0x3e0] sm:$0xf]  ;;  %v5855_v10 = vld [vmem:[%s8948_s1 + $0x3e8] sm:$0xf0] }
 0x1e5   : > { %v3388_v32 = vpop.f32.mrf.mxu1  ;;  %3640 = vmatpush.bf16.msra.mxu2 %v4531_v4  ;;  %3669 = vmatpush.bf16.msra.mxu3 %v4627_v25  ;;  %v4831_v58 = vor.u32 %v5855_v10, %v4830_v9  ;;  %v5852_v4 = vld [vmem:[%s8948_s1 + $0x3d0] sm:$0xf0]  ;;  %v9057_v25 = vld [vmem:[#allocation26_spill] sm:$0xff] }
 0x1e6   : > { %v3358_v41 = vadd.f32 %v3357_v55, %v3329_v36  ;;  %v4734_v55 = vld [vmem:[%s8948_s1 + $0x320] sm:$0xf] }
 0x1e7   : > { %v4735_v34 = vor.u32 %v5831_v24, %v4734_v55  ;;  %3726 = vmatpush.bf16.msra.mxu1 %v4831_v58  ;;  %v9056_v55 = vld [vmem:[#allocation24_spill] sm:$0xff] }
 0x1e8   : > { %v8227_v43 = vadd.f32 %v3386_v14, %v3358_v41  ;;  %v3301_v60 = vpop.f32.mrf.mxu2  ;;  %v4722_v14 = vld [vmem:[%s8948_s1 + $0x308] sm:$0xf]  ;;  %v5828_v41 = vld [vmem:[%s8948_s1 + $0x310] sm:$0xf0] }
 0x1e9   : > { %v3302_v36 = vadd.f32 %v3301_v60, %v8032_v49  ;;  %3697 = vmatpush.bf16.msra.mxu0 %v4735_v34  ;;  %v4723_v30 = vor.u32 %v5828_v41, %v4722_v14  ;;  %v4818_v49 = vld [vmem:[%s8948_s1 + $0x3c8] sm:$0xf]  ;;  %v4998_v34 = vld [vmem:[%s8948_s1 + $0x530] sm:$0xf]  ;;  %v5897_v60 = vld [vmem:[%s8948_s1 + $0x538] sm:$0xf0] }
 0x1ea   : > { %v4819_v24 = vor.u32 %v5852_v4, %v4818_v49  ;;  %v4999_v9 = vor.u32 %v5897_v60, %v4998_v34  ;;  %v5082_v4 = vld [vmem:[%s8948_s1 + $0x5d8] sm:$0xf] }
 0x1eb   : > { %v3330_v52 = vpop.f32.mrf.mxu3  ;;  %v3362_v51 = vpop.f32.mrf.mxu0 }
 0x1ec   : > { %v3331_v29 = vadd.f32 %v3330_v52, %v3302_v36  ;;  %3727 = vmatpush.bf16.msra.mxu1 %v4819_v24  ;;  %3749 = vmatpush.bf16.msrb.mxu2 %v4999_v9  ;;  %v5945_v24 = vld [vmem:[%s8948_s1 + $0x6b8] sm:$0xf0] }
 0x1ed   : > { %v3391_v0 = vpop.f32.mrf.mxu1  ;;  %3535 = vmatmul.bf16.gmra.mxu2 %v9056_v55  ;;  %3698 = vmatpush.bf16.msra.mxu0 %v4723_v30 }
 0x1ee   : > { %v3360_v37 = vadd.f32 %v3359_v20, %v3331_v29  ;;  %3593 = vmatmul.bf16.gmra.mxu0 %v6271_v3  ;;  %v5094_v20 = vld [vmem:[%s8948_s1 + $0x5f0] sm:$0xf]  ;;  %v5921_v3 = vld [vmem:[%s8948_s1 + $0x5f8] sm:$0xf0] }
 0x1ef   : > { %v5095_v52 = vor.u32 %v5921_v3, %v5094_v20 }
 0x1f0   : > { %3564 = vmatmul.bf16.gmra.mxu3 %v9057_v25  ;;  %3622 = vmatmul.bf16.gmra.mxu1 %v6284_v8  ;;  %v8264_v10 = vadd.f32 %v3388_v32, %v3360_v37  ;;  %v3304_v36 = vpop.f32.mrf.mxu2  ;;  %v4986_v8 = vld [vmem:[%s8948_s1 + $0x518] sm:$0xf]  ;;  %v5894_v32 = vld [vmem:[%s8948_s1 + $0x520] sm:$0xf0] }
 0x1f1   : > { %v3305_v58 = vadd.f32 %v3304_v36, %v8053_v57  ;;  %3778 = vmatpush.bf16.msrb.mxu3 %v5095_v52  ;;  %v4987_v57 = vor.u32 %v5894_v32, %v4986_v8  ;;  %v5918_v37 = vld [vmem:[%s8948_s1 + $0x5e0] sm:$0xf0]  ;;  %v4974_v8 = vld [vmem:[%s8948_s1 + $0x500] sm:$0xf] }
 0x1f2   : > { %v5083_v34 = vor.u32 %v5918_v37, %v5082_v4  ;;  %v5915_v4 = vld [vmem:[%s8948_s1 + $0x5c8] sm:$0xf0]  ;;  %v5942_v37 = vld [vmem:[%s8948_s1 + $0x6a0] sm:$0xf0] }
 0x1f3   : > { %v3333_v14 = vpop.f32.mrf.mxu3  ;;  %v3364_v41 = vpop.f32.mrf.mxu0  ;;  %3750 = vmatpush.bf16.msrb.mxu2 %v4987_v57  ;;  %v5178_v57 = vld [vmem:[%s8948_s1 + $0x698] sm:$0xf] }
 0x1f4   : > { %v3334_v29 = vadd.f32 %v3333_v14, %v3305_v58 }
 0x1f5   : > { %v3393_v30 = vpop.f32.mrf.mxu1  ;;  %3779 = vmatpush.bf16.msrb.mxu3 %v5083_v34 }
 0x1f6   : > { %v3363_v49 = vadd.f32 %v3362_v51, %v3334_v29  ;;  %v5190_v51 = vld [vmem:[%s8948_s1 + $0x6b0] sm:$0xf] }
 0x1f7   : > { %v5191_v60 = vor.u32 %v5945_v24, %v5190_v51 }
 0x1f8   : > { %v8285_v20 = vadd.f32 %v3391_v0, %v3363_v49  ;;  %v3306_v9 = vpop.f32.mrf.mxu2  ;;  %v5286_v0 = vld [vmem:[%s8948_s1 + $0x770] sm:$0xf]  ;;  %v5969_v49 = vld [vmem:[%s8948_s1 + $0x778] sm:$0xf0] }
 0x1f9   : > { %v3307_v3 = vadd.f32 %v3306_v9, %v8084_v35  ;;  %3807 = vmatpush.bf16.msrb.mxu0 %v5191_v60  ;;  %v5287_v35 = vor.u32 %v5969_v49, %v5286_v0  ;;  %v5179_v60 = vor.u32 %v5942_v37, %v5178_v57  ;;  %v5274_v49 = vld [vmem:[%s8948_s1 + $0x758] sm:$0xf] }
 0x1fb   : > { %v3335_v36 = vpop.f32.mrf.mxu3  ;;  %v3367_v52 = vpop.f32.mrf.mxu0  ;;  %3836 = vmatpush.bf16.msrb.mxu1 %v5287_v35  ;;  %v5888_v35 = vld [vmem:[%s8948_s1 + $0x4f0] sm:$0xf0] }
 0x1fc   : > { %v3336_v58 = vadd.f32 %v3335_v36, %v3307_v3 }
 0x1fd   : > { %v3396_v14 = vpop.f32.mrf.mxu1  ;;  %3540 = vmatmul.bf16.gmra.mxu2 %v7349_v26  ;;  %3808 = vmatpush.bf16.msrb.mxu0 %v5179_v60 }
 0x1fe   : > { %v3365_v29 = vadd.f32 %v3364_v41, %v3336_v58  ;;  %3598 = vmatmul.bf16.gmra.mxu0 %v6387_v63  ;;  %v5891_v41 = vld [vmem:[%s8948_s1 + $0x508] sm:$0xf0]  ;;  %v5070_v63 = vld [vmem:[%s8948_s1 + $0x5c0] sm:$0xf] }
 0x1ff   : > { %v4975_v32 = vor.u32 %v5891_v41, %v4974_v8  ;;  %v5071_v34 = vor.u32 %v5915_v4, %v5070_v63  ;;  %v5912_v8 = vld [vmem:[%s8948_s1 + $0x5b0] sm:$0xf0]  ;;  %v5939_v4 = vld [vmem:[%s8948_s1 + $0x688] sm:$0xf0] }
 0x200   : > { %3569 = vmatmul.bf16.gmra.mxu3 %v7353_v45  ;;  %3627 = vmatmul.bf16.gmra.mxu1 %v6400_v6  ;;  %v8316_v51 = vadd.f32 %v3393_v30, %v3365_v29  ;;  %v3309_v24 = vpop.f32.mrf.mxu2  ;;  %v5966_v30 = vld [vmem:[%s8948_s1 + $0x760] sm:$0xf0] }
 0x201   : > { %v3310_v6 = vadd.f32 %v3309_v24, %v8111_v13  ;;  %3751 = vmatpush.bf16.msrb.mxu2 %v4975_v32  ;;  %3780 = vmatpush.bf16.msrb.mxu3 %v5071_v34  ;;  %v4962_v13 = vld [vmem:[%s8948_s1 + $0x4e8] sm:$0xf]  ;;  %v5275_v29 = vor.u32 %v5966_v30, %v5274_v49  ;;  %v5166_v32 = vld [vmem:[%s8948_s1 + $0x680] sm:$0xf]  ;;  %v4950_v30 = vld [vmem:[%s8948_s1 + $0x4d0] sm:$0xf] }
 0x202   : > { %v4963_v41 = vor.u32 %v5888_v35, %v4962_v13  ;;  %v5167_v24 = vor.u32 %v5939_v4, %v5166_v32  ;;  %v5154_v13 = vld [vmem:[%s8948_s1 + $0x668] sm:$0xf] }
 0x203   : > { %v3338_v9 = vpop.f32.mrf.mxu3  ;;  %v3369_v3 = vpop.f32.mrf.mxu0  ;;  %3837 = vmatpush.bf16.msrb.mxu1 %v5275_v29  ;;  %v5936_v29 = vld [vmem:[%s8948_s1 + $0x670] sm:$0xf0]  ;;  %v5250_v4 = vld [vmem:[%s8948_s1 + $0x728] sm:$0xf] }
 0x204   : > { %v3339_v36 = vadd.f32 %v3338_v9, %v3310_v6  ;;  %3809 = vmatpush.bf16.msrb.mxu0 %v5167_v24 }
 0x205   : > { %v3398_v58 = vpop.f32.mrf.mxu1  ;;  %3752 = vmatpush.bf16.msrb.mxu2 %v4963_v41 }
 0x206   : > { %v3368_v0 = vadd.f32 %v3367_v52, %v3339_v36  ;;  %v5058_v52 = vld [vmem:[%s8948_s1 + $0x5a8] sm:$0xf] }
 0x207   : > { %v5059_v63 = vor.u32 %v5912_v8, %v5058_v52 }
 0x208   : > { %v8343_v57 = vadd.f32 %v3396_v14, %v3368_v0  ;;  %v3311_v37 = vpop.f32.mrf.mxu2  ;;  %v5262_v14 = vld [vmem:[%s8948_s1 + $0x740] sm:$0xf] }
 0x209   : > { %v3312_v34 = vadd.f32 %v3311_v37, %v8142_v27  ;;  %3781 = vmatpush.bf16.msrb.mxu3 %v5059_v63  ;;  %v5963_v27 = vld [vmem:[%s8948_s1 + $0x748] sm:$0xf0]  ;;  %v4938_v37 = vld [vmem:[%s8948_s1 + $0x4b8] sm:$0xf] }
 0x20a   : > { %v5263_v0 = vor.u32 %v5963_v27, %v5262_v14  ;;  %v5142_v27 = vld [vmem:[%s8948_s1 + $0x650] sm:$0xf] }
 0x20b   : > { %v3340_v60 = vpop.f32.mrf.mxu3  ;;  %v8346_v6 = vpop.f32.mrf.mxu0 }
 0x20c   : > { %v3341_v9 = vadd.f32 %v3340_v60, %v3312_v34  ;;  %3838 = vmatpush.bf16.msrb.mxu1 %v5263_v0  ;;  %v5882_v34 = vld [vmem:[%s8948_s1 + $0x4c0] sm:$0xf0]  ;;  %v5034_v60 = vld [vmem:[%s8948_s1 + $0x578] sm:$0xf]  ;;  %v5933_v0 = vld [vmem:[%s8948_s1 + $0x658] sm:$0xf0] }
 0x20d   : > { %v8348_v36 = vpop.f32.mrf.mxu1  ;;  %3641 = vmatmul.bf16.vlgmr.msra.gmra.mxu2 %v6509_v7  ;;  %v5885_v7 = vld [vmem:[%s8948_s1 + $0x4d8] sm:$0xf0] }
 0x20e   : > { %v3370_v49 = vadd.f32 %v3369_v3, %v3341_v9  ;;  %3699 = vmatmul.bf16.vlgmr.msra.gmra.mxu0 %v6511_v11  ;;  %v5046_v11 = vld [vmem:[%s8948_s1 + $0x590] sm:$0xf]  ;;  %v4951_v3 = vor.u32 %v5885_v7, %v4950_v30  ;;  %v5906_v9 = vld [vmem:[%s8948_s1 + $0x580] sm:$0xf0]  ;;  %v5143_v7 = vor.u32 %v5933_v0, %v5142_v27 }
 0x20f   : > { %v5035_v14 = vor.u32 %v5906_v9, %v5034_v60  ;;  %v5954_v27 = vld [vmem:[%s8948_s1 + $0x700] sm:$0xf0] }
 0x210   : > { %3670 = vmatmul.bf16.vlgmr.msra.gmra.mxu3 %v6522_v15  ;;  %3728 = vmatmul.bf16.vlgmr.msra.gmra.mxu1 %v6524_v17  ;;  %v5909_v15 = vld [vmem:[%s8948_s1 + $0x598] sm:$0xf0]  ;;  %v8378_v35 = vadd.f32 %v3398_v58, %v3370_v49  ;;  %v8380_v52 = vpop.f32.mrf.mxu2  ;;  %v5155_v17 = vor.u32 %v5936_v29, %v5154_v13  ;;  %v5960_v58 = vld [vmem:[%s8948_s1 + $0x730] sm:$0xf0]  ;;  %v4939_v49 = vor.u32 %v5882_v34, %v4938_v37  ;;  %v5238_v13 = vld [vmem:[%s8948_s1 + $0x710] sm:$0xf] }
 0x211   : > { %v5047_v8 = vor.u32 %v5909_v15, %v5046_v11  ;;  %3753 = vmatpush.bf16.msrb.mxu2 %v4951_v3  ;;  %v5251_v24 = vor.u32 %v5960_v58, %v5250_v4  ;;  %v5957_v29 = vld [vmem:[%s8948_s1 + $0x718] sm:$0xf0]  ;;  %v5130_v58 = vld [vmem:[%s8948_s1 + $0x638] sm:$0xf]  ;;  %v5930_v37 = vld [vmem:[%s8948_s1 + $0x640] sm:$0xf0] }
 0x212   : > { %3810 = vmatpush.bf16.msrb.mxu0 %v5155_v17  ;;  %v4926_v17 = vld [vmem:[%s8948_s1 + $0x4a0] sm:$0xf]  ;;  %v5131_v60 = vor.u32 %v5930_v37, %v5130_v58 }
 0x213   : > { %v8382_v41 = vpop.f32.mrf.mxu3  ;;  %v8384_v63 = vpop.f32.mrf.mxu0  ;;  %3782 = vmatpush.bf16.msrb.mxu3 %v5047_v8  ;;  %3839 = vmatpush.bf16.msrb.mxu1 %v5251_v24  ;;  %v5239_v8 = vor.u32 %v5957_v29, %v5238_v13  ;;  %v5876_v13 = vld [vmem:[%s8948_s1 + $0x490] sm:$0xf0]  ;;  %v5010_v29 = vld [vmem:[%s8948_s1 + $0x548] sm:$0xf]  ;;  %v5214_v37 = vld [vmem:[%s8948_s1 + $0x6e0] sm:$0xf] }
 0x215   : > { %v8386_v32 = vpop.f32.mrf.mxu1  ;;  %3754 = vmatpush.bf16.msrb.mxu2 %v4939_v49 }
 0x216   : > { %3811 = vmatpush.bf16.msrb.mxu0 %v5143_v7  ;;  %v4914_v7 = vld [vmem:[%s8948_s1 + $0x488] sm:$0xf] }
 0x217   : > { %3783 = vmatpush.bf16.msrb.mxu3 %v5035_v14  ;;  %3840 = vmatpush.bf16.msrb.mxu1 %v5239_v8  ;;  %v5226_v14 = vld [vmem:[%s8948_s1 + $0x6f8] sm:$0xf]  ;;  %v4915_v8 = vor.u32 %v5876_v13, %v4914_v7  ;;  %v5924_v7 = vld [vmem:[%s8948_s1 + $0x610] sm:$0xf0] }
 0x218   : > { %v8412_v30 = vpop.f32.mrf.mxu2  ;;  %v5227_v0 = vor.u32 %v5954_v27, %v5226_v14 }
 0x21a   : > { %3812 = vmatpush.bf16.msrb.mxu0 %v5131_v60 }
 0x21b   : > { %v8414_v11 = vpop.f32.mrf.mxu3  ;;  %v8416_v3 = vpop.f32.mrf.mxu0  ;;  %3841 = vmatpush.bf16.msrb.mxu1 %v5227_v0  ;;  %v5106_v0 = vld [vmem:[%s8948_s1 + $0x608] sm:$0xf] }
 0x21c   : > { %v5107_v13 = vor.u32 %v5924_v7, %v5106_v0 }
 0x21d   : > { %v8418_v15 = vpop.f32.mrf.mxu1  ;;  %3646 = vmatmul.bf16.gmra.mxu2 %v6622_v16  ;;  %v5879_v16 = vld [vmem:[%s8948_s1 + $0x4a8] sm:$0xf0] }
 0x21e   : > { %3704 = vmatmul.bf16.gmra.mxu0 %v6624_v18  ;;  %v5022_v18 = vld [vmem:[%s8948_s1 + $0x560] sm:$0xf]  ;;  %v4927_v4 = vor.u32 %v5879_v16, %v4926_v17  ;;  %v5900_v17 = vld [vmem:[%s8948_s1 + $0x550] sm:$0xf0] }
 0x21f   : > { %v5118_v16 = vld [vmem:[%s8948_s1 + $0x620] sm:$0xf] }
 0x220   : > { %3675 = vmatmul.bf16.gmra.mxu3 %v6632_v21  ;;  %3733 = vmatmul.bf16.gmra.mxu1 %v6634_v23  ;;  %v5903_v21 = vld [vmem:[%s8948_s1 + $0x568] sm:$0xf0]  ;;  %v8448_v24 = vpop.f32.mrf.mxu2 }
 0x221   : > { %v5023_v34 = vor.u32 %v5903_v21, %v5022_v18  ;;  %3755 = vmatpush.bf16.msrb.mxu2 %v4927_v4  ;;  %v5927_v18 = vld [vmem:[%s8948_s1 + $0x628] sm:$0xf0]  ;;  %v5011_v4 = vor.u32 %v5900_v17, %v5010_v29  ;;  %v5948_v17 = vld [vmem:[%s8948_s1 + $0x6d0] sm:$0xf0] }
 0x222   : > { %v5119_v21 = vor.u32 %v5927_v18, %v5118_v16  ;;  %v5382_v18 = vld [vmem:[%s8948_s1 + $0x830] sm:$0xf] }
 0x223   : > { %v8450_v9 = vpop.f32.mrf.mxu3  ;;  %v8452_v23 = vpop.f32.mrf.mxu0  ;;  %3784 = vmatpush.bf16.msrb.mxu3 %v5023_v34  ;;  %v5951_v34 = vld [vmem:[%s8948_s1 + $0x6e8] sm:$0xf0] }
 0x224   : > { %3813 = vmatpush.bf16.msrb.mxu0 %v5119_v21  ;;  %v5215_v14 = vor.u32 %v5951_v34, %v5214_v37  ;;  %v5478_v21 = vld [vmem:[%s8948_s1 + $0x8f0] sm:$0xf] }
 0x225   : > { %v8454_v49 = vpop.f32.mrf.mxu1  ;;  %3756 = vmatpush.bf16.msrb.mxu2 %v4915_v8  ;;  %v5202_v8 = vld [vmem:[%s8948_s1 + $0x6c8] sm:$0xf] }
 0x226   : > { %3842 = vmatpush.bf16.msrb.mxu1 %v5215_v14  ;;  %v5203_v16 = vor.u32 %v5948_v17, %v5202_v8  ;;  %v5990_v8 = vld [vmem:[%s8948_s1 + $0x820] sm:$0xf0]  ;;  %v5466_v17 = vld [vmem:[%s8948_s1 + $0x8d8] sm:$0xf] }
 0x227   : > { %3785 = vmatpush.bf16.msrb.mxu3 %v5011_v4  ;;  %v5993_v4 = vld [vmem:[%s8948_s1 + $0x838] sm:$0xf0] }
 0x228   : > { %v8480_v58 = vpop.f32.mrf.mxu2  ;;  %3814 = vmatpush.bf16.msrb.mxu0 %v5107_v13  ;;  %v5370_v13 = vld [vmem:[%s8948_s1 + $0x818] sm:$0xf] }
 0x22a   : > { %3843 = vmatpush.bf16.msrb.mxu1 %v5203_v16 }
 0x22b   : > { %v8488_v60 = vpop.f32.mrf.mxu3  ;;  %v8490_v27 = vpop.f32.mrf.mxu0 }
 0x22d   : > { %v8498_v29 = vpop.f32.mrf.mxu1  ;;  %3651 = vmatmul.bf16.gmra.mxu2 %v6702_v61  ;;  %v5383_v61 = vor.u32 %v5993_v4, %v5382_v18  ;;  %v5371_v18 = vor.u32 %v5990_v8, %v5370_v13  ;;  %v6014_v4 = vld [vmem:[%s8948_s1 + $0x8e0] sm:$0xf0] }
 0x22e   : > { %3709 = vmatmul.bf16.gmra.mxu0 %v6704_v62  ;;  %v6017_v62 = vld [vmem:[%s8948_s1 + $0x8f8] sm:$0xf0] }
 0x22f   : > { %v5479_v37 = vor.u32 %v6017_v62, %v5478_v21  ;;  %3865 = vmatpush.bf16.msra.mxu2 %v5383_v61  ;;  %v5574_v21 = vld [vmem:[%s8948_s1 + $0x9b0] sm:$0xf]  ;;  %v6041_v61 = vld [vmem:[%s8948_s1 + $0x9b8] sm:$0xf0]  ;;  %v5467_v62 = vor.u32 %v6014_v4, %v5466_v17  ;;  %v5454_v4 = vld [vmem:[%s8948_s1 + $0x8c0] sm:$0xf] }
 0x230   : > { %3680 = vmatmul.bf16.gmra.mxu3 %v6706_v1  ;;  %3738 = vmatmul.bf16.gmra.mxu1 %v6708_v2  ;;  %v8522_v1 = vpop.f32.mrf.mxu2  ;;  %v5670_v17 = vld [vmem:[%s8948_s1 + $0xa70] sm:$0xf] }
 0x231   : > { %3894 = vmatpush.bf16.msra.mxu3 %v5479_v37  ;;  %v5575_v37 = vor.u32 %v6041_v61, %v5574_v21  ;;  %v6011_v21 = vld [vmem:[%s8948_s1 + $0x8c8] sm:$0xf0]  ;;  %v3411_v61 = vadd.f32 %v8380_v52, %v8169_v54  ;;  %v6093_v54 = vld [vmem:[%s8949_s2] sm:$0x7] }
 0x232   : > { %v8598_v52 = vperm.slane %v6093_v54, 2 }
 0x233   : > { %v8524_v34 = vpop.f32.mrf.mxu3  ;;  %v8526_v14 = vpop.f32.mrf.mxu0  ;;  %3866 = vmatpush.bf16.msra.mxu2 %v5371_v18  ;;  %3923 = vmatpush.bf16.msra.mxu0 %v5575_v37  ;;  %v5987_v18 = vld [vmem:[%s8948_s1 + $0x808] sm:$0xf0]  ;;  %v5455_v37 = vor.u32 %v6011_v21, %v5454_v4  ;;  %v3440_v55 = vadd.f32 %v8382_v41, %v3411_v61  ;;  %v5346_v41 = vld [vmem:[%s8948_s1 + $0x7e8] sm:$0xf]  ;;  %v3413_v4 = vadd.f32 %v8412_v30, %v8200_v22  ;;  %v5550_v30 = vld [vmem:[%s8948_s1 + $0x980] sm:$0xf] }
 0x235   : > { %v8528_v0 = vpop.f32.mrf.mxu1  ;;  %3895 = vmatpush.bf16.msra.mxu3 %v5467_v62 }
 0x238   : > { %v8530_v7 = vpop.f32.mrf.mxu2 }
 0x239   : > { %3896 = vmatpush.bf16.msra.mxu3 %v5455_v37  ;;  %v5442_v37 = vld [vmem:[%s8948_s1 + $0x8a8] sm:$0xf] }
 0x23b   : > { %v8532_v2 = vpop.f32.mrf.mxu3  ;;  %v8543_v16 = vpop.f32.mrf.mxu0 }
 0x23d   : > { %v8554_v45 = vpop.f32.mrf.mxu1  ;;  %3656 = vmatmul.bf16.gmra.mxu2 %v6764_v46  ;;  %v6065_v46 = vld [vmem:[%s8948_s1 + $0xa78] sm:$0xf0] }
 0x23e   : > { %3714 = vmatmul.bf16.gmra.mxu0 %v6766_v47  ;;  %v5358_v47 = vld [vmem:[%s8948_s1 + $0x800] sm:$0xf] }
 0x23f   : > { %v5359_v62 = vor.u32 %v5987_v18, %v5358_v47 }
 0x240   : > { %3685 = vmatmul.bf16.gmra.mxu3 %v6768_v48  ;;  %3743 = vmatmul.bf16.gmra.mxu1 %v9034_v44  ;;  %v8560_v13 = vpop.f32.mrf.mxu2  ;;  %v5671_v44 = vor.u32 %v6065_v46, %v5670_v17  ;;  %v5562_v17 = vld [vmem:[%s8948_s1 + $0x998] sm:$0xf]  ;;  %v6038_v46 = vld [vmem:[%s8948_s1 + $0x9a0] sm:$0xf0] }
 0x241   : > { %v5563_v25 = vor.u32 %v6038_v46, %v5562_v17  ;;  %3867 = vmatpush.bf16.msra.mxu2 %v5359_v62  ;;  %v5984_v62 = vld [vmem:[%s8948_s1 + $0x7f0] sm:$0xf0]  ;;  %v3469_v46 = vadd.f32 %v8346_v6, %v3440_v55  ;;  %v3442_v55 = vadd.f32 %v8414_v11, %v3413_v4  ;;  %v5981_v11 = vld [vmem:[%s8948_s1 + $0x7d8] sm:$0xf0]  ;;  %v5430_v4 = vld [vmem:[%s8948_s1 + $0x890] sm:$0xf] }
 0x242   : > { %3952 = vmatpush.bf16.msra.mxu1 %v5671_v44  ;;  %v5658_v44 = vld [vmem:[%s8948_s1 + $0xa58] sm:$0xf]  ;;  %v6008_v17 = vld [vmem:[%s8948_s1 + $0x8b0] sm:$0xf0]  ;;  %v5347_v59 = vor.u32 %v5984_v62, %v5346_v41  ;;  %v6005_v62 = vld [vmem:[%s8948_s1 + $0x898] sm:$0xf0] }
 0x243   : > { %v8562_v8 = vpop.f32.mrf.mxu3  ;;  %v8573_v48 = vpop.f32.mrf.mxu0  ;;  %3924 = vmatpush.bf16.msra.mxu0 %v5563_v25  ;;  %v6062_v25 = vld [vmem:[%s8948_s1 + $0xa60] sm:$0xf0]  ;;  %v5443_v22 = vor.u32 %v6008_v17, %v5442_v37  ;;  %v3498_v6 = vadd.f32 %v8348_v36, %v3469_v46  ;;  %v6032_v46 = vld [vmem:[%s8948_s1 + $0x970] sm:$0xf0] }
 0x244   : > { %v5659_v61 = vor.u32 %v6062_v25, %v5658_v44  ;;  %v6035_v44 = vld [vmem:[%s8948_s1 + $0x988] sm:$0xf0] }
 0x245   : > { %v8592_v26 = vpop.f32.mrf.mxu1  ;;  %v5551_v39 = vor.u32 %v6035_v44, %v5550_v30  ;;  %3868 = vmatpush.bf16.msra.mxu2 %v5347_v59  ;;  %3897 = vmatpush.bf16.msra.mxu3 %v5443_v22  ;;  %v3416_v59 = vadd.f32 %v8448_v24, %v8227_v43  ;;  %v5431_v43 = vor.u32 %v6005_v62, %v5430_v4  ;;  %v5538_v24 = vld [vmem:[%s8948_s1 + $0x968] sm:$0xf]  ;;  %v3981_v30 = vmax.f32 %v7676_v42, 0.0 }
 0x246   : > { %3953 = vmatpush.bf16.msra.mxu1 %v5659_v61  ;;  %v5539_v22 = vor.u32 %v6032_v46, %v5538_v24 }
 0x247   : > { %3925 = vmatpush.bf16.msra.mxu0 %v5551_v39 }
 0x248   : > { %v8600_v47 = vpop.f32.mrf.mxu2 }
 0x249   : > { %3898 = vmatpush.bf16.msra.mxu3 %v5431_v43  ;;  %v3984_v43 = vmax.f32 %v7706_v28, 0.0 }
 0x24b   : > { %v8602_v18 = vpop.f32.mrf.mxu3  ;;  %v3584_v21 = vpop.f32.mrf.mxu0  ;;  %3926 = vmatpush.bf16.msra.mxu0 %v5539_v22 }
 0x24c   : > { %v3585_v54 = vadd.f32 %v3584_v21, %v8598_v52 }
 0x24d   : > { %v3613_v25 = vpop.f32.mrf.mxu1  ;;  %3757 = vmatmul.bf16.vlgmr.msrb.gmra.mxu2 %v6832_v38  ;;  %v5646_v38 = vld [vmem:[%s8948_s1 + $0xa40] sm:$0xf] }
 0x24e   : > { %v8633_v12 = vadd.f32 %v3613_v25, %v3585_v54  ;;  %3815 = vmatmul.bf16.vlgmr.msrb.gmra.mxu0 %v9038_v5  ;;  %v6059_v5 = vld [vmem:[%s8948_s1 + $0xa48] sm:$0xf0] }
 0x24f   : > { %v5647_v36 = vor.u32 %v6059_v5, %v5646_v38  ;;  %v5634_v38 = vld [vmem:[%s8948_s1 + $0xa28] sm:$0xf]  ;;  %v5322_v5 = vld [vmem:[%s8948_s1 + $0x7b8] sm:$0xf] }
 0x250   : > { %3786 = vmatmul.bf16.vlgmr.msrb.gmra.mxu3 %v6836_v40  ;;  %3844 = vmatmul.bf16.vlgmr.msrb.gmra.mxu1 %v9040_v53  ;;  %v3526_v41 = vpop.f32.mrf.mxu2  ;;  %v5334_v40 = vld [vmem:[%s8948_s1 + $0x7d0] sm:$0xf]  ;;  %v3471_v53 = vadd.f32 %v8384_v63, %v3442_v55  ;;  %v3445_v55 = vadd.f32 %v8450_v9, %v3416_v59  ;;  %v6056_v9 = vld [vmem:[%s8948_s1 + $0xa30] sm:$0xf0] }
 0x251   : > { %v3527_v21 = vadd.f32 %v3526_v41, %v3498_v6  ;;  %v5335_v17 = vor.u32 %v5981_v11, %v5334_v40  ;;  %3954 = vmatpush.bf16.msra.mxu1 %v5647_v36  ;;  %v5635_v59 = vor.u32 %v6056_v9, %v5634_v38  ;;  %v5418_v36 = vld [vmem:[%s8948_s1 + $0x878] sm:$0xf]  ;;  %v6002_v11 = vld [vmem:[%s8948_s1 + $0x880] sm:$0xf0] }
 0x252   : > { %v3500_v41 = vadd.f32 %v8386_v32, %v3471_v53  ;;  %v3474_v40 = vadd.f32 %v8416_v3, %v3445_v55  ;;  %v3418_v32 = vadd.f32 %v8480_v58, %v8264_v10  ;;  %v5526_v10 = vld [vmem:[%s8948_s1 + $0x950] sm:$0xf]  ;;  %v6029_v58 = vld [vmem:[%s8948_s1 + $0x958] sm:$0xf0]  ;;  %v3421_v55 = vadd.f32 %v8522_v1, %v8285_v20  ;;  %v6026_v1 = vld [vmem:[%s8948_s1 + $0x940] sm:$0xf0] }
 0x253   : > { %v3555_v61 = vpop.f32.mrf.mxu3  ;;  %v3586_v39 = vpop.f32.mrf.mxu0  ;;  %3869 = vmatpush.bf16.msra.mxu2 %v5335_v17  ;;  %v5527_v17 = vor.u32 %v6029_v58, %v5526_v10 }
 0x254   : > { %v3556_v37 = vadd.f32 %v3555_v61, %v3527_v21  ;;  %v3587_v63 = vadd.f32 %v3586_v39, %v8598_v52  ;;  %v5978_v39 = vld [vmem:[%s8948_s1 + $0x7c0] sm:$0xf0] }
 0x255   : > { %v3615_v54 = vpop.f32.mrf.mxu1  ;;  %v5323_v62 = vor.u32 %v5978_v39, %v5322_v5  ;;  %3955 = vmatpush.bf16.msra.mxu1 %v5635_v59  ;;  %3927 = vmatpush.bf16.msra.mxu0 %v5527_v17  ;;  %v3987_v59 = vmax.f32 %v7746_v50, 0.0  ;;  %v5394_v17 = vld [vmem:[%s8948_s1 + $0x848] sm:$0xf] }
 0x256   : > { %v3982_v44 = vmax.f32 %v3556_v37, 0.0  ;;  %v8670_v25 = vadd.f32 %v3615_v54, %v3587_v63  ;;  %v5419_v37 = vor.u32 %v6002_v11, %v5418_v36  ;;  %v3447_v54 = vadd.f32 %v8488_v60, %v3418_v32 }
 0x257   : > { %3870 = vmatpush.bf16.msra.mxu2 %v5323_v62  ;;  %v6023_v62 = vld [vmem:[%s8948_s1 + $0x928] sm:$0xf0] }
 0x258   : > { %v4005_v6 = vpack.c.bf16 %v3982_v44, %v3981_v30  ;;  %v3528_v21 = vpop.f32.mrf.mxu2  ;;  %v3503_v30 = vadd.f32 %v8418_v15, %v3474_v40  ;;  %3899 = vmatpush.bf16.msra.mxu3 %v5419_v37  ;;  %v5310_v15 = vld [vmem:[%s8948_s1 + $0x7a0] sm:$0xf]  ;;  %v3476_v38 = vadd.f32 %v8452_v23, %v3447_v54  ;;  %v6050_v23 = vld [vmem:[%s8948_s1 + $0xa00] sm:$0xf0] }
 0x259   : > { %v3529_v42 = vadd.f32 %v3528_v21, %v3500_v41  ;;  %v5406_v21 = vld [vmem:[%s8948_s1 + $0x860] sm:$0xf] }
 0x25a   : > { %4021 = vst [vmem:[%s8678_s6] sm:$0xff] %v4005_v6  ;;  %v3505_v50 = vadd.f32 %v8454_v49, %v3476_v38  ;;  %v5996_v49 = vld [vmem:[%s8948_s1 + $0x850] sm:$0xf0] }
 0x25b   : > { %v3557_v61 = vpop.f32.mrf.mxu3  ;;  %v3589_v53 = vpop.f32.mrf.mxu0 }
 0x25c   : > { %v3558_v4 = vadd.f32 %v3557_v61, %v3529_v42  ;;  %v3590_v3 = vadd.f32 %v3589_v53, %v8598_v52  ;;  %v5999_v42 = vld [vmem:[%s8948_s1 + $0x868] sm:$0xf0]  ;;  %v5514_v61 = vld [vmem:[%s8948_s1 + $0x938] sm:$0xf] }
 0x25d   : > { %v3618_v63 = vpop.f32.mrf.mxu1  ;;  %3762 = vmatmul.bf16.gmra.mxu2 %v6894_v31  ;;  %v5622_v31 = vld [vmem:[%s8948_s1 + $0xa10] sm:$0xf]  ;;  %v5407_v20 = vor.u32 %v5999_v42, %v5406_v21  ;;  %v5515_v32 = vor.u32 %v6026_v1, %v5514_v61  ;;  %v5610_v53 = vld [vmem:[%s8948_s1 + $0x9f8] sm:$0xf]  ;;  %v9059_v61 = vld [vmem:[#allocation7_spill] sm:$0xff] }
 0x25e   : > { %v3985_v24 = vmax.f32 %v3558_v4, 0.0  ;;  %v8712_v46 = vadd.f32 %v3618_v63, %v3590_v3  ;;  %3820 = vmatmul.bf16.gmra.mxu0 %v9043_v56  ;;  %v6053_v56 = vld [vmem:[%s8948_s1 + $0xa18] sm:$0xf0]  ;;  %v5611_v11 = vor.u32 %v6050_v23, %v5610_v53  ;;  %v3450_v4 = vadd.f32 %v8524_v34, %v3421_v55  ;;  %v5502_v3 = vld [vmem:[%s8948_s1 + $0x920] sm:$0xf] }
 0x25f   : > { %v5623_v60 = vor.u32 %v6053_v56, %v5622_v31  ;;  %3900 = vmatpush.bf16.msra.mxu3 %v5407_v20  ;;  %3928 = vmatpush.bf16.msra.mxu0 %v5515_v32  ;;  %v5503_v10 = vor.u32 %v6023_v62, %v5502_v3  ;;  %v5298_v63 = vld [vmem:[%s8948_s1 + $0x788] sm:$0xf]  ;;  %v5972_v34 = vld [vmem:[%s8948_s1 + $0x790] sm:$0xf0]  ;;  %v5395_v56 = vor.u32 %v5996_v49, %v5394_v17  ;;  %v9062_v53 = vld [vmem:[#allocation10_spill] sm:$0xff] }
 0x260   : > { %3791 = vmatmul.bf16.gmra.mxu3 %v6898_v33  ;;  %v4007_v22 = vpack.c.bf16 %v3985_v24, %v3984_v43  ;;  %3849 = vmatmul.bf16.gmra.mxu1 %v9044_v19  ;;  %v3531_v28 = vpop.f32.mrf.mxu2  ;;  %v5975_v19 = vld [vmem:[%s8948_s1 + $0x7a8] sm:$0xf0]  ;;  %v5299_v54 = vor.u32 %v5972_v34, %v5298_v63  ;;  %v5586_v55 = vld [vmem:[%s8948_s1 + $0x9c8] sm:$0xf]  ;;  %v3426_v3 = vadd.f32 %v8560_v13, %v8343_v57 }
 0x261   : > { %v3532_v33 = vadd.f32 %v3531_v28, %v3503_v30  ;;  %v5311_v41 = vor.u32 %v5975_v19, %v5310_v15  ;;  %3956 = vmatpush.bf16.msra.mxu1 %v5623_v60  ;;  %v3479_v30 = vadd.f32 %v8490_v27, %v3450_v4  ;;  %v3423_v28 = vadd.f32 %v8530_v7, %v8316_v51  ;;  %v6020_v60 = vld [vmem:[%s8948_s1 + $0x910] sm:$0xf0] }
 0x262   : > { %4023 = vst [vmem:[%s8678_s6 + $0xc] sm:$0xff] %v4007_v22  ;;  %v5598_v22 = vld [vmem:[%s8948_s1 + $0x9e0] sm:$0xf]  ;;  %v3455_v63 = vadd.f32 %v8562_v8, %v3426_v3  ;;  %v3428_v13 = vadd.f32 %v8600_v47, %v8378_v35 }
 0x263   : > { %v3560_v44 = vpop.f32.mrf.mxu3  ;;  %v3591_v6 = vpop.f32.mrf.mxu0  ;;  %3871 = vmatpush.bf16.msra.mxu2 %v5311_v41  ;;  %3929 = vmatpush.bf16.msra.mxu0 %v5503_v10  ;;  %v9058_v41 = vld [vmem:[#allocation31_spill] sm:$0xff]  ;;  %v3452_v1 = vadd.f32 %v8532_v2, %v3423_v28  ;;  %v3508_v32 = vadd.f32 %v8498_v29, %v3479_v30  ;;  %v9063_v29 = vld [vmem:[#allocation32_spill] sm:$0xff]  ;;  %v9064_v28 = vld [vmem:[#allocation2_spill] sm:$0xff] }
 0x264   : > { %v3561_v9 = vadd.f32 %v3560_v44, %v3532_v33  ;;  %v3592_v5 = vadd.f32 %v3591_v6, %v8598_v52  ;;  %v6047_v33 = vld [vmem:[%s8948_s1 + $0x9e8] sm:$0xf0]  ;;  %v5490_v44 = vld [vmem:[%s8948_s1 + $0x908] sm:$0xf]  ;;  %3901 = vmatpush.bf16.msra.mxu3 %v5395_v56  ;;  %v6044_v6 = vld [vmem:[%s8948_s1 + $0x9d0] sm:$0xf0]  ;;  %v3484_v57 = vadd.f32 %v8543_v16, %v3455_v63  ;;  %v3457_v16 = vadd.f32 %v8602_v18, %v3428_v13 }
 0x265   : > { %v3620_v40 = vpop.f32.mrf.mxu1  ;;  %3957 = vmatpush.bf16.msra.mxu1 %v5611_v11  ;;  %v5599_v51 = vor.u32 %v6047_v33, %v5598_v22  ;;  %v5491_v7 = vor.u32 %v6020_v60, %v5490_v44  ;;  %v3990_v21 = vmax.f32 %v9058_v41, 0.0  ;;  %v5587_v20 = vor.u32 %v6044_v6, %v5586_v55  ;;  %v9065_v56 = vld [vmem:[#allocation11_spill] sm:$0xff]  ;;  %v9066_v33 = vld [vmem:[#allocation12_spill] sm:$0xff]  ;;  %v9067_v44 = vld [vmem:[#allocation13_spill] sm:$0xff] }
 0x266   : > { %v3988_v39 = vmax.f32 %v3561_v9, 0.0  ;;  %v8755_v36 = vadd.f32 %v3620_v40, %v3592_v5  ;;  %v9060_v9 = vld [vmem:[#allocation8_spill] sm:$0xff]  ;;  %v9061_v5 = vld [vmem:[#allocation9_spill] sm:$0xff]  ;;  %v3481_v4 = vadd.f32 %v8526_v14, %v3452_v1  ;;  %v3996_v8 = vmax.f32 %v9064_v28, 0.0  ;;  %v9068_v47 = vld [vmem:[#allocation14_spill] sm:$0xff] }
 0x267   : > { %3872 = vmatpush.bf16.msra.mxu2 %v5299_v54  ;;  %3930 = vmatpush.bf16.msra.mxu0 %v5491_v7  ;;  %v3513_v35 = vadd.f32 %v8554_v45, %v3484_v57  ;;  %v9074_v3 = vld [vmem:[#allocation18_spill] sm:$0xff]  ;;  %v9075_v13 = vld [vmem:[#allocation19_spill] sm:$0xff] }
 0x268   : > { %v4009_v37 = vpack.c.bf16 %v3988_v39, %v3987_v59  ;;  %v3533_v58 = vpop.f32.mrf.mxu2  ;;  %v3510_v17 = vadd.f32 %v8528_v0, %v3481_v4 }
 0x269   : > { %v3534_v43 = vadd.f32 %v3533_v58, %v3505_v50  ;;  %3958 = vmatpush.bf16.msra.mxu1 %v5599_v51  ;;  %v3993_v50 = vmax.f32 %v9063_v29, 0.0 }
 0x26a   : > { %4025 = vst [vmem:[%s8678_s6 + $0x18] sm:$0xff] %v4009_v37 }
 0x26b   : > { %v3562_v24 = vpop.f32.mrf.mxu3  ;;  %v3594_v31 = vpop.f32.mrf.mxu0 }
 0x26c   : > { %v3563_v15 = vadd.f32 %v3562_v24, %v3534_v43  ;;  %v3595_v27 = vadd.f32 %v3594_v31, %v8598_v52 }
 0x26d   : > { %v3623_v19 = vpop.f32.mrf.mxu1  ;;  %3767 = vmatmul.bf16.gmra.mxu2 %v9059_v61  ;;  %3959 = vmatpush.bf16.msra.mxu1 %v5587_v20 }
 0x26e   : > { %v3991_v42 = vmax.f32 %v3563_v15, 0.0  ;;  %v8802_v38 = vadd.f32 %v3623_v19, %v3595_v27  ;;  %3825 = vmatmul.bf16.gmra.mxu0 %v9060_v9  ;;  %v3486_v19 = vadd.f32 %v8573_v48, %v3457_v16 }
 0x270   : > { %3796 = vmatmul.bf16.gmra.mxu3 %v9061_v5  ;;  %v4011_v40 = vpack.c.bf16 %v3991_v42, %v3990_v21  ;;  %3854 = vmatmul.bf16.gmra.mxu1 %v9062_v53  ;;  %v3536_v23 = vpop.f32.mrf.mxu2  ;;  %v9069_v21 = vld [vmem:[#allocation33_spill] sm:$0xff]  ;;  %v3515_v9 = vadd.f32 %v8592_v26, %v3486_v19  ;;  %v9070_v53 = vld [vmem:[#allocation3_spill] sm:$0xff] }
 0x271   : > { %v3537_v59 = vadd.f32 %v3536_v23, %v3508_v32  ;;  %v3999_v42 = vmax.f32 %v9069_v21, 0.0  ;;  %v4002_v23 = vmax.f32 %v9070_v53, 0.0  ;;  %v9079_v19 = vld [vmem:[#allocation23_spill] sm:$0xff] }
 0x272   : > { %4027 = vst [vmem:[%s8678_s6 + $0x24] sm:$0xff] %v4011_v40 }
 0x273   : > { %v3565_v39 = vpop.f32.mrf.mxu3  ;;  %v3596_v11 = vpop.f32.mrf.mxu0 }
 0x274   : > { %v3566_v62 = vadd.f32 %v3565_v39, %v3537_v59  ;;  %v3597_v2 = vadd.f32 %v3596_v11, %v8598_v52  ;;  %v9071_v59 = vld [vmem:[#allocation15_spill] sm:$0xff]  ;;  %v9072_v39 = vld [vmem:[#allocation16_spill] sm:$0xff]  ;;  %v9073_v11 = vld [vmem:[#allocation17_spill] sm:$0xff] }
 0x275   : > { %v3625_v37 = vpop.f32.mrf.mxu1 }
 0x276   : > { %v3994_v10 = vmax.f32 %v3566_v62, 0.0  ;;  %v8815_v58 = vadd.f32 %v3625_v37, %v3597_v2 }
 0x278   : > { %v4013_v34 = vpack.c.bf16 %v3994_v10, %v3993_v50  ;;  %v3538_v43 = vpop.f32.mrf.mxu2 }
 0x279   : > { %v3539_v14 = vadd.f32 %v3538_v43, %v3510_v17 }
 0x27a   : > { %4029 = vst [vmem:[%s8678_s6 + $0x30] sm:$0xff] %v4013_v34 }
 0x27b   : > { %v3567_v24 = vpop.f32.mrf.mxu3  ;;  %v3599_v54 = vpop.f32.mrf.mxu0 }
 0x27c   : > { %v3568_v49 = vadd.f32 %v3567_v24, %v3539_v14  ;;  %v3600_v22 = vadd.f32 %v3599_v54, %v8598_v52 }
 0x27d   : > { %v3628_v30 = vpop.f32.mrf.mxu1  ;;  %3772 = vmatmul.bf16.gmra.mxu2 %v9065_v56 }
 0x27e   : > { %v3997_v31 = vmax.f32 %v3568_v49, 0.0  ;;  %v8826_v0 = vadd.f32 %v3628_v30, %v3600_v22  ;;  %3830 = vmatmul.bf16.gmra.mxu0 %v9066_v33  ;;  %v9076_v49 = vld [vmem:[#allocation20_spill] sm:$0xff]  ;;  %v9078_v22 = vld [vmem:[#allocation22_spill] sm:$0xff] }
 0x280   : > { %3801 = vmatmul.bf16.gmra.mxu3 %v9067_v44  ;;  %v4015_v60 = vpack.c.bf16 %v3997_v31, %v3996_v8  ;;  %3859 = vmatmul.bf16.gmra.mxu1 %v9068_v47  ;;  %v3541_v15 = vpop.f32.mrf.mxu2 }
 0x281   : > { %v3542_v27 = vadd.f32 %v3541_v15, %v3513_v35 }
 0x282   : > { %4031 = vst [vmem:[%s8678_s6 + $0x3c] sm:$0xff] %v4015_v60 }
 0x283   : > { %v3570_v51 = vpop.f32.mrf.mxu3  ;;  %v3601_v7 = vpop.f32.mrf.mxu0 }
 0x284   : > { %v3571_v55 = vadd.f32 %v3570_v51, %v3542_v27  ;;  %v3602_v6 = vadd.f32 %v3601_v7, %v8598_v52 }
 0x285   : > { %v3630_v41 = vpop.f32.mrf.mxu1 }
 0x286   : > { %v4000_v18 = vmax.f32 %v3571_v55, 0.0  ;;  %v8837_v61 = vadd.f32 %v3630_v41, %v3602_v6  ;;  %v9080_v55 = vld [vmem:[#allocation24_spill] sm:$0xff]  ;;  %v9082_v6 = vld [vmem:[#allocation26_spill] sm:$0xff] }
 0x288   : > { %v4017_v45 = vpack.c.bf16 %v4000_v18, %v3999_v42  ;;  %v3543_v5 = vpop.f32.mrf.mxu2 }
 0x289   : > { %v3544_v20 = vadd.f32 %v3543_v5, %v3515_v9 }
 0x28a   : > { %4033 = vst [vmem:[%s8678_s6 + $0x48] sm:$0xff] %v4017_v45 }
 0x28b   : > { %v3572_v1 = vpop.f32.mrf.mxu3  ;;  %v3700_v40 = vpop.f32.mrf.mxu0 }
 0x28c   : > { %v3573_v32 = vadd.f32 %v3572_v1, %v3544_v20 }
 0x28d   : > { %v3729_v48 = vpop.f32.mrf.mxu1  ;;  %3873 = vmatmul.bf16.vlgmr.msra.gmra.mxu2 %v9071_v59  ;;  %v9083_v59 = vld [vmem:[#allocation27_spill] sm:$0xff] }
 0x28e   : > { %v4003_v52 = vmax.f32 %v3573_v32, 0.0  ;;  %3931 = vmatmul.bf16.vlgmr.msra.gmra.mxu0 %v9072_v39  ;;  %v9084_v39 = vld [vmem:[#allocation28_spill] sm:$0xff] }
 0x290   : > { %3902 = vmatmul.bf16.vlgmr.msra.gmra.mxu3 %v9073_v11  ;;  %v4019_v4 = vpack.c.bf16 %v4003_v52, %v4002_v23  ;;  %3960 = vmatmul.bf16.vlgmr.msra.gmra.mxu1 %v9074_v3  ;;  %v3642_v26 = vpop.f32.mrf.mxu2  ;;  %v9086_v11 = vld [vmem:[#allocation30_spill] sm:$0xff] }
 0x291   : > { %v3643_v62 = vadd.f32 %v3642_v26, %v8633_v12  ;;  %v9077_v12 = vld [vmem:[#allocation21_spill] sm:$0xff] }
 0x292   : > { %4035 = vst [vmem:[%s8678_s6 + $0x54] sm:$0xff] %v4019_v4 }
 0x293   : > { %v3671_v2 = vpop.f32.mrf.mxu3  ;;  %v3702_v37 = vpop.f32.mrf.mxu0 }
 0x294   : > { %v3672_v29 = vadd.f32 %v3671_v2, %v3643_v62 }
 0x295   : > { %v3731_v50 = vpop.f32.mrf.mxu1 }
 0x296   : > { %v3701_v10 = vadd.f32 %v3700_v40, %v3672_v29 }
 0x298   : > { %v8848_v63 = vadd.f32 %v3729_v48, %v3701_v10  ;;  %v3644_v34 = vpop.f32.mrf.mxu2 }
 0x299   : > { %v3645_v17 = vadd.f32 %v3644_v34, %v8670_v25 }
 0x29b   : > { %v3673_v43 = vpop.f32.mrf.mxu3  ;;  %v3705_v14 = vpop.f32.mrf.mxu0 }
 0x29c   : > { %v3674_v24 = vadd.f32 %v3673_v43, %v3645_v17 }
 0x29d   : > { %v3734_v54 = vpop.f32.mrf.mxu1  ;;  %3878 = vmatmul.bf16.gmra.mxu2 %v9075_v13 }
 0x29e   : > { %v3703_v57 = vadd.f32 %v3702_v37, %v3674_v24  ;;  %3936 = vmatmul.bf16.gmra.mxu0 %v9076_v49 }
 0x2a0   : > { %3907 = vmatmul.bf16.gmra.mxu3 %v9077_v12  ;;  %3965 = vmatmul.bf16.gmra.mxu1 %v9078_v22  ;;  %v8855_v30 = vadd.f32 %v3731_v50, %v3703_v57  ;;  %v3647_v28 = vpop.f32.mrf.mxu2 }
 0x2a1   : > { %v3648_v8 = vadd.f32 %v3647_v28, %v8712_v46  ;;  %v9081_v46 = vld [vmem:[#allocation25_spill] sm:$0xff] }
 0x2a3   : > { %v3676_v31 = vpop.f32.mrf.mxu3  ;;  %v3707_v25 = vpop.f32.mrf.mxu0 }
 0x2a4   : > { %v3677_v56 = vadd.f32 %v3676_v31, %v3648_v8 }
 0x2a5   : > { %v3736_v33 = vpop.f32.mrf.mxu1 }
 0x2a6   : > { %v3706_v44 = vadd.f32 %v3705_v14, %v3677_v56 }
 0x2a8   : > { %v8858_v16 = vadd.f32 %v3734_v54, %v3706_v44  ;;  %v3649_v60 = vpop.f32.mrf.mxu2 }
 0x2a9   : > { %v3650_v35 = vadd.f32 %v3649_v60, %v8755_v36 }
 0x2ab   : > { %v3678_v47 = vpop.f32.mrf.mxu3  ;;  %v3710_v15 = vpop.f32.mrf.mxu0 }
 0x2ac   : > { %v3679_v27 = vadd.f32 %v3678_v47, %v3650_v35 }
 0x2ad   : > { %v3739_v51 = vpop.f32.mrf.mxu1  ;;  %3883 = vmatmul.bf16.gmra.mxu2 %v9079_v19 }
 0x2ae   : > { %v3708_v7 = vadd.f32 %v3707_v25, %v3679_v27  ;;  %3941 = vmatmul.bf16.gmra.mxu0 %v9080_v55 }
 0x2b0   : > { %3912 = vmatmul.bf16.gmra.mxu3 %v9081_v46  ;;  %3970 = vmatmul.bf16.gmra.mxu1 %v9082_v6  ;;  %v8865_v41 = vadd.f32 %v3736_v33, %v3708_v7  ;;  %v3652_v21 = vpop.f32.mrf.mxu2 }
 0x2b1   : > { %v3653_v42 = vadd.f32 %v3652_v21, %v8802_v38  ;;  %v9085_v38 = vld [vmem:[#allocation29_spill] sm:$0xff] }
 0x2b3   : > { %v3681_v18 = vpop.f32.mrf.mxu3  ;;  %v3712_v36 = vpop.f32.mrf.mxu0 }
 0x2b4   : > { %v3682_v45 = vadd.f32 %v3681_v18, %v3653_v42 }
 0x2b5   : > { %v3741_v9 = vpop.f32.mrf.mxu1 }
 0x2b6   : > { %v3711_v5 = vadd.f32 %v3710_v15, %v3682_v45 }
 0x2b8   : > { %v8868_v20 = vadd.f32 %v3739_v51, %v3711_v5  ;;  %v3654_v1 = vpop.f32.mrf.mxu2 }
 0x2b9   : > { %v3655_v40 = vadd.f32 %v3654_v1, %v8815_v58 }
 0x2bb   : > { %v3683_v32 = vpop.f32.mrf.mxu3  ;;  %v3715_v48 = vpop.f32.mrf.mxu0 }
 0x2bc   : > { %v3684_v53 = vadd.f32 %v3683_v32, %v3655_v40 }
 0x2bd   : > { %v3744_v23 = vpop.f32.mrf.mxu1  ;;  %3888 = vmatmul.bf16.gmra.mxu2 %v9083_v59 }
 0x2be   : > { %v3713_v52 = vadd.f32 %v3712_v36, %v3684_v53  ;;  %3946 = vmatmul.bf16.gmra.mxu0 %v9084_v39 }
 0x2c0   : > { %3917 = vmatmul.bf16.gmra.mxu3 %v9085_v38  ;;  %3975 = vmatmul.bf16.gmra.mxu1 %v9086_v11  ;;  %v8875_v4 = vadd.f32 %v3741_v9, %v3713_v52  ;;  %v3657_v3 = vpop.f32.mrf.mxu2 }
 0x2c1   : > { %v3658_v26 = vadd.f32 %v3657_v3, %v8826_v0 }
 0x2c3   : > { %v3686_v62 = vpop.f32.mrf.mxu3  ;;  %v3717_v58 = vpop.f32.mrf.mxu0 }
 0x2c4   : > { %v3687_v2 = vadd.f32 %v3686_v62, %v3658_v26 }
 0x2c5   : > { %v3746_v37 = vpop.f32.mrf.mxu1 }
 0x2c6   : > { %v3716_v29 = vadd.f32 %v3715_v48, %v3687_v2 }
 0x2c8   : > { %v8878_v50 = vadd.f32 %v3744_v23, %v3716_v29  ;;  %v3659_v10 = vpop.f32.mrf.mxu2 }
 0x2c9   : > { %v3660_v34 = vadd.f32 %v3659_v10, %v8837_v61 }
 0x2cb   : > { %v3688_v17 = vpop.f32.mrf.mxu3  ;;  %v3816_v43 = vpop.f32.mrf.mxu0 }
 0x2cc   : > { %v3689_v14 = vadd.f32 %v3688_v17, %v3660_v34 }
 0x2cd   : > { %v3845_v24 = vpop.f32.mrf.mxu1 }
 0x2ce   : > { %v3718_v54 = vadd.f32 %v3717_v58, %v3689_v14 }
 0x2d0   : > { %v8881_v57 = vadd.f32 %v3746_v37, %v3718_v54  ;;  %v3758_v13 = vpop.f32.mrf.mxu2 }
 0x2d1   : > { %v3759_v36 = vadd.f32 %v3758_v13, %v8848_v63 }
 0x2d3   : > { %v3787_v49 = vpop.f32.mrf.mxu3  ;;  %v3818_v0 = vpop.f32.mrf.mxu0 }
 0x2d4   : > { %v3788_v9 = vadd.f32 %v3787_v49, %v3759_v36 }
 0x2d5   : > { %v3847_v12 = vpop.f32.mrf.mxu1 }
 0x2d6   : > { %v3817_v32 = vadd.f32 %v3816_v43, %v3788_v9 }
 0x2d8   : > { %v3760_v22 = vpop.f32.mrf.mxu2  ;;  %v3846_v52 = vadd.f32 %v3845_v24, %v3817_v32 }
 0x2d9   : > { %v3761_v48 = vadd.f32 %v3760_v22, %v8855_v30 }
 0x2db   : > { %v3789_v28 = vpop.f32.mrf.mxu3  ;;  %v3821_v8 = vpop.f32.mrf.mxu0 }
 0x2dc   : > { %v3790_v23 = vadd.f32 %v3789_v28, %v3761_v48 }
 0x2dd   : > { %v3850_v31 = vpop.f32.mrf.mxu1 }
 0x2de   : > { %v3819_v3 = vadd.f32 %v3818_v0, %v3790_v23 }
 0x2e0   : > { %v3763_v25 = vpop.f32.mrf.mxu2  ;;  %v3848_v29 = vadd.f32 %v3847_v12, %v3819_v3 }
 0x2e1   : > { %v3764_v63 = vadd.f32 %v3763_v25, %v8858_v16 }
 0x2e3   : > { %v3792_v56 = vpop.f32.mrf.mxu3  ;;  %v3823_v33 = vpop.f32.mrf.mxu0 }
 0x2e4   : > { %v3793_v2 = vadd.f32 %v3792_v56, %v3764_v63 }
 0x2e5   : > { %v8883_v44 = vpop.f32.mrf.mxu1 }
 0x2e6   : > { %v3822_v14 = vadd.f32 %v3821_v8, %v3793_v2 }
 0x2e8   : > { %v3765_v61 = vpop.f32.mrf.mxu2  ;;  %v3851_v28 = vadd.f32 %v3850_v31, %v3822_v14 }
 0x2e9   : > { %v3766_v24 = vadd.f32 %v3765_v61, %v8865_v41 }
 0x2eb   : > { %v3794_v60 = vpop.f32.mrf.mxu3  ;;  %v8885_v35 = vpop.f32.mrf.mxu0 }
 0x2ec   : > { %v3795_v0 = vadd.f32 %v3794_v60, %v3766_v24 }
 0x2ed   : > { %v8887_v47 = vpop.f32.mrf.mxu1 }
 0x2ee   : > { %v3824_v9 = vadd.f32 %v3823_v33, %v3795_v0 }
 0x2f0   : > { %v3768_v15 = vpop.f32.mrf.mxu2  ;;  %v3853_v60 = vadd.f32 %v8883_v44, %v3824_v9 }
 0x2f3   : > { %v3797_v27 = vpop.f32.mrf.mxu3  ;;  %v8889_v51 = vpop.f32.mrf.mxu0 }
 0x2f5   : > { %v8891_v7 = vpop.f32.mrf.mxu1 }
 0x2f8   : > { %v8893_v19 = vpop.f32.mrf.mxu2 }
 0x2fb   : > { %v8895_v55 = vpop.f32.mrf.mxu3  ;;  %v8897_v46 = vpop.f32.mrf.mxu0 }
 0x2fd   : > { %v8899_v6 = vpop.f32.mrf.mxu1 }
 0x300   : > { %v8901_v21 = vpop.f32.mrf.mxu2 }
 0x303   : > { %v8903_v42 = vpop.f32.mrf.mxu3  ;;  %v8905_v18 = vpop.f32.mrf.mxu0 }
 0x305   : > { %v8908_v45 = vpop.f32.mrf.mxu1 }
 0x308   : > { %v8910_v5 = vpop.f32.mrf.mxu2 }
 0x30b   : > { %v8912_v1 = vpop.f32.mrf.mxu3  ;;  %v3932_v40 = vpop.f32.mrf.mxu0 }
 0x30d   : > { %v3961_v53 = vpop.f32.mrf.mxu1 }
 0x310   : > { %v3874_v59 = vpop.f32.mrf.mxu2 }
 0x311   : > { %v3875_v39 = vadd.f32 %v3874_v59, %v3846_v52 }
 0x313   : > { %v3903_v38 = vpop.f32.mrf.mxu3  ;;  %v3934_v11 = vpop.f32.mrf.mxu0 }
 0x314   : > { %v3904_v26 = vadd.f32 %v3903_v38, %v3875_v39 }
 0x315   : > { %v3963_v62 = vpop.f32.mrf.mxu1 }
 0x316   : > { %v3933_v58 = vadd.f32 %v3932_v40, %v3904_v26  ;;  %v3769_v40 = vadd.f32 %v3768_v15, %v8868_v20  ;;  %v3771_v20 = vadd.f32 %v8893_v19, %v8875_v4  ;;  %v3774_v4 = vadd.f32 %v8901_v21, %v8878_v50 }
 0x317   : > { %v3776_v50 = vadd.f32 %v8910_v5, %v8881_v57 }
 0x318   : > { %v3962_v37 = vadd.f32 %v3961_v53, %v3933_v58  ;;  %v3876_v10 = vpop.f32.mrf.mxu2  ;;  %v3798_v53 = vadd.f32 %v3797_v27, %v3769_v40  ;;  %v3800_v27 = vadd.f32 %v8895_v55, %v3771_v20  ;;  %v3803_v55 = vadd.f32 %v8903_v42, %v3774_v4 }
 0x319   : > { %v3877_v30 = vadd.f32 %v3876_v10, %v3848_v29  ;;  %v3805_v42 = vadd.f32 %v8912_v1, %v3776_v50 }
 0x31a   : > { %v3983_v34 = vmax.f32 %v3962_v37, 0.0  ;;  %v3827_v38 = vadd.f32 %v8885_v35, %v3798_v53  ;;  %v3829_v35 = vadd.f32 %v8889_v51, %v3800_v27  ;;  %v3832_v51 = vadd.f32 %v8897_v46, %v3803_v55 }
 0x31b   : > { %v3905_v17 = vpop.f32.mrf.mxu3  ;;  %v3937_v43 = vpop.f32.mrf.mxu0  ;;  %v3834_v46 = vadd.f32 %v8905_v18, %v3805_v42 }
 0x31c   : > { %v4006_v54 = vpack.c.bf16 %v3983_v34, %v3983_v34  ;;  %v3906_v13 = vadd.f32 %v3905_v17, %v3877_v30  ;;  %v3856_v44 = vadd.f32 %v8887_v47, %v3827_v38  ;;  %v3858_v47 = vadd.f32 %v8891_v7, %v3829_v35 }
 0x31d   : > { %v3966_v49 = vpop.f32.mrf.mxu1  ;;  %v3861_v7 = vadd.f32 %v8899_v6, %v3832_v51  ;;  %v3863_v1 = vadd.f32 %v8908_v45, %v3834_v46 }
 0x31e   : > { %4022 = vst [vmem:[%s8678_s6 + $0x8] sm:$0xf] %v4006_v54  ;;  %v3935_v16 = vadd.f32 %v3934_v11, %v3906_v13 }
 0x320   : > { %v3964_v22 = vadd.f32 %v3963_v62, %v3935_v16  ;;  %v3879_v25 = vpop.f32.mrf.mxu2 }
 0x321   : > { %v3880_v12 = vadd.f32 %v3879_v25, %v3851_v28 }
 0x322   : > { %v3986_v56 = vmax.f32 %v3964_v22, 0.0 }
 0x323   : > { %v3908_v36 = vpop.f32.mrf.mxu3  ;;  %v3939_v41 = vpop.f32.mrf.mxu0 }
 0x324   : > { %v4008_v32 = vpack.c.bf16 %v3986_v56, %v3986_v56  ;;  %v3909_v8 = vadd.f32 %v3908_v36, %v3880_v12 }
 0x325   : > { %v3968_v48 = vpop.f32.mrf.mxu1 }
 0x326   : > { %4024 = vst [vmem:[%s8678_s6 + $0x14] sm:$0xf] %v4008_v32  ;;  %v3938_v61 = vadd.f32 %v3937_v43, %v3909_v8 }
 0x328   : > { %v3967_v23 = vadd.f32 %v3966_v49, %v3938_v61  ;;  %v3881_v52 = vpop.f32.mrf.mxu2 }
 0x329   : > { %v3882_v59 = vadd.f32 %v3881_v52, %v3853_v60 }
 0x32a   : > { %v3989_v31 = vmax.f32 %v3967_v23, 0.0 }
 0x32b   : > { %v3910_v39 = vpop.f32.mrf.mxu3  ;;  %v3942_v3 = vpop.f32.mrf.mxu0 }
 0x32c   : > { %v4010_v33 = vpack.c.bf16 %v3989_v31, %v3989_v31  ;;  %v3911_v15 = vadd.f32 %v3910_v39, %v3882_v59 }
 0x32d   : > { %v3971_v26 = vpop.f32.mrf.mxu1 }
 0x32e   : > { %4026 = vst [vmem:[%s8678_s6 + $0x20] sm:$0xf] %v4010_v33  ;;  %v3940_v11 = vadd.f32 %v3939_v41, %v3911_v15 }
 0x330   : > { %v3969_v63 = vadd.f32 %v3968_v48, %v3940_v11  ;;  %v3884_v62 = vpop.f32.mrf.mxu2 }
 0x331   : > { %v3885_v2 = vadd.f32 %v3884_v62, %v3856_v44 }
 0x332   : > { %v3992_v58 = vmax.f32 %v3969_v63, 0.0 }
 0x333   : > { %v3913_v37 = vpop.f32.mrf.mxu3  ;;  %v3944_v30 = vpop.f32.mrf.mxu0 }
 0x334   : > { %v4012_v19 = vpack.c.bf16 %v3992_v58, %v3992_v58  ;;  %v3914_v29 = vadd.f32 %v3913_v37, %v3885_v2 }
 0x335   : > { %v3973_v54 = vpop.f32.mrf.mxu1 }
 0x336   : > { %4028 = vst [vmem:[%s8678_s6 + $0x2c] sm:$0xf] %v4012_v19  ;;  %v3943_v10 = vadd.f32 %v3942_v3, %v3914_v29 }
 0x338   : > { %v3972_v34 = vadd.f32 %v3971_v26, %v3943_v10  ;;  %v3886_v17 = vpop.f32.mrf.mxu2 }
 0x339   : > { %v3887_v14 = vadd.f32 %v3886_v17, %v3858_v47 }
 0x33a   : > { %v3995_v43 = vmax.f32 %v3972_v34, 0.0 }
 0x33b   : > { %v3915_v24 = vpop.f32.mrf.mxu3  ;;  %v3947_v56 = vpop.f32.mrf.mxu0 }
 0x33c   : > { %v4014_v21 = vpack.c.bf16 %v3995_v43, %v3995_v43  ;;  %v3916_v13 = vadd.f32 %v3915_v24, %v3887_v14 }
 0x33d   : > { %v3976_v5 = vpop.f32.mrf.mxu1 }
 0x33e   : > { %4030 = vst [vmem:[%s8678_s6 + $0x38] sm:$0xf] %v4014_v21  ;;  %v3945_v49 = vadd.f32 %v3944_v30, %v3916_v13 }
 0x340   : > { %v3974_v16 = vadd.f32 %v3973_v54, %v3945_v49  ;;  %v3889_v0 = vpop.f32.mrf.mxu2 }
 0x341   : > { %v3890_v28 = vadd.f32 %v3889_v0, %v3861_v7 }
 0x342   : > { %v3998_v22 = vmax.f32 %v3974_v16, 0.0 }
 0x343   : > { %v3918_v25 = vpop.f32.mrf.mxu3  ;;  %v3949_v48 = vpop.f32.mrf.mxu0 }
 0x344   : > { %v4016_v12 = vpack.c.bf16 %v3998_v22, %v3998_v22  ;;  %v3919_v57 = vadd.f32 %v3918_v25, %v3890_v28 }
 0x345   : > { %v3978_v23 = vpop.f32.mrf.mxu1 }
 0x346   : > { %4032 = vst [vmem:[%s8678_s6 + $0x44] sm:$0xf] %v4016_v12  ;;  %v3948_v36 = vadd.f32 %v3947_v56, %v3919_v57 }
 0x348   : > { %v3977_v9 = vadd.f32 %v3976_v5, %v3948_v36  ;;  %v3891_v40 = vpop.f32.mrf.mxu2 }
 0x349   : > { %v3892_v6 = vadd.f32 %v3891_v40, %v3863_v1 }
 0x34a   : > { %v4001_v32 = vmax.f32 %v3977_v9, 0.0 }
 0x34b   : > { %v3920_v8 = vpop.f32.mrf.mxu3 }
 0x34c   : > { %v4018_v41 = vpack.c.bf16 %v4001_v32, %v4001_v32  ;;  %v3921_v61 = vadd.f32 %v3920_v8, %v3892_v6 }
 0x34e   : > { %4034 = vst [vmem:[%s8678_s6 + $0x50] sm:$0xf] %v4018_v41  ;;  %v3950_v53 = vadd.f32 %v3949_v48, %v3921_v61 }
 0x350   : > { %v3979_v18 = vadd.f32 %v3978_v23, %v3950_v53 }
 0x352   : > { %v4004_v60 = vmax.f32 %v3979_v18, 0.0 }
 0x354   : > { %v4020_v52 = vpack.c.bf16 %v4004_v60, %v4004_v60 }
 0x356   : > { %4036 = vst [vmem:[%s8678_s6 + $0x5c] sm:$0xf] %v4020_v52 }
 0x357 PF: > { %s13_s12 = sadd.s32 1, %s6100_s12  }
 0x358   : > { %p10_p4 = scmp.ge.s32.totalorder %s13_s12, 4  }
 0x35a   :  { %12 = sbr.rel (!%p10_p4) target bundleno = 1 (0x1), region = 62 }

// kernel: inception_c_unit.7
= control target key start
LH: loop header
LB: loop body
LE: loop exit
PB: predicated region body
PF: predicated region fallthrough
CT: control target
= control target key end

     0   :  { %11 = vsyncpa [#allocation3], 0  ;;  %s10163_s0 = inlined_call_operand.vmem [shape: bf16[128,192], index: 0, kind: input, shape index: {}]   ;;  %s10164_s1 = inlined_call_operand.vmem [shape: bf16[128,192], index: 1, kind: input, shape index: {}]   ;;  %s10165_s2 = inlined_call_operand.vmem [shape: f32[128,1792], index: 2, kind: input, shape index: {}]   ;;  %s10166_s3 = inlined_call_operand.vmem [shape: bf16[192,1792], index: 3, kind: input, shape index: {}]   ;;  %s10167_s4 = inlined_call_operand.vmem [shape: bf16[192,1792], index: 4, kind: input, shape index: {}]   ;;  %s10168_s5 = inlined_call_operand.vmem [shape: f32[1,1792], index: 5, kind: input, shape index: {}]   ;;  %s10169_s6 = inlined_call_operand.hbm [shape: f32[128,1792], index: 6, kind: output, shape index: {}]  }
   0x1   :  { %13 = vsyncpa [#allocation3 + $0x1], 0  ;;  %s6904_s21 = smov 0   ;;  %s6906_s22 = smov 0  }
   0x2   :  { %s6908_s23 = smov 0   ;;  %s6910_s24 = smov 0  }
   0x3 LB: > { %s6925_s25 = sadd.s32 4294967295, %s6865_s24   ;;  %s4867_s26 = sadd.s32 4294967294, %s6865_s24   ;;  %s6865_s24 = sphi %s6910_s24, %s10323_s24   ;;  %s6861_s23 = sphi %s6908_s23, %s10322_s23   ;;  %s6857_s22 = sphi %s6906_s22, %s10321_s22   ;;  %s6853_s21 = sphi %s6904_s21, %s10320_s21  }
   0x4   : > { %s6929_s27 = sadd.s32 1, %s6865_s24   ;;  %s167_s28 = sadd.s32 1, %s6861_s23 }
   0x5   : > { %s164_s29 = ssub.s32 %s6865_s24, %s6929_s27  ;;  %p177_p0 = scmp.ne.s32.totalorder %s6861_s23, %s6857_s22 }
   0x6   : > { %p165_p1 = scmp.eq.s32.totalorder %s164_s29, 0  ;;  %p178_p2 = scmp.eq.s32.totalorder %s6925_s25, 1 }
   0x7   : > { %p183_p3 = scmp.ne.s32.totalorder %s6857_s22, %s6853_s21  ;;  %p184_p4 = scmp.eq.s32.totalorder %s4867_s26, 1 }
   0x8   : > { %s6940_s30 = scalar_select %p165_p1, %s6861_s23, %s167_s28  }
   0x9   : > { %p6942_p5 = por %p178_p2, %p177_p0  ;;  %p6946_p6 = por %p184_p4, %p183_p3 }
   0xa   : > { %p4870_p7 = scmp.ge.s32.totalorder %s6865_s24, 1  ;;  %p241_p8 = scmp.lt.s32.totalorder %s6865_s24, 3 }
   0xc   : > { %p242_p9 = pnand %p4870_p7, %p241_p8 }
   0xe   : > { %245 = sbr.rel (%p242_p9) target bundleno = 1090 (0x442), region = 44 }
  0x13   : > { %v5305_v0 = vld [vmem:[%s10167_s4 + $0x310] sm:$0xf]  ;;  %v6695_v1 = vld [vmem:[%s10167_s4 + $0x344] sm:$0xf0]  ;;  %v6688_v5 = vld [vmem:[%s10167_s4 + $0x314] sm:$0xf] }
  0x14   : > { %v5529_v2 = vld [vmem:[%s10167_s4 + $0x4d0] sm:$0xf]  ;;  %v5306_v3 = vor.u32 %v6695_v1, %v5305_v0  ;;  %v6751_v4 = vld [vmem:[%s10167_s4 + $0x504] sm:$0xf0]  ;;  %v5307_v6 = vld [vmem:[%s10167_s4 + $0x348] sm:$0xf0] }
  0x15   : > { %v5530_v7 = vor.u32 %v6751_v4, %v5529_v2  ;;  %v5310_v8 = vor.u32 %v6688_v5, %v5307_v6  ;;  %v6744_v9 = vld [vmem:[%s10167_s4 + $0x4d4] sm:$0xf]  ;;  %v5531_v10 = vld [vmem:[%s10167_s4 + $0x508] sm:$0xf0]  ;;  %v5249_v11 = vld [vmem:[%s10167_s4 + $0x2a0] sm:$0xf] }
  0x16   : > { %1548 = vmatpush.bf16.msra.mxu0 %v5306_v3  ;;  %v5534_v12 = vor.u32 %v6744_v9, %v5531_v10  ;;  %v6681_v13 = vld [vmem:[%s10167_s4 + $0x2d4] sm:$0xf0]  ;;  %v5473_v14 = vld [vmem:[%s10167_s4 + $0x460] sm:$0xf]  ;;  %v6674_v18 = vld [vmem:[%s10167_s4 + $0x2a4] sm:$0xf] }
  0x17   : > { %v6737_v15 = vld [vmem:[%s10167_s4 + $0x494] sm:$0xf0]  ;;  %1581 = vmatpush.bf16.msra.mxu1 %v5530_v7  ;;  %1606 = vmatpush.bf16.msra.mxu2 %v5310_v8  ;;  %v5250_v16 = vor.u32 %v6681_v13, %v5249_v11  ;;  %v5251_v19 = vld [vmem:[%s10167_s4 + $0x2d8] sm:$0xf0]  ;;  %v6730_v20 = vld [vmem:[%s10167_s4 + $0x464] sm:$0xf] }
  0x18   : > { %v5474_v17 = vor.u32 %v6737_v15, %v5473_v14  ;;  %1639 = vmatpush.bf16.msra.mxu3 %v5534_v12  ;;  %v5254_v21 = vor.u32 %v6674_v18, %v5251_v19  ;;  %v5475_v22 = vld [vmem:[%s10167_s4 + $0x498] sm:$0xf0]  ;;  %v5193_v23 = vld [vmem:[%s10167_s4 + $0x230] sm:$0xf]  ;;  %v6667_v24 = vld [vmem:[%s10167_s4 + $0x264] sm:$0xf0] }
  0x19   : > { %v5478_v25 = vor.u32 %v6730_v20, %v5475_v22  ;;  %v5417_v26 = vld [vmem:[%s10167_s4 + $0x3f0] sm:$0xf]  ;;  %v6723_v27 = vld [vmem:[%s10167_s4 + $0x424] sm:$0xf0]  ;;  %v6660_v28 = vld [vmem:[%s10167_s4 + $0x234] sm:$0xf]  ;;  %v5194_v29 = vor.u32 %v6667_v24, %v5193_v23 }
  0x1a   : > { %1549 = vmatpush.bf16.msra.mxu0 %v5250_v16  ;;  %v5195_v30 = vld [vmem:[%s10167_s4 + $0x268] sm:$0xf0]  ;;  %v6716_v31 = vld [vmem:[%s10167_s4 + $0x3f4] sm:$0xf]  ;;  %v5418_v33 = vor.u32 %v6723_v27, %v5417_v26  ;;  %v5137_v35 = vld [vmem:[%s10167_s4 + $0x1c0] sm:$0xf] }
  0x1b   : > { %v5419_v32 = vld [vmem:[%s10167_s4 + $0x428] sm:$0xf0]  ;;  %1582 = vmatpush.bf16.msra.mxu1 %v5474_v17  ;;  %1607 = vmatpush.bf16.msra.mxu2 %v5254_v21  ;;  %v5198_v34 = vor.u32 %v6660_v28, %v5195_v30  ;;  %v6653_v36 = vld [vmem:[%s10167_s4 + $0x1f4] sm:$0xf0]  ;;  %v5361_v37 = vld [vmem:[%s10167_s4 + $0x380] sm:$0xf] }
  0x1c   : > { %1640 = vmatpush.bf16.msra.mxu3 %v5478_v25  ;;  %v5422_v38 = vor.u32 %v6716_v31, %v5419_v32  ;;  %v6709_v39 = vld [vmem:[%s10167_s4 + $0x3b4] sm:$0xf0]  ;;  %v6646_v40 = vld [vmem:[%s10167_s4 + $0x1c4] sm:$0xf]  ;;  %v5139_v41 = vld [vmem:[%s10167_s4 + $0x1f8] sm:$0xf0]  ;;  %v5138_v44 = vor.u32 %v6653_v36, %v5137_v35 }
  0x1d   : > { %v6702_v42 = vld [vmem:[%s10167_s4 + $0x384] sm:$0xf]  ;;  %v5363_v43 = vld [vmem:[%s10167_s4 + $0x3b8] sm:$0xf0]  ;;  %s4871_s13 = sshll.u32 %s6925_s25, 3  ;;  %v5362_v45 = vor.u32 %v6709_v39, %v5361_v37  ;;  %v5142_v46 = vor.u32 %v6646_v40, %v5139_v41  ;;  %vm1535_vm0 = vcmask 523264  }
  0x1e   : > { %1550 = vmatpush.bf16.msra.mxu0 %v5194_v29  ;;  %p285_p10 = scmp.lt.s32.totalorder %s4871_s13, 15  ;;  %v5081_v47 = vld [vmem:[%s10167_s4 + $0x150] sm:$0xf]  ;;  %v6639_v48 = vld [vmem:[%s10167_s4 + $0x184] sm:$0xf0]  ;;  %v5366_v49 = vor.u32 %v6702_v42, %v5363_v43  ;;  %s6760_s18 = smul.u32 896, %s6925_s25 }
  0x1f   : > { %1583 = vmatpush.bf16.msra.mxu1 %v5418_v33  ;;  %1608 = vmatpush.bf16.msra.mxu2 %v5198_v34  ;;  %v6632_v50 = vld [vmem:[%s10167_s4 + $0x154] sm:$0xf]  ;;  %v5083_v51 = vld [vmem:[%s10167_s4 + $0x188] sm:$0xf0]  ;;  %v5082_v52 = vor.u32 %v6639_v48, %v5081_v47  ;;  %v5025_v53 = vld [vmem:[%s10167_s4 + $0xe0] sm:$0xf] }
  0x20   : > { %1641 = vmatpush.bf16.msra.mxu3 %v5422_v38  ;;  %s10325_s13 = smov (!%p285_p10, %s4871_s13), 15  ;;  %v6625_v54 = vld [vmem:[%s10167_s4 + $0x114] sm:$0xf0]  ;;  %v5086_v57 = vor.u32 %v6632_v50, %v5083_v51  ;;  %v6618_v59 = vld [vmem:[%s10167_s4 + $0xe4] sm:$0xf]  ;;  %s4777_s29 = scalar_lea.hbm %s10169_s6, %s6760_s18 }
  0x21   : > { %s6404_s28 = sshll.u32 %s10325_s13, 3  ;;  %v5027_v60 = vld [vmem:[%s10167_s4 + $0x118] sm:$0xf0]  ;;  %v5026_v61 = vor.u32 %v6625_v54, %v5025_v53  ;;  %v5537_v62 = vld [vmem:[%s10167_s4 + $0x4d8] sm:$0xf]  ;;  %s6759_s16 = smul.u32 112, %s10325_s13 }
  0x22   : > { %1551 = vmatpush.bf16.msra.mxu0 %v5138_v44  ;;  %s7069_s10 = scalar_lea.vmem %s10164_s1, %s6404_s28  ;;  %v6752_v63 = vld [vmem:[%s10167_s4 + $0x50c] sm:$0xf0]  ;;  %v6611_v1 = vld [vmem:[%s10167_s4 + $0xa4] sm:$0xf0]  ;;  %v5313_v3 = vld [vmem:[%s10167_s4 + $0x318] sm:$0xf]  ;;  %v5030_v4 = vor.u32 %v6618_v59, %v5027_v60  ;;  %s8490_s20 = scalar_lea.vmem %s10163_s0, %s6404_s28 }
  0x23   : > { %1584 = vmatpush.bf16.msra.mxu1 %v5362_v45  ;;  %1609 = vmatpush.bf16.msra.mxu2 %v5142_v46  ;;  %v6582_v55 = vld [vmem:[%s7069_s10 + $0x4] sm:$0xf]  ;;  %v4883_v56 = vld [vmem:[%s7069_s10 + $0x8] sm:$0xf0]  ;;  %v4969_v0 = vld [vmem:[%s10167_s4 + $0x70] sm:$0xf]  ;;  %v5538_v2 = vor.u32 %v6752_v63, %v5537_v62  ;;  %s8946_s15 = scalar_lea.vmem %s10165_s2, %s6759_s16 }
  0x24   : > { %1642 = vmatpush.bf16.msra.mxu3 %v5366_v49  ;;  %v7079_v58 = vor.u32 %v6582_v55, %v4883_v56  ;;  %v6604_v5 = vld [vmem:[%s10167_s4 + $0x74] sm:$0xf]  ;;  %v6696_v6 = vld [vmem:[%s10167_s4 + $0x34c] sm:$0xf0]  ;;  %v4971_v7 = vld [vmem:[%s10167_s4 + $0xa8] sm:$0xf0]  ;;  %v4970_v11 = vor.u32 %v6611_v1, %v4969_v0 }
  0x25   : > { %v5314_v8 = vor.u32 %v6696_v6, %v5313_v3  ;;  %v5257_v9 = vld [vmem:[%s10167_s4 + $0x2a8] sm:$0xf]  ;;  %v6682_v10 = vld [vmem:[%s10167_s4 + $0x2dc] sm:$0xf0]  ;;  %v6597_v13 = vld [vmem:[%s10167_s4 + $0x34] sm:$0xf0]  ;;  %v4974_v18 = vor.u32 %v6604_v5, %v4971_v7 }
  0x26   : > { %1552 = vmatpush.bf16.msra.mxu0 %v5082_v52  ;;  %5583 = vmatmul.msk.bf16.vlgmr.msra.gmra.mxu1 %vm1535_vm0, %v7079_v58  ;;  %v4913_v12 = vld [vmem:[%s10167_s4] sm:$0xf]  ;;  %v6590_v14 = vld [vmem:[%s10167_s4 + $0x4] sm:$0xf]  ;;  %v4915_v15 = vld [vmem:[%s10167_s4 + $0x38] sm:$0xf0]  ;;  %v5258_v16 = vor.u32 %v6682_v10, %v5257_v9 }
  0x27   : > { %5587 = vmatmul.msk.bf16.vlgmr.msra.gmra.mxu3 %vm1535_vm0, %v7079_v58  ;;  %1610 = vmatpush.bf16.msra.mxu2 %v5086_v57  ;;  %v5481_v17 = vld [vmem:[%s10167_s4 + $0x468] sm:$0xf]  ;;  %v6689_v19 = vld [vmem:[%s10167_s4 + $0x31c] sm:$0xf]  ;;  %v5315_v20 = vld [vmem:[%s10167_s4 + $0x350] sm:$0xf0]  ;;  %v4914_v26 = vor.u32 %v6597_v13, %v4913_v12  ;;  %v4918_v32 = vor.u32 %v6590_v14, %v4915_v15 }
  0x28   : > { %1697 = vmatpush.bf16.msrb.mxu3 %v5538_v2  ;;  %1664 = vmatpush.bf16.msrb.mxu1 %v5314_v8  ;;  %v6738_v21 = vld [vmem:[%s10167_s4 + $0x49c] sm:$0xf0]  ;;  %v5201_v24 = vld [vmem:[%s10167_s4 + $0x238] sm:$0xf]  ;;  %v6668_v25 = vld [vmem:[%s10167_s4 + $0x26c] sm:$0xf0]  ;;  %v5318_v30 = vor.u32 %v6689_v19, %v5315_v20 }
  0x29   : > { %v4881_v22 = vld [vmem:[%s7069_s10] sm:$0xf]  ;;  %v5482_v23 = vor.u32 %v6738_v21, %v5481_v17  ;;  %v6583_v27 = vld [vmem:[%s7069_s10 + $0x4] sm:$0xf0]  ;;  %v6745_v28 = vld [vmem:[%s10167_s4 + $0x4dc] sm:$0xf]  ;;  %v5202_v31 = vor.u32 %v6668_v25, %v5201_v24 }
  0x2a   : > { %1553 = vmatpush.bf16.msra.mxu0 %v5026_v61  ;;  %v5539_v29 = vld [vmem:[%s10167_s4 + $0x510] sm:$0xf0]  ;;  %v4891_v34 = vld [vmem:[%s7069_s10 + $0x18] sm:$0xf0]  ;;  %v7161_v35 = vor.u32 %v6583_v27, %v4881_v22  ;;  %v6675_v37 = vld [vmem:[%s10167_s4 + $0x2ac] sm:$0xf] }
  0x2b   : > { %1611 = vmatpush.bf16.msra.mxu2 %v5030_v4  ;;  %v6584_v33 = vld [vmem:[%s7069_s10 + $0x14] sm:$0xf]  ;;  %v5542_v36 = vor.u32 %v6745_v28, %v5539_v29  ;;  %v5259_v38 = vld [vmem:[%s10167_s4 + $0x2e0] sm:$0xf0]  ;;  %v6731_v39 = vld [vmem:[%s10167_s4 + $0x46c] sm:$0xf] }
  0x2c   : > { %1665 = vmatpush.bf16.msrb.mxu1 %v5258_v16  ;;  %1698 = vmatpush.bf16.msrb.mxu3 %v5482_v23  ;;  %v5483_v40 = vld [vmem:[%s10167_s4 + $0x4a0] sm:$0xf0]  ;;  %v5145_v41 = vld [vmem:[%s10167_s4 + $0x1c8] sm:$0xf]  ;;  %v6654_v42 = vld [vmem:[%s10167_s4 + $0x1fc] sm:$0xf0]  ;;  %v7181_v43 = vor.u32 %v6584_v33, %v4891_v34  ;;  %v5262_v44 = vor.u32 %v6675_v37, %v5259_v38 }
  0x2d   : > { %v5486_v45 = vor.u32 %v6731_v39, %v5483_v40  ;;  %v6661_v46 = vld [vmem:[%s10167_s4 + $0x23c] sm:$0xf]  ;;  %v5203_v47 = vld [vmem:[%s10167_s4 + $0x270] sm:$0xf0]  ;;  %v5146_v48 = vor.u32 %v6654_v42, %v5145_v41  ;;  %v5089_v49 = vld [vmem:[%s10167_s4 + $0x158] sm:$0xf] }
  0x2e   : > { %1554 = vmatpush.bf16.msra.mxu0 %v4970_v11  ;;  %v6640_v50 = vld [vmem:[%s10167_s4 + $0x18c] sm:$0xf0]  ;;  %v5206_v51 = vor.u32 %v6661_v46, %v5203_v47  ;;  %v5425_v52 = vld [vmem:[%s10167_s4 + $0x3f8] sm:$0xf]  ;;  %v6717_v54 = vld [vmem:[%s10167_s4 + $0x3fc] sm:$0xf] }
  0x2f   : > { %1612 = vmatpush.bf16.msra.mxu2 %v4974_v18  ;;  %v6724_v53 = vld [vmem:[%s10167_s4 + $0x42c] sm:$0xf0]  ;;  %v6647_v55 = vld [vmem:[%s10167_s4 + $0x1cc] sm:$0xf]  ;;  %v5147_v56 = vld [vmem:[%s10167_s4 + $0x200] sm:$0xf0]  ;;  %v5090_v60 = vor.u32 %v6640_v50, %v5089_v49 }
  0x30   : > { %1666 = vmatpush.bf16.msrb.mxu1 %v5202_v31  ;;  %v5426_v57 = vor.u32 %v6724_v53, %v5425_v52  ;;  %v5427_v59 = vld [vmem:[%s10167_s4 + $0x430] sm:$0xf0]  ;;  %v5033_v62 = vld [vmem:[%s10167_s4 + $0xe8] sm:$0xf]  ;;  %v6626_v63 = vld [vmem:[%s10167_s4 + $0x11c] sm:$0xf0]  ;;  %v5150_v1 = vor.u32 %v6647_v55, %v5147_v56 }
  0x31   : > { %v5430_v61 = vor.u32 %v6717_v54, %v5427_v59  ;;  %v4889_v0 = vld [vmem:[%s7069_s10 + $0x10] sm:$0xf]  ;;  %v5369_v2 = vld [vmem:[%s10167_s4 + $0x388] sm:$0xf]  ;;  %v6633_v3 = vld [vmem:[%s10167_s4 + $0x15c] sm:$0xf]  ;;  %v5034_v5 = vor.u32 %v6626_v63, %v5033_v62 }
  0x32   : > { %1555 = vmatpush.bf16.msra.mxu0 %v4914_v26  ;;  %1699 = vmatpush.bf16.msrb.mxu3 %v5426_v57  ;;  %v5091_v4 = vld [vmem:[%s10167_s4 + $0x190] sm:$0xf0]  ;;  %v6710_v6 = vld [vmem:[%s10167_s4 + $0x3bc] sm:$0xf0]  ;;  %v6585_v7 = vld [vmem:[%s7069_s10 + $0x14] sm:$0xf0] }
  0x33   : > { %1613 = vmatpush.bf16.msra.mxu2 %v4918_v32  ;;  %v4977_v8 = vld [vmem:[%s10167_s4 + $0x78] sm:$0xf]  ;;  %v6612_v9 = vld [vmem:[%s10167_s4 + $0xac] sm:$0xf0]  ;;  %v5370_v10 = vor.u32 %v6710_v6, %v5369_v2  ;;  %v6586_v11 = vld [vmem:[%s7069_s10 + $0x24] sm:$0xf]  ;;  %v5094_v13 = vor.u32 %v6633_v3, %v5091_v4  ;;  %v7247_v14 = vor.u32 %v6585_v7, %v4889_v0 }
  0x34   : > { %1667 = vmatpush.bf16.msrb.mxu1 %v5146_v48  ;;  %v4899_v12 = vld [vmem:[%s7069_s10 + $0x28] sm:$0xf0]  ;;  %v4978_v15 = vor.u32 %v6612_v9, %v4977_v8  ;;  %v5035_v17 = vld [vmem:[%s10167_s4 + $0x120] sm:$0xf0]  ;;  %v4921_v18 = vld [vmem:[%s10167_s4 + $0x8] sm:$0xf] }
  0x35   : > { %1556 = vmatmul.bf16.vlgmr.msra.gmra.mxu0 %v7161_v35  ;;  %v6619_v16 = vld [vmem:[%s10167_s4 + $0xec] sm:$0xf]  ;;  %v6598_v19 = vld [vmem:[%s10167_s4 + $0x3c] sm:$0xf0]  ;;  %v7261_v20 = vor.u32 %v6586_v11, %v4899_v12  ;;  %v5371_v24 = vld [vmem:[%s10167_s4 + $0x3c0] sm:$0xf0] }
  0x36   : > { %1722 = vmatpush.bf16.msrb.mxu0 %v5318_v30  ;;  %5584 = vmatmul.msk.bf16.gmra.mxu1 %vm1535_vm0, %v7181_v43  ;;  %v5038_v21 = vor.u32 %v6619_v16, %v5035_v17  ;;  %v4922_v22 = vor.u32 %v6598_v19, %v4921_v18  ;;  %v6703_v23 = vld [vmem:[%s10167_s4 + $0x38c] sm:$0xf]  ;;  %v6605_v25 = vld [vmem:[%s10167_s4 + $0x7c] sm:$0xf]  ;;  %v4979_v27 = vld [vmem:[%s10167_s4 + $0xb0] sm:$0xf0] }
  0x37   : > { %1755 = vmatpush.bf16.msrb.mxu2 %v5542_v36  ;;  %5588 = vmatmul.msk.bf16.gmra.mxu3 %vm1535_vm0, %v7181_v43  ;;  %v5374_v26 = vor.u32 %v6703_v23, %v5371_v24  ;;  %v6591_v28 = vld [vmem:[%s10167_s4 + $0xc] sm:$0xf]  ;;  %v4923_v29 = vld [vmem:[%s10167_s4 + $0x40] sm:$0xf0]  ;;  %v4982_v30 = vor.u32 %v6605_v25, %v4979_v27  ;;  %v4897_v32 = vld [vmem:[%s7069_s10 + $0x20] sm:$0xf] }
  0x38   : > { %1614 = vmatmul.bf16.vlgmr.msra.gmra.mxu2 %v7161_v35  ;;  %1668 = vmatpush.bf16.msrb.mxu1 %v5090_v60  ;;  %v4926_v31 = vor.u32 %v6591_v28, %v4923_v29  ;;  %v6587_v33 = vld [vmem:[%s7069_s10 + $0x24] sm:$0xf0]  ;;  %v6588_v34 = vld [vmem:[%s7069_s10 + $0x34] sm:$0xf]  ;;  %v4907_v36 = vld [vmem:[%s7069_s10 + $0x38] sm:$0xf0] }
  0x39   : > { %1700 = vmatpush.bf16.msrb.mxu3 %v5370_v10  ;;  %v7291_v37 = vor.u32 %v6587_v33, %v4897_v32  ;;  %v7293_v38 = vor.u32 %v6588_v34, %v4907_v36  ;;  %v5545_v39 = vld [vmem:[%s10167_s4 + $0x4e0] sm:$0xf]  ;;  %v6753_v40 = vld [vmem:[%s10167_s4 + $0x514] sm:$0xf0]  ;;  %v6746_v41 = vld [vmem:[%s10167_s4 + $0x4e4] sm:$0xf] }
  0x3a   : > { %1723 = vmatpush.bf16.msrb.mxu0 %v5262_v44  ;;  %v5546_v42 = vor.u32 %v6753_v40, %v5545_v39  ;;  %v5547_v44 = vld [vmem:[%s10167_s4 + $0x518] sm:$0xf0]  ;;  %v6697_v46 = vld [vmem:[%s10167_s4 + $0x354] sm:$0xf0]  ;;  %v6690_v49 = vld [vmem:[%s10167_s4 + $0x324] sm:$0xf] }
  0x3b   : > { %1756 = vmatpush.bf16.msrb.mxu2 %v5486_v45  ;;  %v5321_v45 = vld [vmem:[%s10167_s4 + $0x320] sm:$0xf]  ;;  %v5550_v47 = vor.u32 %v6746_v41, %v5547_v44  ;;  %v5323_v50 = vld [vmem:[%s10167_s4 + $0x358] sm:$0xf0]  ;;  %v6683_v53 = vld [vmem:[%s10167_s4 + $0x2e4] sm:$0xf0] }
  0x3c   : > { %1669 = vmatpush.bf16.msrb.mxu1 %v5034_v5  ;;  %v5322_v48 = vor.u32 %v6697_v46, %v5321_v45  ;;  %v5326_v52 = vor.u32 %v6690_v49, %v5323_v50  ;;  %v6676_v54 = vld [vmem:[%s10167_s4 + $0x2b4] sm:$0xf]  ;;  %v5267_v55 = vld [vmem:[%s10167_s4 + $0x2e8] sm:$0xf0]  ;;  %v4905_v59 = vld [vmem:[%s7069_s10 + $0x30] sm:$0xf] }
  0x3d   : > { %1813 = vmatpush.bf16.msra.mxu3 %v5546_v42  ;;  %v5270_v57 = vor.u32 %v6676_v54, %v5267_v55  ;;  %v6589_v60 = vld [vmem:[%s7069_s10 + $0x34] sm:$0xf0]  ;;  %v5489_v62 = vld [vmem:[%s10167_s4 + $0x470] sm:$0xf]  ;;  %v6739_v63 = vld [vmem:[%s10167_s4 + $0x4a4] sm:$0xf0] }
  0x3e   : > { %1724 = vmatpush.bf16.msrb.mxu0 %v5206_v51  ;;  %v5265_v51 = vld [vmem:[%s10167_s4 + $0x2b0] sm:$0xf]  ;;  %v6732_v0 = vld [vmem:[%s10167_s4 + $0x474] sm:$0xf]  ;;  %v5491_v2 = vld [vmem:[%s10167_s4 + $0x4a8] sm:$0xf0] }
  0x3f   : > { %1757 = vmatpush.bf16.msrb.mxu2 %v5430_v61  ;;  %v5266_v56 = vor.u32 %v6683_v53, %v5265_v51  ;;  %v7339_v61 = vor.u32 %v6589_v60, %v4905_v59  ;;  %v5209_v3 = vld [vmem:[%s10167_s4 + $0x240] sm:$0xf]  ;;  %v6669_v4 = vld [vmem:[%s10167_s4 + $0x274] sm:$0xf0]  ;;  %v5494_v5 = vor.u32 %v6732_v0, %v5491_v2  ;;  %v6662_v7 = vld [vmem:[%s10167_s4 + $0x244] sm:$0xf] }
  0x40   : > { %1670 = vmatpush.bf16.msrb.mxu1 %v4978_v15  ;;  %v5210_v6 = vor.u32 %v6669_v4, %v5209_v3  ;;  %v5211_v8 = vld [vmem:[%s10167_s4 + $0x278] sm:$0xf0]  ;;  %v5153_v9 = vld [vmem:[%s10167_s4 + $0x1d0] sm:$0xf]  ;;  %v6655_v11 = vld [vmem:[%s10167_s4 + $0x204] sm:$0xf0] }
  0x41   : > { %v5214_v10 = vor.u32 %v6662_v7, %v5211_v8  ;;  %v6648_v12 = vld [vmem:[%s10167_s4 + $0x1d4] sm:$0xf]  ;;  %v5154_v15 = vor.u32 %v6655_v11, %v5153_v9  ;;  %v5097_v17 = vld [vmem:[%s10167_s4 + $0x160] sm:$0xf]  ;;  %v6641_v18 = vld [vmem:[%s10167_s4 + $0x194] sm:$0xf0] }
  0x42   : > { %1725 = vmatpush.bf16.msrb.mxu0 %v5150_v1  ;;  %v5490_v1 = vor.u32 %v6739_v63, %v5489_v62  ;;  %v5098_v19 = vor.u32 %v6641_v18, %v5097_v17  ;;  %v6718_v23 = vld [vmem:[%s10167_s4 + $0x404] sm:$0xf]  ;;  %v5435_v25 = vld [vmem:[%s10167_s4 + $0x438] sm:$0xf0]  ;;  %v4985_v32 = vld [vmem:[%s10167_s4 + $0x80] sm:$0xf] }
  0x43   : > { %1758 = vmatpush.bf16.msrb.mxu2 %v5374_v26  ;;  %v6634_v26 = vld [vmem:[%s10167_s4 + $0x164] sm:$0xf]  ;;  %v5099_v27 = vld [vmem:[%s10167_s4 + $0x198] sm:$0xf0]  ;;  %v5438_v28 = vor.u32 %v6718_v23, %v5435_v25  ;;  %v6613_v34 = vld [vmem:[%s10167_s4 + $0xb4] sm:$0xf0] }
  0x44   : > { %1671 = vmatpush.bf16.msrb.mxu1 %v4922_v22  ;;  %1814 = vmatpush.bf16.msra.mxu3 %v5490_v1  ;;  %v6725_v22 = vld [vmem:[%s10167_s4 + $0x434] sm:$0xf0]  ;;  %v5102_v29 = vor.u32 %v6634_v26, %v5099_v27  ;;  %v6620_v36 = vld [vmem:[%s10167_s4 + $0xf4] sm:$0xf]  ;;  %v5043_v39 = vld [vmem:[%s10167_s4 + $0x128] sm:$0xf0]  ;;  %v4986_v41 = vor.u32 %v6613_v34, %v4985_v32 }
  0x45   : > { %1561 = vmatmul.bf16.gmra.mxu0 %v7247_v14  ;;  %v5046_v40 = vor.u32 %v6620_v36, %v5043_v39  ;;  %v4929_v42 = vld [vmem:[%s10167_s4 + $0x10] sm:$0xf]  ;;  %v6599_v44 = vld [vmem:[%s10167_s4 + $0x44] sm:$0xf0]  ;;  %v6704_v49 = vld [vmem:[%s10167_s4 + $0x394] sm:$0xf] }
  0x46   : > { %1726 = vmatpush.bf16.msrb.mxu0 %v5094_v13  ;;  %5585 = vmatmul.msk.bf16.gmra.mxu1 %vm1535_vm0, %v7261_v20  ;;  %v5155_v13 = vld [vmem:[%s10167_s4 + $0x208] sm:$0xf0]  ;;  %v5377_v45 = vld [vmem:[%s10167_s4 + $0x390] sm:$0xf]  ;;  %v4930_v46 = vor.u32 %v6599_v44, %v4929_v42  ;;  %v4987_v53 = vld [vmem:[%s10167_s4 + $0xb8] sm:$0xf0] }
  0x47   : > { %5589 = vmatmul.msk.bf16.gmra.mxu3 %vm1535_vm0, %v7261_v20  ;;  %1871 = vmatpush.bf16.msra.mxu2 %v5550_v47  ;;  %v5158_v16 = vor.u32 %v6648_v12, %v5155_v13  ;;  %v6711_v47 = vld [vmem:[%s10167_s4 + $0x3c4] sm:$0xf0]  ;;  %v5379_v50 = vld [vmem:[%s10167_s4 + $0x3c8] sm:$0xf0]  ;;  %v6592_v55 = vld [vmem:[%s10167_s4 + $0x14] sm:$0xf] }
  0x48   : > { %1619 = vmatmul.bf16.gmra.mxu2 %v7247_v14  ;;  %1780 = vmatpush.bf16.msra.mxu1 %v5322_v48  ;;  %v5378_v48 = vor.u32 %v6711_v47, %v5377_v45  ;;  %v5382_v51 = vor.u32 %v6704_v49, %v5379_v50  ;;  %v5553_v59 = vld [vmem:[%s10167_s4 + $0x4e8] sm:$0xf]  ;;  %v6754_v60 = vld [vmem:[%s10167_s4 + $0x51c] sm:$0xf0]  ;;  %v6747_v62 = vld [vmem:[%s10167_s4 + $0x4ec] sm:$0xf] }
  0x49   : > { %v5554_v63 = vor.u32 %v6754_v60, %v5553_v59  ;;  %v5555_v0 = vld [vmem:[%s10167_s4 + $0x520] sm:$0xf0]  ;;  %v5329_v2 = vld [vmem:[%s10167_s4 + $0x328] sm:$0xf]  ;;  %v6698_v3 = vld [vmem:[%s10167_s4 + $0x35c] sm:$0xf0] }
  0x4a   : > { %1727 = vmatpush.bf16.msrb.mxu0 %v5038_v21  ;;  %v5433_v21 = vld [vmem:[%s10167_s4 + $0x400] sm:$0xf]  ;;  %v5558_v1 = vor.u32 %v6747_v62, %v5555_v0  ;;  %v6691_v4 = vld [vmem:[%s10167_s4 + $0x32c] sm:$0xf]  ;;  %v5273_v8 = vld [vmem:[%s10167_s4 + $0x2b8] sm:$0xf] }
  0x4b   : > { %1872 = vmatpush.bf16.msra.mxu2 %v5494_v5  ;;  %v5434_v24 = vor.u32 %v6725_v22, %v5433_v21  ;;  %v5330_v5 = vor.u32 %v6698_v3, %v5329_v2  ;;  %v6684_v9 = vld [vmem:[%s10167_s4 + $0x2ec] sm:$0xf0]  ;;  %v5275_v13 = vld [vmem:[%s10167_s4 + $0x2f0] sm:$0xf0]  ;;  %v6733_v18 = vld [vmem:[%s10167_s4 + $0x47c] sm:$0xf] }
  0x4c   : > { %1781 = vmatpush.bf16.msra.mxu1 %v5266_v56  ;;  %v4931_v56 = vld [vmem:[%s10167_s4 + $0x48] sm:$0xf0]  ;;  %v5274_v12 = vor.u32 %v6684_v9, %v5273_v8  ;;  %v6740_v17 = vld [vmem:[%s10167_s4 + $0x4ac] sm:$0xf0]  ;;  %v5499_v21 = vld [vmem:[%s10167_s4 + $0x4b0] sm:$0xf0] }
  0x4d   : > { %1815 = vmatpush.bf16.msra.mxu3 %v5434_v24  ;;  %v5502_v23 = vor.u32 %v6733_v18, %v5499_v21  ;;  %v5217_v24 = vld [vmem:[%s10167_s4 + $0x248] sm:$0xf]  ;;  %v6670_v25 = vld [vmem:[%s10167_s4 + $0x27c] sm:$0xf0]  ;;  %v6663_v26 = vld [vmem:[%s10167_s4 + $0x24c] sm:$0xf] }
  0x4e   : > { %1728 = vmatpush.bf16.msrb.mxu0 %v4982_v30  ;;  %v5041_v30 = vld [vmem:[%s10167_s4 + $0xf0] sm:$0xf]  ;;  %v5105_v45 = vld [vmem:[%s10167_s4 + $0x168] sm:$0xf]  ;;  %v6726_v49 = vld [vmem:[%s10167_s4 + $0x43c] sm:$0xf0] }
  0x4f   : > { %1873 = vmatpush.bf16.msra.mxu2 %v5438_v28  ;;  %v5218_v28 = vor.u32 %v6670_v25, %v5217_v24  ;;  %v6656_v34 = vld [vmem:[%s10167_s4 + $0x20c] sm:$0xf0]  ;;  %v6719_v50 = vld [vmem:[%s10167_s4 + $0x40c] sm:$0xf]  ;;  %v5107_v0 = vld [vmem:[%s10167_s4 + $0x1a0] sm:$0xf0] }
  0x50   : > { %1782 = vmatpush.bf16.msra.mxu1 %v5210_v6  ;;  %v5331_v6 = vld [vmem:[%s10167_s4 + $0x360] sm:$0xf0]  ;;  %v4937_v9 = vld [vmem:[%s10167_s4 + $0x18] sm:$0xf]  ;;  %v6705_v24 = vld [vmem:[%s10167_s4 + $0x39c] sm:$0xf] }
  0x51   : > { %1816 = vmatpush.bf16.msra.mxu3 %v5378_v48  ;;  %v5334_v7 = vor.u32 %v6691_v4, %v5331_v6  ;;  %v5441_v48 = vld [vmem:[%s10167_s4 + $0x408] sm:$0xf]  ;;  %v5387_v25 = vld [vmem:[%s10167_s4 + $0x3d0] sm:$0xf0]  ;;  %s281_s10 = sand.u32 1, %s6857_s22   ;;  %s4780_s25 = sshll.u32 %s4777_s29, 4  ;;  %s4781_s25 = int_to_ptr.hbm [resolvable:$true] %s4780_s25 }
  0x52   : > { %1729 = vmatpush.bf16.msrb.mxu0 %v4926_v31  ;;  %v6627_v31 = vld [vmem:[%s10167_s4 + $0x124] sm:$0xf0]  ;;  %s8963_s16 = smul.u32 896, %s281_s10  ;;  %s4765_s13 = scalar_lea.sflag [#allocation3], %s281_s10 }
  0x53   : > { %v5042_v33 = vor.u32 %v6627_v31, %v5041_v30  ;;  %1874 = vmatpush.bf16.msra.mxu2 %v5382_v51  ;;  %v5442_v51 = vor.u32 %v6726_v49, %v5441_v48  ;;  %v4993_v4 = vld [vmem:[%s10167_s4 + $0x88] sm:$0xf] }
  0x54   : > { %1783 = vmatpush.bf16.msra.mxu1 %v5154_v15  ;;  %s9002_s17 = scalar_lea.vmem [#allocation2], %s8963_s16  ;;  %s6817_s16 = sshra.s32 %s4781_s25, 4  ;;  %s6818_s16 = int_to_ptr.hbm [resolvable:$true] %s6817_s16 }
  0x55   : > { %1566 = vmatmul.bf16.gmra.mxu0 %v7291_v37  ;;  %s4778_s28 = sshll.u32 %s9002_s17, 4  ;;  %s6819_s9 = scalar_lea.hbm %s6818_s16, 896  ;;  %s4779_s28 = int_to_ptr.vmem [resolvable:$true] %s4778_s28 }
  0x56   : > { %5586 = vmatmul.msk.bf16.gmra.mxu1 %vm1535_vm0, %v7293_v38  ;;  %1838 = vmatpush.bf16.msra.mxu0 %v5326_v52  ;;  %v6606_v52 = vld [vmem:[%s10167_s4 + $0x84] sm:$0xf]  ;;  %p6820_p11 = scmp.ne.s32.totalorder %s6818_s16, %s6819_s9  ;;  %p6824_p0 = scmp.lt.s32.totalorder %s6818_s16, %s10169_s6 }
  0x57   : > { %5590 = vmatmul.msk.bf16.gmra.mxu3 %vm1535_vm0, %v7293_v38  ;;  %v4990_v54 = vor.u32 %v6606_v52, %v4987_v53  ;;  %v5443_v52 = vld [vmem:[%s10167_s4 + $0x440] sm:$0xf0] }
  0x58   : > { %1624 = vmatmul.bf16.gmra.mxu2 %v7291_v37  ;;  %1784 = vmatpush.bf16.msra.mxu1 %v5098_v19  ;;  %p6821_p12 = pnand %p6820_p11, %p6942_p5 }
  0x5a   : > { %1839 = vmatpush.bf16.msra.mxu0 %v5270_v57  ;;  %v4934_v57 = vor.u32 %v6592_v55, %v4931_v56  ;;  %v5446_v55 = vor.u32 %v6719_v50, %v5443_v52  ;;  %v5049_v56 = vld [vmem:[%s10167_s4 + $0xf8] sm:$0xf]  ;;  %v5561_v50 = vld [vmem:[%s10167_s4 + $0x4f0] sm:$0xf]  ;;  %v6748_v52 = vld [vmem:[%s10167_s4 + $0x4f4] sm:$0xf]  ;;  %p6822_p13 = pneg %p6821_p12 }
  0x5c   : > { %1785 = vmatpush.bf16.msra.mxu1 %v5042_v33  ;;  %v5161_v33 = vld [vmem:[%s10167_s4 + $0x1d8] sm:$0xf] }
  0x5d   : > { %v5162_v39 = vor.u32 %v6656_v34, %v5161_v33  ;;  %v6607_v33 = vld [vmem:[%s10167_s4 + $0x8c] sm:$0xf]  ;;  %v4995_v34 = vld [vmem:[%s10167_s4 + $0xc0] sm:$0xf0] }
  0x5e   : > { %1840 = vmatpush.bf16.msra.mxu0 %v5214_v10  ;;  %v6677_v10 = vld [vmem:[%s10167_s4 + $0x2bc] sm:$0xf] }
  0x5f   : > { %v5278_v15 = vor.u32 %v6677_v10, %v5275_v13  ;;  %v6600_v10 = vld [vmem:[%s10167_s4 + $0x4c] sm:$0xf0] }
  0x60   : > { %1786 = vmatpush.bf16.msra.mxu1 %v4986_v41  ;;  %v5163_v41 = vld [vmem:[%s10167_s4 + $0x210] sm:$0xf0]  ;;  %v4938_v18 = vor.u32 %v6600_v10, %v4937_v9 }
  0x62   : > { %1841 = vmatpush.bf16.msra.mxu0 %v5158_v16  ;;  %v5497_v16 = vld [vmem:[%s10167_s4 + $0x478] sm:$0xf] }
  0x63   : > { %v5498_v19 = vor.u32 %v6740_v17, %v5497_v16  ;;  %v6621_v16 = vld [vmem:[%s10167_s4 + $0xfc] sm:$0xf]  ;;  %v5051_v17 = vld [vmem:[%s10167_s4 + $0x130] sm:$0xf0] }
  0x64   : > { %1787 = vmatpush.bf16.msra.mxu1 %v4930_v46  ;;  %v6642_v46 = vld [vmem:[%s10167_s4 + $0x19c] sm:$0xf0] }
  0x65   : > { %1571 = vmatmul.bf16.gmra.mxu0 %v7339_v61  ;;  %v5106_v47 = vor.u32 %v6642_v46, %v5105_v45 }
  0x66   : > { %1672 = vmatmul.bf16.vlgmr.msrb.gmra.mxu1 %v7161_v35  ;;  %1842 = vmatpush.bf16.msra.mxu0 %v5102_v29  ;;  %v5219_v29 = vld [vmem:[%s10167_s4 + $0x280] sm:$0xf0] }
  0x67   : > { %5591 = vmatmul.msk.bf16.vlgmr.msrb.gmra.mxu3 %vm1535_vm0, %v7079_v58  ;;  %v5222_v30 = vor.u32 %v6663_v26, %v5219_v29  ;;  %v5390_v26 = vor.u32 %v6705_v24, %v5387_v25  ;;  %v5505_v24 = vld [vmem:[%s10167_s4 + $0x480] sm:$0xf]  ;;  %v6741_v25 = vld [vmem:[%s10167_s4 + $0x4b4] sm:$0xf0] }
  0x68   : > { %1629 = vmatmul.bf16.gmra.mxu2 %v7339_v61  ;;  %1929 = vmatpush.bf16.msrb.mxu3 %v5554_v63  ;;  %v6635_v63 = vld [vmem:[%s10167_s4 + $0x16c] sm:$0xf] }
  0x69   : > { %1896 = vmatpush.bf16.msrb.mxu1 %v5330_v5  ;;  %v5110_v3 = vor.u32 %v6635_v63, %v5107_v0  ;;  %v6614_v5 = vld [vmem:[%s10167_s4 + $0xbc] sm:$0xf0] }
  0x6a   : > { %1843 = vmatpush.bf16.msra.mxu0 %v5046_v40  ;;  %v6649_v40 = vld [vmem:[%s10167_s4 + $0x1dc] sm:$0xf]  ;;  %v4994_v6 = vor.u32 %v6614_v5, %v4993_v4  ;;  %v6692_v4 = vld [vmem:[%s10167_s4 + $0x334] sm:$0xf] }
  0x6b   : > { %v5166_v44 = vor.u32 %v6649_v40, %v5163_v41 }
  0x6c   : > { %1930 = vmatpush.bf16.msrb.mxu3 %v5498_v19  ;;  %v6712_v19 = vld [vmem:[%s10167_s4 + $0x3cc] sm:$0xf0] }
  0x6d   : > { %1897 = vmatpush.bf16.msrb.mxu1 %v5274_v12 }
  0x6e   : > { %1844 = vmatpush.bf16.msra.mxu0 %v4990_v54 }
  0x70   : > { %1931 = vmatpush.bf16.msrb.mxu3 %v5442_v51  ;;  %v6755_v51 = vld [vmem:[%s10167_s4 + $0x524] sm:$0xf0] }
  0x71   : > { %1898 = vmatpush.bf16.msrb.mxu1 %v5218_v28 }
  0x72   : > { %1845 = vmatpush.bf16.msra.mxu0 %v4934_v57  ;;  %v6628_v57 = vld [vmem:[%s10167_s4 + $0x12c] sm:$0xf0] }
  0x75   : > { %1730 = vmatmul.bf16.vlgmr.msrb.gmra.mxu0 %v7161_v35  ;;  %1899 = vmatpush.bf16.msrb.mxu1 %v5162_v39  ;;  %v4998_v39 = vor.u32 %v6607_v33, %v4995_v34 }
  0x76   : > { %1677 = vmatmul.bf16.gmra.mxu1 %v7247_v14  ;;  %1954 = vmatpush.bf16.msrb.mxu0 %v5334_v7 }
  0x77   : > { %5592 = vmatmul.msk.bf16.gmra.mxu3 %vm1535_vm0, %v7181_v43 }
  0x78   : > { %5595 = vmatmul.msk.bf16.vlgmr.msrb.gmra.mxu2 %vm1535_vm0, %v7079_v58 }
  0x79   : > { %1987 = vmatpush.bf16.msrb.mxu2 %v5558_v1  ;;  %1900 = vmatpush.bf16.msrb.mxu1 %v5106_v47  ;;  %v5050_v1 = vor.u32 %v6628_v57, %v5049_v56 }
  0x7a   : > { %1955 = vmatpush.bf16.msrb.mxu0 %v5278_v15 }
  0x7d   : > { %1988 = vmatpush.bf16.msrb.mxu2 %v5502_v23  ;;  %1901 = vmatpush.bf16.msrb.mxu1 %v5050_v1 }
  0x7e   : > { %1956 = vmatpush.bf16.msrb.mxu0 %v5222_v30 }
  0x81   : > { %1989 = vmatpush.bf16.msrb.mxu2 %v5446_v55  ;;  %1902 = vmatpush.bf16.msrb.mxu1 %v4994_v6  ;;  %v5339_v6 = vld [vmem:[%s10167_s4 + $0x368] sm:$0xf0] }
  0x82   : > { %1957 = vmatpush.bf16.msrb.mxu0 %v5166_v44  ;;  %v4939_v44 = vld [vmem:[%s10167_s4 + $0x50] sm:$0xf0] }
  0x85   : > { %1735 = vmatmul.bf16.gmra.mxu0 %v7247_v14  ;;  %1903 = vmatpush.bf16.msrb.mxu1 %v4938_v18  ;;  %v6685_v18 = vld [vmem:[%s10167_s4 + $0x2f4] sm:$0xf0] }
  0x86   : > { %1682 = vmatmul.bf16.gmra.mxu1 %v7291_v37  ;;  %1958 = vmatpush.bf16.msrb.mxu0 %v5110_v3  ;;  %v6699_v3 = vld [vmem:[%s10167_s4 + $0x364] sm:$0xf0] }
  0x87   : > { %5593 = vmatmul.msk.bf16.gmra.mxu3 %vm1535_vm0, %v7261_v20  ;;  %1990 = vmatpush.bf16.msrb.mxu2 %v5390_v26  ;;  %v6734_v26 = vld [vmem:[%s10167_s4 + $0x484] sm:$0xf] }
  0x88   : > { %5596 = vmatmul.msk.bf16.gmra.mxu2 %vm1535_vm0, %v7181_v43 }
  0x95   : > { %1740 = vmatmul.bf16.gmra.mxu0 %v7291_v37 }
  0x96   : > { %1687 = vmatmul.bf16.gmra.mxu1 %v7339_v61 }
  0x97   : > { %5594 = vmatmul.msk.bf16.gmra.mxu3 %vm1535_vm0, %v7293_v38 }
  0x98   : > { %5597 = vmatmul.msk.bf16.gmra.mxu2 %vm1535_vm0, %v7261_v20 }
  0xa3   : > { %v1586_v11 = vpop.f32.mrf.mxu1 }
  0xa5   : > { %1745 = vmatmul.bf16.gmra.mxu0 %v7339_v61 }
  0xa6   : > { %1788 = vmatmul.bf16.vlgmr.msra.gmra.mxu1 %v7161_v35 }
  0xa7   : > { %5599 = vmatmul.msk.bf16.vlgmr.msra.gmra.mxu3 %vm1535_vm0, %v7079_v58 }
  0xa8   : > { %5598 = vmatmul.msk.bf16.gmra.mxu2 %vm1535_vm0, %v7293_v38 }
  0xaa   : > { %v1644_v22 = vpop.f32.mrf.mxu3 }
  0xab   : > { %v1588_v27 = vpop.f32.mrf.mxu1 }
  0xb2   : > { %v1646_v31 = vpop.f32.mrf.mxu3  ;;  %v1557_v32 = vpop.f32.mrf.mxu0 }
  0xb3   : > { %v7544_v36 = vadd.f32 %v1586_v11, %v1557_v32  ;;  %v1591_v42 = vpop.f32.mrf.mxu1  ;;  %v5385_v11 = vld [vmem:[%s10167_s4 + $0x398] sm:$0xf] }
  0xb4   : > { %v5386_v23 = vor.u32 %v6712_v19, %v5385_v11  ;;  %v6678_v19 = vld [vmem:[%s10167_s4 + $0x2c4] sm:$0xf] }
  0xb5   : > { %1846 = vmatmul.bf16.vlgmr.msra.gmra.mxu0 %v7161_v35 }
  0xb6   : > { %1793 = vmatmul.bf16.gmra.mxu1 %v7247_v14  ;;  %1932 = vmatpush.bf16.msrb.mxu3 %v5386_v23 }
  0xb7   : > { %5600 = vmatmul.msk.bf16.gmra.mxu3 %vm1535_vm0, %v7181_v43 }
  0xb8   : > { %5603 = vmatmul.msk.bf16.vlgmr.msra.gmra.mxu2 %vm1535_vm0, %v7079_v58 }
  0xba   : > { %v1559_v54 = vpop.f32.mrf.mxu0  ;;  %v1649_v60 = vpop.f32.mrf.mxu3 }
  0xbb   : > { %v1615_v53 = vpop.f32.mrf.mxu2  ;;  %v7584_v62 = vadd.f32 %v1588_v27, %v1559_v54  ;;  %v1593_v2 = vpop.f32.mrf.mxu1  ;;  %v5563_v54 = vld [vmem:[%s10167_s4 + $0x528] sm:$0xf0] }
  0xbc   : > { %v7582_v59 = vadd.f32 %v1644_v22, %v1615_v53  ;;  %v5054_v22 = vor.u32 %v6621_v16, %v5051_v17  ;;  %v5562_v53 = vor.u32 %v6755_v51, %v5561_v50  ;;  %v5566_v57 = vor.u32 %v6748_v52, %v5563_v54  ;;  %v5281_v17 = vld [vmem:[%s10167_s4 + $0x2c0] sm:$0xf]  ;;  %v5227_v50 = vld [vmem:[%s10167_s4 + $0x288] sm:$0xf0] }
  0xbd   : > { %v5169_v54 = vld [vmem:[%s10167_s4 + $0x1e0] sm:$0xf] }
  0xbe   : > { %1959 = vmatpush.bf16.msrb.mxu0 %v5054_v22  ;;  %2045 = vmatpush.bf16.msra.mxu3 %v5562_v53  ;;  %v5283_v22 = vld [vmem:[%s10167_s4 + $0x2f8] sm:$0xf0] }
  0xbf   : > { %2103 = vmatpush.bf16.msra.mxu2 %v5566_v57  ;;  %v5286_v23 = vor.u32 %v6678_v19, %v5283_v22 }
  0xc2   : > { %v1562_v8 = vpop.f32.mrf.mxu0  ;;  %v1651_v13 = vpop.f32.mrf.mxu3  ;;  %1960 = vmatpush.bf16.msrb.mxu0 %v4998_v39 }
  0xc3   : > { %v1617_v7 = vpop.f32.mrf.mxu2  ;;  %v7609_v15 = vadd.f32 %v1591_v42, %v1562_v8  ;;  %v1596_v21 = vpop.f32.mrf.mxu1  ;;  %v6593_v42 = vld [vmem:[%s10167_s4 + $0x1c] sm:$0xf] }
  0xc4   : > { %v7607_v12 = vadd.f32 %v1646_v31, %v1617_v7  ;;  %v4942_v48 = vor.u32 %v6593_v42, %v4939_v44  ;;  %v5342_v7 = vor.u32 %v6692_v4, %v5339_v6  ;;  %v5225_v44 = vld [vmem:[%s10167_s4 + $0x250] sm:$0xf]  ;;  %v5171_v4 = vld [vmem:[%s10167_s4 + $0x218] sm:$0xf0] }
  0xc5   : > { %1851 = vmatmul.bf16.gmra.mxu0 %v7247_v14  ;;  %v5113_v6 = vld [vmem:[%s10167_s4 + $0x170] sm:$0xf] }
  0xc6   : > { %1798 = vmatmul.bf16.gmra.mxu1 %v7291_v37  ;;  %1961 = vmatpush.bf16.msrb.mxu0 %v4942_v48  ;;  %v6664_v48 = vld [vmem:[%s10167_s4 + $0x254] sm:$0xf] }
  0xc7   : > { %5601 = vmatmul.msk.bf16.gmra.mxu3 %vm1535_vm0, %v7261_v20  ;;  %v5230_v51 = vor.u32 %v6664_v48, %v5227_v50  ;;  %v4945_v50 = vld [vmem:[%s10167_s4 + $0x20] sm:$0xf] }
  0xc8   : > { %5604 = vmatmul.msk.bf16.gmra.mxu2 %vm1535_vm0, %v7181_v43 }
  0xca   : > { %v1564_v28 = vpop.f32.mrf.mxu0  ;;  %v1654_v30 = vpop.f32.mrf.mxu3  ;;  %2070 = vmatpush.bf16.msra.mxu0 %v5342_v7  ;;  %v6643_v7 = vld [vmem:[%s10167_s4 + $0x1a4] sm:$0xf0] }
  0xcb   : > { %v1620_v27 = vpop.f32.mrf.mxu2  ;;  %v7634_v31 = vadd.f32 %v1593_v2, %v1564_v28  ;;  %v1598_v32 = vpop.f32.mrf.mxu1  ;;  %v5337_v2 = vld [vmem:[%s10167_s4 + $0x330] sm:$0xf]  ;;  %v5507_v28 = vld [vmem:[%s10167_s4 + $0x4b8] sm:$0xf0] }
  0xcc   : > { %v7632_v29 = vadd.f32 %v1649_v60, %v1620_v27  ;;  %v5338_v5 = vor.u32 %v6699_v3, %v5337_v2  ;;  %v5506_v27 = vor.u32 %v6741_v25, %v5505_v24  ;;  %v5510_v33 = vor.u32 %v6734_v26, %v5507_v28  ;;  %v6650_v3 = vld [vmem:[%s10167_s4 + $0x1e4] sm:$0xf]  ;;  %v6629_v24 = vld [vmem:[%s10167_s4 + $0x134] sm:$0xf0] }
  0xce   : > { %2012 = vmatpush.bf16.msra.mxu1 %v5338_v5  ;;  %2071 = vmatpush.bf16.msra.mxu0 %v5286_v23  ;;  %v5174_v5 = vor.u32 %v6650_v3, %v5171_v4  ;;  %v5057_v23 = vld [vmem:[%s10167_s4 + $0x100] sm:$0xf]  ;;  %v6622_v3 = vld [vmem:[%s10167_s4 + $0x104] sm:$0xf]  ;;  %v5059_v4 = vld [vmem:[%s10167_s4 + $0x138] sm:$0xf0] }
  0xcf   : > { %2046 = vmatpush.bf16.msra.mxu3 %v5506_v27  ;;  %2104 = vmatpush.bf16.msra.mxu2 %v5510_v33  ;;  %v5058_v27 = vor.u32 %v6629_v24, %v5057_v23  ;;  %v5115_v33 = vld [vmem:[%s10167_s4 + $0x1a8] sm:$0xf0] }
  0xd0   : > { %v5003_v23 = vld [vmem:[%s10167_s4 + $0xc8] sm:$0xf0] }
  0xd2   : > { %v1567_v41 = vpop.f32.mrf.mxu0  ;;  %v1656_v46 = vpop.f32.mrf.mxu3  ;;  %2072 = vmatpush.bf16.msra.mxu0 %v5230_v51  ;;  %v6601_v51 = vld [vmem:[%s10167_s4 + $0x54] sm:$0xf0] }
  0xd3   : > { %v1622_v40 = vpop.f32.mrf.mxu2  ;;  %v7650_v47 = vadd.f32 %v1596_v21, %v1567_v41  ;;  %v1601_v49 = vpop.f32.mrf.mxu1  ;;  %v5282_v21 = vor.u32 %v6685_v18, %v5281_v17  ;;  %v5451_v18 = vld [vmem:[%s10167_s4 + $0x448] sm:$0xf0] }
  0xd4   : > { %v7648_v45 = vadd.f32 %v1651_v13, %v1622_v40 }
  0xd5   : > { %1856 = vmatmul.bf16.gmra.mxu0 %v7291_v37  ;;  %2013 = vmatpush.bf16.msra.mxu1 %v5282_v21 }
  0xd6   : > { %1803 = vmatmul.bf16.gmra.mxu1 %v7339_v61  ;;  %2073 = vmatpush.bf16.msra.mxu0 %v5174_v5 }
  0xd7   : > { %5602 = vmatmul.msk.bf16.gmra.mxu3 %vm1535_vm0, %v7293_v38 }
  0xd8   : > { %5605 = vmatmul.msk.bf16.gmra.mxu2 %vm1535_vm0, %v7261_v20 }
  0xda   : > { %v1569_v56 = vpop.f32.mrf.mxu0  ;;  %v1659_v63 = vpop.f32.mrf.mxu3 }
  0xdb   : > { %v1625_v55 = vpop.f32.mrf.mxu2  ;;  %v7672_v0 = vadd.f32 %v1598_v32, %v1569_v56  ;;  %v1603_v1 = vpop.f32.mrf.mxu1 }
  0xdc   : > { %v7670_v60 = vadd.f32 %v1654_v30, %v1625_v55  ;;  %v6657_v55 = vld [vmem:[%s10167_s4 + $0x214] sm:$0xf0] }
  0xe2   : > { %v1572_v9 = vpop.f32.mrf.mxu0  ;;  %v1661_v11 = vpop.f32.mrf.mxu3 }
  0xe3   : > { %v1627_v8 = vpop.f32.mrf.mxu2  ;;  %v7688_v13 = vadd.f32 %v1601_v49, %v1572_v9  ;;  %v1673_v16 = vpop.f32.mrf.mxu1  ;;  %v5449_v9 = vld [vmem:[%s10167_s4 + $0x410] sm:$0xf] }
  0xe4   : > { %v7686_v10 = vadd.f32 %v1656_v46, %v1627_v8  ;;  %v6671_v46 = vld [vmem:[%s10167_s4 + $0x284] sm:$0xf0]  ;;  %v5114_v8 = vor.u32 %v6643_v7, %v5113_v6  ;;  %v5062_v6 = vor.u32 %v6622_v3, %v5059_v4  ;;  %v6706_v7 = vld [vmem:[%s10167_s4 + $0x3a4] sm:$0xf] }
  0xe5   : > { %1861 = vmatmul.bf16.gmra.mxu0 %v7339_v61  ;;  %v5226_v49 = vor.u32 %v6671_v46, %v5225_v44  ;;  %v6615_v44 = vld [vmem:[%s10167_s4 + $0xc4] sm:$0xf0] }
  0xe6   : > { %1904 = vmatmul.bf16.vlgmr.msrb.gmra.mxu1 %v7161_v35 }
  0xe7   : > { %5607 = vmatmul.msk.bf16.vlgmr.msrb.gmra.mxu3 %vm1535_vm0, %v7079_v58  ;;  %2014 = vmatpush.bf16.msra.mxu1 %v5226_v49 }
  0xe8   : > { %5606 = vmatmul.msk.bf16.gmra.mxu2 %vm1535_vm0, %v7293_v38 }
  0xea   : > { %v1574_v32 = vpop.f32.mrf.mxu0  ;;  %v1702_v39 = vpop.f32.mrf.mxu3 }
  0xeb   : > { %v1630_v30 = vpop.f32.mrf.mxu2  ;;  %v7722_v40 = vadd.f32 %v1603_v1, %v1574_v32  ;;  %v7724_v41 = vadd.f32 %v1702_v39, %v1673_v16  ;;  %v1675_v42 = vpop.f32.mrf.mxu1  ;;  %v6720_v16 = vld [vmem:[%s10167_s4 + $0x414] sm:$0xf]  ;;  %v5001_v39 = vld [vmem:[%s10167_s4 + $0x90] sm:$0xf] }
  0xec   : > { %v7720_v34 = vadd.f32 %v1659_v63, %v1630_v30  ;;  %v5170_v63 = vor.u32 %v6657_v55, %v5169_v54  ;;  %v5454_v22 = vor.u32 %v6720_v16, %v5451_v18  ;;  %v6636_v32 = vld [vmem:[%s10167_s4 + $0x174] sm:$0xf]  ;;  %v5002_v46 = vor.u32 %v6615_v44, %v5001_v39 }
  0xed   : > { %v4946_v55 = vor.u32 %v6601_v51, %v4945_v50  ;;  %v6749_v50 = vld [vmem:[%s10167_s4 + $0x4fc] sm:$0xf] }
  0xee   : > { %2015 = vmatpush.bf16.msra.mxu1 %v5170_v63  ;;  %2105 = vmatpush.bf16.msra.mxu2 %v5454_v22  ;;  %v6608_v22 = vld [vmem:[%s10167_s4 + $0x94] sm:$0xf] }
  0xef   : > { %v5006_v24 = vor.u32 %v6608_v22, %v5003_v23 }
  0xf2   : > { %v1731_v53 = vpop.f32.mrf.mxu0  ;;  %v1704_v57 = vpop.f32.mrf.mxu3  ;;  %2016 = vmatpush.bf16.msra.mxu1 %v5114_v8  ;;  %v5395_v8 = vld [vmem:[%s10167_s4 + $0x3d8] sm:$0xf0] }
  0xf3   : > { %v1632_v52 = vpop.f32.mrf.mxu2  ;;  %v7746_v1 = vadd.f32 %v1704_v57, %v1675_v42  ;;  %v1678_v2 = vpop.f32.mrf.mxu1  ;;  %v5118_v42 = vor.u32 %v6636_v32, %v5115_v33  ;;  %v6713_v57 = vld [vmem:[%s10167_s4 + $0x3d4] sm:$0xf0]  ;;  %v4947_v32 = vld [vmem:[%s10167_s4 + $0x58] sm:$0xf0] }
  0xf4   : > { %v7744_v56 = vadd.f32 %v1661_v11, %v1632_v52  ;;  %v6727_v11 = vld [vmem:[%s10167_s4 + $0x444] sm:$0xf0]  ;;  %v5393_v52 = vld [vmem:[%s10167_s4 + $0x3a0] sm:$0xf] }
  0xf5   : > { %1962 = vmatmul.bf16.vlgmr.msrb.gmra.mxu0 %v7161_v35  ;;  %v5450_v17 = vor.u32 %v6727_v11, %v5449_v9  ;;  %v5394_v5 = vor.u32 %v6713_v57, %v5393_v52  ;;  %v5398_v9 = vor.u32 %v6706_v7, %v5395_v8  ;;  %v5571_v52 = vld [vmem:[%s10167_s4 + $0x530] sm:$0xf0]  ;;  %v6700_v7 = vld [vmem:[%s10167_s4 + $0x36c] sm:$0xf0]  ;;  %v6693_v8 = vld [vmem:[%s10167_s4 + $0x33c] sm:$0xf] }
  0xf6   : > { %1909 = vmatmul.bf16.gmra.mxu1 %v7247_v14  ;;  %2074 = vmatpush.bf16.msra.mxu0 %v5118_v42  ;;  %v5574_v57 = vor.u32 %v6749_v50, %v5571_v52  ;;  %v6735_v50 = vld [vmem:[%s10167_s4 + $0x48c] sm:$0xf]  ;;  %v5515_v52 = vld [vmem:[%s10167_s4 + $0x4c0] sm:$0xf0] }
  0xf7   : > { %5608 = vmatmul.msk.bf16.gmra.mxu3 %vm1535_vm0, %v7181_v43  ;;  %2017 = vmatpush.bf16.msra.mxu1 %v5058_v27 }
  0xf8   : > { %5611 = vmatmul.msk.bf16.vlgmr.msrb.gmra.mxu2 %vm1535_vm0, %v7079_v58  ;;  %2047 = vmatpush.bf16.msra.mxu3 %v5450_v17 }
  0xf9   : > { %2106 = vmatpush.bf16.msra.mxu2 %v5398_v9 }
  0xfa   : > { %v1733_v21 = vpop.f32.mrf.mxu0  ;;  %v1707_v25 = vpop.f32.mrf.mxu3  ;;  %2075 = vmatpush.bf16.msra.mxu0 %v5062_v6  ;;  %v5345_v6 = vld [vmem:[%s10167_s4 + $0x338] sm:$0xf] }
  0xfb   : > { %v1760_v19 = vpop.f32.mrf.mxu2  ;;  %v7786_v28 = vadd.f32 %v1707_v25, %v1678_v2  ;;  %v1680_v30 = vpop.f32.mrf.mxu1  ;;  %2018 = vmatpush.bf16.msra.mxu1 %v5002_v46  ;;  %v5346_v9 = vor.u32 %v6700_v7, %v5345_v6 }
  0xfc   : > { %v7784_v26 = vadd.f32 %v1760_v19, %v1731_v53  ;;  %2048 = vmatpush.bf16.msra.mxu3 %v5394_v5 }
  0xfd   : > { %2219 = vmatpush.bf16.msrb.mxu2 %v5574_v57  ;;  %v5518_v57 = vor.u32 %v6735_v50, %v5515_v52  ;;  %v5179_v50 = vld [vmem:[%s10167_s4 + $0x220] sm:$0xf0]  ;;  %v5121_v52 = vld [vmem:[%s10167_s4 + $0x178] sm:$0xf] }
  0xfe   : > { %2076 = vmatpush.bf16.msra.mxu0 %v5006_v24 }
  0xff   : > { %2019 = vmatpush.bf16.msra.mxu1 %v4946_v55 }
 0x101   : > { %2220 = vmatpush.bf16.msrb.mxu2 %v5518_v57  ;;  %v5457_v57 = vld [vmem:[%s10167_s4 + $0x418] sm:$0xf] }
 0x102   : > { %v1736_v49 = vpop.f32.mrf.mxu0  ;;  %v1709_v53 = vpop.f32.mrf.mxu3 }
 0x103   : > { %v1762_v48 = vpop.f32.mrf.mxu2  ;;  %v7814_v63 = vadd.f32 %v1709_v53, %v1680_v30  ;;  %v1683_v2 = vpop.f32.mrf.mxu1  ;;  %v6594_v30 = vld [vmem:[%s10167_s4 + $0x24] sm:$0xf]  ;;  %2128 = vmatpush.bf16.msrb.mxu1 %v5346_v9  ;;  %v6672_v9 = vld [vmem:[%s10167_s4 + $0x28c] sm:$0xf0] }
 0x104   : > { %v7809_v54 = vadd.f32 %v1762_v48, %v1733_v21  ;;  %v4950_v42 = vor.u32 %v6594_v30, %v4947_v32  ;;  %v5569_v48 = vld [vmem:[%s10167_s4 + $0x4f8] sm:$0xf]  ;;  %v6686_v30 = vld [vmem:[%s10167_s4 + $0x2fc] sm:$0xf0]  ;;  %v6679_v32 = vld [vmem:[%s10167_s4 + $0x2cc] sm:$0xf] }
 0x105   : > { %1967 = vmatmul.bf16.gmra.mxu0 %v7247_v14 }
 0x106   : > { %1914 = vmatmul.bf16.gmra.mxu1 %v7291_v37  ;;  %2077 = vmatpush.bf16.msra.mxu0 %v4950_v42  ;;  %v5291_v42 = vld [vmem:[%s10167_s4 + $0x300] sm:$0xf0] }
 0x107   : > { %5609 = vmatmul.msk.bf16.gmra.mxu3 %vm1535_vm0, %v7261_v20 }
 0x108   : > { %5612 = vmatmul.msk.bf16.gmra.mxu2 %vm1535_vm0, %v7181_v43 }
 0x10a   : > { %v1738_v16 = vpop.f32.mrf.mxu0  ;;  %v1712_v17 = vpop.f32.mrf.mxu3 }
 0x10b   : > { %v1765_v11 = vpop.f32.mrf.mxu2  ;;  %v7836_v19 = vadd.f32 %v1712_v17, %v1683_v2  ;;  %v1685_v21 = vpop.f32.mrf.mxu1 }
 0x10c   : > { %v7834_v18 = vadd.f32 %v1765_v11, %v1736_v49  ;;  %v6756_v49 = vld [vmem:[%s10167_s4 + $0x52c] sm:$0xf0]  ;;  %v5347_v11 = vld [vmem:[%s10167_s4 + $0x370] sm:$0xf0] }
 0x10d   : > { %v5570_v51 = vor.u32 %v6756_v49, %v5569_v48  ;;  %v5513_v48 = vld [vmem:[%s10167_s4 + $0x488] sm:$0xf]  ;;  %v6742_v49 = vld [vmem:[%s10167_s4 + $0x4bc] sm:$0xf0] }
 0x10f   : > { %2161 = vmatpush.bf16.msrb.mxu3 %v5570_v51  ;;  %v5514_v51 = vor.u32 %v6742_v49, %v5513_v48  ;;  %v6651_v49 = vld [vmem:[%s10167_s4 + $0x1ec] sm:$0xf] }
 0x112   : > { %v1741_v27 = vpop.f32.mrf.mxu0  ;;  %v1714_v33 = vpop.f32.mrf.mxu3 }
 0x113   : > { %v1767_v25 = vpop.f32.mrf.mxu2  ;;  %v7852_v44 = vadd.f32 %v1714_v33, %v1685_v21  ;;  %v1688_v46 = vpop.f32.mrf.mxu1  ;;  %2162 = vmatpush.bf16.msrb.mxu3 %v5514_v51  ;;  %v5182_v51 = vor.u32 %v6651_v49, %v5179_v50  ;;  %v6637_v50 = vld [vmem:[%s10167_s4 + $0x17c] sm:$0xf] }
 0x114   : > { %v7850_v39 = vadd.f32 %v1767_v25, %v1738_v16  ;;  %v5350_v16 = vor.u32 %v6693_v8, %v5347_v11  ;;  %v5233_v8 = vld [vmem:[%s10167_s4 + $0x258] sm:$0xf]  ;;  %v6665_v11 = vld [vmem:[%s10167_s4 + $0x25c] sm:$0xf] }
 0x115   : > { %1972 = vmatmul.bf16.gmra.mxu0 %v7291_v37 }
 0x116   : > { %1919 = vmatmul.bf16.gmra.mxu1 %v7339_v61  ;;  %2186 = vmatpush.bf16.msrb.mxu0 %v5350_v16  ;;  %v5234_v16 = vor.u32 %v6672_v9, %v5233_v8  ;;  %v5459_v9 = vld [vmem:[%s10167_s4 + $0x450] sm:$0xf0] }
 0x117   : > { %5610 = vmatmul.msk.bf16.gmra.mxu3 %vm1535_vm0, %v7293_v38 }
 0x118   : > { %5613 = vmatmul.msk.bf16.gmra.mxu2 %vm1535_vm0, %v7261_v20 }
 0x11a   : > { %v1743_v55 = vpop.f32.mrf.mxu0  ;;  %v1717_v2 = vpop.f32.mrf.mxu3 }
 0x11b   : > { %v1770_v53 = vpop.f32.mrf.mxu2  ;;  %v7874_v4 = vadd.f32 %v1717_v2, %v1688_v46  ;;  %v1690_v5 = vpop.f32.mrf.mxu1  ;;  %v5294_v46 = vor.u32 %v6679_v32, %v5291_v42 }
 0x11c   : > { %v7872_v3 = vadd.f32 %v1770_v53, %v1741_v27  ;;  %v5289_v27 = vld [vmem:[%s10167_s4 + $0x2c8] sm:$0xf] }
 0x11d   : > { %v5290_v33 = vor.u32 %v6686_v30, %v5289_v27  ;;  %2187 = vmatpush.bf16.msrb.mxu0 %v5294_v46  ;;  %v5177_v27 = vld [vmem:[%s10167_s4 + $0x1e8] sm:$0xf]  ;;  %v6658_v30 = vld [vmem:[%s10167_s4 + $0x21c] sm:$0xf0] }
 0x11e   : > { %v5178_v42 = vor.u32 %v6658_v30, %v5177_v27 }
 0x11f   : > { %2129 = vmatpush.bf16.msrb.mxu1 %v5290_v33 }
 0x122   : > { %v1746_v21 = vpop.f32.mrf.mxu0  ;;  %v1719_v22 = vpop.f32.mrf.mxu3 }
 0x123   : > { %v1772_v17 = vpop.f32.mrf.mxu2  ;;  %v7890_v24 = vadd.f32 %v1719_v22, %v1690_v5  ;;  %v1789_v25 = vpop.f32.mrf.mxu1  ;;  %2130 = vmatpush.bf16.msrb.mxu1 %v5234_v16 }
 0x124   : > { %v7888_v23 = vadd.f32 %v1772_v17, %v1743_v55  ;;  %v5235_v17 = vld [vmem:[%s10167_s4 + $0x290] sm:$0xf0] }
 0x125   : > { %1977 = vmatmul.bf16.gmra.mxu0 %v7339_v61 }
 0x126   : > { %2020 = vmatmul.bf16.vlgmr.msra.gmra.mxu1 %v7161_v35 }
 0x127   : > { %5615 = vmatmul.msk.bf16.vlgmr.msra.gmra.mxu3 %vm1535_vm0, %v7079_v58  ;;  %2131 = vmatpush.bf16.msrb.mxu1 %v5178_v42 }
 0x128   : > { %5614 = vmatmul.msk.bf16.gmra.mxu2 %vm1535_vm0, %v7293_v38 }
 0x12a   : > { %v1748_v55 = vpop.f32.mrf.mxu0  ;;  %v1818_v5 = vpop.f32.mrf.mxu3 }
 0x12b   : > { %v1775_v53 = vpop.f32.mrf.mxu2  ;;  %v7924_v6 = vadd.f32 %v1818_v5, %v1789_v25  ;;  %v1791_v7 = vpop.f32.mrf.mxu1  ;;  %v6728_v5 = vld [vmem:[%s10167_s4 + $0x44c] sm:$0xf0] }
 0x12c   : > { %v7922_v2 = vadd.f32 %v1775_v53, %v1746_v21  ;;  %v5238_v21 = vor.u32 %v6665_v11, %v5235_v17  ;;  %v6644_v53 = vld [vmem:[%s10167_s4 + $0x1ac] sm:$0xf0]  ;;  %v5458_v8 = vor.u32 %v6728_v5, %v5457_v57  ;;  %v4953_v5 = vld [vmem:[%s10167_s4 + $0x28] sm:$0xf] }
 0x12e   : > { %2188 = vmatpush.bf16.msrb.mxu0 %v5238_v21  ;;  %v5065_v21 = vld [vmem:[%s10167_s4 + $0x108] sm:$0xf]  ;;  %2163 = vmatpush.bf16.msrb.mxu3 %v5458_v8 }
 0x12f   : > { %v5401_v8 = vld [vmem:[%s10167_s4 + $0x3a8] sm:$0xf] }
 0x132   : > { %v1847_v25 = vpop.f32.mrf.mxu0  ;;  %v1820_v33 = vpop.f32.mrf.mxu3  ;;  %2189 = vmatpush.bf16.msrb.mxu0 %v5182_v51  ;;  %v5123_v51 = vld [vmem:[%s10167_s4 + $0x1b0] sm:$0xf0] }
 0x133   : > { %v1777_v22 = vpop.f32.mrf.mxu2  ;;  %v7946_v46 = vadd.f32 %v1820_v33, %v1791_v7  ;;  %v1794_v48 = vpop.f32.mrf.mxu1  ;;  %v6721_v7 = vld [vmem:[%s10167_s4 + $0x41c] sm:$0xf] }
 0x134   : > { %v7944_v32 = vadd.f32 %v1777_v22, %v1748_v55  ;;  %v5122_v55 = vor.u32 %v6644_v53, %v5121_v52  ;;  %v5462_v17 = vor.u32 %v6721_v7, %v5459_v9  ;;  %v6630_v22 = vld [vmem:[%s10167_s4 + $0x13c] sm:$0xf0]  ;;  %v5009_v52 = vld [vmem:[%s10167_s4 + $0x98] sm:$0xf] }
 0x135   : > { %2078 = vmatmul.bf16.vlgmr.msra.gmra.mxu0 %v7161_v35  ;;  %v5066_v33 = vor.u32 %v6630_v22, %v5065_v21  ;;  %v6602_v7 = vld [vmem:[%s10167_s4 + $0x5c] sm:$0xf0] }
 0x136   : > { %2025 = vmatmul.bf16.gmra.mxu1 %v7247_v14  ;;  %2221 = vmatpush.bf16.msrb.mxu2 %v5462_v17  ;;  %v4954_v17 = vor.u32 %v6602_v7, %v4953_v5  ;;  %v6714_v21 = vld [vmem:[%s10167_s4 + $0x3dc] sm:$0xf0] }
 0x137   : > { %5616 = vmatmul.msk.bf16.gmra.mxu3 %vm1535_vm0, %v7181_v43  ;;  %2132 = vmatpush.bf16.msrb.mxu1 %v5122_v55 }
 0x138   : > { %5619 = vmatmul.msk.bf16.vlgmr.msra.gmra.mxu2 %vm1535_vm0, %v7079_v58 }
 0x13a   : > { %v1849_v16 = vpop.f32.mrf.mxu0  ;;  %v1823_v27 = vpop.f32.mrf.mxu3 }
 0x13b   : > { %v1876_v11 = vpop.f32.mrf.mxu2  ;;  %v7986_v42 = vadd.f32 %v1823_v27, %v1794_v48  ;;  %v1796_v49 = vpop.f32.mrf.mxu1  ;;  %2133 = vmatpush.bf16.msrb.mxu1 %v5066_v33  ;;  %v6616_v48 = vld [vmem:[%s10167_s4 + $0xcc] sm:$0xf0]  ;;  %v6623_v33 = vld [vmem:[%s10167_s4 + $0x10c] sm:$0xf] }
 0x13c   : > { %v7984_v30 = vadd.f32 %v1876_v11, %v1847_v25  ;;  %v5126_v25 = vor.u32 %v6637_v50, %v5123_v51  ;;  %v5010_v53 = vor.u32 %v6616_v48, %v5009_v52  ;;  %v5067_v50 = vld [vmem:[%s10167_s4 + $0x140] sm:$0xf0]  ;;  %v5402_v51 = vor.u32 %v6714_v21, %v5401_v8 }
 0x13d   : > { %v5403_v52 = vld [vmem:[%s10167_s4 + $0x3e0] sm:$0xf0] }
 0x13e   : > { %2190 = vmatpush.bf16.msrb.mxu0 %v5126_v25  ;;  %2164 = vmatpush.bf16.msrb.mxu3 %v5402_v51 }
 0x13f   : > { %2134 = vmatpush.bf16.msrb.mxu1 %v5010_v53 }
 0x142   : > { %v1852_v57 = vpop.f32.mrf.mxu0  ;;  %v1825_v9 = vpop.f32.mrf.mxu3 }
 0x143   : > { %v1878_v55 = vpop.f32.mrf.mxu2  ;;  %v8014_v22 = vadd.f32 %v1825_v9, %v1796_v49  ;;  %v1799_v27 = vpop.f32.mrf.mxu1  ;;  %2135 = vmatpush.bf16.msrb.mxu1 %v4954_v17  ;;  %v6707_v49 = vld [vmem:[%s10167_s4 + $0x3ac] sm:$0xf]  ;;  %v6609_v9 = vld [vmem:[%s10167_s4 + $0x9c] sm:$0xf]  ;;  %v5011_v17 = vld [vmem:[%s10167_s4 + $0xd0] sm:$0xf0] }
 0x144   : > { %v8009_v11 = vadd.f32 %v1878_v55, %v1849_v16  ;;  %v5070_v16 = vor.u32 %v6623_v33, %v5067_v50  ;;  %v5406_v25 = vor.u32 %v6707_v49, %v5403_v52  ;;  %v5014_v21 = vor.u32 %v6609_v9, %v5011_v17  ;;  %v5579_v9 = vld [vmem:[%s10167_s4 + $0x538] sm:$0xf0] }
 0x145   : > { %10172 = vst [vmem:[#allocation5_spill] sm:$0xff] %v8014_v22  ;;  %2083 = vmatmul.bf16.gmra.mxu0 %v7247_v14 }
 0x146   : > { %2030 = vmatmul.bf16.gmra.mxu1 %v7291_v37  ;;  %2191 = vmatpush.bf16.msrb.mxu0 %v5070_v16 }
 0x147   : > { %5617 = vmatmul.msk.bf16.gmra.mxu3 %vm1535_vm0, %v7261_v20  ;;  %2222 = vmatpush.bf16.msrb.mxu2 %v5406_v25 }
 0x148   : > { %5620 = vmatmul.msk.bf16.gmra.mxu2 %vm1535_vm0, %v7181_v43 }
 0x14a   : > { %v1854_v53 = vpop.f32.mrf.mxu0  ;;  %v1828_v55 = vpop.f32.mrf.mxu3  ;;  %2192 = vmatpush.bf16.msrb.mxu0 %v5014_v21 }
 0x14b   : > { %v1881_v48 = vpop.f32.mrf.mxu2  ;;  %v8036_v7 = vadd.f32 %v1828_v55, %v1799_v27  ;;  %v1801_v8 = vpop.f32.mrf.mxu1  ;;  %v4955_v27 = vld [vmem:[%s10167_s4 + $0x60] sm:$0xf0] }
 0x14c   : > { %v8034_v5 = vadd.f32 %v1881_v48, %v1852_v57  ;;  %v6595_v57 = vld [vmem:[%s10167_s4 + $0x2c] sm:$0xf]  ;;  %v5577_v48 = vld [vmem:[%s10167_s4 + $0x500] sm:$0xf]  ;;  %v6750_v55 = vld [vmem:[%s10167_s4 + $0x504] sm:$0xf] }
 0x14d   : > { %10174 = vst [vmem:[#allocation7_spill] sm:$0xff] %v8036_v7  ;;  %v4958_v49 = vor.u32 %v6595_v57, %v4955_v27 }
 0x14e   : > { %10173 = vst [vmem:[#allocation6_spill] sm:$0xff] %v8034_v5 }
 0x14f   : > { %2193 = vmatpush.bf16.msrb.mxu0 %v4958_v49 }
 0x152   : > { %v1857_v50 = vpop.f32.mrf.mxu0  ;;  %v1830_v51 = vpop.f32.mrf.mxu3 }
 0x153   : > { %v1883_v33 = vpop.f32.mrf.mxu2  ;;  %v8052_v52 = vadd.f32 %v1830_v51, %v1801_v8  ;;  %v1804_v25 = vpop.f32.mrf.mxu1 }
 0x154   : > { %v8050_v16 = vadd.f32 %v1883_v33, %v1854_v53  ;;  %v6757_v53 = vld [vmem:[%s10167_s4 + $0x534] sm:$0xf0]  ;;  %v5582_v33 = vor.u32 %v6750_v55, %v5579_v9 }
 0x155   : > { %10176 = vst [vmem:[#allocation9_spill] sm:$0xff] %v8052_v52  ;;  %2088 = vmatmul.bf16.gmra.mxu0 %v7291_v37  ;;  %v5578_v8 = vor.u32 %v6757_v53, %v5577_v48  ;;  %v5353_v52 = vld [vmem:[%s10167_s4 + $0x340] sm:$0xf]  ;;  %v6701_v48 = vld [vmem:[%s10167_s4 + $0x374] sm:$0xf0] }
 0x156   : > { %10175 = vst [vmem:[#allocation8_spill] sm:$0xff] %v8050_v16  ;;  %2035 = vmatmul.bf16.gmra.mxu1 %v7339_v61  ;;  %2335 = vmatpush.bf16.msra.mxu2 %v5582_v33  ;;  %v6694_v53 = vld [vmem:[%s10167_s4 + $0x344] sm:$0xf]  ;;  %v5354_v55 = vor.u32 %v6701_v48, %v5353_v52  ;;  %v6687_v52 = vld [vmem:[%s10167_s4 + $0x304] sm:$0xf0] }
 0x157   : > { %5618 = vmatmul.msk.bf16.gmra.mxu3 %vm1535_vm0, %v7293_v38  ;;  %v6680_v48 = vld [vmem:[%s10167_s4 + $0x2d4] sm:$0xf] }
 0x158   : > { %5621 = vmatmul.msk.bf16.gmra.mxu2 %vm1535_vm0, %v7261_v20  ;;  %2277 = vmatpush.bf16.msra.mxu3 %v5578_v8 }
 0x159   : > { %2244 = vmatpush.bf16.msra.mxu1 %v5354_v55  ;;  %v5521_v55 = vld [vmem:[%s10167_s4 + $0x490] sm:$0xf] }
 0x15a   : > { %v1859_v21 = vpop.f32.mrf.mxu0  ;;  %v1833_v57 = vpop.f32.mrf.mxu3 }
 0x15b   : > { %v1886_v17 = vpop.f32.mrf.mxu2  ;;  %v8074_v51 = vadd.f32 %v1833_v57, %v1804_v25  ;;  %v1806_v49 = vpop.f32.mrf.mxu1 }
 0x15c   : > { %v8072_v27 = vadd.f32 %v1886_v17, %v1857_v50  ;;  %v5355_v50 = vld [vmem:[%s10167_s4 + $0x378] sm:$0xf0] }
 0x15d   : > { %10178 = vst [vmem:[#allocation11_spill] sm:$0xff] %v8074_v51  ;;  %v5358_v25 = vor.u32 %v6694_v53, %v5355_v50  ;;  %v6736_v50 = vld [vmem:[%s10167_s4 + $0x494] sm:$0xf] }
 0x15e   : > { %10177 = vst [vmem:[#allocation10_spill] sm:$0xff] %v8072_v27  ;;  %v5297_v27 = vld [vmem:[%s10167_s4 + $0x2d0] sm:$0xf] }
 0x15f   : > { %2302 = vmatpush.bf16.msra.mxu0 %v5358_v25  ;;  %v5298_v53 = vor.u32 %v6687_v52, %v5297_v27  ;;  %v6743_v27 = vld [vmem:[%s10167_s4 + $0x4c4] sm:$0xf0] }
 0x160   : > { %v5522_v25 = vor.u32 %v6743_v27, %v5521_v55  ;;  %v6673_v55 = vld [vmem:[%s10167_s4 + $0x294] sm:$0xf0]  ;;  %v6666_v27 = vld [vmem:[%s10167_s4 + $0x264] sm:$0xf] }
 0x161   : > { %2245 = vmatpush.bf16.msra.mxu1 %v5298_v53 }
 0x162   : > { %v1862_v9 = vpop.f32.mrf.mxu0  ;;  %v1835_v17 = vpop.f32.mrf.mxu3  ;;  %2278 = vmatpush.bf16.msra.mxu3 %v5522_v25 }
 0x163   : > { %v1888_v8 = vpop.f32.mrf.mxu2  ;;  %v8090_v57 = vadd.f32 %v1835_v17, %v1806_v49  ;;  %v1905_v51 = vpop.f32.mrf.mxu1 }
 0x164   : > { %v8088_v33 = vadd.f32 %v1888_v8, %v1859_v21  ;;  %v5299_v21 = vld [vmem:[%s10167_s4 + $0x308] sm:$0xf0] }
 0x165   : > { %10180 = vst [vmem:[#allocation13_spill] sm:$0xff] %v8090_v57  ;;  %2093 = vmatmul.bf16.gmra.mxu0 %v7339_v61  ;;  %v5302_v49 = vor.u32 %v6680_v48, %v5299_v21  ;;  %v5523_v8 = vld [vmem:[%s10167_s4 + $0x4c8] sm:$0xf0] }
 0x166   : > { %10179 = vst [vmem:[#allocation12_spill] sm:$0xff] %v8088_v33  ;;  %2136 = vmatmul.bf16.vlgmr.msrb.gmra.mxu1 %v7161_v35  ;;  %v5526_v48 = vor.u32 %v6736_v50, %v5523_v8 }
 0x167   : > { %5623 = vmatmul.msk.bf16.vlgmr.msrb.gmra.mxu3 %vm1535_vm0, %v7079_v58  ;;  %2303 = vmatpush.bf16.msra.mxu0 %v5302_v49  ;;  %v5241_v49 = vld [vmem:[%s10167_s4 + $0x260] sm:$0xf] }
 0x168   : > { %5622 = vmatmul.msk.bf16.gmra.mxu2 %vm1535_vm0, %v7293_v38 }
 0x169   : > { %2336 = vmatpush.bf16.msra.mxu2 %v5526_v48  ;;  %v6659_v48 = vld [vmem:[%s10167_s4 + $0x224] sm:$0xf0] }
 0x16a   : > { %v1864_v52 = vpop.f32.mrf.mxu0  ;;  %v1934_v21 = vpop.f32.mrf.mxu3 }
 0x16b   : > { %v1891_v17 = vpop.f32.mrf.mxu2  ;;  %v8124_v57 = vadd.f32 %v1934_v21, %v1905_v51  ;;  %v1907_v33 = vpop.f32.mrf.mxu1  ;;  %v5243_v51 = vld [vmem:[%s10167_s4 + $0x298] sm:$0xf0] }
 0x16c   : > { %v8122_v53 = vadd.f32 %v1891_v17, %v1862_v9  ;;  %v5242_v9 = vor.u32 %v6673_v55, %v5241_v49  ;;  %v5246_v50 = vor.u32 %v6666_v27, %v5243_v51  ;;  %v5185_v17 = vld [vmem:[%s10167_s4 + $0x1f0] sm:$0xf]  ;;  %v6652_v27 = vld [vmem:[%s10167_s4 + $0x1f4] sm:$0xf] }
 0x16d   : > { %10182 = vst [vmem:[#allocation15_spill] sm:$0xff] %v8124_v57  ;;  %v5186_v55 = vor.u32 %v6659_v48, %v5185_v17  ;;  %v6729_v17 = vld [vmem:[%s10167_s4 + $0x454] sm:$0xf0]  ;;  %v6722_v48 = vld [vmem:[%s10167_s4 + $0x424] sm:$0xf] }
 0x16e   : > { %10181 = vst [vmem:[#allocation14_spill] sm:$0xff] %v8122_v53  ;;  %2246 = vmatpush.bf16.msra.mxu1 %v5242_v9  ;;  %2304 = vmatpush.bf16.msra.mxu0 %v5246_v50  ;;  %v5187_v9 = vld [vmem:[%s10167_s4 + $0x228] sm:$0xf0] }
 0x16f   : > { %v5190_v51 = vor.u32 %v6652_v27, %v5187_v9 }
 0x172   : > { %v1963_v8 = vpop.f32.mrf.mxu0  ;;  %v1936_v49 = vpop.f32.mrf.mxu3  ;;  %2247 = vmatpush.bf16.msra.mxu1 %v5186_v55  ;;  %2305 = vmatpush.bf16.msra.mxu0 %v5190_v51  ;;  %v5467_v55 = vld [vmem:[%s10167_s4 + $0x458] sm:$0xf0] }
 0x173   : > { %v1893_v25 = vpop.f32.mrf.mxu2  ;;  %v8146_v57 = vadd.f32 %v1936_v49, %v1907_v33  ;;  %v1910_v53 = vpop.f32.mrf.mxu1  ;;  %v6645_v33 = vld [vmem:[%s10167_s4 + $0x1b4] sm:$0xf0]  ;;  %v5470_v51 = vor.u32 %v6722_v48, %v5467_v55  ;;  %v5131_v48 = vld [vmem:[%s10167_s4 + $0x1b8] sm:$0xf0]  ;;  %v5017_v55 = vld [vmem:[%s10167_s4 + $0xa0] sm:$0xf] }
 0x174   : > { %v8144_v21 = vadd.f32 %v1893_v25, %v1864_v52  ;;  %v5129_v52 = vld [vmem:[%s10167_s4 + $0x180] sm:$0xf] }
 0x175   : > { %10184 = vst [vmem:[#allocation17_spill] sm:$0xff] %v8146_v57  ;;  %2194 = vmatmul.bf16.vlgmr.msrb.gmra.mxu0 %v7161_v35  ;;  %v5130_v50 = vor.u32 %v6645_v33, %v5129_v52  ;;  %v5465_v25 = vld [vmem:[%s10167_s4 + $0x420] sm:$0xf]  ;;  %v5073_v52 = vld [vmem:[%s10167_s4 + $0x110] sm:$0xf]  ;;  %2337 = vmatpush.bf16.msra.mxu2 %v5470_v51 }
 0x176   : > { %10183 = vst [vmem:[#allocation16_spill] sm:$0xff] %v8144_v21  ;;  %2141 = vmatmul.bf16.gmra.mxu1 %v7247_v14  ;;  %v5466_v49 = vor.u32 %v6729_v17, %v5465_v25  ;;  %v6631_v33 = vld [vmem:[%s10167_s4 + $0x144] sm:$0xf0]  ;;  %v4961_v51 = vld [vmem:[%s10167_s4 + $0x30] sm:$0xf] }
 0x177   : > { %5624 = vmatmul.msk.bf16.gmra.mxu3 %vm1535_vm0, %v7181_v43  ;;  %2248 = vmatpush.bf16.msra.mxu1 %v5130_v50  ;;  %v5074_v25 = vor.u32 %v6631_v33, %v5073_v52  ;;  %v6638_v50 = vld [vmem:[%s10167_s4 + $0x184] sm:$0xf]  ;;  %v6603_v52 = vld [vmem:[%s10167_s4 + $0x64] sm:$0xf0]  ;;  %v5409_v33 = vld [vmem:[%s10167_s4 + $0x3b0] sm:$0xf] }
 0x178   : > { %5627 = vmatmul.msk.bf16.vlgmr.msrb.gmra.mxu2 %vm1535_vm0, %v7079_v58  ;;  %2279 = vmatpush.bf16.msra.mxu3 %v5466_v49 }
 0x17a   : > { %v1965_v9 = vpop.f32.mrf.mxu0  ;;  %v1939_v57 = vpop.f32.mrf.mxu3 }
 0x17b   : > { %v1992_v27 = vpop.f32.mrf.mxu2  ;;  %v8186_v17 = vadd.f32 %v1939_v57, %v1910_v53  ;;  %v1912_v16 = vpop.f32.mrf.mxu1  ;;  %2249 = vmatpush.bf16.msra.mxu1 %v5074_v25  ;;  %v6617_v57 = vld [vmem:[%s10167_s4 + $0xd4] sm:$0xf0] }
 0x17c   : > { %v8184_v21 = vadd.f32 %v1992_v27, %v1963_v8  ;;  %v5134_v8 = vor.u32 %v6638_v50, %v5131_v48  ;;  %v5018_v53 = vor.u32 %v6617_v57, %v5017_v55  ;;  %v4962_v48 = vor.u32 %v6603_v52, %v4961_v51  ;;  %v6715_v55 = vld [vmem:[%s10167_s4 + $0x3e4] sm:$0xf0] }
 0x17d   : > { %10186 = vst [vmem:[#allocation19_spill] sm:$0xff] %v8186_v17  ;;  %v5075_v17 = vld [vmem:[%s10167_s4 + $0x148] sm:$0xf0] }
 0x17e   : > { %10185 = vst [vmem:[#allocation18_spill] sm:$0xff] %v8184_v21  ;;  %2306 = vmatpush.bf16.msra.mxu0 %v5134_v8  ;;  %v5410_v21 = vor.u32 %v6715_v55, %v5409_v33  ;;  %v6610_v55 = vld [vmem:[%s10167_s4 + $0xa4] sm:$0xf] }
 0x17f   : > { %2250 = vmatpush.bf16.msra.mxu1 %v5018_v53  ;;  %v6624_v53 = vld [vmem:[%s10167_s4 + $0x114] sm:$0xf] }
 0x180   : > { %2280 = vmatpush.bf16.msra.mxu3 %v5410_v21 }
 0x182   : > { %v1968_v27 = vpop.f32.mrf.mxu0  ;;  %v1941_v25 = vpop.f32.mrf.mxu3 }
 0x183   : > { %v1994_v49 = vpop.f32.mrf.mxu2  ;;  %v8214_v8 = vadd.f32 %v1941_v25, %v1912_v16  ;;  %v1915_v57 = vpop.f32.mrf.mxu1  ;;  %2251 = vmatpush.bf16.msra.mxu1 %v4962_v48  ;;  %v6708_v16 = vld [vmem:[%s10167_s4 + $0x3b4] sm:$0xf] }
 0x184   : > { %v8209_v50 = vadd.f32 %v1994_v49, %v1965_v9  ;;  %v5078_v9 = vor.u32 %v6624_v53, %v5075_v17  ;;  %v5411_v49 = vld [vmem:[%s10167_s4 + $0x3e8] sm:$0xf0]  ;;  %v5019_v53 = vld [vmem:[%s10167_s4 + $0xd8] sm:$0xf0] }
 0x185   : > { %10188 = vst [vmem:[#allocation21_spill] sm:$0xff] %v8214_v8  ;;  %2199 = vmatmul.bf16.gmra.mxu0 %v7247_v14  ;;  %v5414_v17 = vor.u32 %v6708_v16, %v5411_v49  ;;  %v6065_v8 = vld [vmem:[%s10166_s3 + $0x310] sm:$0xf] }
 0x186   : > { %10187 = vst [vmem:[#allocation20_spill] sm:$0xff] %v8209_v50  ;;  %2146 = vmatmul.bf16.gmra.mxu1 %v7291_v37  ;;  %2307 = vmatpush.bf16.msra.mxu0 %v5078_v9  ;;  %v5022_v9 = vor.u32 %v6610_v55, %v5019_v53  ;;  %v6568_v55 = vld [vmem:[%s10166_s3 + $0x4d4] sm:$0xf]  ;;  %v6443_v50 = vld [vmem:[%s10166_s3 + $0xec] sm:$0xf] }
 0x187   : > { %5625 = vmatmul.msk.bf16.gmra.mxu3 %vm1535_vm0, %v7261_v20  ;;  %2338 = vmatpush.bf16.msra.mxu2 %v5414_v17 }
 0x188   : > { %5628 = vmatmul.msk.bf16.gmra.mxu2 %vm1535_vm0, %v7181_v43 }
 0x18a   : > { %v1970_v21 = vpop.f32.mrf.mxu0  ;;  %v1944_v52 = vpop.f32.mrf.mxu3  ;;  %2308 = vmatpush.bf16.msra.mxu0 %v5022_v9  ;;  %v6291_v9 = vld [vmem:[%s10166_s3 + $0x508] sm:$0xf0] }
 0x18b   : > { %v1997_v51 = vpop.f32.mrf.mxu2  ;;  %v8236_v25 = vadd.f32 %v1944_v52, %v1915_v57  ;;  %v1917_v48 = vpop.f32.mrf.mxu1  ;;  %v4963_v57 = vld [vmem:[%s10167_s4 + $0x68] sm:$0xf0] }
 0x18c   : > { %v8234_v33 = vadd.f32 %v1997_v51, %v1968_v27  ;;  %v6596_v27 = vld [vmem:[%s10167_s4 + $0x34] sm:$0xf] }
 0x18d   : > { %10190 = vst [vmem:[#allocation23_spill] sm:$0xff] %v8236_v25  ;;  %v4966_v52 = vor.u32 %v6596_v27, %v4963_v57  ;;  %v6294_v57 = vor.u32 %v6568_v55, %v6291_v9 }
 0x18e   : > { %10189 = vst [vmem:[#allocation22_spill] sm:$0xff] %v8234_v33 }
 0x18f   : > { %2309 = vmatpush.bf16.msra.mxu0 %v4966_v52  ;;  %3339 = vmatpush.bf16.msrb.mxu2 %v6294_v57 }
 0x192   : > { %v1973_v49 = vpop.f32.mrf.mxu0  ;;  %v1946_v17 = vpop.f32.mrf.mxu3 }
 0x193   : > { %v1999_v16 = vpop.f32.mrf.mxu2  ;;  %v8252_v25 = vadd.f32 %v1946_v17, %v1917_v48  ;;  %v1920_v33 = vpop.f32.mrf.mxu1  ;;  %v6575_v48 = vld [vmem:[%s10166_s3 + $0x504] sm:$0xf0] }
 0x194   : > { %v8250_v51 = vadd.f32 %v1999_v16, %v1970_v21  ;;  %v6289_v21 = vld [vmem:[%s10166_s3 + $0x4d0] sm:$0xf] }
 0x195   : > { %10192 = vst [vmem:[#allocation25_spill] sm:$0xff] %v8252_v25  ;;  %2204 = vmatmul.bf16.gmra.mxu0 %v7291_v37  ;;  %v6290_v53 = vor.u32 %v6575_v48, %v6289_v21  ;;  %v6519_v21 = vld [vmem:[%s10166_s3 + $0x344] sm:$0xf0]  ;;  %v6512_v48 = vld [vmem:[%s10166_s3 + $0x314] sm:$0xf] }
 0x196   : > { %10191 = vst [vmem:[#allocation24_spill] sm:$0xff] %v8250_v51  ;;  %2151 = vmatmul.bf16.gmra.mxu1 %v7339_v61  ;;  %v6066_v55 = vor.u32 %v6519_v21, %v6065_v8  ;;  %v6505_v8 = vld [vmem:[%s10166_s3 + $0x2d4] sm:$0xf0]  ;;  %v6498_v21 = vld [vmem:[%s10166_s3 + $0x2a4] sm:$0xf] }
 0x197   : > { %5626 = vmatmul.msk.bf16.gmra.mxu3 %vm1535_vm0, %v7293_v38 }
 0x198   : > { %5629 = vmatmul.msk.bf16.gmra.mxu2 %vm1535_vm0, %v7261_v20  ;;  %3281 = vmatpush.bf16.msrb.mxu3 %v6290_v53 }
 0x199   : > { %3248 = vmatpush.bf16.msrb.mxu1 %v6066_v55  ;;  %v6233_v55 = vld [vmem:[%s10166_s3 + $0x460] sm:$0xf] }
 0x19a   : > { %v1975_v27 = vpop.f32.mrf.mxu0  ;;  %v1949_v17 = vpop.f32.mrf.mxu3 }
 0x19b   : > { %v2002_v16 = vpop.f32.mrf.mxu2  ;;  %v8274_v25 = vadd.f32 %v1949_v17, %v1920_v33  ;;  %v1922_v51 = vpop.f32.mrf.mxu1  ;;  %v6067_v33 = vld [vmem:[%s10166_s3 + $0x348] sm:$0xf0] }
 0x19c   : > { %v8272_v52 = vadd.f32 %v2002_v16, %v1973_v49  ;;  %v6070_v49 = vor.u32 %v6512_v48, %v6067_v33  ;;  %v6554_v33 = vld [vmem:[%s10166_s3 + $0x464] sm:$0xf] }
 0x19d   : > { %10194 = vst [vmem:[#allocation27_spill] sm:$0xff] %v8274_v25 }
 0x19e   : > { %10193 = vst [vmem:[#allocation26_spill] sm:$0xff] %v8272_v52  ;;  %3306 = vmatpush.bf16.msrb.mxu0 %v6070_v49  ;;  %v6009_v52 = vld [vmem:[%s10166_s3 + $0x2a0] sm:$0xf] }
 0x19f   : > { %v6010_v48 = vor.u32 %v6505_v8, %v6009_v52  ;;  %v6561_v52 = vld [vmem:[%s10166_s3 + $0x494] sm:$0xf0] }
 0x1a0   : > { %v6234_v49 = vor.u32 %v6561_v52, %v6233_v55  ;;  %v6491_v55 = vld [vmem:[%s10166_s3 + $0x264] sm:$0xf0]  ;;  %v6484_v52 = vld [vmem:[%s10166_s3 + $0x234] sm:$0xf] }
 0x1a1   : > { %3249 = vmatpush.bf16.msrb.mxu1 %v6010_v48 }
 0x1a2   : > { %v1978_v9 = vpop.f32.mrf.mxu0  ;;  %v1951_v16 = vpop.f32.mrf.mxu3  ;;  %3282 = vmatpush.bf16.msrb.mxu3 %v6234_v49 }
 0x1a3   : > { %v2004_v53 = vpop.f32.mrf.mxu2  ;;  %v8290_v17 = vadd.f32 %v1951_v16, %v1922_v51  ;;  %v2021_v25 = vpop.f32.mrf.mxu1  ;;  %v6011_v51 = vld [vmem:[%s10166_s3 + $0x2d8] sm:$0xf0] }
 0x1a4   : > { %v8288_v57 = vadd.f32 %v2004_v53, %v1975_v27  ;;  %v6014_v27 = vor.u32 %v6498_v21, %v6011_v51  ;;  %v6235_v53 = vld [vmem:[%s10166_s3 + $0x498] sm:$0xf0] }
 0x1a5   : > { %10196 = vst [vmem:[#allocation29_spill] sm:$0xff] %v8290_v17  ;;  %2209 = vmatmul.bf16.gmra.mxu0 %v7339_v61  ;;  %v6238_v21 = vor.u32 %v6554_v33, %v6235_v53 }
 0x1a6   : > { %10195 = vst [vmem:[#allocation28_spill] sm:$0xff] %v8288_v57  ;;  %2252 = vmatmul.bf16.vlgmr.msra.gmra.mxu1 %v7161_v35  ;;  %3307 = vmatpush.bf16.msrb.mxu0 %v6014_v27  ;;  %v5953_v27 = vld [vmem:[%s10166_s3 + $0x230] sm:$0xf] }
 0x1a7   : > { %5631 = vmatmul.msk.bf16.vlgmr.msra.gmra.mxu3 %vm1535_vm0, %v7079_v58  ;;  %3340 = vmatpush.bf16.msrb.mxu2 %v6238_v21  ;;  %v6477_v21 = vld [vmem:[%s10166_s3 + $0x1f4] sm:$0xf0] }
 0x1a8   : > { %5630 = vmatmul.msk.bf16.gmra.mxu2 %vm1535_vm0, %v7293_v38 }
 0x1aa   : > { %v1980_v8 = vpop.f32.mrf.mxu0  ;;  %v2050_v51 = vpop.f32.mrf.mxu3 }
 0x1ab   : > { %v2007_v16 = vpop.f32.mrf.mxu2  ;;  %v8324_v17 = vadd.f32 %v2050_v51, %v2021_v25  ;;  %v2023_v57 = vpop.f32.mrf.mxu1  ;;  %v5955_v25 = vld [vmem:[%s10166_s3 + $0x268] sm:$0xf0] }
 0x1ac   : > { %v8322_v48 = vadd.f32 %v2007_v16, %v1978_v9  ;;  %v5954_v9 = vor.u32 %v6491_v55, %v5953_v27  ;;  %v5958_v33 = vor.u32 %v6484_v52, %v5955_v25  ;;  %v5897_v16 = vld [vmem:[%s10166_s3 + $0x1c0] sm:$0xf]  ;;  %v6470_v52 = vld [vmem:[%s10166_s3 + $0x1c4] sm:$0xf] }
 0x1ad   : > { %10198 = vst [vmem:[#allocation31_spill] sm:$0xff] %v8324_v17  ;;  %v5898_v55 = vor.u32 %v6477_v21, %v5897_v16  ;;  %v6540_v16 = vld [vmem:[%s10166_s3 + $0x3f4] sm:$0xf] }
 0x1ae   : > { %10197 = vst [vmem:[#allocation30_spill] sm:$0xff] %v8322_v48  ;;  %3250 = vmatpush.bf16.msrb.mxu1 %v5954_v9  ;;  %3308 = vmatpush.bf16.msrb.mxu0 %v5958_v33  ;;  %v5899_v9 = vld [vmem:[%s10166_s3 + $0x1f8] sm:$0xf0] }
 0x1af   : > { %v5902_v25 = vor.u32 %v6470_v52, %v5899_v9  ;;  %v5785_v9 = vld [vmem:[%s10166_s3 + $0xe0] sm:$0xf] }
 0x1b2   : > { %v2079_v53 = vpop.f32.mrf.mxu0  ;;  %v2052_v27 = vpop.f32.mrf.mxu3  ;;  %3251 = vmatpush.bf16.msrb.mxu1 %v5898_v55  ;;  %3309 = vmatpush.bf16.msrb.mxu0 %v5902_v25  ;;  %v6449_v25 = vld [vmem:[%s10166_s3 + $0x114] sm:$0xf0] }
 0x1b3   : > { %v2009_v49 = vpop.f32.mrf.mxu2  ;;  %v8346_v17 = vadd.f32 %v2052_v27, %v2023_v57  ;;  %v2026_v48 = vpop.f32.mrf.mxu1  ;;  %v6463_v57 = vld [vmem:[%s10166_s3 + $0x184] sm:$0xf0] }
 0x1b4   : > { %v8344_v51 = vadd.f32 %v2009_v49, %v1980_v8  ;;  %v5841_v8 = vld [vmem:[%s10166_s3 + $0x150] sm:$0xf]  ;;  %v6547_v49 = vld [vmem:[%s10166_s3 + $0x424] sm:$0xf0] }
 0x1b5   : > { %10200 = vst [vmem:[#allocation33_spill] sm:$0xff] %v8346_v17  ;;  %2310 = vmatmul.bf16.vlgmr.msra.gmra.mxu0 %v7161_v35  ;;  %v5842_v33 = vor.u32 %v6463_v57, %v5841_v8  ;;  %v6177_v35 = vld [vmem:[%s10166_s3 + $0x3f0] sm:$0xf] }
 0x1b6   : > { %10199 = vst [vmem:[#allocation32_spill] sm:$0xff] %v8344_v51  ;;  %2257 = vmatmul.bf16.gmra.mxu1 %v7247_v14  ;;  %v6178_v21 = vor.u32 %v6547_v49, %v6177_v35  ;;  %v5786_v35 = vor.u32 %v6449_v25, %v5785_v9  ;;  %v5673_v9 = vld [vmem:[%s10166_s3] sm:$0xf]  ;;  %v6421_v25 = vld [vmem:[%s10166_s3 + $0x34] sm:$0xf0] }
 0x1b7   : > { %5632 = vmatmul.msk.bf16.gmra.mxu3 %vm1535_vm0, %v7181_v43  ;;  %3252 = vmatpush.bf16.msrb.mxu1 %v5842_v33  ;;  %v6456_v33 = vld [vmem:[%s10166_s3 + $0x154] sm:$0xf] }
 0x1b8   : > { %5635 = vmatmul.msk.bf16.vlgmr.msra.gmra.mxu2 %vm1535_vm0, %v7079_v58  ;;  %v6179_v58 = vld [vmem:[%s10166_s3 + $0x428] sm:$0xf0]  ;;  %3283 = vmatpush.bf16.msrb.mxu3 %v6178_v21 }
 0x1b9   : > { %v6182_v52 = vor.u32 %v6540_v16, %v6179_v58  ;;  %v5843_v16 = vld [vmem:[%s10166_s3 + $0x188] sm:$0xf0]  ;;  %v5729_v58 = vld [vmem:[%s10166_s3 + $0x70] sm:$0xf] }
 0x1ba   : > { %v2081_v55 = vpop.f32.mrf.mxu0  ;;  %v2055_v8 = vpop.f32.mrf.mxu3 }
 0x1bb   : > { %v2108_v27 = vpop.f32.mrf.mxu2  ;;  %v8386_v49 = vadd.f32 %v2055_v8, %v2026_v48  ;;  %v2028_v17 = vpop.f32.mrf.mxu1  ;;  %3341 = vmatpush.bf16.msrb.mxu2 %v6182_v52  ;;  %3253 = vmatpush.bf16.msrb.mxu1 %v5786_v35  ;;  %v6435_v48 = vld [vmem:[%s10166_s3 + $0xa4] sm:$0xf0]  ;;  %v6121_v8 = vld [vmem:[%s10166_s3 + $0x380] sm:$0xf] }
 0x1bc   : > { %v8384_v57 = vadd.f32 %v2108_v27, %v2079_v53  ;;  %v5846_v53 = vor.u32 %v6456_v33, %v5843_v16  ;;  %v5730_v21 = vor.u32 %v6435_v48, %v5729_v58  ;;  %v5674_v16 = vor.u32 %v6421_v25, %v5673_v9  ;;  %v6533_v58 = vld [vmem:[%s10166_s3 + $0x3b4] sm:$0xf0] }
 0x1bd   : > { %10202 = vst [vmem:[#allocation35_spill] sm:$0xff] %v8386_v49  ;;  %v5787_v49 = vld [vmem:[%s10166_s3 + $0x118] sm:$0xf0] }
 0x1be   : > { %10201 = vst [vmem:[#allocation34_spill] sm:$0xff] %v8384_v57  ;;  %3310 = vmatpush.bf16.msrb.mxu0 %v5846_v53  ;;  %v6122_v57 = vor.u32 %v6533_v58, %v6121_v8 }
 0x1bf   : > { %3254 = vmatpush.bf16.msrb.mxu1 %v5730_v21  ;;  %v6442_v21 = vld [vmem:[%s10166_s3 + $0xe4] sm:$0xf] }
 0x1c0   : > { %3284 = vmatpush.bf16.msrb.mxu3 %v6122_v57 }
 0x1c2   : > { %v2084_v52 = vpop.f32.mrf.mxu0  ;;  %v2057_v35 = vpop.f32.mrf.mxu3 }
 0x1c3   : > { %v2110_v27 = vpop.f32.mrf.mxu2  ;;  %v8414_v53 = vadd.f32 %v2057_v35, %v2028_v17  ;;  %v2031_v48 = vpop.f32.mrf.mxu1  ;;  %3255 = vmatpush.bf16.msrb.mxu1 %v5674_v16  ;;  %v6526_v17 = vld [vmem:[%s10166_s3 + $0x384] sm:$0xf]  ;;  %v6428_v35 = vld [vmem:[%s10166_s3 + $0x74] sm:$0xf]  ;;  %v5731_v16 = vld [vmem:[%s10166_s3 + $0xa8] sm:$0xf0] }
 0x1c4   : > { %v8409_v33 = vadd.f32 %v2110_v27, %v2081_v55  ;;  %v5790_v55 = vor.u32 %v6442_v21, %v5787_v49  ;;  %v5734_v58 = vor.u32 %v6428_v35, %v5731_v16 }
 0x1c5   : > { %10204 = vst [vmem:[#allocation37_spill] sm:$0xff] %v8414_v53  ;;  %2315 = vmatmul.bf16.gmra.mxu0 %v7247_v14  ;;  %v6123_v14 = vld [vmem:[%s10166_s3 + $0x3b8] sm:$0xf0]  ;;  %v5907_v53 = vld [vmem:[%s10166_s3 + $0x200] sm:$0xf0] }
 0x1c6   : > { %10203 = vst [vmem:[#allocation36_spill] sm:$0xff] %v8409_v33  ;;  %2262 = vmatmul.bf16.gmra.mxu1 %v7291_v37  ;;  %3311 = vmatpush.bf16.msrb.mxu0 %v5790_v55  ;;  %v6126_v49 = vor.u32 %v6526_v17, %v6123_v14 }
 0x1c7   : > { %5633 = vmatmul.msk.bf16.gmra.mxu3 %vm1535_vm0, %v7261_v20 }
 0x1c8   : > { %5636 = vmatmul.msk.bf16.gmra.mxu2 %vm1535_vm0, %v7181_v43 }
 0x1c9   : > { %3342 = vmatpush.bf16.msrb.mxu2 %v6126_v49 }
 0x1ca   : > { %v2086_v57 = vpop.f32.mrf.mxu0  ;;  %v2060_v9 = vpop.f32.mrf.mxu3  ;;  %3312 = vmatpush.bf16.msrb.mxu0 %v5734_v58 }
 0x1cb   : > { %v2113_v27 = vpop.f32.mrf.mxu2  ;;  %v8436_v43 = vadd.f32 %v2060_v9, %v2031_v48  ;;  %v2033_v8 = vpop.f32.mrf.mxu1  ;;  %v5675_v48 = vld [vmem:[%s10166_s3 + $0x38] sm:$0xf0] }
 0x1cc   : > { %v8434_v25 = vadd.f32 %v2113_v27, %v2084_v52  ;;  %v6414_v52 = vld [vmem:[%s10166_s3 + $0x4] sm:$0xf] }
 0x1cd   : > { %10206 = vst [vmem:[#allocation39_spill] sm:$0xff] %v8436_v43  ;;  %v5678_v49 = vor.u32 %v6414_v52, %v5675_v48 }
 0x1ce   : > { %10205 = vst [vmem:[#allocation38_spill] sm:$0xff] %v8434_v25 }
 0x1cf   : > { %3313 = vmatpush.bf16.msrb.mxu0 %v5678_v49 }
 0x1d2   : > { %v2089_v55 = vpop.f32.mrf.mxu0  ;;  %v2062_v17 = vpop.f32.mrf.mxu3 }
 0x1d3   : > { %v2115_v21 = vpop.f32.mrf.mxu2  ;;  %v8452_v27 = vadd.f32 %v2062_v17, %v2033_v8  ;;  %v2036_v9 = vpop.f32.mrf.mxu1  ;;  %v6576_v8 = vld [vmem:[%s10166_s3 + $0x50c] sm:$0xf0] }
 0x1d4   : > { %v8450_v14 = vadd.f32 %v2115_v21, %v2086_v57  ;;  %v6297_v57 = vld [vmem:[%s10166_s3 + $0x4d8] sm:$0xf] }
 0x1d5   : > { %10208 = vst [vmem:[#allocation41_spill] sm:$0xff] %v8452_v27  ;;  %2320 = vmatmul.bf16.gmra.mxu0 %v7291_v37  ;;  %v6569_v37 = vld [vmem:[%s10166_s3 + $0x4dc] sm:$0xf]  ;;  %v6298_v35 = vor.u32 %v6576_v8, %v6297_v57  ;;  %v6073_v27 = vld [vmem:[%s10166_s3 + $0x318] sm:$0xf] }
 0x1d6   : > { %10207 = vst [vmem:[#allocation40_spill] sm:$0xff] %v8450_v14  ;;  %2267 = vmatmul.bf16.gmra.mxu1 %v7339_v61  ;;  %v6520_v57 = vld [vmem:[%s10166_s3 + $0x34c] sm:$0xf0]  ;;  %v6513_v8 = vld [vmem:[%s10166_s3 + $0x31c] sm:$0xf] }
 0x1d7   : > { %5634 = vmatmul.msk.bf16.gmra.mxu3 %vm1535_vm0, %v7293_v38 }
 0x1d8   : > { %5637 = vmatmul.msk.bf16.gmra.mxu2 %vm1535_vm0, %v7261_v20  ;;  %v6299_v20 = vld [vmem:[%s10166_s3 + $0x510] sm:$0xf0]  ;;  %3397 = vmatpush.bf16.msra.mxu3 %v6298_v35  ;;  %v5641_v35 = vld [vmem:[%s8490_s20] sm:$0xf] }
 0x1d9   : > { %v6302_v21 = vor.u32 %v6569_v37, %v6299_v20  ;;  %v6407_v20 = vld [vmem:[%s8490_s20 + $0x4] sm:$0xf0] }
 0x1da   : > { %v2091_v58 = vpop.f32.mrf.mxu0  ;;  %v2065_v52 = vpop.f32.mrf.mxu3  ;;  %v8501_v43 = vor.u32 %v6407_v20, %v5641_v35  ;;  %v6555_v35 = vld [vmem:[%s10166_s3 + $0x46c] sm:$0xf]  ;;  %v6243_v20 = vld [vmem:[%s10166_s3 + $0x4a0] sm:$0xf0] }
 0x1db   : > { %v2118_v16 = vpop.f32.mrf.mxu2  ;;  %v8474_v17 = vadd.f32 %v2065_v52, %v2036_v9  ;;  %v2038_v49 = vpop.f32.mrf.mxu1  ;;  %3455 = vmatpush.bf16.msra.mxu2 %v6302_v21  ;;  %v6075_v9 = vld [vmem:[%s10166_s3 + $0x350] sm:$0xf0]  ;;  %v5643_v21 = vld [vmem:[%s8490_s20 + $0x8] sm:$0xf0] }
 0x1dc   : > { %v8472_v48 = vadd.f32 %v2118_v16, %v2089_v55  ;;  %v6074_v55 = vor.u32 %v6520_v57, %v6073_v27  ;;  %v6078_v37 = vor.u32 %v6513_v8, %v6075_v9  ;;  %v6406_v16 = vld [vmem:[%s8490_s20 + $0x4] sm:$0xf]  ;;  %v6017_v8 = vld [vmem:[%s10166_s3 + $0x2a8] sm:$0xf] }
 0x1dd   : > { %10210 = vst [vmem:[#allocation43_spill] sm:$0xff] %v8474_v17  ;;  %v8505_v57 = vor.u32 %v6406_v16, %v5643_v21 }
 0x1de   : > { %10209 = vst [vmem:[#allocation42_spill] sm:$0xff] %v8472_v48  ;;  %3364 = vmatpush.bf16.msra.mxu1 %v6074_v55  ;;  %3422 = vmatpush.bf16.msra.mxu0 %v6078_v37  ;;  %v6506_v55 = vld [vmem:[%s10166_s3 + $0x2dc] sm:$0xf0]  ;;  %v6241_v37 = vld [vmem:[%s10166_s3 + $0x468] sm:$0xf] }
 0x1df   : > { %v6018_v9 = vor.u32 %v6506_v55, %v6017_v8 }
 0x1e2   : > { %v2094_v17 = vpop.f32.mrf.mxu0  ;;  %v2067_v48 = vpop.f32.mrf.mxu3  ;;  %3365 = vmatpush.bf16.msra.mxu1 %v6018_v9 }
 0x1e3   : > { %v2120_v52 = vpop.f32.mrf.mxu2  ;;  %v8503_v25 = vadd.f32 %v2067_v48, %v2038_v49  ;;  %v2137_v27 = vpop.f32.mrf.mxu1  ;;  %v6019_v48 = vld [vmem:[%s10166_s3 + $0x2e0] sm:$0xf0] }
 0x1e4   : > { %v8499_v14 = vadd.f32 %v2120_v52, %v2091_v58  ;;  %v6499_v58 = vld [vmem:[%s10166_s3 + $0x2ac] sm:$0xf]  ;;  %v6246_v52 = vor.u32 %v6555_v35, %v6243_v20  ;;  %v5649_v35 = vld [vmem:[%s8490_s20 + $0x10] sm:$0xf]  ;;  %v6408_v20 = vld [vmem:[%s8490_s20 + $0x14] sm:$0xf] }
 0x1e5   : > { %10212 = vst [vmem:[#allocation45_spill] sm:$0xff] %v8503_v25  ;;  %2325 = vmatmul.bf16.gmra.mxu0 %v7339_v61  ;;  %v6022_v49 = vor.u32 %v6499_v58, %v6019_v48  ;;  %v6562_v61 = vld [vmem:[%s10166_s3 + $0x49c] sm:$0xf0]  ;;  %v5961_v48 = vld [vmem:[%s10166_s3 + $0x238] sm:$0xf] }
 0x1e6   : > { %10211 = vst [vmem:[#allocation44_spill] sm:$0xff] %v8499_v14  ;;  %3256 = vmatmul.bf16.vlgmr.msrb.gmra.mxu1 %v8501_v43  ;;  %3456 = vmatpush.bf16.msra.mxu2 %v6246_v52  ;;  %v6471_v14 = vld [vmem:[%s10166_s3 + $0x1cc] sm:$0xf] }
 0x1e7   : > { %6343 = vmatmul.msk.bf16.vlgmr.msrb.gmra.mxu3 %vm1535_vm0, %v8505_v57  ;;  %3423 = vmatpush.bf16.msra.mxu0 %v6022_v49  ;;  %v6492_v49 = vld [vmem:[%s10166_s3 + $0x26c] sm:$0xf0] }
 0x1e8   : > { %5638 = vmatmul.msk.bf16.gmra.mxu2 %vm1535_vm0, %v7293_v38  ;;  %v6242_v38 = vor.u32 %v6562_v61, %v6241_v37  ;;  %v5962_v37 = vor.u32 %v6492_v49, %v5961_v48  ;;  %v6478_v48 = vld [vmem:[%s10166_s3 + $0x1fc] sm:$0xf0] }
 0x1ea   : > { %v2096_v21 = vpop.f32.mrf.mxu0  ;;  %v2166_v55 = vpop.f32.mrf.mxu3  ;;  %3398 = vmatpush.bf16.msra.mxu3 %v6242_v38  ;;  %3366 = vmatpush.bf16.msra.mxu1 %v5962_v37  ;;  %v6409_v38 = vld [vmem:[%s8490_s20 + $0x14] sm:$0xf0] }
 0x1eb   : > { %v2123_v16 = vpop.f32.mrf.mxu2  ;;  %v8539_v58 = vadd.f32 %v2166_v55, %v2137_v27  ;;  %v2139_v9 = vpop.f32.mrf.mxu1  ;;  %v5963_v27 = vld [vmem:[%s10166_s3 + $0x270] sm:$0xf0] }
 0x1ec   : > { %v8537_v8 = vadd.f32 %v2123_v16, %v2094_v17  ;;  %v6485_v17 = vld [vmem:[%s10166_s3 + $0x23c] sm:$0xf] }
 0x1ed   : > { %10214 = vst [vmem:[#allocation47_spill] sm:$0xff] %v8539_v58  ;;  %v5966_v61 = vor.u32 %v6485_v17, %v5963_v27  ;;  %v5651_v16 = vld [vmem:[%s8490_s20 + $0x18] sm:$0xf0]  ;;  %v5905_v58 = vld [vmem:[%s10166_s3 + $0x1c8] sm:$0xf]  ;;  %v8565_v17 = vor.u32 %v6409_v38, %v5649_v35 }
 0x1ee   : > { %10213 = vst [vmem:[#allocation46_spill] sm:$0xff] %v8537_v8  ;;  %v5906_v37 = vor.u32 %v6478_v48, %v5905_v58  ;;  %v8569_v25 = vor.u32 %v6408_v20, %v5651_v16  ;;  %v6464_v58 = vld [vmem:[%s10166_s3 + $0x18c] sm:$0xf0]  ;;  %v6541_v35 = vld [vmem:[%s10166_s3 + $0x3fc] sm:$0xf] }
 0x1ef   : > { %3424 = vmatpush.bf16.msra.mxu0 %v5966_v61  ;;  %v6187_v20 = vld [vmem:[%s10166_s3 + $0x430] sm:$0xf0] }
 0x1f0   : > { %3367 = vmatpush.bf16.msra.mxu1 %v5906_v37  ;;  %v6190_v48 = vor.u32 %v6541_v35, %v6187_v20  ;;  %v5793_v37 = vld [vmem:[%s10166_s3 + $0xe8] sm:$0xf]  ;;  %v6457_v35 = vld [vmem:[%s10166_s3 + $0x15c] sm:$0xf]  ;;  %v5851_v20 = vld [vmem:[%s10166_s3 + $0x190] sm:$0xf0] }
 0x1f2   : > { %v2195_v55 = vpop.f32.mrf.mxu0  ;;  %v2168_v8 = vpop.f32.mrf.mxu3  ;;  %3457 = vmatpush.bf16.msra.mxu2 %v6190_v48  ;;  %v5657_v48 = vld [vmem:[%s8490_s20 + $0x20] sm:$0xf] }
 0x1f3   : > { %v2125_v52 = vpop.f32.mrf.mxu2  ;;  %v8567_v27 = vadd.f32 %v2168_v8, %v2139_v9  ;;  %v2142_v61 = vpop.f32.mrf.mxu1  ;;  %v5849_v8 = vld [vmem:[%s10166_s3 + $0x158] sm:$0xf] }
 0x1f4   : > { %v8563_v49 = vadd.f32 %v2125_v52, %v2096_v21  ;;  %v5910_v21 = vor.u32 %v6471_v14, %v5907_v53  ;;  %v5850_v9 = vor.u32 %v6464_v58, %v5849_v8  ;;  %v6185_v53 = vld [vmem:[%s10166_s3 + $0x3f8] sm:$0xf]  ;;  %v6548_v14 = vld [vmem:[%s10166_s3 + $0x42c] sm:$0xf0] }
 0x1f5   : > { %10216 = vst [vmem:[#allocation49_spill] sm:$0xff] %v8567_v27  ;;  %3314 = vmatmul.bf16.vlgmr.msrb.gmra.mxu0 %v8501_v43  ;;  %v6186_v38 = vor.u32 %v6548_v14, %v6185_v53  ;;  %v5681_v27 = vld [vmem:[%s10166_s3 + $0x8] sm:$0xf] }
 0x1f6   : > { %10215 = vst [vmem:[#allocation48_spill] sm:$0xff] %v8563_v49  ;;  %3261 = vmatmul.bf16.gmra.mxu1 %v8565_v17  ;;  %3425 = vmatpush.bf16.msra.mxu0 %v5910_v21  ;;  %v6450_v21 = vld [vmem:[%s10166_s3 + $0x11c] sm:$0xf0] }
 0x1f7   : > { %6344 = vmatmul.msk.bf16.gmra.mxu3 %vm1535_vm0, %v8569_v25  ;;  %3368 = vmatpush.bf16.msra.mxu1 %v5850_v9  ;;  %v5794_v9 = vor.u32 %v6450_v21, %v5793_v37  ;;  %v6411_v37 = vld [vmem:[%s8490_s20 + $0x24] sm:$0xf0]  ;;  %v6410_v21 = vld [vmem:[%s8490_s20 + $0x24] sm:$0xf] }
 0x1f8   : > { %6347 = vmatmul.msk.bf16.vlgmr.msrb.gmra.mxu2 %vm1535_vm0, %v8505_v57  ;;  %3399 = vmatpush.bf16.msra.mxu3 %v6186_v38 }
 0x1fa   : > { %v2197_v52 = vpop.f32.mrf.mxu0  ;;  %v2171_v8 = vpop.f32.mrf.mxu3 }
 0x1fb   : > { %v2224_v16 = vpop.f32.mrf.mxu2  ;;  %v8609_v53 = vadd.f32 %v2171_v8, %v2142_v61  ;;  %v2144_v14 = vpop.f32.mrf.mxu1  ;;  %3369 = vmatpush.bf16.msra.mxu1 %v5794_v9  ;;  %v6436_v61 = vld [vmem:[%s10166_s3 + $0xac] sm:$0xf0]  ;;  %v5659_v8 = vld [vmem:[%s8490_s20 + $0x28] sm:$0xf0]  ;;  %v6422_v9 = vld [vmem:[%s10166_s3 + $0x3c] sm:$0xf0] }
 0x1fc   : > { %v8607_v58 = vadd.f32 %v2224_v16, %v2195_v55  ;;  %v5737_v55 = vld [vmem:[%s10166_s3 + $0x78] sm:$0xf]  ;;  %v5854_v16 = vor.u32 %v6457_v35, %v5851_v20  ;;  %v6129_v35 = vld [vmem:[%s10166_s3 + $0x388] sm:$0xf]  ;;  %v8645_v51 = vor.u32 %v6410_v21, %v5659_v8 }
 0x1fd   : > { %10218 = vst [vmem:[#allocation51_spill] sm:$0xff] %v8609_v53  ;;  %v5738_v38 = vor.u32 %v6436_v61, %v5737_v55  ;;  %v5682_v61 = vor.u32 %v6422_v9, %v5681_v27 }
 0x1fe   : > { %10217 = vst [vmem:[#allocation50_spill] sm:$0xff] %v8607_v58  ;;  %3426 = vmatpush.bf16.msra.mxu0 %v5854_v16  ;;  %v8638_v16 = vor.u32 %v6411_v37, %v5657_v48 }
 0x1ff   : > { %3370 = vmatpush.bf16.msra.mxu1 %v5738_v38  ;;  %v6534_v38 = vld [vmem:[%s10166_s3 + $0x3bc] sm:$0xf0] }
 0x202   : > { %v2200_v58 = vpop.f32.mrf.mxu0  ;;  %v2173_v20 = vpop.f32.mrf.mxu3 }
 0x203   : > { %v2226_v53 = vpop.f32.mrf.mxu2  ;;  %v8643_v49 = vadd.f32 %v2173_v20, %v2144_v14  ;;  %v2147_v33 = vpop.f32.mrf.mxu1  ;;  %3371 = vmatpush.bf16.msra.mxu1 %v5682_v61  ;;  %v6527_v14 = vld [vmem:[%s10166_s3 + $0x38c] sm:$0xf]  ;;  %v6429_v61 = vld [vmem:[%s10166_s3 + $0x7c] sm:$0xf] }
 0x204   : > { %v8636_v55 = vadd.f32 %v2226_v53, %v2197_v52  ;;  %v5795_v52 = vld [vmem:[%s10166_s3 + $0x120] sm:$0xf0]  ;;  %v6130_v53 = vor.u32 %v6534_v38, %v6129_v35  ;;  %v5739_v38 = vld [vmem:[%s10166_s3 + $0xb0] sm:$0xf0] }
 0x205   : > { %10220 = vst [vmem:[#allocation53_spill] sm:$0xff] %v8643_v49  ;;  %3319 = vmatmul.bf16.gmra.mxu0 %v8565_v17  ;;  %v5798_v27 = vor.u32 %v6443_v50, %v5795_v52  ;;  %v6131_v50 = vld [vmem:[%s10166_s3 + $0x3c0] sm:$0xf0]  ;;  %v5742_v52 = vor.u32 %v6429_v61, %v5739_v38 }
 0x206   : > { %10219 = vst [vmem:[#allocation52_spill] sm:$0xff] %v8636_v55  ;;  %3400 = vmatpush.bf16.msra.mxu3 %v6130_v53  ;;  %3266 = vmatmul.bf16.gmra.mxu1 %v8638_v16  ;;  %v6134_v48 = vor.u32 %v6527_v14, %v6131_v50  ;;  %v5665_v53 = vld [vmem:[%s8490_s20 + $0x30] sm:$0xf]  ;;  %v6412_v14 = vld [vmem:[%s8490_s20 + $0x34] sm:$0xf] }
 0x207   : > { %6345 = vmatmul.msk.bf16.gmra.mxu3 %vm1535_vm0, %v8645_v51  ;;  %3427 = vmatpush.bf16.msra.mxu0 %v5798_v27  ;;  %v6413_v27 = vld [vmem:[%s8490_s20 + $0x34] sm:$0xf0]  ;;  %v5667_v50 = vld [vmem:[%s8490_s20 + $0x38] sm:$0xf0] }
 0x208   : > { %6348 = vmatmul.msk.bf16.gmra.mxu2 %vm1535_vm0, %v8569_v25  ;;  %v8691_v49 = vor.u32 %v6412_v14, %v5667_v50  ;;  %v6307_v14 = vld [vmem:[%s10166_s3 + $0x518] sm:$0xf0] }
 0x209   : > { %3458 = vmatpush.bf16.msra.mxu2 %v6134_v48  ;;  %v5683_v48 = vld [vmem:[%s10166_s3 + $0x40] sm:$0xf0] }
 0x20a   : > { %v2202_v21 = vpop.f32.mrf.mxu0  ;;  %v2176_v8 = vpop.f32.mrf.mxu3 }
 0x20b   : > { %v2229_v37 = vpop.f32.mrf.mxu2  ;;  %v8667_v35 = vadd.f32 %v2176_v8, %v2147_v33  ;;  %v2149_v20 = vpop.f32.mrf.mxu1  ;;  %3428 = vmatpush.bf16.msra.mxu0 %v5742_v52  ;;  %v6415_v33 = vld [vmem:[%s10166_s3 + $0xc] sm:$0xf] }
 0x20c   : > { %v8665_v9 = vadd.f32 %v2229_v37, %v2200_v58  ;;  %v5686_v61 = vor.u32 %v6415_v33, %v5683_v48 }
 0x20d   : > { %10222 = vst [vmem:[#allocation55_spill] sm:$0xff] %v8667_v35 }
 0x20e   : > { %10221 = vst [vmem:[#allocation54_spill] sm:$0xff] %v8665_v9  ;;  %v8687_v9 = vor.u32 %v6413_v27, %v5665_v53  ;;  %v6570_v53 = vld [vmem:[%s10166_s3 + $0x4e4] sm:$0xf] }
 0x20f   : > { %3429 = vmatpush.bf16.msra.mxu0 %v5686_v61  ;;  %v6310_v33 = vor.u32 %v6570_v53, %v6307_v14 }
 0x211   : > { %3571 = vmatpush.bf16.msrb.mxu2 %v6310_v33 }
 0x212   : > { %v2205_v37 = vpop.f32.mrf.mxu0  ;;  %v2178_v8 = vpop.f32.mrf.mxu3 }
 0x213   : > { %v2231_v58 = vpop.f32.mrf.mxu2  ;;  %v8689_v38 = vadd.f32 %v2178_v8, %v2149_v20  ;;  %v2152_v52 = vpop.f32.mrf.mxu1  ;;  %v6577_v20 = vld [vmem:[%s10166_s3 + $0x514] sm:$0xf0] }
 0x214   : > { %v8685_v35 = vadd.f32 %v2231_v58, %v2202_v21  ;;  %v6305_v21 = vld [vmem:[%s10166_s3 + $0x4e0] sm:$0xf] }
 0x215   : > { %10224 = vst [vmem:[#allocation57_spill] sm:$0xff] %v8689_v38  ;;  %3324 = vmatmul.bf16.gmra.mxu0 %v8638_v16  ;;  %v6306_v27 = vor.u32 %v6577_v20, %v6305_v21  ;;  %v6521_v21 = vld [vmem:[%s10166_s3 + $0x354] sm:$0xf0]  ;;  %v6514_v20 = vld [vmem:[%s10166_s3 + $0x324] sm:$0xf] }
 0x216   : > { %10223 = vst [vmem:[#allocation56_spill] sm:$0xff] %v8685_v35  ;;  %3271 = vmatmul.bf16.gmra.mxu1 %v8687_v9  ;;  %v6081_v35 = vld [vmem:[%s10166_s3 + $0x320] sm:$0xf] }
 0x217   : > { %6346 = vmatmul.msk.bf16.gmra.mxu3 %vm1535_vm0, %v8691_v49  ;;  %v6082_v53 = vor.u32 %v6521_v21, %v6081_v35  ;;  %v6507_v35 = vld [vmem:[%s10166_s3 + $0x2e4] sm:$0xf0]  ;;  %v6500_v21 = vld [vmem:[%s10166_s3 + $0x2b4] sm:$0xf] }
 0x218   : > { %6349 = vmatmul.msk.bf16.gmra.mxu2 %vm1535_vm0, %v8645_v51  ;;  %3513 = vmatpush.bf16.msrb.mxu3 %v6306_v27 }
 0x219   : > { %3480 = vmatpush.bf16.msrb.mxu1 %v6082_v53  ;;  %v6249_v53 = vld [vmem:[%s10166_s3 + $0x470] sm:$0xf] }
 0x21a   : > { %v2207_v58 = vpop.f32.mrf.mxu0  ;;  %v2181_v48 = vpop.f32.mrf.mxu3 }
 0x21b   : > { %v2234_v50 = vpop.f32.mrf.mxu2  ;;  %v8713_v61 = vadd.f32 %v2181_v48, %v2152_v52  ;;  %v2154_v38 = vpop.f32.mrf.mxu1 }
 0x21c   : > { %v8711_v8 = vadd.f32 %v2234_v50, %v2205_v37  ;;  %v6083_v37 = vld [vmem:[%s10166_s3 + $0x358] sm:$0xf0] }
 0x21d   : > { %10226 = vst [vmem:[#allocation59_spill] sm:$0xff] %v8713_v61  ;;  %v6086_v52 = vor.u32 %v6514_v20, %v6083_v37  ;;  %v6556_v37 = vld [vmem:[%s10166_s3 + $0x474] sm:$0xf] }
 0x21e   : > { %10225 = vst [vmem:[#allocation58_spill] sm:$0xff] %v8711_v8  ;;  %v6025_v8 = vld [vmem:[%s10166_s3 + $0x2b0] sm:$0xf] }
 0x21f   : > { %3538 = vmatpush.bf16.msrb.mxu0 %v6086_v52  ;;  %v6026_v20 = vor.u32 %v6507_v35, %v6025_v8  ;;  %v6563_v8 = vld [vmem:[%s10166_s3 + $0x4a4] sm:$0xf0] }
 0x220   : > { %v6250_v52 = vor.u32 %v6563_v8, %v6249_v53  ;;  %v6493_v53 = vld [vmem:[%s10166_s3 + $0x274] sm:$0xf0]  ;;  %v6486_v8 = vld [vmem:[%s10166_s3 + $0x244] sm:$0xf] }
 0x221   : > { %3481 = vmatpush.bf16.msrb.mxu1 %v6026_v20 }
 0x222   : > { %v2210_v14 = vpop.f32.mrf.mxu0  ;;  %v2183_v50 = vpop.f32.mrf.mxu3  ;;  %3514 = vmatpush.bf16.msrb.mxu3 %v6250_v52 }
 0x223   : > { %v2236_v27 = vpop.f32.mrf.mxu2  ;;  %v8729_v48 = vadd.f32 %v2183_v50, %v2154_v38  ;;  %v2253_v61 = vpop.f32.mrf.mxu1  ;;  %v6027_v38 = vld [vmem:[%s10166_s3 + $0x2e8] sm:$0xf0] }
 0x224   : > { %v8727_v33 = vadd.f32 %v2236_v27, %v2207_v58  ;;  %v6030_v58 = vor.u32 %v6500_v21, %v6027_v38  ;;  %v6251_v27 = vld [vmem:[%s10166_s3 + $0x4a8] sm:$0xf0] }
 0x225   : > { %10228 = vst [vmem:[#allocation61_spill] sm:$0xff] %v8729_v48  ;;  %3329 = vmatmul.bf16.gmra.mxu0 %v8687_v9  ;;  %v6254_v21 = vor.u32 %v6556_v37, %v6251_v27 }
 0x226   : > { %10227 = vst [vmem:[#allocation60_spill] sm:$0xff] %v8727_v33  ;;  %3372 = vmatmul.bf16.vlgmr.msra.gmra.mxu1 %v8501_v43  ;;  %3539 = vmatpush.bf16.msrb.mxu0 %v6030_v58  ;;  %v5969_v58 = vld [vmem:[%s10166_s3 + $0x240] sm:$0xf] }
 0x227   : > { %6351 = vmatmul.msk.bf16.vlgmr.msra.gmra.mxu3 %vm1535_vm0, %v8505_v57  ;;  %3572 = vmatpush.bf16.msrb.mxu2 %v6254_v21  ;;  %v6479_v21 = vld [vmem:[%s10166_s3 + $0x204] sm:$0xf0] }
 0x228   : > { %6350 = vmatmul.msk.bf16.gmra.mxu2 %vm1535_vm0, %v8691_v49 }
 0x22a   : > { %v2212_v35 = vpop.f32.mrf.mxu0  ;;  %v2282_v38 = vpop.f32.mrf.mxu3 }
 0x22b   : > { %v2239_v50 = vpop.f32.mrf.mxu2  ;;  %v8763_v48 = vadd.f32 %v2282_v38, %v2253_v61  ;;  %v2255_v33 = vpop.f32.mrf.mxu1  ;;  %v5971_v61 = vld [vmem:[%s10166_s3 + $0x278] sm:$0xf0] }
 0x22c   : > { %v8761_v20 = vadd.f32 %v2239_v50, %v2210_v14  ;;  %v5970_v14 = vor.u32 %v6493_v53, %v5969_v58  ;;  %v5974_v37 = vor.u32 %v6486_v8, %v5971_v61  ;;  %v5913_v50 = vld [vmem:[%s10166_s3 + $0x1d0] sm:$0xf]  ;;  %v6472_v8 = vld [vmem:[%s10166_s3 + $0x1d4] sm:$0xf] }
 0x22d   : > { %10230 = vst [vmem:[#allocation63_spill] sm:$0xff] %v8763_v48  ;;  %v5914_v53 = vor.u32 %v6479_v21, %v5913_v50  ;;  %v6549_v50 = vld [vmem:[%s10166_s3 + $0x434] sm:$0xf0]  ;;  %v6542_v21 = vld [vmem:[%s10166_s3 + $0x404] sm:$0xf] }
 0x22e   : > { %10229 = vst [vmem:[#allocation62_spill] sm:$0xff] %v8761_v20  ;;  %3482 = vmatpush.bf16.msrb.mxu1 %v5970_v14  ;;  %3540 = vmatpush.bf16.msrb.mxu0 %v5974_v37  ;;  %v5915_v14 = vld [vmem:[%s10166_s3 + $0x208] sm:$0xf0] }
 0x22f   : > { %v5918_v61 = vor.u32 %v6472_v8, %v5915_v14 }
 0x232   : > { %v2311_v27 = vpop.f32.mrf.mxu0  ;;  %v2284_v58 = vpop.f32.mrf.mxu3  ;;  %3483 = vmatpush.bf16.msrb.mxu1 %v5914_v53  ;;  %3541 = vmatpush.bf16.msrb.mxu0 %v5918_v61  ;;  %v6195_v53 = vld [vmem:[%s10166_s3 + $0x438] sm:$0xf0] }
 0x233   : > { %v2241_v52 = vpop.f32.mrf.mxu2  ;;  %v8785_v48 = vadd.f32 %v2284_v58, %v2255_v33  ;;  %v2258_v20 = vpop.f32.mrf.mxu1  ;;  %v6465_v33 = vld [vmem:[%s10166_s3 + $0x194] sm:$0xf0]  ;;  %v6198_v61 = vor.u32 %v6542_v21, %v6195_v53  ;;  %v5859_v21 = vld [vmem:[%s10166_s3 + $0x198] sm:$0xf0]  ;;  %v5745_v53 = vld [vmem:[%s10166_s3 + $0x80] sm:$0xf] }
 0x234   : > { %v8783_v38 = vadd.f32 %v2241_v52, %v2212_v35  ;;  %v5857_v35 = vld [vmem:[%s10166_s3 + $0x160] sm:$0xf] }
 0x235   : > { %10232 = vst [vmem:[#allocation65_spill] sm:$0xff] %v8785_v48  ;;  %3430 = vmatmul.bf16.vlgmr.msra.gmra.mxu0 %v8501_v43  ;;  %v5858_v37 = vor.u32 %v6465_v33, %v5857_v35  ;;  %v6193_v52 = vld [vmem:[%s10166_s3 + $0x400] sm:$0xf]  ;;  %v5801_v35 = vld [vmem:[%s10166_s3 + $0xf0] sm:$0xf]  ;;  %3573 = vmatpush.bf16.msrb.mxu2 %v6198_v61 }
 0x236   : > { %10231 = vst [vmem:[#allocation64_spill] sm:$0xff] %v8783_v38  ;;  %3377 = vmatmul.bf16.gmra.mxu1 %v8565_v17  ;;  %v6194_v58 = vor.u32 %v6549_v50, %v6193_v52  ;;  %v6451_v33 = vld [vmem:[%s10166_s3 + $0x124] sm:$0xf0]  ;;  %v5689_v61 = vld [vmem:[%s10166_s3 + $0x10] sm:$0xf] }
 0x237   : > { %6352 = vmatmul.msk.bf16.gmra.mxu3 %vm1535_vm0, %v8569_v25  ;;  %3484 = vmatpush.bf16.msrb.mxu1 %v5858_v37  ;;  %v5802_v52 = vor.u32 %v6451_v33, %v5801_v35  ;;  %v6458_v37 = vld [vmem:[%s10166_s3 + $0x164] sm:$0xf]  ;;  %v6423_v35 = vld [vmem:[%s10166_s3 + $0x44] sm:$0xf0]  ;;  %v6137_v33 = vld [vmem:[%s10166_s3 + $0x390] sm:$0xf] }
 0x238   : > { %6355 = vmatmul.msk.bf16.vlgmr.msra.gmra.mxu2 %vm1535_vm0, %v8505_v57  ;;  %3515 = vmatpush.bf16.msrb.mxu3 %v6194_v58 }
 0x23a   : > { %v2313_v14 = vpop.f32.mrf.mxu0  ;;  %v2287_v48 = vpop.f32.mrf.mxu3 }
 0x23b   : > { %v2340_v8 = vpop.f32.mrf.mxu2  ;;  %v8825_v50 = vadd.f32 %v2287_v48, %v2258_v20  ;;  %v2260_v55 = vpop.f32.mrf.mxu1  ;;  %3485 = vmatpush.bf16.msrb.mxu1 %v5802_v52  ;;  %v6437_v48 = vld [vmem:[%s10166_s3 + $0xb4] sm:$0xf0] }
 0x23c   : > { %v8823_v38 = vadd.f32 %v2340_v8, %v2311_v27  ;;  %v5862_v27 = vor.u32 %v6458_v37, %v5859_v21  ;;  %v5746_v20 = vor.u32 %v6437_v48, %v5745_v53  ;;  %v5690_v21 = vor.u32 %v6423_v35, %v5689_v61  ;;  %v6535_v53 = vld [vmem:[%s10166_s3 + $0x3c4] sm:$0xf0] }
 0x23d   : > { %10234 = vst [vmem:[#allocation67_spill] sm:$0xff] %v8825_v50  ;;  %v5803_v50 = vld [vmem:[%s10166_s3 + $0x128] sm:$0xf0] }
 0x23e   : > { %10233 = vst [vmem:[#allocation66_spill] sm:$0xff] %v8823_v38  ;;  %3542 = vmatpush.bf16.msrb.mxu0 %v5862_v27  ;;  %v6138_v38 = vor.u32 %v6535_v53, %v6137_v33  ;;  %v6430_v53 = vld [vmem:[%s10166_s3 + $0x84] sm:$0xf] }
 0x23f   : > { %3486 = vmatpush.bf16.msrb.mxu1 %v5746_v20  ;;  %v6444_v20 = vld [vmem:[%s10166_s3 + $0xf4] sm:$0xf] }
 0x240   : > { %3516 = vmatpush.bf16.msrb.mxu3 %v6138_v38 }
 0x242   : > { %v2316_v8 = vpop.f32.mrf.mxu0  ;;  %v2289_v52 = vpop.f32.mrf.mxu3 }
 0x243   : > { %v2342_v58 = vpop.f32.mrf.mxu2  ;;  %v8853_v27 = vadd.f32 %v2289_v52, %v2260_v55  ;;  %v2263_v48 = vpop.f32.mrf.mxu1  ;;  %3487 = vmatpush.bf16.msrb.mxu1 %v5690_v21  ;;  %v6528_v55 = vld [vmem:[%s10166_s3 + $0x394] sm:$0xf] }
 0x244   : > { %v8848_v37 = vadd.f32 %v2342_v58, %v2313_v14  ;;  %v5806_v14 = vor.u32 %v6444_v20, %v5803_v50  ;;  %v6139_v58 = vld [vmem:[%s10166_s3 + $0x3c8] sm:$0xf0]  ;;  %v5747_v20 = vld [vmem:[%s10166_s3 + $0xb8] sm:$0xf0] }
 0x245   : > { %10236 = vst [vmem:[#allocation69_spill] sm:$0xff] %v8853_v27  ;;  %3435 = vmatmul.bf16.gmra.mxu0 %v8565_v17  ;;  %v6142_v50 = vor.u32 %v6528_v55, %v6139_v58  ;;  %v6501_v27 = vld [vmem:[%s10166_s3 + $0x2bc] sm:$0xf] }
 0x246   : > { %10235 = vst [vmem:[#allocation68_spill] sm:$0xff] %v8848_v37  ;;  %3382 = vmatmul.bf16.gmra.mxu1 %v8638_v16  ;;  %3543 = vmatpush.bf16.msrb.mxu0 %v5806_v14  ;;  %v5750_v14 = vor.u32 %v6430_v53, %v5747_v20  ;;  %v5977_v37 = vld [vmem:[%s10166_s3 + $0x248] sm:$0xf] }
 0x247   : > { %6353 = vmatmul.msk.bf16.gmra.mxu3 %vm1535_vm0, %v8645_v51  ;;  %3574 = vmatpush.bf16.msrb.mxu2 %v6142_v50 }
 0x248   : > { %6356 = vmatmul.msk.bf16.gmra.mxu2 %vm1535_vm0, %v8569_v25 }
 0x24a   : > { %v2318_v38 = vpop.f32.mrf.mxu0  ;;  %v2292_v35 = vpop.f32.mrf.mxu3  ;;  %3544 = vmatpush.bf16.msrb.mxu0 %v5750_v14 }
 0x24b   : > { %v2345_v61 = vpop.f32.mrf.mxu2  ;;  %v8875_v52 = vadd.f32 %v2292_v35, %v2263_v48  ;;  %v2265_v21 = vpop.f32.mrf.mxu1  ;;  %v5691_v48 = vld [vmem:[%s10166_s3 + $0x48] sm:$0xf0] }
 0x24c   : > { %v8873_v33 = vadd.f32 %v2345_v61, %v2316_v8  ;;  %v6416_v8 = vld [vmem:[%s10166_s3 + $0x14] sm:$0xf] }
 0x24d   : > { %10238 = vst [vmem:[#allocation71_spill] sm:$0xff] %v8875_v52  ;;  %v5694_v35 = vor.u32 %v6416_v8, %v5691_v48  ;;  %v6313_v8 = vld [vmem:[%s10166_s3 + $0x4e8] sm:$0xf]  ;;  %v6578_v48 = vld [vmem:[%s10166_s3 + $0x51c] sm:$0xf0] }
 0x24e   : > { %10237 = vst [vmem:[#allocation70_spill] sm:$0xff] %v8873_v33 }
 0x24f   : > { %3545 = vmatpush.bf16.msrb.mxu0 %v5694_v35  ;;  %v6314_v35 = vor.u32 %v6578_v48, %v6313_v8  ;;  %v6089_v8 = vld [vmem:[%s10166_s3 + $0x328] sm:$0xf]  ;;  %v6522_v48 = vld [vmem:[%s10166_s3 + $0x35c] sm:$0xf0] }
 0x251   : > { %3629 = vmatpush.bf16.msra.mxu3 %v6314_v35 }
 0x252   : > { %v2321_v58 = vpop.f32.mrf.mxu0  ;;  %v2294_v50 = vpop.f32.mrf.mxu3 }
 0x253   : > { %v2347_v55 = vpop.f32.mrf.mxu2  ;;  %v8891_v52 = vadd.f32 %v2294_v50, %v2265_v21  ;;  %v2268_v33 = vpop.f32.mrf.mxu1  ;;  %v6571_v50 = vld [vmem:[%s10166_s3 + $0x4ec] sm:$0xf] }
 0x254   : > { %v8889_v61 = vadd.f32 %v2347_v55, %v2318_v38 }
 0x255   : > { %10240 = vst [vmem:[#allocation73_spill] sm:$0xff] %v8891_v52  ;;  %3440 = vmatmul.bf16.gmra.mxu0 %v8638_v16 }
 0x256   : > { %10239 = vst [vmem:[#allocation72_spill] sm:$0xff] %v8889_v61  ;;  %3387 = vmatmul.bf16.gmra.mxu1 %v8687_v9 }
 0x257   : > { %6354 = vmatmul.msk.bf16.gmra.mxu3 %vm1535_vm0, %v8691_v49 }
 0x258   : > { %6357 = vmatmul.msk.bf16.gmra.mxu2 %vm1535_vm0, %v8645_v51 }
 0x25a   : > { %v2323_v20 = vpop.f32.mrf.mxu0  ;;  %v2297_v14 = vpop.f32.mrf.mxu3 }
 0x25b   : > { %v2350_v53 = vpop.f32.mrf.mxu2  ;;  %v8901_v55 = vadd.f32 %v2297_v14, %v2268_v33  ;;  %v2270_v21 = vpop.f32.mrf.mxu1  ;;  %v6315_v33 = vld [vmem:[%s10166_s3 + $0x520] sm:$0xf0] }
 0x25c   : > { %v8899_v38 = vadd.f32 %v2350_v53, %v2321_v58  ;;  %v6318_v58 = vor.u32 %v6571_v50, %v6315_v33  ;;  %v6091_v50 = vld [vmem:[%s10166_s3 + $0x360] sm:$0xf0] }
 0x25d   : > { %10242 = vst [vmem:[#allocation75_spill] sm:$0xff] %v8901_v55 }
 0x25e   : > { %10241 = vst [vmem:[#allocation74_spill] sm:$0xff] %v8899_v38  ;;  %3687 = vmatpush.bf16.msra.mxu2 %v6318_v58 }
 0x262   : > { %v2326_v14 = vpop.f32.mrf.mxu0  ;;  %v2299_v55 = vpop.f32.mrf.mxu3 }
 0x263   : > { %v2352_v53 = vpop.f32.mrf.mxu2  ;;  %v8917_v52 = vadd.f32 %v2299_v55, %v2270_v21  ;;  %v3257_v61 = vpop.f32.mrf.mxu1  ;;  %v8936_v55 = vld [vmem:[%s10168_s5] sm:$0xff]  ;;  %v6090_v21 = vor.u32 %v6522_v48, %v6089_v8  ;;  %v6033_v48 = vld [vmem:[%s10166_s3 + $0x2b8] sm:$0xf] }
 0x264   : > { %v8915_v38 = vadd.f32 %v2352_v53, %v2323_v20  ;;  %v6515_v20 = vld [vmem:[%s10166_s3 + $0x32c] sm:$0xf]  ;;  %v3258_v33 = vadd.f32 %v3257_v61, %v7544_v36  ;;  %v8951_v53 = vperm.slane %v8936_v55, 0 }
 0x265   : > { %10244 = vst [vmem:[#allocation77_spill] sm:$0xff] %v8917_v52  ;;  %3445 = vmatmul.bf16.gmra.mxu0 %v8687_v9  ;;  %v6094_v35 = vor.u32 %v6515_v20, %v6091_v50  ;;  %3596 = vmatpush.bf16.msra.mxu1 %v6090_v21  ;;  %v6508_v20 = vld [vmem:[%s10166_s3 + $0x2ec] sm:$0xf0] }
 0x266   : > { %10243 = vst [vmem:[#allocation76_spill] sm:$0xff] %v8915_v38  ;;  %3488 = vmatmul.bf16.vlgmr.msrb.gmra.mxu1 %v8501_v43  ;;  %v6034_v52 = vor.u32 %v6508_v20, %v6033_v48  ;;  %v4316_v38 = vld [vmem:[%s8946_s15] sm:$0xff]  ;;  %v6564_v48 = vld [vmem:[%s10166_s3 + $0x4ac] sm:$0xf0]  ;;  %v6259_v20 = vld [vmem:[%s10166_s3 + $0x4b0] sm:$0xf0] }
 0x267   : > { %6359 = vmatmul.msk.bf16.vlgmr.msrb.gmra.mxu3 %vm1535_vm0, %v8505_v57  ;;  %3654 = vmatpush.bf16.msra.mxu0 %v6094_v35 }
 0x268   : > { %6358 = vmatmul.msk.bf16.gmra.mxu2 %vm1535_vm0, %v8691_v49 }
 0x269   : > { %3597 = vmatpush.bf16.msra.mxu1 %v6034_v52  ;;  %v6557_v52 = vld [vmem:[%s10166_s3 + $0x47c] sm:$0xf] }
 0x26a   : > { %v2328_v8 = vpop.f32.mrf.mxu0  ;;  %v3286_v50 = vpop.f32.mrf.mxu3 }
 0x26b   : > { %v2355_v58 = vpop.f32.mrf.mxu2  ;;  %v3287_v36 = vadd.f32 %v3286_v50, %v3258_v33  ;;  %v3259_v61 = vpop.f32.mrf.mxu1  ;;  %v6257_v33 = vld [vmem:[%s10166_s3 + $0x478] sm:$0xf] }
 0x26c   : > { %v8959_v21 = vadd.f32 %v2355_v58, %v2326_v14  ;;  %v6035_v14 = vld [vmem:[%s10166_s3 + $0x2f0] sm:$0xf0]  ;;  %v3260_v7 = vadd.f32 %v3259_v61, %v7584_v62 }
 0x26d   : > { %v4092_v35 = vadd.f32 %v8951_v53, %v3287_v36  ;;  %v6038_v58 = vor.u32 %v6501_v27, %v6035_v14  ;;  %v6258_v36 = vor.u32 %v6564_v48, %v6257_v33  ;;  %v6494_v27 = vld [vmem:[%s10166_s3 + $0x27c] sm:$0xf0]  ;;  %v5921_v33 = vld [vmem:[%s10166_s3 + $0x1d8] sm:$0xf] }
 0x26e   : > { %10245 = vst [vmem:[#allocation78_spill] sm:$0xff] %v8959_v21  ;;  %v6262_v21 = vor.u32 %v6557_v52, %v6259_v20 }
 0x26f   : > { %v4204_v50 = vmul.f32 0.2, %v4092_v35  ;;  %3655 = vmatpush.bf16.msra.mxu0 %v6038_v58  ;;  %3630 = vmatpush.bf16.msra.mxu3 %v6258_v36  ;;  %v5978_v35 = vor.u32 %v6494_v27, %v5977_v37  ;;  %v6480_v58 = vld [vmem:[%s10166_s3 + $0x20c] sm:$0xf0]  ;;  %v6466_v36 = vld [vmem:[%s10166_s3 + $0x19c] sm:$0xf0] }
 0x270   : > { %3688 = vmatpush.bf16.msra.mxu2 %v6262_v21  ;;  %v5922_v20 = vor.u32 %v6480_v58, %v5921_v33  ;;  %v6487_v21 = vld [vmem:[%s10166_s3 + $0x24c] sm:$0xf]  ;;  %v9026_v33 = vperm.slane %v8936_v55, 1 }
 0x271   : > { %v4428_v14 = vadd.f32 %v4316_v38, %v4204_v50  ;;  %3598 = vmatpush.bf16.msra.mxu1 %v5978_v35 }
 0x272   : > { %v3315_v22 = vpop.f32.mrf.mxu0  ;;  %v3288_v38 = vpop.f32.mrf.mxu3 }
 0x273   : > { %v2357_v5 = vpop.f32.mrf.mxu2  ;;  %v4540_v52 = vmax.f32 %v4428_v14, 0.0  ;;  %v3289_v62 = vadd.f32 %v3288_v38, %v3260_v7  ;;  %v3262_v61 = vpop.f32.mrf.mxu1  ;;  %v5865_v7 = vld [vmem:[%s10166_s3 + $0x168] sm:$0xf]  ;;  %v3316_v35 = vadd.f32 %v3315_v22, %v7582_v59  ;;  %v6452_v59 = vld [vmem:[%s10166_s3 + $0x12c] sm:$0xf0] }
 0x274   : > { %v8998_v48 = vadd.f32 %v2357_v5, %v2328_v8  ;;  %v5979_v5 = vld [vmem:[%s10166_s3 + $0x280] sm:$0xf0]  ;;  %v4330_v8 = vld [vmem:[%s8946_s15 + $0x70] sm:$0xff]  ;;  %v5866_v14 = vor.u32 %v6466_v36, %v5865_v7  ;;  %v3263_v38 = vadd.f32 %v3262_v61, %v7609_v15  ;;  %v4317_v36 = vld [vmem:[%s8946_s15 + $0x8] sm:$0xff] }
 0x275   : > { %3546 = vmatmul.bf16.vlgmr.msrb.gmra.mxu0 %v8501_v43  ;;  %4652 = vst [vmem:[%s9002_s17] sm:$0xff] %v4540_v52  ;;  %v4106_v37 = vadd.f32 %v8951_v53, %v3289_v62  ;;  %v5982_v50 = vor.u32 %v6487_v21, %v5979_v5  ;;  %3599 = vmatpush.bf16.msra.mxu1 %v5922_v20 }
 0x276   : > { %3493 = vmatmul.bf16.gmra.mxu1 %v8565_v17 }
 0x277   : > { %v4218_v27 = vmul.f32 0.2, %v4106_v37  ;;  %6360 = vmatmul.msk.bf16.gmra.mxu3 %vm1535_vm0, %v8569_v25  ;;  %3656 = vmatpush.bf16.msra.mxu0 %v5982_v50  ;;  %v5809_v37 = vld [vmem:[%s10166_s3 + $0xf8] sm:$0xf]  ;;  %v4344_v50 = vld [vmem:[%s8946_s15 + $0xe0] sm:$0xff] }
 0x278   : > { %6363 = vmatmul.msk.bf16.vlgmr.msrb.gmra.mxu2 %vm1535_vm0, %v8505_v57 }
 0x279   : > { %v4442_v58 = vadd.f32 %v4330_v8, %v4218_v27  ;;  %3600 = vmatpush.bf16.msra.mxu1 %v5866_v14  ;;  %v5810_v8 = vor.u32 %v6452_v59, %v5809_v37  ;;  %v6473_v27 = vld [vmem:[%s10166_s3 + $0x1dc] sm:$0xf]  ;;  %v6201_v14 = vld [vmem:[%s10166_s3 + $0x408] sm:$0xf] }
 0x27a   : > { %v3317_v62 = vpop.f32.mrf.mxu0  ;;  %v3291_v22 = vpop.f32.mrf.mxu3 }
 0x27b   : > { %v3344_v52 = vpop.f32.mrf.mxu2  ;;  %v4554_v21 = vmax.f32 %v4442_v58, 0.0  ;;  %v3292_v5 = vadd.f32 %v3291_v22, %v3263_v38  ;;  %v3264_v7 = vpop.f32.mrf.mxu1  ;;  %v6543_v22 = vld [vmem:[%s10166_s3 + $0x40c] sm:$0xf] }
 0x27c   : > { %v3345_v20 = vadd.f32 %v3344_v52, %v3316_v35  ;;  %v5923_v35 = vld [vmem:[%s10166_s3 + $0x210] sm:$0xf0]  ;;  %v6550_v52 = vld [vmem:[%s10166_s3 + $0x43c] sm:$0xf0] }
 0x27d   : > { %4666 = vst [vmem:[%s9002_s17 + $0x70] sm:$0xff] %v4554_v21  ;;  %v4120_v61 = vadd.f32 %v8951_v53, %v3292_v5  ;;  %v5926_v38 = vor.u32 %v6473_v27, %v5923_v35  ;;  %v6202_v59 = vor.u32 %v6550_v52, %v6201_v14  ;;  %3601 = vmatpush.bf16.msra.mxu1 %v5810_v8  ;;  %v5753_v27 = vld [vmem:[%s10166_s3 + $0x88] sm:$0xf]  ;;  %v6438_v8 = vld [vmem:[%s10166_s3 + $0xbc] sm:$0xf0] }
 0x27e   : > { %v4093_v15 = vadd.f32 %v9026_v33, %v3345_v20  ;;  %v6203_v20 = vld [vmem:[%s10166_s3 + $0x440] sm:$0xf0]  ;;  %v3318_v5 = vadd.f32 %v3317_v62, %v7607_v12  ;;  %v3265_v35 = vadd.f32 %v3264_v7, %v7634_v31  ;;  %v5697_v12 = vld [vmem:[%s10166_s3 + $0x18] sm:$0xf]  ;;  %v6424_v62 = vld [vmem:[%s10166_s3 + $0x4c] sm:$0xf0]  ;;  %v5754_v7 = vor.u32 %v6438_v8, %v5753_v27 }
 0x27f   : > { %v4232_v37 = vmul.f32 0.2, %v4120_v61  ;;  %3657 = vmatpush.bf16.msra.mxu0 %v5926_v38  ;;  %3631 = vmatpush.bf16.msra.mxu3 %v6202_v59  ;;  %v6536_v38 = vld [vmem:[%s10166_s3 + $0x3cc] sm:$0xf0]  ;;  %v4331_v27 = vld [vmem:[%s8946_s15 + $0x78] sm:$0xff] }
 0x280   : > { %v4205_v58 = vmul.f32 0.2, %v4093_v15  ;;  %v6206_v15 = vor.u32 %v6543_v22, %v6203_v20 }
 0x281   : > { %v4456_v61 = vadd.f32 %v4344_v50, %v4232_v37  ;;  %3602 = vmatpush.bf16.msra.mxu1 %v5754_v7 }
 0x282   : > { %v4429_v21 = vadd.f32 %v4317_v36, %v4205_v58  ;;  %v3320_v52 = vpop.f32.mrf.mxu0  ;;  %v3293_v50 = vpop.f32.mrf.mxu3  ;;  %3689 = vmatpush.bf16.msra.mxu2 %v6206_v15  ;;  %v6145_v58 = vld [vmem:[%s10166_s3 + $0x398] sm:$0xf] }
 0x283   : > { %v3346_v14 = vpop.f32.mrf.mxu2  ;;  %v4568_v37 = vmax.f32 %v4456_v61, 0.0  ;;  %v3294_v59 = vadd.f32 %v3293_v50, %v3265_v35  ;;  %v3267_v22 = vpop.f32.mrf.mxu1  ;;  %v6146_v20 = vor.u32 %v6536_v38, %v6145_v58  ;;  %v5867_v61 = vld [vmem:[%s10166_s3 + $0x1a0] sm:$0xf0]  ;;  %v4358_v35 = vld [vmem:[%s8946_s15 + $0x150] sm:$0xff]  ;;  %v3321_v50 = vadd.f32 %v3320_v52, %v7632_v29 }
 0x284   : > { %v4541_v36 = vmax.f32 %v4429_v21, 0.0  ;;  %v3347_v31 = vadd.f32 %v3346_v14, %v3318_v5  ;;  %v5698_v5 = vor.u32 %v6424_v62, %v5697_v12  ;;  %v6459_v14 = vld [vmem:[%s10166_s3 + $0x16c] sm:$0xf]  ;;  %v3268_v7 = vadd.f32 %v3267_v22, %v7650_v47 }
 0x285   : > { %3551 = vmatmul.bf16.gmra.mxu0 %v8565_v17  ;;  %4680 = vst [vmem:[%s9002_s17 + $0xe0] sm:$0xff] %v4568_v37  ;;  %v4134_v15 = vadd.f32 %v8951_v53, %v3294_v59  ;;  %3632 = vmatpush.bf16.msra.mxu3 %v6146_v20  ;;  %v5870_v12 = vor.u32 %v6459_v14, %v5867_v61  ;;  %v6445_v37 = vld [vmem:[%s10166_s3 + $0xfc] sm:$0xf]  ;;  %v5811_v59 = vld [vmem:[%s10166_s3 + $0x130] sm:$0xf0]  ;;  %v4345_v14 = vld [vmem:[%s8946_s15 + $0xe8] sm:$0xff] }
 0x286   : > { %4653 = vst [vmem:[%s9002_s17 + $0x8] sm:$0xff] %v4541_v36  ;;  %v4107_v21 = vadd.f32 %v9026_v33, %v3347_v31  ;;  %3498 = vmatmul.bf16.gmra.mxu1 %v8638_v16  ;;  %v6529_v61 = vld [vmem:[%s10166_s3 + $0x39c] sm:$0xf] }
 0x287   : > { %v4246_v62 = vmul.f32 0.2, %v4134_v15  ;;  %6361 = vmatmul.msk.bf16.gmra.mxu3 %vm1535_vm0, %v8645_v51  ;;  %3658 = vmatpush.bf16.msra.mxu0 %v5870_v12 }
 0x288   : > { %v4219_v8 = vmul.f32 0.2, %v4107_v21  ;;  %6364 = vmatmul.msk.bf16.gmra.mxu2 %vm1535_vm0, %v8569_v25  ;;  %3603 = vmatpush.bf16.msra.mxu1 %v5698_v5  ;;  %v5814_v21 = vor.u32 %v6445_v37, %v5811_v59 }
 0x289   : > { %v4470_v31 = vadd.f32 %v4358_v35, %v4246_v62  ;;  %v6147_v35 = vld [vmem:[%s10166_s3 + $0x3d0] sm:$0xf0] }
 0x28a   : > { %v4443_v36 = vadd.f32 %v4331_v27, %v4219_v8  ;;  %v3322_v38 = vpop.f32.mrf.mxu0  ;;  %v3296_v52 = vpop.f32.mrf.mxu3  ;;  %v4372_v8 = vld [vmem:[%s8946_s15 + $0x1c0] sm:$0xff]  ;;  %v6150_v62 = vor.u32 %v6529_v61, %v6147_v35  ;;  %v4359_v35 = vld [vmem:[%s8946_s15 + $0x158] sm:$0xff] }
 0x28b   : > { %v3349_v58 = vpop.f32.mrf.mxu2  ;;  %v4582_v5 = vmax.f32 %v4470_v31, 0.0  ;;  %v3297_v15 = vadd.f32 %v3296_v52, %v3268_v7  ;;  %v3269_v27 = vpop.f32.mrf.mxu1  ;;  %3659 = vmatpush.bf16.msra.mxu0 %v5814_v21  ;;  %v5755_v31 = vld [vmem:[%s10166_s3 + $0xc0] sm:$0xf0]  ;;  %v6417_v21 = vld [vmem:[%s10166_s3 + $0x1c] sm:$0xf] }
 0x28c   : > { %v4555_v29 = vmax.f32 %v4443_v36, 0.0  ;;  %v3350_v20 = vadd.f32 %v3349_v58, %v3321_v50  ;;  %v6431_v36 = vld [vmem:[%s10166_s3 + $0x8c] sm:$0xf]  ;;  %v3323_v58 = vadd.f32 %v3322_v38, %v7648_v45  ;;  %3690 = vmatpush.bf16.msra.mxu2 %v6150_v62 }
 0x28d   : > { %4694 = vst [vmem:[%s9002_s17 + $0x150] sm:$0xff] %v4582_v5  ;;  %v4148_v22 = vadd.f32 %v8951_v53, %v3297_v15  ;;  %v5758_v37 = vor.u32 %v6431_v36, %v5755_v31  ;;  %v5699_v5 = vld [vmem:[%s10166_s3 + $0x50] sm:$0xf0] }
 0x28e   : > { %4667 = vst [vmem:[%s9002_s17 + $0x78] sm:$0xff] %v4555_v29  ;;  %v4121_v47 = vadd.f32 %v9026_v33, %v3350_v20  ;;  %v3270_v29 = vadd.f32 %v3269_v27, %v7672_v0  ;;  %v5702_v27 = vor.u32 %v6417_v21, %v5699_v5 }
 0x28f   : > { %v4260_v50 = vmul.f32 0.2, %v4148_v22  ;;  %3660 = vmatpush.bf16.msra.mxu0 %v5758_v37 }
 0x290   : > { %v4233_v12 = vmul.f32 0.2, %v4121_v47 }
 0x291   : > { %v4484_v59 = vadd.f32 %v4372_v8, %v4260_v50  ;;  %v4386_v8 = vld [vmem:[%s8946_s15 + $0x230] sm:$0xff] }
 0x292   : > { %v4457_v7 = vadd.f32 %v4345_v14, %v4233_v12  ;;  %v3325_v20 = vpop.f32.mrf.mxu0  ;;  %v3298_v38 = vpop.f32.mrf.mxu3 }
 0x293   : > { %v3351_v52 = vpop.f32.mrf.mxu2  ;;  %v4596_v47 = vmax.f32 %v4484_v59, 0.0  ;;  %v3299_v22 = vadd.f32 %v3298_v38, %v3270_v29  ;;  %v3272_v0 = vpop.f32.mrf.mxu1  ;;  %3661 = vmatpush.bf16.msra.mxu0 %v5702_v27  ;;  %v3326_v50 = vadd.f32 %v3325_v20, %v7670_v60  ;;  %v4400_v38 = vld [vmem:[%s8946_s15 + $0x2a0] sm:$0xff]  ;;  %v4373_v60 = vld [vmem:[%s8946_s15 + $0x1c8] sm:$0xff]  ;;  %v6572_v27 = vld [vmem:[%s10166_s3 + $0x4f4] sm:$0xf] }
 0x294   : > { %v4569_v45 = vmax.f32 %v4457_v7, 0.0  ;;  %v3352_v15 = vadd.f32 %v3351_v52, %v3323_v58  ;;  %v3273_v7 = vadd.f32 %v3272_v0, %v7688_v13  ;;  %v6321_v13 = vld [vmem:[%s10166_s3 + $0x4f0] sm:$0xf]  ;;  %v6579_v20 = vld [vmem:[%s10166_s3 + $0x524] sm:$0xf0] }
 0x295   : > { %3556 = vmatmul.bf16.gmra.mxu0 %v8638_v16  ;;  %4708 = vst [vmem:[%s9002_s17 + $0x1c0] sm:$0xff] %v4596_v47  ;;  %v4162_v61 = vadd.f32 %v8951_v53, %v3299_v22  ;;  %v6322_v0 = vor.u32 %v6579_v20, %v6321_v13 }
 0x296   : > { %4681 = vst [vmem:[%s9002_s17 + $0xe8] sm:$0xff] %v4569_v45  ;;  %v4135_v14 = vadd.f32 %v9026_v33, %v3352_v15  ;;  %3503 = vmatmul.bf16.gmra.mxu1 %v8687_v9 }
 0x297   : > { %v4274_v62 = vmul.f32 0.2, %v4162_v61  ;;  %6362 = vmatmul.msk.bf16.gmra.mxu3 %vm1535_vm0, %v8691_v49 }
 0x298   : > { %v4247_v12 = vmul.f32 0.2, %v4135_v14  ;;  %6365 = vmatmul.msk.bf16.gmra.mxu2 %vm1535_vm0, %v8645_v51  ;;  %v6323_v14 = vld [vmem:[%s10166_s3 + $0x528] sm:$0xf0]  ;;  %3745 = vmatpush.bf16.msrb.mxu3 %v6322_v0 }
 0x299   : > { %v4498_v31 = vadd.f32 %v4386_v8, %v4274_v62 }
 0x29a   : > { %v4471_v36 = vadd.f32 %v4359_v35, %v4247_v12  ;;  %v3327_v37 = vpop.f32.mrf.mxu0  ;;  %v3301_v29 = vpop.f32.mrf.mxu3  ;;  %v6326_v35 = vor.u32 %v6572_v27, %v6323_v14 }
 0x29b   : > { %v3354_v58 = vpop.f32.mrf.mxu2  ;;  %v4610_v21 = vmax.f32 %v4498_v31, 0.0  ;;  %v3302_v5 = vadd.f32 %v3301_v29, %v3273_v7  ;;  %v3274_v45 = vpop.f32.mrf.mxu1  ;;  %v3328_v12 = vadd.f32 %v3327_v37, %v7686_v10  ;;  %v6097_v37 = vld [vmem:[%s10166_s3 + $0x330] sm:$0xf] }
 0x29c   : > { %v4583_v59 = vmax.f32 %v4471_v36, 0.0  ;;  %v3355_v52 = vadd.f32 %v3354_v58, %v3326_v50  ;;  %v3275_v36 = vadd.f32 %v3274_v45, %v7722_v40  ;;  %3803 = vmatpush.bf16.msrb.mxu2 %v6326_v35  ;;  %v4387_v40 = vld [vmem:[%s8946_s15 + $0x238] sm:$0xff]  ;;  %v6523_v45 = vld [vmem:[%s10166_s3 + $0x364] sm:$0xf0]  ;;  %v9191_v35 = vperm.slane %v8936_v55, 2 }
 0x29d   : > { %4722 = vst [vmem:[%s9002_s17 + $0x230] sm:$0xff] %v4610_v21  ;;  %v4176_v47 = vadd.f32 %v8951_v53, %v3302_v5  ;;  %v4414_v5 = vld [vmem:[%s8946_s15 + $0x310] sm:$0xff] }
 0x29e   : > { %4695 = vst [vmem:[%s9002_s17 + $0x158] sm:$0xff] %v4583_v59  ;;  %v4149_v15 = vadd.f32 %v9026_v33, %v3355_v52 }
 0x29f   : > { %v4288_v61 = vmul.f32 0.2, %v4176_v47  ;;  %v6098_v47 = vor.u32 %v6523_v45, %v6097_v37  ;;  %v6265_v37 = vld [vmem:[%s10166_s3 + $0x480] sm:$0xf]  ;;  %v6565_v45 = vld [vmem:[%s10166_s3 + $0x4b4] sm:$0xf0] }
 0x2a0   : > { %v4261_v22 = vmul.f32 0.2, %v4149_v15 }
 0x2a1   : > { %v4512_v62 = vadd.f32 %v4400_v38, %v4288_v61  ;;  %3712 = vmatpush.bf16.msrb.mxu1 %v6098_v47  ;;  %v6266_v47 = vor.u32 %v6565_v45, %v6265_v37  ;;  %v6467_v37 = vld [vmem:[%s10166_s3 + $0x1a4] sm:$0xf0] }
 0x2a2   : > { %v4485_v8 = vadd.f32 %v4373_v60, %v4261_v22  ;;  %v3330_v31 = vpop.f32.mrf.mxu0  ;;  %v3303_v58 = vpop.f32.mrf.mxu3  ;;  %v6099_v60 = vld [vmem:[%s10166_s3 + $0x368] sm:$0xf0] }
 0x2a3   : > { %v3356_v50 = vpop.f32.mrf.mxu2  ;;  %v4624_v29 = vmax.f32 %v4512_v62, 0.0  ;;  %v3304_v52 = vadd.f32 %v3303_v58, %v3275_v36  ;;  %v3373_v21 = vpop.f32.mrf.mxu1  ;;  %v3331_v0 = vadd.f32 %v3330_v31, %v7720_v34  ;;  %v6509_v34 = vld [vmem:[%s10166_s3 + $0x2f4] sm:$0xf0]  ;;  %3746 = vmatpush.bf16.msrb.mxu3 %v6266_v47 }
 0x2a4   : > { %v4597_v7 = vmax.f32 %v4485_v8, 0.0  ;;  %v3357_v59 = vadd.f32 %v3356_v50, %v3328_v12  ;;  %v3374_v14 = vadd.f32 %v3373_v21, %v7724_v41  ;;  %v6041_v12 = vld [vmem:[%s10166_s3 + $0x2c0] sm:$0xf]  ;;  %v4318_v21 = vld [vmem:[%s8946_s15 + $0x10] sm:$0xff] }
 0x2a5   : > { %3561 = vmatmul.bf16.gmra.mxu0 %v8687_v9  ;;  %4736 = vst [vmem:[%s9002_s17 + $0x2a0] sm:$0xff] %v4624_v29  ;;  %v4190_v10 = vadd.f32 %v8951_v53, %v3304_v52  ;;  %v6516_v53 = vld [vmem:[%s10166_s3 + $0x334] sm:$0xf]  ;;  %v6042_v50 = vor.u32 %v6509_v34, %v6041_v12  ;;  %v4401_v29 = vld [vmem:[%s8946_s15 + $0x2a8] sm:$0xff] }
 0x2a6   : > { %4709 = vst [vmem:[%s9002_s17 + $0x1c8] sm:$0xff] %v4597_v7  ;;  %v4163_v15 = vadd.f32 %v9026_v33, %v3357_v59  ;;  %3604 = vmatmul.bf16.vlgmr.msra.gmra.mxu1 %v8501_v43  ;;  %v6102_v20 = vor.u32 %v6516_v53, %v6099_v60  ;;  %v6558_v53 = vld [vmem:[%s10166_s3 + $0x484] sm:$0xf]  ;;  %v6267_v60 = vld [vmem:[%s10166_s3 + $0x4b8] sm:$0xf0] }
 0x2a7   : > { %v4302_v13 = vmul.f32 0.2, %v4190_v10  ;;  %6367 = vmatmul.msk.bf16.vlgmr.msra.gmra.mxu3 %vm1535_vm0, %v8505_v57  ;;  %3713 = vmatpush.bf16.msrb.mxu1 %v6042_v50  ;;  %v6495_v34 = vld [vmem:[%s10166_s3 + $0x284] sm:$0xf0] }
 0x2a8   : > { %v4275_v38 = vmul.f32 0.2, %v4163_v15  ;;  %6366 = vmatmul.msk.bf16.gmra.mxu2 %vm1535_vm0, %v8691_v49  ;;  %3770 = vmatpush.bf16.msrb.mxu0 %v6102_v20  ;;  %v6043_v15 = vld [vmem:[%s10166_s3 + $0x2f8] sm:$0xf0] }
 0x2a9   : > { %v4526_v27 = vadd.f32 %v4414_v5, %v4302_v13  ;;  %v6502_v5 = vld [vmem:[%s10166_s3 + $0x2c4] sm:$0xf] }
 0x2aa   : > { %v4499_v22 = vadd.f32 %v4387_v40, %v4275_v38  ;;  %v3332_v8 = vpop.f32.mrf.mxu0  ;;  %v3402_v41 = vpop.f32.mrf.mxu3  ;;  %v6046_v40 = vor.u32 %v6502_v5, %v6043_v15  ;;  %v6488_v5 = vld [vmem:[%s10166_s3 + $0x254] sm:$0xf]  ;;  %v5987_v15 = vld [vmem:[%s10166_s3 + $0x288] sm:$0xf0] }
 0x2ab   : > { %v3359_v61 = vpop.f32.mrf.mxu2  ;;  %v4638_v31 = vmax.f32 %v4526_v27, 0.0  ;;  %v3403_v7 = vadd.f32 %v3402_v41, %v3374_v14  ;;  %v3375_v58 = vpop.f32.mrf.mxu1  ;;  %v3333_v20 = vadd.f32 %v3332_v8, %v7744_v56  ;;  %v5929_v56 = vld [vmem:[%s10166_s3 + $0x1e0] sm:$0xf]  ;;  %v6481_v8 = vld [vmem:[%s10166_s3 + $0x214] sm:$0xf0] }
 0x2ac   : > { %v4611_v62 = vmax.f32 %v4499_v22, 0.0  ;;  %v3360_v36 = vadd.f32 %v3359_v61, %v3331_v0  ;;  %3771 = vmatpush.bf16.msrb.mxu0 %v6046_v40  ;;  %v6270_v22 = vor.u32 %v6558_v53, %v6267_v60  ;;  %v5985_v0 = vld [vmem:[%s10166_s3 + $0x250] sm:$0xf]  ;;  %v3376_v14 = vadd.f32 %v3375_v58, %v7746_v1 }
 0x2ad   : > { %4750 = vst [vmem:[%s9002_s17 + $0x310] sm:$0xff] %v4638_v31  ;;  %v4094_v52 = vadd.f32 %v9191_v35, %v3403_v7  ;;  %v5986_v41 = vor.u32 %v6495_v34, %v5985_v0  ;;  %v5873_v40 = vld [vmem:[%s10166_s3 + $0x170] sm:$0xf]  ;;  %v9263_v53 = vperm.slane %v8936_v55, 3 }
 0x2ae   : > { %4723 = vst [vmem:[%s9002_s17 + $0x238] sm:$0xff] %v4611_v62  ;;  %v4177_v59 = vadd.f32 %v9026_v33, %v3360_v36  ;;  %3804 = vmatpush.bf16.msrb.mxu2 %v6270_v22  ;;  %v5874_v60 = vor.u32 %v6467_v37, %v5873_v40  ;;  %v5761_v40 = vld [vmem:[%s10166_s3 + $0x90] sm:$0xf] }
 0x2af   : > { %v4206_v38 = vmul.f32 0.2, %v4094_v52  ;;  %3714 = vmatpush.bf16.msrb.mxu1 %v5986_v41  ;;  %v6474_v41 = vld [vmem:[%s10166_s3 + $0x1e4] sm:$0xf] }
 0x2b0   : > { %v4289_v10 = vmul.f32 0.2, %v4177_v59  ;;  %v4415_v59 = vld [vmem:[%s8946_s15 + $0x318] sm:$0xff] }
 0x2b1   : > { %v4430_v27 = vadd.f32 %v4318_v21, %v4206_v38  ;;  %v4332_v21 = vld [vmem:[%s8946_s15 + $0x80] sm:$0xff] }
 0x2b2   : > { %v4513_v13 = vadd.f32 %v4401_v29, %v4289_v10  ;;  %v3431_v12 = vpop.f32.mrf.mxu0  ;;  %v3404_v36 = vpop.f32.mrf.mxu3  ;;  %v5930_v29 = vor.u32 %v6481_v8, %v5929_v56 }
 0x2b3   : > { %v3361_v61 = vpop.f32.mrf.mxu2  ;;  %v4542_v50 = vmax.f32 %v4430_v27, 0.0  ;;  %v3405_v31 = vadd.f32 %v3404_v36, %v3376_v14  ;;  %v3378_v7 = vpop.f32.mrf.mxu1  ;;  %v3432_v47 = vadd.f32 %v3431_v12, %v7784_v26  ;;  %v5817_v27 = vld [vmem:[%s10166_s3 + $0x100] sm:$0xf]  ;;  %v6453_v26 = vld [vmem:[%s10166_s3 + $0x134] sm:$0xf0] }
 0x2b4   : > { %v4625_v62 = vmax.f32 %v4513_v13, 0.0  ;;  %v3362_v1 = vadd.f32 %v3361_v61, %v3333_v20  ;;  %3715 = vmatpush.bf16.msrb.mxu1 %v5930_v29  ;;  %v3379_v20 = vadd.f32 %v3378_v7, %v7786_v28  ;;  %v4346_v28 = vld [vmem:[%s8946_s15 + $0xf0] sm:$0xff]  ;;  %v4319_v36 = vld [vmem:[%s8946_s15 + $0x18] sm:$0xff] }
 0x2b5   : > { %3662 = vmatmul.bf16.vlgmr.msra.gmra.mxu0 %v8501_v43  ;;  %4654 = vst [vmem:[%s9002_s17 + $0x10] sm:$0xff] %v4542_v50  ;;  %v4108_v52 = vadd.f32 %v9191_v35, %v3405_v31  ;;  %v5931_v50 = vld [vmem:[%s10166_s3 + $0x218] sm:$0xf0] }
 0x2b6   : > { %4737 = vst [vmem:[%s9002_s17 + $0x2a8] sm:$0xff] %v4625_v62  ;;  %v4191_v58 = vadd.f32 %v9026_v33, %v3362_v1  ;;  %3609 = vmatmul.bf16.gmra.mxu1 %v8565_v17  ;;  %v5990_v33 = vor.u32 %v6488_v5, %v5987_v15  ;;  %v5818_v62 = vor.u32 %v6453_v26, %v5817_v27  ;;  %v6211_v5 = vld [vmem:[%s10166_s3 + $0x448] sm:$0xf0]  ;;  %v6153_v27 = vld [vmem:[%s10166_s3 + $0x3a0] sm:$0xf] }
 0x2b7   : > { %v4220_v45 = vmul.f32 0.2, %v4108_v52  ;;  %6368 = vmatmul.msk.bf16.gmra.mxu3 %vm1535_vm0, %v8569_v25  ;;  %v5934_v7 = vor.u32 %v6474_v41, %v5931_v50  ;;  %v6537_v26 = vld [vmem:[%s10166_s3 + $0x3d4] sm:$0xf0] }
 0x2b8   : > { %v4303_v10 = vmul.f32 0.2, %v4191_v58  ;;  %6371 = vmatmul.msk.bf16.vlgmr.msra.gmra.mxu2 %vm1535_vm0, %v8505_v57  ;;  %3772 = vmatpush.bf16.msrb.mxu0 %v5990_v33  ;;  %v6209_v58 = vld [vmem:[%s10166_s3 + $0x410] sm:$0xf] }
 0x2b9   : > { %v4444_v13 = vadd.f32 %v4332_v21, %v4220_v45  ;;  %3716 = vmatpush.bf16.msrb.mxu1 %v5874_v60  ;;  %v6544_v21 = vld [vmem:[%s10166_s3 + $0x414] sm:$0xf]  ;;  %v6439_v60 = vld [vmem:[%s10166_s3 + $0xc4] sm:$0xf0] }
 0x2ba   : > { %v4527_v38 = vadd.f32 %v4415_v59, %v4303_v10  ;;  %v3433_v0 = vpop.f32.mrf.mxu0  ;;  %v3407_v14 = vpop.f32.mrf.mxu3  ;;  %v6551_v59 = vld [vmem:[%s10166_s3 + $0x444] sm:$0xf0]  ;;  %v6214_v33 = vor.u32 %v6544_v21, %v6211_v5  ;;  %v6446_v5 = vld [vmem:[%s10166_s3 + $0x104] sm:$0xf] }
 0x2bb   : > { %v3460_v22 = vpop.f32.mrf.mxu2  ;;  %v4556_v12 = vmax.f32 %v4444_v13, 0.0  ;;  %v3408_v34 = vadd.f32 %v3407_v14, %v3379_v20  ;;  %v3380_v56 = vpop.f32.mrf.mxu1  ;;  %v6210_v52 = vor.u32 %v6551_v59, %v6209_v58  ;;  %v3434_v10 = vadd.f32 %v3433_v0, %v7809_v54  ;;  %v5705_v54 = vld [vmem:[%s10166_s3 + $0x20] sm:$0xf]  ;;  %v6425_v13 = vld [vmem:[%s10166_s3 + $0x54] sm:$0xf0] }
 0x2bc   : > { %v4639_v55 = vmax.f32 %v4527_v38, 0.0  ;;  %v3461_v61 = vadd.f32 %v3460_v22, %v3432_v47  ;;  %3773 = vmatpush.bf16.msrb.mxu0 %v5934_v7  ;;  %v3381_v45 = vadd.f32 %v3380_v56, %v7814_v63  ;;  %3805 = vmatpush.bf16.msrb.mxu2 %v6214_v33  ;;  %v5762_v0 = vor.u32 %v6439_v60, %v5761_v40  ;;  %v4347_v60 = vld [vmem:[%s8946_s15 + $0xf8] sm:$0xff] }
 0x2bd   : > { %4668 = vst [vmem:[%s9002_s17 + $0x80] sm:$0xff] %v4556_v12  ;;  %v4122_v1 = vadd.f32 %v9191_v35, %v3408_v34  ;;  %3717 = vmatpush.bf16.msrb.mxu1 %v5818_v62  ;;  %3747 = vmatpush.bf16.msrb.mxu3 %v6210_v52  ;;  %v6154_v12 = vor.u32 %v6537_v26, %v6153_v27  ;;  %v6460_v62 = vld [vmem:[%s10166_s3 + $0x174] sm:$0xf]  ;;  %v5763_v26 = vld [vmem:[%s10166_s3 + $0xc8] sm:$0xf0] }
 0x2be   : > { %4751 = vst [vmem:[%s9002_s17 + $0x318] sm:$0xff] %v4639_v55  ;;  %v4095_v8 = vadd.f32 %v9263_v53, %v3461_v61  ;;  %v5706_v56 = vor.u32 %v6425_v13, %v5705_v54  ;;  %v6530_v54 = vld [vmem:[%s10166_s3 + $0x3a4] sm:$0xf]  ;;  %v6155_v13 = vld [vmem:[%s10166_s3 + $0x3d8] sm:$0xf0] }
 0x2bf   : > { %v4234_v29 = vmul.f32 0.2, %v4122_v1  ;;  %v5875_v1 = vld [vmem:[%s10166_s3 + $0x1a8] sm:$0xf0] }
 0x2c0   : > { %v4207_v31 = vmul.f32 0.2, %v4095_v8  ;;  %v4333_v8 = vld [vmem:[%s8946_s15 + $0x88] sm:$0xff]  ;;  %v5878_v50 = vor.u32 %v6460_v62, %v5875_v1  ;;  %v5707_v62 = vld [vmem:[%s10166_s3 + $0x58] sm:$0xf0] }
 0x2c1   : > { %v4458_v37 = vadd.f32 %v4346_v28, %v4234_v29  ;;  %3718 = vmatpush.bf16.msrb.mxu1 %v5762_v0  ;;  %3748 = vmatpush.bf16.msrb.mxu3 %v6154_v12  ;;  %v6432_v0 = vld [vmem:[%s10166_s3 + $0x94] sm:$0xf] }
 0x2c2   : > { %v4431_v15 = vadd.f32 %v4319_v36, %v4207_v31  ;;  %v3436_v47 = vpop.f32.mrf.mxu0  ;;  %v3409_v22 = vpop.f32.mrf.mxu3  ;;  %v4360_v36 = vld [vmem:[%s8946_s15 + $0x160] sm:$0xff]  ;;  %3774 = vmatpush.bf16.msrb.mxu0 %v5878_v50 }
 0x2c3   : > { %v3462_v38 = vpop.f32.mrf.mxu2  ;;  %v4570_v55 = vmax.f32 %v4458_v37, 0.0  ;;  %v3410_v14 = vadd.f32 %v3409_v22, %v3381_v45  ;;  %v3383_v61 = vpop.f32.mrf.mxu1  ;;  %v3437_v58 = vadd.f32 %v3436_v47, %v7834_v18 }
 0x2c4   : > { %v4543_v20 = vmax.f32 %v4431_v15, 0.0  ;;  %v3463_v63 = vadd.f32 %v3462_v38, %v3434_v10  ;;  %v3384_v29 = vadd.f32 %v3383_v61, %v7836_v19  ;;  %v5819_v15 = vld [vmem:[%s10166_s3 + $0x138] sm:$0xf0]  ;;  %v5766_v61 = vor.u32 %v6432_v0, %v5763_v26  ;;  %v6331_v26 = vld [vmem:[%s10166_s3 + $0x530] sm:$0xf0] }
 0x2c5   : > { %3667 = vmatmul.bf16.gmra.mxu0 %v8565_v17  ;;  %4682 = vst [vmem:[%s9002_s17 + $0xf0] sm:$0xff] %v4570_v55  ;;  %v4136_v28 = vadd.f32 %v9191_v35, %v3410_v14  ;;  %3719 = vmatpush.bf16.msrb.mxu1 %v5706_v56  ;;  %v5822_v40 = vor.u32 %v6446_v5, %v5819_v15 }
 0x2c6   : > { %4655 = vst [vmem:[%s9002_s17 + $0x18] sm:$0xff] %v4543_v20  ;;  %v4109_v34 = vadd.f32 %v9263_v53, %v3463_v63  ;;  %3614 = vmatmul.bf16.gmra.mxu1 %v8638_v16  ;;  %v4374_v20 = vld [vmem:[%s8946_s15 + $0x1d0] sm:$0xff]  ;;  %v6158_v63 = vor.u32 %v6530_v54, %v6155_v13 }
 0x2c7   : > { %v4248_v31 = vmul.f32 0.2, %v4136_v28  ;;  %6369 = vmatmul.msk.bf16.gmra.mxu3 %vm1535_vm0, %v8645_v51  ;;  %3775 = vmatpush.bf16.msrb.mxu0 %v5822_v40  ;;  %v4402_v54 = vld [vmem:[%s8946_s15 + $0x2b0] sm:$0xff] }
 0x2c8   : > { %v4221_v41 = vmul.f32 0.2, %v4109_v34  ;;  %6372 = vmatmul.msk.bf16.gmra.mxu2 %vm1535_vm0, %v8569_v25 }
 0x2c9   : > { %v4472_v59 = vadd.f32 %v4360_v36, %v4248_v31  ;;  %3806 = vmatpush.bf16.msrb.mxu2 %v6158_v63 }
 0x2ca   : > { %v4445_v7 = vadd.f32 %v4333_v8, %v4221_v41  ;;  %v3438_v21 = vpop.f32.mrf.mxu0  ;;  %v3412_v10 = vpop.f32.mrf.mxu3  ;;  %v6418_v8 = vld [vmem:[%s10166_s3 + $0x24] sm:$0xf] }
 0x2cb   : > { %v3465_v52 = vpop.f32.mrf.mxu2  ;;  %v4584_v37 = vmax.f32 %v4472_v59, 0.0  ;;  %v3413_v45 = vadd.f32 %v3412_v10, %v3384_v29  ;;  %v3385_v38 = vpop.f32.mrf.mxu1  ;;  %v3439_v14 = vadd.f32 %v3438_v21, %v7850_v39  ;;  %3776 = vmatpush.bf16.msrb.mxu0 %v5766_v61  ;;  %v5710_v31 = vor.u32 %v6418_v8, %v5707_v62  ;;  %v4361_v59 = vld [vmem:[%s8946_s15 + $0x168] sm:$0xff]  ;;  %v4388_v29 = vld [vmem:[%s8946_s15 + $0x240] sm:$0xff] }
 0x2cc   : > { %v4557_v18 = vmax.f32 %v4445_v7, 0.0  ;;  %v3466_v33 = vadd.f32 %v3465_v52, %v3437_v58  ;;  %v3386_v34 = vadd.f32 %v3385_v38, %v7852_v44 }
 0x2cd   : > { %4696 = vst [vmem:[%s9002_s17 + $0x160] sm:$0xff] %v4584_v37  ;;  %v4150_v47 = vadd.f32 %v9191_v35, %v3413_v45 }
 0x2ce   : > { %4669 = vst [vmem:[%s9002_s17 + $0x88] sm:$0xff] %v4557_v18  ;;  %v4123_v19 = vadd.f32 %v9263_v53, %v3466_v33 }
 0x2cf   : > { %v4262_v27 = vmul.f32 0.2, %v4150_v47  ;;  %3777 = vmatpush.bf16.msrb.mxu0 %v5710_v31 }
 0x2d0   : > { %v4235_v22 = vmul.f32 0.2, %v4123_v19 }
 0x2d1   : > { %v4486_v12 = vadd.f32 %v4374_v20, %v4262_v27  ;;  %v6573_v27 = vld [vmem:[%s10166_s3 + $0x4fc] sm:$0xf] }
 0x2d2   : > { %v4459_v55 = vadd.f32 %v4347_v60, %v4235_v22  ;;  %v3441_v28 = vpop.f32.mrf.mxu0  ;;  %v3414_v1 = vpop.f32.mrf.mxu3  ;;  %v6580_v22 = vld [vmem:[%s10166_s3 + $0x52c] sm:$0xf0] }
 0x2d3   : > { %v3467_v56 = vpop.f32.mrf.mxu2  ;;  %v4598_v41 = vmax.f32 %v4486_v12, 0.0  ;;  %v3415_v50 = vadd.f32 %v3414_v1, %v3386_v34  ;;  %v3388_v44 = vpop.f32.mrf.mxu1  ;;  %v3442_v15 = vadd.f32 %v3441_v28, %v7872_v3  ;;  %v4375_v3 = vld [vmem:[%s8946_s15 + $0x1d8] sm:$0xff] }
 0x2d4   : > { %v4571_v39 = vmax.f32 %v4459_v55, 0.0  ;;  %v3468_v36 = vadd.f32 %v3467_v56, %v3439_v14  ;;  %v3389_v10 = vadd.f32 %v3388_v44, %v7874_v4  ;;  %v6329_v4 = vld [vmem:[%s10166_s3 + $0x4f8] sm:$0xf]  ;;  %v6334_v14 = vor.u32 %v6573_v27, %v6331_v26  ;;  %v4416_v44 = vld [vmem:[%s8946_s15 + $0x320] sm:$0xff]  ;;  %v6503_v27 = vld [vmem:[%s10166_s3 + $0x2cc] sm:$0xf] }
 0x2d5   : > { %3672 = vmatmul.bf16.gmra.mxu0 %v8638_v16  ;;  %4710 = vst [vmem:[%s9002_s17 + $0x1d0] sm:$0xff] %v4598_v41  ;;  %v4164_v58 = vadd.f32 %v9191_v35, %v3415_v50  ;;  %v6330_v0 = vor.u32 %v6580_v22, %v6329_v4  ;;  %v4403_v22 = vld [vmem:[%s8946_s15 + $0x2b8] sm:$0xff]  ;;  %v6051_v26 = vld [vmem:[%s10166_s3 + $0x300] sm:$0xf0] }
 0x2d6   : > { %4683 = vst [vmem:[%s9002_s17 + $0xf8] sm:$0xff] %v4571_v39  ;;  %v4137_v7 = vadd.f32 %v9263_v53, %v3468_v36  ;;  %3619 = vmatmul.bf16.gmra.mxu1 %v8687_v9  ;;  %3919 = vmatpush.bf16.msra.mxu2 %v6334_v14  ;;  %v6054_v14 = vor.u32 %v6503_v27, %v6051_v26 }
 0x2d7   : > { %v4276_v21 = vmul.f32 0.2, %v4164_v58  ;;  %6370 = vmatmul.msk.bf16.gmra.mxu3 %vm1535_vm0, %v8691_v49  ;;  %v6524_v58 = vld [vmem:[%s10166_s3 + $0x36c] sm:$0xf0] }
 0x2d8   : > { %v4249_v52 = vmul.f32 0.2, %v4137_v7  ;;  %6373 = vmatmul.msk.bf16.gmra.mxu2 %vm1535_vm0, %v8645_v51  ;;  %3861 = vmatpush.bf16.msra.mxu3 %v6330_v0  ;;  %v6105_v7 = vld [vmem:[%s10166_s3 + $0x338] sm:$0xf]  ;;  %v4320_v0 = vld [vmem:[%s8946_s15 + $0x20] sm:$0xff] }
 0x2d9   : > { %v4500_v18 = vadd.f32 %v4388_v29, %v4276_v21  ;;  %v6106_v29 = vor.u32 %v6524_v58, %v6105_v7 }
 0x2da   : > { %v4473_v5 = vadd.f32 %v4361_v59, %v4249_v52  ;;  %v3443_v40 = vpop.f32.mrf.mxu0  ;;  %v3417_v45 = vpop.f32.mrf.mxu3  ;;  %v6107_v52 = vld [vmem:[%s10166_s3 + $0x370] sm:$0xf0] }
 0x2db   : > { %v3470_v33 = vpop.f32.mrf.mxu2  ;;  %v4612_v19 = vmax.f32 %v4500_v18, 0.0  ;;  %v3418_v47 = vadd.f32 %v3417_v45, %v3389_v10  ;;  %v3390_v60 = vpop.f32.mrf.mxu1  ;;  %v3444_v12 = vadd.f32 %v3443_v40, %v7888_v23  ;;  %3828 = vmatpush.bf16.msra.mxu1 %v6106_v29 }
 0x2dc   : > { %v4585_v37 = vmax.f32 %v4473_v5, 0.0  ;;  %v3471_v38 = vadd.f32 %v3470_v33, %v3442_v15  ;;  %v3391_v56 = vadd.f32 %v3390_v60, %v7890_v24  ;;  %v4389_v24 = vld [vmem:[%s8946_s15 + $0x248] sm:$0xff] }
 0x2dd   : > { %4724 = vst [vmem:[%s9002_s17 + $0x240] sm:$0xff] %v4612_v19  ;;  %v4178_v20 = vadd.f32 %v9191_v35, %v3418_v47 }
 0x2de   : > { %4697 = vst [vmem:[%s9002_s17 + $0x168] sm:$0xff] %v4585_v37  ;;  %v4151_v13 = vadd.f32 %v9263_v53, %v3471_v38  ;;  %v9431_v37 = vld [vmem:[%s10168_s5] sm:$0xff] }
 0x2df   : > { %v4290_v55 = vmul.f32 0.2, %v4178_v20  ;;  %v9434_v45 = vperm.slane %v9431_v37, 4 }
 0x2e0   : > { %v4263_v63 = vmul.f32 0.2, %v4151_v13 }
 0x2e1   : > { %v4514_v34 = vadd.f32 %v4402_v54, %v4290_v55 }
 0x2e2   : > { %v4487_v61 = vadd.f32 %v4375_v3, %v4263_v63  ;;  %v3446_v8 = vpop.f32.mrf.mxu0  ;;  %v3419_v39 = vpop.f32.mrf.mxu3 }
 0x2e3   : > { %v3472_v28 = vpop.f32.mrf.mxu2  ;;  %v4626_v36 = vmax.f32 %v4514_v34, 0.0  ;;  %v3420_v41 = vadd.f32 %v3419_v39, %v3391_v56  ;;  %v3489_v50 = vpop.f32.mrf.mxu1  ;;  %v3447_v18 = vadd.f32 %v3446_v8, %v7922_v2  ;;  %v6049_v2 = vld [vmem:[%s10166_s3 + $0x2c8] sm:$0xf]  ;;  %v6275_v8 = vld [vmem:[%s10166_s3 + $0x4c0] sm:$0xf0] }
 0x2e4   : > { %v4599_v62 = vmax.f32 %v4487_v61, 0.0  ;;  %v3473_v1 = vadd.f32 %v3472_v28, %v3444_v12  ;;  %v3490_v33 = vadd.f32 %v3489_v50, %v7924_v6  ;;  %v6510_v6 = vld [vmem:[%s10166_s3 + $0x2fc] sm:$0xf0]  ;;  %v6273_v61 = vld [vmem:[%s10166_s3 + $0x488] sm:$0xf] }
 0x2e5   : > { %3677 = vmatmul.bf16.gmra.mxu0 %v8687_v9  ;;  %4738 = vst [vmem:[%s9002_s17 + $0x2b0] sm:$0xff] %v4626_v36  ;;  %v4192_v23 = vadd.f32 %v9191_v35, %v3420_v41  ;;  %v6517_v35 = vld [vmem:[%s10166_s3 + $0x33c] sm:$0xf]  ;;  %v6050_v54 = vor.u32 %v6510_v6, %v6049_v2  ;;  %v6566_v12 = vld [vmem:[%s10166_s3 + $0x4bc] sm:$0xf0] }
 0x2e6   : > { %4711 = vst [vmem:[%s9002_s17 + $0x1d8] sm:$0xff] %v4599_v62  ;;  %v4165_v31 = vadd.f32 %v9263_v53, %v3473_v1  ;;  %3720 = vmatmul.bf16.vlgmr.msrb.gmra.mxu1 %v8501_v43  ;;  %v6110_v5 = vor.u32 %v6517_v35, %v6107_v52  ;;  %v6274_v56 = vor.u32 %v6566_v12, %v6273_v61  ;;  %v6559_v28 = vld [vmem:[%s10166_s3 + $0x48c] sm:$0xf]  ;;  %v5993_v36 = vld [vmem:[%s10166_s3 + $0x258] sm:$0xf] }
 0x2e7   : > { %v4304_v21 = vmul.f32 0.2, %v4192_v23  ;;  %6375 = vmatmul.msk.bf16.vlgmr.msrb.gmra.mxu3 %vm1535_vm0, %v8505_v57  ;;  %3829 = vmatpush.bf16.msra.mxu1 %v6050_v54  ;;  %v6278_v1 = vor.u32 %v6559_v28, %v6275_v8  ;;  %v6496_v23 = vld [vmem:[%s10166_s3 + $0x28c] sm:$0xf0]  ;;  %v5881_v2 = vld [vmem:[%s10166_s3 + $0x178] sm:$0xf] }
 0x2e8   : > { %v4277_v59 = vmul.f32 0.2, %v4165_v31  ;;  %6374 = vmatmul.msk.bf16.gmra.mxu2 %vm1535_vm0, %v8691_v49  ;;  %3886 = vmatpush.bf16.msra.mxu0 %v6110_v5  ;;  %v4417_v5 = vld [vmem:[%s8946_s15 + $0x328] sm:$0xff]  ;;  %v6468_v6 = vld [vmem:[%s10166_s3 + $0x1ac] sm:$0xf0]  ;;  %v9506_v54 = vperm.slane %v9431_v37, 5 }
 0x2e9   : > { %v4528_v10 = vadd.f32 %v4416_v44, %v4304_v21  ;;  %3862 = vmatpush.bf16.msra.mxu3 %v6274_v56  ;;  %3920 = vmatpush.bf16.msra.mxu2 %v6278_v1  ;;  %v4321_v28 = vld [vmem:[%s8946_s15 + $0x28] sm:$0xff] }
 0x2ea   : > { %v4501_v15 = vadd.f32 %v4389_v24, %v4277_v59  ;;  %v3448_v38 = vpop.f32.mrf.mxu0  ;;  %v3518_v60 = vpop.f32.mrf.mxu3  ;;  %v6482_v24 = vld [vmem:[%s10166_s3 + $0x21c] sm:$0xf0]  ;;  %v5994_v59 = vor.u32 %v6496_v23, %v5993_v36  ;;  %v6475_v8 = vld [vmem:[%s10166_s3 + $0x1ec] sm:$0xf]  ;;  %v6217_v36 = vld [vmem:[%s10166_s3 + $0x418] sm:$0xf] }
 0x2eb   : > { %v3475_v40 = vpop.f32.mrf.mxu2  ;;  %v4640_v13 = vmax.f32 %v4528_v10, 0.0  ;;  %v3519_v20 = vadd.f32 %v3518_v60, %v3490_v33  ;;  %v3491_v3 = vpop.f32.mrf.mxu1  ;;  %v3449_v39 = vadd.f32 %v3448_v38, %v7944_v32  ;;  %v5937_v32 = vld [vmem:[%s10166_s3 + $0x1e8] sm:$0xf]  ;;  %v4334_v10 = vld [vmem:[%s8946_s15 + $0x90] sm:$0xff]  ;;  %v6489_v33 = vld [vmem:[%s10166_s3 + $0x25c] sm:$0xf] }
 0x2ec   : > { %v4613_v19 = vmax.f32 %v4501_v15, 0.0  ;;  %v3476_v47 = vadd.f32 %v3475_v40, %v3447_v18  ;;  %3887 = vmatpush.bf16.msra.mxu0 %v6054_v14  ;;  %v3492_v50 = vadd.f32 %v3491_v3, %v7946_v46  ;;  %3830 = vmatpush.bf16.msra.mxu1 %v5994_v59  ;;  %v5938_v15 = vor.u32 %v6482_v24, %v5937_v32  ;;  %v5995_v40 = vld [vmem:[%s10166_s3 + $0x290] sm:$0xf0]  ;;  %v10246_v59 = vld [vmem:[#allocation5_spill] sm:$0xff] }
 0x2ed   : > { %4752 = vst [vmem:[%s9002_s17 + $0x320] sm:$0xff] %v4640_v13  ;;  %v4096_v63 = vadd.f32 %v9434_v45, %v3519_v20  ;;  %v5882_v13 = vor.u32 %v6468_v6, %v5881_v2  ;;  %v6219_v23 = vld [vmem:[%s10166_s3 + $0x450] sm:$0xf0] }
 0x2ee   : > { %4725 = vst [vmem:[%s9002_s17 + $0x248] sm:$0xff] %v4613_v19  ;;  %v4179_v4 = vadd.f32 %v9263_v53, %v3476_v47 }
 0x2ef   : > { %v4208_v34 = vmul.f32 0.2, %v4096_v63  ;;  %v5825_v63 = vld [vmem:[%s10166_s3 + $0x108] sm:$0xf] }
 0x2f0   : > { %v4291_v55 = vmul.f32 0.2, %v4179_v4  ;;  %3831 = vmatpush.bf16.msra.mxu1 %v5938_v15 }
 0x2f1   : > { %v4432_v41 = vadd.f32 %v4320_v0, %v4208_v34 }
 0x2f2   : > { %v4515_v62 = vadd.f32 %v4403_v22, %v4291_v55  ;;  %v3547_v31 = vpop.f32.mrf.mxu0  ;;  %v3520_v58 = vpop.f32.mrf.mxu3 }
 0x2f3   : > { %v3477_v44 = vpop.f32.mrf.mxu2  ;;  %v4544_v29 = vmax.f32 %v4432_v41, 0.0  ;;  %v3521_v35 = vadd.f32 %v3520_v58, %v3492_v50  ;;  %v3494_v52 = vpop.f32.mrf.mxu1  ;;  %v3548_v60 = vadd.f32 %v3547_v31, %v7984_v30  ;;  %v6454_v30 = vld [vmem:[%s10166_s3 + $0x13c] sm:$0xf0]  ;;  %v6552_v41 = vld [vmem:[%s10166_s3 + $0x44c] sm:$0xf0] }
 0x2f4   : > { %v4627_v7 = vmax.f32 %v4515_v62, 0.0  ;;  %v3478_v46 = vadd.f32 %v3477_v44, %v3449_v39  ;;  %v3495_v3 = vadd.f32 %v3494_v52, %v7986_v42  ;;  %v4348_v42 = vld [vmem:[%s8946_s15 + $0x100] sm:$0xff]  ;;  %3832 = vmatpush.bf16.msra.mxu1 %v5882_v13  ;;  %v5826_v34 = vor.u32 %v6454_v30, %v5825_v63  ;;  %v6545_v31 = vld [vmem:[%s10166_s3 + $0x41c] sm:$0xf] }
 0x2f5   : > { %3778 = vmatmul.bf16.vlgmr.msrb.gmra.mxu0 %v8501_v43  ;;  %4656 = vst [vmem:[%s9002_s17 + $0x20] sm:$0xff] %v4544_v29  ;;  %v4110_v18 = vadd.f32 %v9434_v45, %v3521_v35  ;;  %v5939_v62 = vld [vmem:[%s10166_s3 + $0x220] sm:$0xf0]  ;;  %v6218_v44 = vor.u32 %v6552_v41, %v6217_v36 }
 0x2f6   : > { %4739 = vst [vmem:[%s9002_s17 + $0x2b8] sm:$0xff] %v4627_v7  ;;  %v4193_v21 = vadd.f32 %v9263_v53, %v3478_v46  ;;  %3725 = vmatmul.bf16.gmra.mxu1 %v8565_v17  ;;  %v5998_v53 = vor.u32 %v6489_v33, %v5995_v40  ;;  %v5942_v1 = vor.u32 %v6475_v8, %v5939_v62  ;;  %v5769_v46 = vld [vmem:[%s10166_s3 + $0x98] sm:$0xf]  ;;  %v6161_v40 = vld [vmem:[%s10166_s3 + $0x3a8] sm:$0xf] }
 0x2f7   : > { %v4222_v19 = vmul.f32 0.2, %v4110_v18  ;;  %6376 = vmatmul.msk.bf16.gmra.mxu3 %vm1535_vm0, %v8569_v25  ;;  %v6222_v7 = vor.u32 %v6545_v31, %v6219_v23  ;;  %v4349_v23 = vld [vmem:[%s8946_s15 + $0x108] sm:$0xff] }
 0x2f8   : > { %v4305_v38 = vmul.f32 0.2, %v4193_v21  ;;  %6379 = vmatmul.msk.bf16.vlgmr.msrb.gmra.mxu2 %vm1535_vm0, %v8505_v57  ;;  %3888 = vmatpush.bf16.msra.mxu0 %v5998_v53  ;;  %v6440_v21 = vld [vmem:[%s10166_s3 + $0xcc] sm:$0xf0] }
 0x2f9   : > { %v4446_v20 = vadd.f32 %v4334_v10, %v4222_v19  ;;  %3833 = vmatpush.bf16.msra.mxu1 %v5826_v34  ;;  %3863 = vmatpush.bf16.msra.mxu3 %v6218_v44  ;;  %v5770_v33 = vor.u32 %v6440_v21, %v5769_v46  ;;  %v10249_v21 = vld [vmem:[#allocation8_spill] sm:$0xff] }
 0x2fa   : > { %v4529_v47 = vadd.f32 %v4417_v5, %v4305_v38  ;;  %v3549_v22 = vpop.f32.mrf.mxu0  ;;  %v3523_v27 = vpop.f32.mrf.mxu3  ;;  %v6426_v5 = vld [vmem:[%s10166_s3 + $0x5c] sm:$0xf0]  ;;  %3921 = vmatpush.bf16.msra.mxu2 %v6222_v7 }
 0x2fb   : > { %v3576_v4 = vpop.f32.mrf.mxu2  ;;  %v4558_v55 = vmax.f32 %v4446_v20, 0.0  ;;  %v3524_v14 = vadd.f32 %v3523_v27, %v3495_v3  ;;  %v3496_v61 = vpop.f32.mrf.mxu1  ;;  %v3550_v24 = vadd.f32 %v3549_v22, %v8009_v11  ;;  %v5713_v11 = vld [vmem:[%s10166_s3 + $0x28] sm:$0xf]  ;;  %v6538_v38 = vld [vmem:[%s10166_s3 + $0x3dc] sm:$0xf0]  ;;  %v4335_v20 = vld [vmem:[%s8946_s15 + $0x98] sm:$0xff] }
 0x2fc   : > { %v4641_v0 = vmax.f32 %v4529_v47, 0.0  ;;  %v3577_v26 = vadd.f32 %v3576_v4, %v3548_v60  ;;  %3889 = vmatpush.bf16.msra.mxu0 %v5942_v1  ;;  %v3497_v29 = vadd.f32 %v3496_v61, %v10246_v59  ;;  %v6162_v19 = vor.u32 %v6538_v38, %v6161_v40  ;;  %v6461_v3 = vld [vmem:[%s10166_s3 + $0x17c] sm:$0xf]  ;;  %v5883_v4 = vld [vmem:[%s10166_s3 + $0x1b0] sm:$0xf0]  ;;  %v4376_v7 = vld [vmem:[%s8946_s15 + $0x1e0] sm:$0xff] }
 0x2fd   : > { %4670 = vst [vmem:[%s9002_s17 + $0x90] sm:$0xff] %v4558_v55  ;;  %v4124_v56 = vadd.f32 %v9434_v45, %v3524_v14  ;;  %3834 = vmatpush.bf16.msra.mxu1 %v5770_v33  ;;  %v5714_v60 = vor.u32 %v6426_v5, %v5713_v11  ;;  %v4362_v22 = vld [vmem:[%s8946_s15 + $0x170] sm:$0xff]  ;;  %v5886_v30 = vor.u32 %v6461_v3, %v5883_v4  ;;  %v6433_v59 = vld [vmem:[%s10166_s3 + $0x9c] sm:$0xf]  ;;  %v6419_v38 = vld [vmem:[%s10166_s3 + $0x2c] sm:$0xf] }
 0x2fe   : > { %4753 = vst [vmem:[%s9002_s17 + $0x328] sm:$0xff] %v4641_v0  ;;  %v4097_v12 = vadd.f32 %v9506_v54, %v3577_v26  ;;  %3864 = vmatpush.bf16.msra.mxu3 %v6162_v19  ;;  %v10247_v26 = vld [vmem:[#allocation6_spill] sm:$0xff]  ;;  %v10248_v61 = vld [vmem:[#allocation7_spill] sm:$0xff] }
 0x2ff   : > { %v4236_v50 = vmul.f32 0.2, %v4124_v56  ;;  %v6447_v56 = vld [vmem:[%s10166_s3 + $0x10c] sm:$0xf] }
 0x300   : > { %v4209_v39 = vmul.f32 0.2, %v4097_v12  ;;  %3890 = vmatpush.bf16.msra.mxu0 %v5886_v30 }
 0x301   : > { %v4460_v58 = vadd.f32 %v4348_v42, %v4236_v50  ;;  %3835 = vmatpush.bf16.msra.mxu1 %v5714_v60 }
 0x302   : > { %v4433_v32 = vadd.f32 %v4321_v28, %v4209_v39  ;;  %v3552_v52 = vpop.f32.mrf.mxu0  ;;  %v3525_v18 = vpop.f32.mrf.mxu3  ;;  %v5827_v28 = vld [vmem:[%s10166_s3 + $0x140] sm:$0xf0] }
 0x303   : > { %v3578_v35 = vpop.f32.mrf.mxu2  ;;  %v4572_v53 = vmax.f32 %v4460_v58, 0.0  ;;  %v3526_v2 = vadd.f32 %v3525_v18, %v3497_v29  ;;  %v3499_v6 = vpop.f32.mrf.mxu1  ;;  %v3553_v55 = vadd.f32 %v3552_v52, %v10247_v26  ;;  %v5830_v1 = vor.u32 %v6447_v56, %v5827_v28  ;;  %v10250_v18 = vld [vmem:[#allocation9_spill] sm:$0xff]  ;;  %v10251_v26 = vld [vmem:[#allocation10_spill] sm:$0xff] }
 0x304   : > { %v4545_v15 = vmax.f32 %v4433_v32, 0.0  ;;  %v3579_v10 = vadd.f32 %v3578_v35, %v3550_v24  ;;  %v3500_v42 = vadd.f32 %v3499_v6, %v10248_v61  ;;  %v6531_v32 = vld [vmem:[%s10166_s3 + $0x3ac] sm:$0xf]  ;;  %v6163_v24 = vld [vmem:[%s10166_s3 + $0x3e0] sm:$0xf0]  ;;  %v10252_v61 = vld [vmem:[#allocation11_spill] sm:$0xff] }
 0x305   : > { %3783 = vmatmul.bf16.gmra.mxu0 %v8565_v17  ;;  %4684 = vst [vmem:[%s9002_s17 + $0x100] sm:$0xff] %v4572_v53  ;;  %v4138_v13 = vadd.f32 %v9434_v45, %v3526_v2  ;;  %v6166_v58 = vor.u32 %v6531_v32, %v6163_v24  ;;  %v5771_v35 = vld [vmem:[%s10166_s3 + $0xd0] sm:$0xf0]  ;;  %v5715_v53 = vld [vmem:[%s10166_s3 + $0x60] sm:$0xf0] }
 0x306   : > { %4657 = vst [vmem:[%s9002_s17 + $0x28] sm:$0xff] %v4545_v15  ;;  %v4111_v47 = vadd.f32 %v9506_v54, %v3579_v10  ;;  %3730 = vmatmul.bf16.gmra.mxu1 %v8638_v16  ;;  %3891 = vmatpush.bf16.msra.mxu0 %v5830_v1  ;;  %v5774_v5 = vor.u32 %v6433_v59, %v5771_v35  ;;  %v10253_v35 = vld [vmem:[#allocation12_spill] sm:$0xff] }
 0x307   : > { %v4250_v0 = vmul.f32 0.2, %v4138_v13  ;;  %6377 = vmatmul.msk.bf16.gmra.mxu3 %vm1535_vm0, %v8645_v51  ;;  %3922 = vmatpush.bf16.msra.mxu2 %v6166_v58 }
 0x308   : > { %v4223_v63 = vmul.f32 0.2, %v4111_v47  ;;  %6380 = vmatmul.msk.bf16.gmra.mxu2 %vm1535_vm0, %v8569_v25 }
 0x309   : > { %v4474_v14 = vadd.f32 %v4362_v22, %v4250_v0  ;;  %v4363_v22 = vld [vmem:[%s8946_s15 + $0x178] sm:$0xff] }
 0x30a   : > { %v4447_v27 = vadd.f32 %v4335_v20, %v4223_v63  ;;  %v3554_v34 = vpop.f32.mrf.mxu0  ;;  %v3528_v62 = vpop.f32.mrf.mxu3  ;;  %3892 = vmatpush.bf16.msra.mxu0 %v5774_v5  ;;  %v5718_v20 = vor.u32 %v6419_v38, %v5715_v53  ;;  %v4390_v63 = vld [vmem:[%s8946_s15 + $0x250] sm:$0xff] }
 0x30b   : > { %v3581_v12 = vpop.f32.mrf.mxu2  ;;  %v4586_v36 = vmax.f32 %v4474_v14, 0.0  ;;  %v3529_v41 = vadd.f32 %v3528_v62, %v3500_v42  ;;  %v3501_v50 = vpop.f32.mrf.mxu1  ;;  %v3555_v11 = vadd.f32 %v3554_v34, %v10249_v21 }
 0x30c   : > { %v4559_v8 = vmax.f32 %v4447_v27, 0.0  ;;  %v3582_v39 = vadd.f32 %v3581_v12, %v3553_v55  ;;  %v3502_v10 = vadd.f32 %v3501_v50, %v10250_v18 }
 0x30d   : > { %4698 = vst [vmem:[%s9002_s17 + $0x170] sm:$0xff] %v4586_v36  ;;  %v4152_v31 = vadd.f32 %v9434_v45, %v3529_v41  ;;  %v4404_v36 = vld [vmem:[%s8946_s15 + $0x2c0] sm:$0xff] }
 0x30e   : > { %4671 = vst [vmem:[%s9002_s17 + $0x98] sm:$0xff] %v4559_v8  ;;  %v4125_v44 = vadd.f32 %v9506_v54, %v3582_v39  ;;  %3893 = vmatpush.bf16.msra.mxu0 %v5718_v20  ;;  %v6525_v20 = vld [vmem:[%s10166_s3 + $0x374] sm:$0xf0] }
 0x30f   : > { %v4264_v29 = vmul.f32 0.2, %v4152_v31  ;;  %v6337_v31 = vld [vmem:[%s10166_s3 + $0x500] sm:$0xf] }
 0x310   : > { %v4237_v46 = vmul.f32 0.2, %v4125_v44  ;;  %v4377_v44 = vld [vmem:[%s8946_s15 + $0x1e8] sm:$0xff] }
 0x311   : > { %v4488_v15 = vadd.f32 %v4376_v7, %v4264_v29  ;;  %v6574_v7 = vld [vmem:[%s10166_s3 + $0x504] sm:$0xf] }
 0x312   : > { %v4461_v52 = vadd.f32 %v4349_v23, %v4237_v46  ;;  %v3557_v40 = vpop.f32.mrf.mxu0  ;;  %v3530_v6 = vpop.f32.mrf.mxu3  ;;  %v6581_v23 = vld [vmem:[%s10166_s3 + $0x534] sm:$0xf0]  ;;  %v6339_v46 = vld [vmem:[%s10166_s3 + $0x538] sm:$0xf0] }
 0x313   : > { %v3583_v33 = vpop.f32.mrf.mxu2  ;;  %v4600_v47 = vmax.f32 %v4488_v15, 0.0  ;;  %v3531_v60 = vadd.f32 %v3530_v6, %v3502_v10  ;;  %v3504_v13 = vpop.f32.mrf.mxu1  ;;  %v3558_v55 = vadd.f32 %v3557_v40, %v10251_v26  ;;  %v6338_v24 = vor.u32 %v6581_v23, %v6337_v31  ;;  %v4418_v6 = vld [vmem:[%s8946_s15 + $0x330] sm:$0xff]  ;;  %v4405_v31 = vld [vmem:[%s8946_s15 + $0x2c8] sm:$0xff] }
 0x314   : > { %v4573_v2 = vmax.f32 %v4461_v52, 0.0  ;;  %v3584_v19 = vadd.f32 %v3583_v33, %v3555_v11  ;;  %v3505_v42 = vadd.f32 %v3504_v13, %v10252_v61  ;;  %v6342_v59 = vor.u32 %v6574_v7, %v6339_v46  ;;  %v10254_v11 = vld [vmem:[#allocation13_spill] sm:$0xff]  ;;  %v6059_v7 = vld [vmem:[%s10166_s3 + $0x308] sm:$0xf0] }
 0x315   : > { %3788 = vmatmul.bf16.gmra.mxu0 %v8638_v16  ;;  %4712 = vst [vmem:[%s9002_s17 + $0x1e0] sm:$0xff] %v4600_v47  ;;  %v4166_v4 = vadd.f32 %v9434_v45, %v3531_v60  ;;  %3977 = vmatpush.bf16.msrb.mxu3 %v6338_v24  ;;  %v4391_v60 = vld [vmem:[%s8946_s15 + $0x258] sm:$0xff]  ;;  %v6113_v13 = vld [vmem:[%s10166_s3 + $0x340] sm:$0xf]  ;;  %v6504_v24 = vld [vmem:[%s10166_s3 + $0x2d4] sm:$0xf] }
 0x316   : > { %4685 = vst [vmem:[%s9002_s17 + $0x108] sm:$0xff] %v4573_v2  ;;  %v4139_v3 = vadd.f32 %v9506_v54, %v3584_v19  ;;  %3735 = vmatmul.bf16.gmra.mxu1 %v8687_v9  ;;  %4035 = vmatpush.bf16.msrb.mxu2 %v6342_v59  ;;  %v6281_v59 = vld [vmem:[%s10166_s3 + $0x490] sm:$0xf] }
 0x317   : > { %v4278_v0 = vmul.f32 0.2, %v4166_v4  ;;  %6378 = vmatmul.msk.bf16.gmra.mxu3 %vm1535_vm0, %v8691_v49  ;;  %v6114_v4 = vor.u32 %v6525_v20, %v6113_v13 }
 0x318   : > { %v4251_v30 = vmul.f32 0.2, %v4139_v3  ;;  %6381 = vmatmul.msk.bf16.gmra.mxu2 %vm1535_vm0, %v8645_v51 }
 0x319   : > { %v4502_v14 = vadd.f32 %v4390_v63, %v4278_v0  ;;  %3944 = vmatpush.bf16.msrb.mxu1 %v6114_v4 }
 0x31a   : > { %v4475_v27 = vadd.f32 %v4363_v22, %v4251_v30  ;;  %v3559_v34 = vpop.f32.mrf.mxu0  ;;  %v3533_v28 = vpop.f32.mrf.mxu3  ;;  %v6115_v22 = vld [vmem:[%s10166_s3 + $0x378] sm:$0xf0] }
 0x31b   : > { %v3586_v12 = vpop.f32.mrf.mxu2  ;;  %v4614_v62 = vmax.f32 %v4502_v14, 0.0  ;;  %v3534_v39 = vadd.f32 %v3533_v28, %v3505_v42  ;;  %v3506_v1 = vpop.f32.mrf.mxu1  ;;  %v3560_v52 = vadd.f32 %v3559_v34, %v10253_v35  ;;  %v10256_v14 = vld [vmem:[#allocation15_spill] sm:$0xff]  ;;  %v6511_v28 = vld [vmem:[%s10166_s3 + $0x304] sm:$0xf0] }
 0x31c   : > { %v4587_v56 = vmax.f32 %v4475_v27, 0.0  ;;  %v3587_v8 = vadd.f32 %v3586_v12, %v3558_v55  ;;  %v3507_v5 = vadd.f32 %v3506_v1, %v10254_v11  ;;  %v10255_v27 = vld [vmem:[#allocation14_spill] sm:$0xff]  ;;  %v9672_v12 = vperm.slane %v9431_v37, 6 }
 0x31d   : > { %4726 = vst [vmem:[%s9002_s17 + $0x250] sm:$0xff] %v4614_v62  ;;  %v4180_v50 = vadd.f32 %v9434_v45, %v3534_v39  ;;  %v6283_v11 = vld [vmem:[%s10166_s3 + $0x4c8] sm:$0xf0] }
 0x31e   : > { %4699 = vst [vmem:[%s9002_s17 + $0x178] sm:$0xff] %v4587_v56  ;;  %v4153_v41 = vadd.f32 %v9506_v54, %v3587_v8  ;;  %v6057_v56 = vld [vmem:[%s10166_s3 + $0x2d0] sm:$0xf] }
 0x31f   : > { %v4292_v58 = vmul.f32 0.2, %v4180_v50  ;;  %v6058_v1 = vor.u32 %v6511_v28, %v6057_v56  ;;  %v6469_v56 = vld [vmem:[%s10166_s3 + $0x1b4] sm:$0xf0] }
 0x320   : > { %v4265_v32 = vmul.f32 0.2, %v4153_v41 }
 0x321   : > { %v4516_v21 = vadd.f32 %v4404_v36, %v4292_v58  ;;  %3945 = vmatpush.bf16.msrb.mxu1 %v6058_v1  ;;  %v6062_v58 = vor.u32 %v6504_v24, %v6059_v7  ;;  %v9744_v1 = vperm.slane %v9431_v37, 7  ;;  %v6455_v37 = vld [vmem:[%s10166_s3 + $0x144] sm:$0xf0] }
 0x322   : > { %v4489_v29 = vadd.f32 %v4377_v44, %v4265_v32  ;;  %v3562_v18 = vpop.f32.mrf.mxu0  ;;  %v3535_v33 = vpop.f32.mrf.mxu3  ;;  %v4322_v32 = vld [vmem:[%s8946_s15 + $0x30] sm:$0xff] }
 0x323   : > { %v3588_v15 = vpop.f32.mrf.mxu2  ;;  %v4628_v38 = vmax.f32 %v4516_v21, 0.0  ;;  %v3536_v53 = vadd.f32 %v3535_v33, %v3507_v5  ;;  %v3605_v2 = vpop.f32.mrf.mxu1  ;;  %v3563_v26 = vadd.f32 %v3562_v18, %v10255_v27  ;;  %v6560_v21 = vld [vmem:[%s10166_s3 + $0x494] sm:$0xf]  ;;  %v6001_v33 = vld [vmem:[%s10166_s3 + $0x260] sm:$0xf] }
 0x324   : > { %v4601_v10 = vmax.f32 %v4489_v29, 0.0  ;;  %v3589_v40 = vadd.f32 %v3588_v15, %v3560_v52  ;;  %v3606_v61 = vadd.f32 %v3605_v2, %v10256_v14  ;;  %v6567_v29 = vld [vmem:[%s10166_s3 + $0x4c4] sm:$0xf0]  ;;  %v10257_v15 = vld [vmem:[#allocation16_spill] sm:$0xff]  ;;  %v6490_v14 = vld [vmem:[%s10166_s3 + $0x264] sm:$0xf] }
 0x325   : > { %3793 = vmatmul.bf16.gmra.mxu0 %v8687_v9  ;;  %4740 = vst [vmem:[%s9002_s17 + $0x2c0] sm:$0xff] %v4628_v38  ;;  %v4194_v47 = vadd.f32 %v9434_v45, %v3536_v53  ;;  %v6518_v45 = vld [vmem:[%s10166_s3 + $0x344] sm:$0xf]  ;;  %v6282_v52 = vor.u32 %v6567_v29, %v6281_v59 }
 0x326   : > { %4713 = vst [vmem:[%s9002_s17 + $0x1e8] sm:$0xff] %v4601_v10  ;;  %v4167_v19 = vadd.f32 %v9506_v54, %v3589_v40  ;;  %3836 = vmatmul.bf16.vlgmr.msra.gmra.mxu1 %v8501_v43  ;;  %v6118_v30 = vor.u32 %v6518_v45, %v6115_v22  ;;  %v6286_v10 = vor.u32 %v6560_v21, %v6283_v11  ;;  %v10258_v38 = vld [vmem:[#allocation17_spill] sm:$0xff] }
 0x327   : > { %v4306_v63 = vmul.f32 0.2, %v4194_v47  ;;  %6383 = vmatmul.msk.bf16.vlgmr.msra.gmra.mxu3 %vm1535_vm0, %v8505_v57  ;;  %v5945_v47 = vld [vmem:[%s10166_s3 + $0x1f0] sm:$0xf] }
 0x328   : > { %v4279_v3 = vmul.f32 0.2, %v4167_v19  ;;  %6382 = vmatmul.msk.bf16.gmra.mxu2 %vm1535_vm0, %v8691_v49  ;;  %4002 = vmatpush.bf16.msrb.mxu0 %v6118_v30  ;;  %v6497_v19 = vld [vmem:[%s10166_s3 + $0x294] sm:$0xf0] }
 0x329   : > { %v4530_v55 = vadd.f32 %v4418_v6, %v4306_v63  ;;  %3978 = vmatpush.bf16.msrb.mxu3 %v6282_v52  ;;  %4036 = vmatpush.bf16.msrb.mxu2 %v6286_v10  ;;  %v6002_v4 = vor.u32 %v6497_v19, %v6001_v33  ;;  %v6227_v19 = vld [vmem:[%s10166_s3 + $0x458] sm:$0xf0] }
 0x32a   : > { %v4503_v0 = vadd.f32 %v4391_v60, %v4279_v3  ;;  %v3564_v34 = vpop.f32.mrf.mxu0  ;;  %v3634_v39 = vpop.f32.mrf.mxu3  ;;  %v6483_v60 = vld [vmem:[%s10166_s3 + $0x224] sm:$0xf0] }
 0x32b   : > { %v3591_v42 = vpop.f32.mrf.mxu2  ;;  %v4642_v36 = vmax.f32 %v4530_v55, 0.0  ;;  %v3635_v41 = vadd.f32 %v3634_v39, %v3606_v61  ;;  %v3607_v50 = vpop.f32.mrf.mxu1  ;;  %v3565_v18 = vadd.f32 %v3564_v34, %v10257_v15  ;;  %3946 = vmatpush.bf16.msrb.mxu1 %v6002_v4  ;;  %v5946_v27 = vor.u32 %v6483_v60, %v5945_v47  ;;  %v4336_v55 = vld [vmem:[%s8946_s15 + $0xa0] sm:$0xff]  ;;  %v6003_v61 = vld [vmem:[%s10166_s3 + $0x298] sm:$0xf0]  ;;  %v6476_v15 = vld [vmem:[%s10166_s3 + $0x1f4] sm:$0xf] }
 0x32c   : > { %v4615_v8 = vmax.f32 %v4503_v0, 0.0  ;;  %v3592_v62 = vadd.f32 %v3591_v42, %v3563_v26  ;;  %4003 = vmatpush.bf16.msrb.mxu0 %v6062_v58  ;;  %v3608_v53 = vadd.f32 %v3607_v50, %v10258_v38  ;;  %v4419_v0 = vld [vmem:[%s8946_s15 + $0x338] sm:$0xff]  ;;  %v5889_v34 = vld [vmem:[%s10166_s3 + $0x180] sm:$0xf]  ;;  %v10260_v50 = vld [vmem:[#allocation19_spill] sm:$0xff] }
 0x32d   : > { %4754 = vst [vmem:[%s9002_s17 + $0x330] sm:$0xff] %v4642_v36  ;;  %v4098_v23 = vadd.f32 %v9672_v12, %v3635_v41  ;;  %v5890_v36 = vor.u32 %v6469_v56, %v5889_v34  ;;  %v6553_v38 = vld [vmem:[%s10166_s3 + $0x454] sm:$0xf0]  ;;  %v6539_v34 = vld [vmem:[%s10166_s3 + $0x3e4] sm:$0xf0] }
 0x32e   : > { %4727 = vst [vmem:[%s9002_s17 + $0x258] sm:$0xff] %v4615_v8  ;;  %v4181_v44 = vadd.f32 %v9506_v54, %v3592_v62  ;;  %v10259_v62 = vld [vmem:[#allocation18_spill] sm:$0xff]  ;;  %v10261_v60 = vld [vmem:[#allocation20_spill] sm:$0xff] }
 0x32f   : > { %v4210_v35 = vmul.f32 0.2, %v4098_v23  ;;  %3947 = vmatpush.bf16.msrb.mxu1 %v5946_v27  ;;  %v5721_v27 = vld [vmem:[%s10166_s3 + $0x30] sm:$0xf] }
 0x330   : > { %v4293_v46 = vmul.f32 0.2, %v4181_v44 }
 0x331   : > { %v4434_v40 = vadd.f32 %v4322_v32, %v4210_v35  ;;  %v5833_v32 = vld [vmem:[%s10166_s3 + $0x110] sm:$0xf] }
 0x332   : > { %v4517_v5 = vadd.f32 %v4405_v31, %v4293_v46  ;;  %v3663_v6 = vpop.f32.mrf.mxu0  ;;  %v3636_v3 = vpop.f32.mrf.mxu3  ;;  %v4350_v35 = vld [vmem:[%s8946_s15 + $0x110] sm:$0xff]  ;;  %v5834_v21 = vor.u32 %v6455_v37, %v5833_v32 }
 0x333   : > { %v3593_v2 = vpop.f32.mrf.mxu2  ;;  %v4546_v45 = vmax.f32 %v4434_v40, 0.0  ;;  %v3637_v22 = vadd.f32 %v3636_v3, %v3608_v53  ;;  %v3610_v63 = vpop.f32.mrf.mxu1  ;;  %v3664_v39 = vadd.f32 %v3663_v6, %v10259_v62  ;;  %3948 = vmatpush.bf16.msrb.mxu1 %v5890_v36  ;;  %v6225_v40 = vld [vmem:[%s10166_s3 + $0x420] sm:$0xf]  ;;  %v6546_v6 = vld [vmem:[%s10166_s3 + $0x424] sm:$0xf] }
 0x334   : > { %v4629_v13 = vmax.f32 %v4517_v5, 0.0  ;;  %v3594_v20 = vadd.f32 %v3593_v2, %v3565_v18  ;;  %v3611_v44 = vadd.f32 %v3610_v63, %v10260_v50  ;;  %v4323_v5 = vld [vmem:[%s8946_s15 + $0x38] sm:$0xff]  ;;  %v5947_v18 = vld [vmem:[%s10166_s3 + $0x228] sm:$0xf0]  ;;  %v6226_v2 = vor.u32 %v6553_v38, %v6225_v40  ;;  %v5777_v3 = vld [vmem:[%s10166_s3 + $0xa0] sm:$0xf] }
 0x335   : > { %3894 = vmatmul.bf16.vlgmr.msra.gmra.mxu0 %v8501_v43  ;;  %4658 = vst [vmem:[%s9002_s17 + $0x30] sm:$0xff] %v4546_v45  ;;  %v4112_v26 = vadd.f32 %v9672_v12, %v3637_v22  ;;  %v5950_v33 = vor.u32 %v6476_v15, %v5947_v18  ;;  %v10262_v45 = vld [vmem:[#allocation21_spill] sm:$0xff]  ;;  %v4337_v50 = vld [vmem:[%s8946_s15 + $0xa8] sm:$0xff] }
 0x336   : > { %4741 = vst [vmem:[%s9002_s17 + $0x2c8] sm:$0xff] %v4629_v13  ;;  %v4195_v30 = vadd.f32 %v9506_v54, %v3594_v20  ;;  %3841 = vmatmul.bf16.gmra.mxu1 %v8565_v17  ;;  %v6006_v54 = vor.u32 %v6490_v14, %v6003_v61  ;;  %v6230_v20 = vor.u32 %v6546_v6, %v6227_v19  ;;  %v4351_v19 = vld [vmem:[%s8946_s15 + $0x118] sm:$0xff] }
 0x337   : > { %v4224_v28 = vmul.f32 0.2, %v4112_v26  ;;  %6384 = vmatmul.msk.bf16.gmra.mxu3 %vm1535_vm0, %v8569_v25  ;;  %3949 = vmatpush.bf16.msrb.mxu1 %v5834_v21  ;;  %v6427_v26 = vld [vmem:[%s10166_s3 + $0x64] sm:$0xf0] }
 0x338   : > { %v4307_v42 = vmul.f32 0.2, %v4195_v30  ;;  %6387 = vmatmul.msk.bf16.vlgmr.msra.gmra.mxu2 %vm1535_vm0, %v8505_v57  ;;  %4004 = vmatpush.bf16.msrb.mxu0 %v6006_v54  ;;  %v6169_v54 = vld [vmem:[%s10166_s3 + $0x3b0] sm:$0xf]  ;;  %v5722_v36 = vor.u32 %v6427_v26, %v5721_v27 }
 0x339   : > { %v4448_v41 = vadd.f32 %v4336_v55, %v4224_v28  ;;  %3979 = vmatpush.bf16.msrb.mxu3 %v6226_v2  ;;  %4037 = vmatpush.bf16.msrb.mxu2 %v6230_v20  ;;  %v6170_v62 = vor.u32 %v6539_v34, %v6169_v54  ;;  %v6420_v54 = vld [vmem:[%s10166_s3 + $0x34] sm:$0xf]  ;;  %v5723_v34 = vld [vmem:[%s10166_s3 + $0x68] sm:$0xf0] }
 0x33a   : > { %v4531_v8 = vadd.f32 %v4419_v0, %v4307_v42  ;;  %v3665_v23 = vpop.f32.mrf.mxu0  ;;  %v3639_v7 = vpop.f32.mrf.mxu3  ;;  %v6441_v0 = vld [vmem:[%s10166_s3 + $0xd4] sm:$0xf0] }
 0x33b   : > { %v3692_v31 = vpop.f32.mrf.mxu2  ;;  %v4560_v58 = vmax.f32 %v4448_v41, 0.0  ;;  %v3640_v59 = vadd.f32 %v3639_v7, %v3611_v44  ;;  %v3612_v29 = vpop.f32.mrf.mxu1  ;;  %v3666_v13 = vadd.f32 %v3665_v23, %v10261_v60  ;;  %v5778_v42 = vor.u32 %v6441_v0, %v5777_v3  ;;  %v6462_v44 = vld [vmem:[%s10166_s3 + $0x184] sm:$0xf]  ;;  %v6171_v60 = vld [vmem:[%s10166_s3 + $0x3e8] sm:$0xf0] }
 0x33c   : > { %v4643_v24 = vmax.f32 %v4531_v8, 0.0  ;;  %v3693_v46 = vadd.f32 %v3692_v31, %v3664_v39  ;;  %4005 = vmatpush.bf16.msrb.mxu0 %v5950_v33  ;;  %v3613_v22 = vadd.f32 %v3612_v29, %v10262_v45  ;;  %v5891_v31 = vld [vmem:[%s10166_s3 + $0x1b8] sm:$0xf0]  ;;  %v4364_v23 = vld [vmem:[%s8946_s15 + $0x180] sm:$0xff]  ;;  %v10264_v29 = vld [vmem:[#allocation23_spill] sm:$0xff] }
 0x33d   : > { %4672 = vst [vmem:[%s9002_s17 + $0xa0] sm:$0xff] %v4560_v58  ;;  %v4126_v11 = vadd.f32 %v9672_v12, %v3640_v59  ;;  %3950 = vmatpush.bf16.msrb.mxu1 %v5778_v42  ;;  %3980 = vmatpush.bf16.msrb.mxu3 %v6170_v62  ;;  %v5894_v37 = vor.u32 %v6462_v44, %v5891_v31  ;;  %v4365_v31 = vld [vmem:[%s8946_s15 + $0x188] sm:$0xff] }
 0x33e   : > { %4755 = vst [vmem:[%s9002_s17 + $0x338] sm:$0xff] %v4643_v24  ;;  %v4099_v52 = vadd.f32 %v9744_v1, %v3693_v46  ;;  %v10263_v46 = vld [vmem:[#allocation22_spill] sm:$0xff] }
 0x33f   : > { %v4238_v53 = vmul.f32 0.2, %v4126_v11  ;;  %v6448_v11 = vld [vmem:[%s10166_s3 + $0x114] sm:$0xf] }
 0x340   : > { %v4211_v10 = vmul.f32 0.2, %v4099_v52  ;;  %4006 = vmatpush.bf16.msrb.mxu0 %v5894_v37 }
 0x341   : > { %v4462_v4 = vadd.f32 %v4350_v35, %v4238_v53  ;;  %3951 = vmatpush.bf16.msrb.mxu1 %v5722_v36 }
 0x342   : > { %v4435_v47 = vadd.f32 %v4323_v5, %v4211_v10  ;;  %v3668_v30 = vpop.f32.mrf.mxu0  ;;  %v3641_v14 = vpop.f32.mrf.mxu3  ;;  %v5835_v5 = vld [vmem:[%s10166_s3 + $0x148] sm:$0xf0] }
 0x343   : > { %v3694_v63 = vpop.f32.mrf.mxu2  ;;  %v4574_v56 = vmax.f32 %v4462_v4, 0.0  ;;  %v3642_v28 = vadd.f32 %v3641_v14, %v3613_v22  ;;  %v3615_v8 = vpop.f32.mrf.mxu1  ;;  %v3669_v58 = vadd.f32 %v3668_v30, %v10263_v46  ;;  %v5838_v33 = vor.u32 %v6448_v11, %v5835_v5  ;;  %v6434_v4 = vld [vmem:[%s10166_s3 + $0xa4] sm:$0xf]  ;;  %v5779_v22 = vld [vmem:[%s10166_s3 + $0xd8] sm:$0xf0] }
 0x344   : > { %v4547_v55 = vmax.f32 %v4435_v47, 0.0  ;;  %v3695_v61 = vadd.f32 %v3694_v63, %v3666_v13  ;;  %v3616_v35 = vadd.f32 %v3615_v8, %v10264_v29  ;;  %v6532_v47 = vld [vmem:[%s10166_s3 + $0x3b4] sm:$0xf]  ;;  %v10265_v30 = vld [vmem:[#allocation24_spill] sm:$0xff]  ;;  %v5782_v27 = vor.u32 %v6434_v4, %v5779_v22 }
 0x345   : > { %3899 = vmatmul.bf16.gmra.mxu0 %v8565_v17  ;;  %4686 = vst [vmem:[%s9002_s17 + $0x110] sm:$0xff] %v4574_v56  ;;  %v4140_v41 = vadd.f32 %v9672_v12, %v3642_v28  ;;  %v4378_v13 = vld [vmem:[%s8946_s15 + $0x1f0] sm:$0xff]  ;;  %v6174_v3 = vor.u32 %v6532_v47, %v6171_v60  ;;  %v10269_v47 = vld [vmem:[#allocation28_spill] sm:$0xff] }
 0x346   : > { %4659 = vst [vmem:[%s9002_s17 + $0x38] sm:$0xff] %v4547_v55  ;;  %v4113_v39 = vadd.f32 %v9744_v1, %v3695_v61  ;;  %3846 = vmatmul.bf16.gmra.mxu1 %v8638_v16  ;;  %4007 = vmatpush.bf16.msrb.mxu0 %v5838_v33  ;;  %v10266_v55 = vld [vmem:[#allocation25_spill] sm:$0xff] }
 0x347   : > { %v4252_v24 = vmul.f32 0.2, %v4140_v41  ;;  %6385 = vmatmul.msk.bf16.gmra.mxu3 %vm1535_vm0, %v8645_v51  ;;  %4038 = vmatpush.bf16.msrb.mxu2 %v6174_v3  ;;  %v5726_v41 = vor.u32 %v6420_v54, %v5723_v34  ;;  %v9884_v34 = vld [vmem:[%s10168_s5 + $0x8] sm:$0x3f] }
 0x348   : > { %v4225_v32 = vmul.f32 0.2, %v4113_v39  ;;  %6388 = vmatmul.msk.bf16.gmra.mxu2 %vm1535_vm0, %v8569_v25 }
 0x349   : > { %v4476_v59 = vadd.f32 %v4364_v23, %v4252_v24  ;;  %v4392_v23 = vld [vmem:[%s8946_s15 + $0x260] sm:$0xff] }
 0x34a   : > { %v4449_v7 = vadd.f32 %v4337_v50, %v4225_v32  ;;  %v3670_v21 = vpop.f32.mrf.mxu0  ;;  %v3644_v18 = vpop.f32.mrf.mxu3  ;;  %4008 = vmatpush.bf16.msrb.mxu0 %v5782_v27 }
 0x34b   : > { %v3697_v52 = vpop.f32.mrf.mxu2  ;;  %v4588_v40 = vmax.f32 %v4476_v59, 0.0  ;;  %v3645_v38 = vadd.f32 %v3644_v18, %v3616_v35  ;;  %v3617_v53 = vpop.f32.mrf.mxu1  ;;  %v3671_v0 = vadd.f32 %v3670_v21, %v10265_v30  ;;  %v10268_v59 = vld [vmem:[#allocation27_spill] sm:$0xff] }
 0x34c   : > { %v4561_v15 = vmax.f32 %v4449_v7, 0.0  ;;  %v3698_v10 = vadd.f32 %v3697_v52, %v3669_v58  ;;  %v3618_v14 = vadd.f32 %v3617_v53, %v10266_v55  ;;  %v10267_v7 = vld [vmem:[#allocation26_spill] sm:$0xff]  ;;  %v4406_v53 = vld [vmem:[%s8946_s15 + $0x2d0] sm:$0xff] }
 0x34d   : > { %4700 = vst [vmem:[%s9002_s17 + $0x180] sm:$0xff] %v4588_v40  ;;  %v4154_v6 = vadd.f32 %v9672_v12, %v3645_v38  ;;  %v4379_v38 = vld [vmem:[%s8946_s15 + $0x1f8] sm:$0xff] }
 0x34e   : > { %4673 = vst [vmem:[%s9002_s17 + $0xa8] sm:$0xff] %v4561_v15  ;;  %v4127_v2 = vadd.f32 %v9744_v1, %v3698_v10  ;;  %4009 = vmatpush.bf16.msrb.mxu0 %v5726_v41 }
 0x34f   : > { %v4266_v45 = vmul.f32 0.2, %v4154_v6 }
 0x350   : > { %v4239_v20 = vmul.f32 0.2, %v4127_v2 }
 0x351   : > { %v4490_v26 = vadd.f32 %v4378_v13, %v4266_v45 }
 0x352   : > { %v4463_v63 = vadd.f32 %v4351_v19, %v4239_v20  ;;  %v3673_v42 = vpop.f32.mrf.mxu0  ;;  %v3646_v28 = vpop.f32.mrf.mxu3  ;;  %v10270_v20 = vld [vmem:[#allocation29_spill] sm:$0xff] }
 0x353   : > { %v3699_v61 = vpop.f32.mrf.mxu2  ;;  %v4602_v62 = vmax.f32 %v4490_v26, 0.0  ;;  %v3647_v39 = vadd.f32 %v3646_v28, %v3618_v14  ;;  %v3620_v36 = vpop.f32.mrf.mxu1  ;;  %v3674_v46 = vadd.f32 %v3673_v42, %v10267_v7  ;;  %v4420_v42 = vld [vmem:[%s8946_s15 + $0x340] sm:$0xff]  ;;  %v10271_v28 = vld [vmem:[#allocation30_spill] sm:$0xff] }
 0x354   : > { %v4575_v56 = vmax.f32 %v4463_v63, 0.0  ;;  %v3700_v8 = vadd.f32 %v3699_v61, %v3671_v0  ;;  %v3621_v29 = vadd.f32 %v3620_v36, %v10268_v59  ;;  %v4393_v61 = vld [vmem:[%s8946_s15 + $0x268] sm:$0xff] }
 0x355   : > { %3904 = vmatmul.bf16.gmra.mxu0 %v8638_v16  ;;  %4714 = vst [vmem:[%s9002_s17 + $0x1f0] sm:$0xff] %v4602_v62  ;;  %v4168_v44 = vadd.f32 %v9672_v12, %v3647_v39  ;;  %v10272_v39 = vld [vmem:[#allocation31_spill] sm:$0xff] }
 0x356   : > { %4687 = vst [vmem:[%s9002_s17 + $0x118] sm:$0xff] %v4575_v56  ;;  %v4141_v50 = vadd.f32 %v9744_v1, %v3700_v8  ;;  %3851 = vmatmul.bf16.gmra.mxu1 %v8687_v9 }
 0x357   : > { %v4280_v37 = vmul.f32 0.2, %v4168_v44  ;;  %6386 = vmatmul.msk.bf16.gmra.mxu3 %vm1535_vm0, %v8691_v49 }
 0x358   : > { %v4253_v32 = vmul.f32 0.2, %v4141_v50  ;;  %6389 = vmatmul.msk.bf16.gmra.mxu2 %vm1535_vm0, %v8645_v51  ;;  %v9891_v50 = vperm.slane %v9884_v34, 0 }
 0x359   : > { %v4504_v58 = vadd.f32 %v4392_v23, %v4280_v37 }
 0x35a   : > { %v4477_v24 = vadd.f32 %v4365_v31, %v4253_v32  ;;  %v3675_v52 = vpop.f32.mrf.mxu0  ;;  %v3649_v11 = vpop.f32.mrf.mxu3 }
 0x35b   : > { %v3702_v35 = vpop.f32.mrf.mxu2  ;;  %v4616_v15 = vmax.f32 %v4504_v58, 0.0  ;;  %v3650_v18 = vadd.f32 %v3649_v11, %v3621_v29  ;;  %v3622_v10 = vpop.f32.mrf.mxu1  ;;  %v3676_v60 = vadd.f32 %v3675_v52, %v10269_v47  ;;  %v4407_v58 = vld [vmem:[%s8946_s15 + $0x2d8] sm:$0xff] }
 0x35c   : > { %v4589_v21 = vmax.f32 %v4477_v24, 0.0  ;;  %v3703_v5 = vadd.f32 %v3702_v35, %v3674_v46  ;;  %v3623_v3 = vadd.f32 %v3622_v10, %v10270_v20  ;;  %v4324_v35 = vld [vmem:[%s8946_s15 + $0x40] sm:$0xff]  ;;  %v10273_v11 = vld [vmem:[#allocation32_spill] sm:$0xff] }
 0x35d   : > { %4728 = vst [vmem:[%s9002_s17 + $0x260] sm:$0xff] %v4616_v15  ;;  %v4182_v40 = vadd.f32 %v9672_v12, %v3650_v18  ;;  %v10274_v18 = vld [vmem:[#allocation33_spill] sm:$0xff] }
 0x35e   : > { %4701 = vst [vmem:[%s9002_s17 + $0x188] sm:$0xff] %v4589_v21  ;;  %v4155_v33 = vadd.f32 %v9744_v1, %v3703_v5 }
 0x35f   : > { %v4294_v6 = vmul.f32 0.2, %v4182_v40 }
 0x360   : > { %v4267_v2 = vmul.f32 0.2, %v4155_v33 }
 0x361   : > { %v4518_v13 = vadd.f32 %v4406_v53, %v4294_v6 }
 0x362   : > { %v4491_v19 = vadd.f32 %v4379_v38, %v4267_v2  ;;  %v3678_v45 = vpop.f32.mrf.mxu0  ;;  %v3651_v63 = vpop.f32.mrf.mxu3 }
 0x363   : > { %v3704_v4 = vpop.f32.mrf.mxu2  ;;  %v4630_v0 = vmax.f32 %v4518_v13, 0.0  ;;  %v3652_v27 = vadd.f32 %v3651_v63, %v3623_v3  ;;  %v3721_v26 = vpop.f32.mrf.mxu1  ;;  %v3679_v8 = vadd.f32 %v3678_v45, %v10271_v28  ;;  %v4421_v13 = vld [vmem:[%s8946_s15 + $0x348] sm:$0xff]  ;;  %v9915_v63 = vperm.slane %v9884_v34, 1 }
 0x364   : > { %v4603_v22 = vmax.f32 %v4491_v19, 0.0  ;;  %v3705_v30 = vadd.f32 %v3704_v4, %v3676_v60  ;;  %v3722_v36 = vadd.f32 %v3721_v26, %v10272_v39  ;;  %v4338_v4 = vld [vmem:[%s8946_s15 + $0xb0] sm:$0xff] }
 0x365   : > { %3909 = vmatmul.bf16.gmra.mxu0 %v8687_v9  ;;  %4742 = vst [vmem:[%s9002_s17 + $0x2d0] sm:$0xff] %v4630_v0  ;;  %v4196_v14 = vadd.f32 %v9672_v12, %v3652_v27  ;;  %v10276_v0 = vld [vmem:[#allocation35_spill] sm:$0xff] }
 0x366   : > { %4715 = vst [vmem:[%s9002_s17 + $0x1f8] sm:$0xff] %v4603_v22  ;;  %v4169_v55 = vadd.f32 %v9744_v1, %v3705_v30  ;;  %3952 = vmatmul.bf16.vlgmr.msrb.gmra.mxu1 %v8501_v43  ;;  %v10275_v22 = vld [vmem:[#allocation34_spill] sm:$0xff] }
 0x367   : > { %v4308_v56 = vmul.f32 0.2, %v4196_v14  ;;  %6391 = vmatmul.msk.bf16.vlgmr.msrb.gmra.mxu3 %vm1535_vm0, %v8505_v57 }
 0x368   : > { %v4281_v54 = vmul.f32 0.2, %v4169_v55  ;;  %6390 = vmatmul.msk.bf16.gmra.mxu2 %vm1535_vm0, %v8691_v49 }
 0x369   : > { %v4532_v62 = vadd.f32 %v4420_v42, %v4308_v56 }
 0x36a   : > { %v4505_v12 = vadd.f32 %v4393_v61, %v4281_v54  ;;  %v3680_v44 = vpop.f32.mrf.mxu0  ;;  %v3750_v32 = vpop.f32.mrf.mxu3 }
 0x36b   : > { %v3707_v41 = vpop.f32.mrf.mxu2  ;;  %v4644_v37 = vmax.f32 %v4532_v62, 0.0  ;;  %v3751_v24 = vadd.f32 %v3750_v32, %v3722_v36  ;;  %v3723_v7 = vpop.f32.mrf.mxu1  ;;  %v3681_v5 = vadd.f32 %v3680_v44, %v10273_v11  ;;  %v4352_v62 = vld [vmem:[%s8946_s15 + $0x120] sm:$0xff]  ;;  %v10277_v44 = vld [vmem:[#allocation36_spill] sm:$0xff] }
 0x36c   : > { %v4617_v31 = vmax.f32 %v4505_v12, 0.0  ;;  %v3708_v23 = vadd.f32 %v3707_v41, %v3679_v8  ;;  %v3724_v10 = vadd.f32 %v3723_v7, %v10274_v18  ;;  %v4325_v8 = vld [vmem:[%s8946_s15 + $0x48] sm:$0xff]  ;;  %v10278_v32 = vld [vmem:[#allocation37_spill] sm:$0xff] }
 0x36d   : > { %4756 = vst [vmem:[%s9002_s17 + $0x340] sm:$0xff] %v4644_v37  ;;  %v4100_v59 = vadd.f32 %v9891_v50, %v3751_v24 }
 0x36e   : > { %4729 = vst [vmem:[%s9002_s17 + $0x268] sm:$0xff] %v4617_v31  ;;  %v4183_v46 = vadd.f32 %v9744_v1, %v3708_v23 }
 0x36f   : > { %v4212_v52 = vmul.f32 0.2, %v4100_v59 }
 0x370   : > { %v4295_v29 = vmul.f32 0.2, %v4183_v46 }
 0x371   : > { %v4436_v15 = vadd.f32 %v4324_v35, %v4212_v52 }
 0x372   : > { %v4519_v21 = vadd.f32 %v4407_v58, %v4295_v29  ;;  %v3779_v40 = vpop.f32.mrf.mxu0  ;;  %v3752_v2 = vpop.f32.mrf.mxu3 }
 0x373   : > { %v3709_v33 = vpop.f32.mrf.mxu2  ;;  %v4548_v6 = vmax.f32 %v4436_v15, 0.0  ;;  %v3753_v19 = vadd.f32 %v3752_v2, %v3724_v10  ;;  %v3726_v47 = vpop.f32.mrf.mxu1  ;;  %v4366_v15 = vld [vmem:[%s8946_s15 + $0x190] sm:$0xff] }
 0x374   : > { %v4631_v38 = vmax.f32 %v4519_v21, 0.0  ;;  %v3710_v53 = vadd.f32 %v3709_v33, %v3681_v5  ;;  %v3727_v27 = vadd.f32 %v3726_v47, %v10276_v0  ;;  %v4339_v5 = vld [vmem:[%s8946_s15 + $0xb8] sm:$0xff] }
 0x375   : > { %4010 = vmatmul.bf16.vlgmr.msrb.gmra.mxu0 %v8501_v43  ;;  %4660 = vst [vmem:[%s9002_s17 + $0x40] sm:$0xff] %v4548_v6  ;;  %v4114_v20 = vadd.f32 %v9891_v50, %v3753_v19  ;;  %v3780_v43 = vadd.f32 %v3779_v40, %v10275_v22  ;;  %v10279_v40 = vld [vmem:[#allocation38_spill] sm:$0xff]  ;;  %v4380_v22 = vld [vmem:[%s8946_s15 + $0x200] sm:$0xff] }
 0x376   : > { %4743 = vst [vmem:[%s9002_s17 + $0x2d8] sm:$0xff] %v4631_v38  ;;  %v4197_v60 = vadd.f32 %v9744_v1, %v3710_v53  ;;  %3957 = vmatmul.bf16.gmra.mxu1 %v8565_v17  ;;  %v10280_v53 = vld [vmem:[#allocation39_spill] sm:$0xff] }
 0x377   : > { %v4226_v45 = vmul.f32 0.2, %v4114_v20  ;;  %6392 = vmatmul.msk.bf16.gmra.mxu3 %vm1535_vm0, %v8569_v25 }
 0x378   : > { %v4309_v3 = vmul.f32 0.2, %v4197_v60  ;;  %6395 = vmatmul.msk.bf16.vlgmr.msrb.gmra.mxu2 %vm1535_vm0, %v8505_v57 }
 0x379   : > { %v4450_v30 = vadd.f32 %v4338_v4, %v4226_v45 }
 0x37a   : > { %v4533_v1 = vadd.f32 %v4421_v13, %v4309_v3  ;;  %v3781_v55 = vpop.f32.mrf.mxu0  ;;  %v3755_v14 = vpop.f32.mrf.mxu3 }
 0x37b   : > { %v3808_v26 = vpop.f32.mrf.mxu2  ;;  %v4562_v42 = vmax.f32 %v4450_v30, 0.0  ;;  %v3756_v54 = vadd.f32 %v3755_v14, %v3727_v27  ;;  %v3728_v56 = vpop.f32.mrf.mxu1  ;;  %v3782_v31 = vadd.f32 %v3781_v55, %v10277_v44  ;;  %v10281_v27 = vld [vmem:[#allocation40_spill] sm:$0xff]  ;;  %v4394_v44 = vld [vmem:[%s8946_s15 + $0x270] sm:$0xff] }
 0x37c   : > { %v4645_v57 = vmax.f32 %v4533_v1, 0.0  ;;  %v3809_v61 = vadd.f32 %v3808_v26, %v3780_v43  ;;  %v3729_v37 = vadd.f32 %v3728_v56, %v10278_v32  ;;  %v4353_v1 = vld [vmem:[%s8946_s15 + $0x128] sm:$0xff] }
 0x37d   : > { %4674 = vst [vmem:[%s9002_s17 + $0xb0] sm:$0xff] %v4562_v42  ;;  %v4128_v28 = vadd.f32 %v9891_v50, %v3756_v54 }
 0x37e   : > { %4757 = vst [vmem:[%s9002_s17 + $0x348] sm:$0xff] %v4645_v57  ;;  %v4101_v12 = vadd.f32 %v9915_v63, %v3809_v61  ;;  %v10282_v57 = vld [vmem:[#allocation41_spill] sm:$0xff] }
 0x37f   : > { %v4240_v36 = vmul.f32 0.2, %v4128_v28 }
 0x380   : > { %v4213_v39 = vmul.f32 0.2, %v4101_v12 }
 0x381   : > { %v4464_v23 = vadd.f32 %v4352_v62, %v4240_v36 }
 0x382   : > { %v4437_v41 = vadd.f32 %v4325_v8, %v4213_v39  ;;  %v3784_v7 = vpop.f32.mrf.mxu0  ;;  %v3757_v58 = vpop.f32.mrf.mxu3 }
 0x383   : > { %v3810_v24 = vpop.f32.mrf.mxu2  ;;  %v4576_v29 = vmax.f32 %v4464_v23, 0.0  ;;  %v3758_v35 = vadd.f32 %v3757_v58, %v3729_v37  ;;  %v3731_v52 = vpop.f32.mrf.mxu1  ;;  %v10283_v37 = vld [vmem:[#allocation42_spill] sm:$0xff] }
 0x384   : > { %v4549_v46 = vmax.f32 %v4437_v41, 0.0  ;;  %v3811_v59 = vadd.f32 %v3810_v24, %v3782_v31  ;;  %v3732_v2 = vadd.f32 %v3731_v52, %v10280_v53  ;;  %v4367_v41 = vld [vmem:[%s8946_s15 + $0x198] sm:$0xff] }
 0x385   : > { %4015 = vmatmul.bf16.gmra.mxu0 %v8565_v17  ;;  %4688 = vst [vmem:[%s9002_s17 + $0x120] sm:$0xff] %v4576_v29  ;;  %v4142_v11 = vadd.f32 %v9891_v50, %v3758_v35  ;;  %v3785_v17 = vadd.f32 %v3784_v7, %v10279_v40  ;;  %v10284_v7 = vld [vmem:[#allocation43_spill] sm:$0xff] }
 0x386   : > { %4661 = vst [vmem:[%s9002_s17 + $0x48] sm:$0xff] %v4549_v46  ;;  %v4115_v21 = vadd.f32 %v9915_v63, %v3811_v59  ;;  %3962 = vmatmul.bf16.gmra.mxu1 %v8638_v16 }
 0x387   : > { %v4254_v10 = vmul.f32 0.2, %v4142_v11  ;;  %6393 = vmatmul.msk.bf16.gmra.mxu3 %vm1535_vm0, %v8645_v51 }
 0x388   : > { %v4227_v18 = vmul.f32 0.2, %v4115_v21  ;;  %6396 = vmatmul.msk.bf16.gmra.mxu2 %vm1535_vm0, %v8569_v25 }
 0x389   : > { %v4478_v38 = vadd.f32 %v4366_v15, %v4254_v10  ;;  %v4408_v10 = vld [vmem:[%s8946_s15 + $0x2e0] sm:$0xff] }
 0x38a   : > { %v4451_v33 = vadd.f32 %v4339_v5, %v4227_v18  ;;  %v3786_v19 = vpop.f32.mrf.mxu0  ;;  %v3760_v60 = vpop.f32.mrf.mxu3  ;;  %v4381_v18 = vld [vmem:[%s8946_s15 + $0x208] sm:$0xff] }
 0x38b   : > { %v3813_v6 = vpop.f32.mrf.mxu2  ;;  %v4590_v20 = vmax.f32 %v4478_v38, 0.0  ;;  %v3761_v25 = vadd.f32 %v3760_v60, %v3732_v2  ;;  %v3733_v3 = vpop.f32.mrf.mxu1  ;;  %v3787_v26 = vadd.f32 %v3786_v19, %v10281_v27  ;;  %v10285_v38 = vld [vmem:[#allocation44_spill] sm:$0xff] }
 0x38c   : > { %v4563_v47 = vmax.f32 %v4451_v33, 0.0  ;;  %v3814_v13 = vadd.f32 %v3813_v6, %v3785_v17  ;;  %v3734_v14 = vadd.f32 %v3733_v3, %v10282_v57  ;;  %v10286_v6 = vld [vmem:[#allocation45_spill] sm:$0xff] }
 0x38d   : > { %4702 = vst [vmem:[%s9002_s17 + $0x190] sm:$0xff] %v4590_v20  ;;  %v4156_v45 = vadd.f32 %v9891_v50, %v3761_v25 }
 0x38e   : > { %4675 = vst [vmem:[%s9002_s17 + $0xb8] sm:$0xff] %v4563_v47  ;;  %v4129_v4 = vadd.f32 %v9915_v63, %v3814_v13 }
 0x38f   : > { %v4268_v30 = vmul.f32 0.2, %v4156_v45 }
 0x390   : > { %v4241_v43 = vmul.f32 0.2, %v4129_v4 }
 0x391   : > { %v4492_v55 = vadd.f32 %v4380_v22, %v4268_v30  ;;  %v4422_v30 = vld [vmem:[%s8946_s15 + $0x350] sm:$0xff] }
 0x392   : > { %v4465_v0 = vadd.f32 %v4353_v1, %v4241_v43  ;;  %v3789_v42 = vpop.f32.mrf.mxu0  ;;  %v3762_v56 = vpop.f32.mrf.mxu3  ;;  %v4395_v43 = vld [vmem:[%s8946_s15 + $0x278] sm:$0xff] }
 0x393   : > { %v3815_v61 = vpop.f32.mrf.mxu2  ;;  %v4604_v28 = vmax.f32 %v4492_v55, 0.0  ;;  %v3763_v8 = vadd.f32 %v3762_v56, %v3734_v14  ;;  %v3736_v62 = vpop.f32.mrf.mxu1  ;;  %v10287_v55 = vld [vmem:[#allocation46_spill] sm:$0xff] }
 0x394   : > { %v4577_v54 = vmax.f32 %v4465_v0, 0.0  ;;  %v3816_v12 = vadd.f32 %v3815_v61, %v3787_v26  ;;  %v3737_v46 = vadd.f32 %v3736_v62, %v10284_v7  ;;  %v10288_v61 = vld [vmem:[#allocation47_spill] sm:$0xff]  ;;  %v10290_v7 = vld [vmem:[#allocation49_spill] sm:$0xff] }
 0x395   : > { %4020 = vmatmul.bf16.gmra.mxu0 %v8638_v16  ;;  %4716 = vst [vmem:[%s9002_s17 + $0x200] sm:$0xff] %v4604_v28  ;;  %v4170_v36 = vadd.f32 %v9891_v50, %v3763_v8  ;;  %v3790_v16 = vadd.f32 %v3789_v42, %v10283_v37  ;;  %v10289_v37 = vld [vmem:[#allocation48_spill] sm:$0xff] }
 0x396   : > { %4689 = vst [vmem:[%s9002_s17 + $0x128] sm:$0xff] %v4577_v54  ;;  %v4143_v39 = vadd.f32 %v9915_v63, %v3816_v12  ;;  %3967 = vmatmul.bf16.gmra.mxu1 %v8687_v9 }
 0x397   : > { %v4282_v23 = vmul.f32 0.2, %v4170_v36  ;;  %6394 = vmatmul.msk.bf16.gmra.mxu3 %vm1535_vm0, %v8691_v49  ;;  %v4409_v36 = vld [vmem:[%s8946_s15 + $0x2e8] sm:$0xff] }
 0x398   : > { %v4255_v31 = vmul.f32 0.2, %v4143_v39  ;;  %6397 = vmatmul.msk.bf16.gmra.mxu2 %vm1535_vm0, %v8645_v51 }
 0x399   : > { %v4506_v24 = vadd.f32 %v4394_v44, %v4282_v23 }
 0x39a   : > { %v4479_v32 = vadd.f32 %v4367_v41, %v4255_v31  ;;  %v3791_v59 = vpop.f32.mrf.mxu0  ;;  %v3765_v35 = vpop.f32.mrf.mxu3  ;;  %v4326_v31 = vld [vmem:[%s8946_s15 + $0x50] sm:$0xff] }
 0x39b   : > { %v3818_v58 = vpop.f32.mrf.mxu2  ;;  %v4618_v21 = vmax.f32 %v4506_v24, 0.0  ;;  %v3766_v51 = vadd.f32 %v3765_v35, %v3737_v46  ;;  %v3738_v11 = vpop.f32.mrf.mxu1  ;;  %v3792_v53 = vadd.f32 %v3791_v59, %v10285_v38  ;;  %v10291_v38 = vld [vmem:[#allocation50_spill] sm:$0xff] }
 0x39c   : > { %v4591_v29 = vmax.f32 %v4479_v32, 0.0  ;;  %v3819_v52 = vadd.f32 %v3818_v58, %v3790_v16  ;;  %v3739_v19 = vadd.f32 %v3738_v11, %v10286_v6 }
 0x39d   : > { %4730 = vst [vmem:[%s9002_s17 + $0x270] sm:$0xff] %v4618_v21  ;;  %v4184_v15 = vadd.f32 %v9891_v50, %v3766_v51 }
 0x39e   : > { %4703 = vst [vmem:[%s9002_s17 + $0x198] sm:$0xff] %v4591_v29  ;;  %v4157_v5 = vadd.f32 %v9915_v63, %v3819_v52 }
 0x39f   : > { %v4296_v40 = vmul.f32 0.2, %v4184_v15  ;;  %v4423_v15 = vld [vmem:[%s8946_s15 + $0x358] sm:$0xff] }
 0x3a0   : > { %v4269_v33 = vmul.f32 0.2, %v4157_v5 }
 0x3a1   : > { %v4520_v2 = vadd.f32 %v4408_v10, %v4296_v40 }
 0x3a2   : > { %v4493_v17 = vadd.f32 %v4381_v18, %v4269_v33  ;;  %v3794_v60 = vpop.f32.mrf.mxu0  ;;  %v3767_v20 = vpop.f32.mrf.mxu3  ;;  %v4340_v33 = vld [vmem:[%s8946_s15 + $0xc0] sm:$0xff] }
 0x3a3   : > { %v3820_v47 = vpop.f32.mrf.mxu2  ;;  %v4632_v3 = vmax.f32 %v4520_v2, 0.0  ;;  %v3768_v4 = vadd.f32 %v3767_v20, %v3739_v19  ;;  %v3837_v45 = vpop.f32.mrf.mxu1  ;;  %v3795_v57 = vadd.f32 %v3794_v60, %v10287_v55  ;;  %v10000_v2 = vperm.slane %v9884_v34, 3  ;;  %v10292_v19 = vld [vmem:[#allocation51_spill] sm:$0xff]  ;;  %v10293_v55 = vld [vmem:[#allocation52_spill] sm:$0xff] }
 0x3a4   : > { %v4605_v13 = vmax.f32 %v4493_v17, 0.0  ;;  %v3821_v25 = vadd.f32 %v3820_v47, %v3792_v53  ;;  %v3838_v42 = vadd.f32 %v3837_v45, %v10288_v61  ;;  %v10294_v61 = vld [vmem:[#allocation53_spill] sm:$0xff] }
 0x3a5   : > { %4025 = vmatmul.bf16.gmra.mxu0 %v8687_v9  ;;  %4744 = vst [vmem:[%s9002_s17 + $0x2e0] sm:$0xff] %v4632_v3  ;;  %v4198_v22 = vadd.f32 %v9891_v50, %v3768_v4  ;;  %v9982_v50 = vperm.slane %v9884_v34, 2 }
 0x3a6   : > { %4717 = vst [vmem:[%s9002_s17 + $0x208] sm:$0xff] %v4605_v13  ;;  %v4171_v1 = vadd.f32 %v9915_v63, %v3821_v25 }
 0x3a7   : > { %v4310_v27 = vmul.f32 0.2, %v4198_v22 }
 0x3a8   : > { %v4283_v0 = vmul.f32 0.2, %v4171_v1  ;;  %6398 = vmatmul.msk.bf16.gmra.mxu2 %vm1535_vm0, %v8691_v49 }
 0x3a9   : > { %v4534_v14 = vadd.f32 %v4422_v30, %v4310_v27  ;;  %v4354_v30 = vld [vmem:[%s8946_s15 + $0x130] sm:$0xff] }
 0x3aa   : > { %v4507_v26 = vadd.f32 %v4395_v43, %v4283_v0  ;;  %v3796_v54 = vpop.f32.mrf.mxu0  ;;  %v3866_v28 = vpop.f32.mrf.mxu3  ;;  %v4327_v43 = vld [vmem:[%s8946_s15 + $0x58] sm:$0xff] }
 0x3ab   : > { %v3823_v9 = vpop.f32.mrf.mxu2  ;;  %v4646_v8 = vmax.f32 %v4534_v14, 0.0  ;;  %v3867_v49 = vadd.f32 %v3866_v28, %v3838_v42  ;;  %v3839_v62 = vpop.f32.mrf.mxu1  ;;  %v3797_v16 = vadd.f32 %v3796_v54, %v10289_v37  ;;  %v10295_v37 = vld [vmem:[#allocation54_spill] sm:$0xff] }
 0x3ac   : > { %v4619_v56 = vmax.f32 %v4507_v26, 0.0  ;;  %v3824_v12 = vadd.f32 %v3823_v9, %v3795_v57  ;;  %v3840_v46 = vadd.f32 %v3839_v62, %v10290_v7  ;;  %v10296_v7 = vld [vmem:[#allocation55_spill] sm:$0xff] }
 0x3ad   : > { %4758 = vst [vmem:[%s9002_s17 + $0x350] sm:$0xff] %v4646_v8  ;;  %v4102_v41 = vadd.f32 %v9982_v50, %v3867_v49 }
 0x3ae   : > { %4731 = vst [vmem:[%s9002_s17 + $0x278] sm:$0xff] %v4619_v56  ;;  %v4185_v39 = vadd.f32 %v9915_v63, %v3824_v12 }
 0x3af   : > { %v4214_v23 = vmul.f32 0.2, %v4102_v41  ;;  %v4341_v41 = vld [vmem:[%s8946_s15 + $0xc8] sm:$0xff] }
 0x3b0   : > { %v4297_v44 = vmul.f32 0.2, %v4185_v39 }
 0x3b1   : > { %v4438_v24 = vadd.f32 %v4326_v31, %v4214_v23 }
 0x3b2   : > { %v4521_v32 = vadd.f32 %v4409_v36, %v4297_v44  ;;  %v3895_v59 = vpop.f32.mrf.mxu0  ;;  %v3868_v52 = vpop.f32.mrf.mxu3  ;;  %v4368_v44 = vld [vmem:[%s8946_s15 + $0x1a0] sm:$0xff] }
 0x3b3   : > { %v3825_v58 = vpop.f32.mrf.mxu2  ;;  %v4550_v21 = vmax.f32 %v4438_v24, 0.0  ;;  %v3869_v51 = vadd.f32 %v3868_v52, %v3840_v46  ;;  %v3842_v11 = vpop.f32.mrf.mxu1  ;;  %v3896_v53 = vadd.f32 %v3895_v59, %v10291_v38  ;;  %v10297_v38 = vld [vmem:[#allocation56_spill] sm:$0xff] }
 0x3b4   : > { %v4633_v29 = vmax.f32 %v4521_v32, 0.0  ;;  %v3826_v35 = vadd.f32 %v3825_v58, %v3797_v16 }
 0x3b5   : > { %4662 = vst [vmem:[%s9002_s17 + $0x50] sm:$0xff] %v4550_v21  ;;  %v4116_v18 = vadd.f32 %v9982_v50, %v3869_v51 }
 0x3b6   : > { %4745 = vst [vmem:[%s9002_s17 + $0x2e8] sm:$0xff] %v4633_v29  ;;  %v4199_v5 = vadd.f32 %v9915_v63, %v3826_v35  ;;  %v3843_v63 = vadd.f32 %v3842_v11, %v10292_v19  ;;  %v10298_v19 = vld [vmem:[#allocation57_spill] sm:$0xff] }
 0x3b7   : > { %v4228_v40 = vmul.f32 0.2, %v4116_v18  ;;  %v4355_v18 = vld [vmem:[%s8946_s15 + $0x138] sm:$0xff] }
 0x3b8   : > { %v4311_v10 = vmul.f32 0.2, %v4199_v5 }
 0x3b9   : > { %v4452_v6 = vadd.f32 %v4340_v33, %v4228_v40 }
 0x3ba   : > { %v4535_v17 = vadd.f32 %v4423_v15, %v4311_v10  ;;  %v3897_v60 = vpop.f32.mrf.mxu0  ;;  %v3871_v20 = vpop.f32.mrf.mxu3  ;;  %v4382_v10 = vld [vmem:[%s8946_s15 + $0x210] sm:$0xff] }
 0x3bb   : > { %v3924_v47 = vpop.f32.mrf.mxu2  ;;  %v4564_v3 = vmax.f32 %v4452_v6, 0.0  ;;  %v3872_v4 = vadd.f32 %v3871_v20, %v3843_v63  ;;  %v3844_v45 = vpop.f32.mrf.mxu1  ;;  %v3898_v57 = vadd.f32 %v3897_v60, %v10293_v55  ;;  %v10299_v55 = vld [vmem:[#allocation58_spill] sm:$0xff] }
 0x3bc   : > { %v4647_v13 = vmax.f32 %v4535_v17, 0.0  ;;  %v3925_v25 = vadd.f32 %v3924_v47, %v3896_v53  ;;  %v3845_v42 = vadd.f32 %v3844_v45, %v10294_v61  ;;  %v10300_v61 = vld [vmem:[#allocation59_spill] sm:$0xff] }
 0x3bd   : > { %4676 = vst [vmem:[%s9002_s17 + $0xc0] sm:$0xff] %v4564_v3  ;;  %v4130_v22 = vadd.f32 %v9982_v50, %v3872_v4 }
 0x3be   : > { %4759 = vst [vmem:[%s9002_s17 + $0x358] sm:$0xff] %v4647_v13  ;;  %v4103_v1 = vadd.f32 %v10000_v2, %v3925_v25 }
 0x3bf   : > { %v4242_v27 = vmul.f32 0.2, %v4130_v22 }
 0x3c0   : > { %v4215_v0 = vmul.f32 0.2, %v4103_v1 }
 0x3c1   : > { %v4466_v14 = vadd.f32 %v4354_v30, %v4242_v27  ;;  %v4396_v30 = vld [vmem:[%s8946_s15 + $0x280] sm:$0xff] }
 0x3c2   : > { %v4439_v26 = vadd.f32 %v4327_v43, %v4215_v0  ;;  %v3900_v54 = vpop.f32.mrf.mxu0  ;;  %v3873_v12 = vpop.f32.mrf.mxu3  ;;  %v4369_v43 = vld [vmem:[%s8946_s15 + $0x1a8] sm:$0xff] }
 0x3c3   : > { %v3926_v9 = vpop.f32.mrf.mxu2  ;;  %v4578_v8 = vmax.f32 %v4466_v14, 0.0  ;;  %v3874_v49 = vadd.f32 %v3873_v12, %v3845_v42  ;;  %v3847_v62 = vpop.f32.mrf.mxu1  ;;  %v3901_v16 = vadd.f32 %v3900_v54, %v10295_v37  ;;  %v10301_v37 = vld [vmem:[#allocation60_spill] sm:$0xff] }
 0x3c4   : > { %v4551_v56 = vmax.f32 %v4439_v26, 0.0  ;;  %v3927_v28 = vadd.f32 %v3926_v9, %v3898_v57  ;;  %v3848_v46 = vadd.f32 %v3847_v62, %v10296_v7  ;;  %v10302_v7 = vld [vmem:[#allocation61_spill] sm:$0xff] }
 0x3c5   : > { %4690 = vst [vmem:[%s9002_s17 + $0x130] sm:$0xff] %v4578_v8  ;;  %v4144_v36 = vadd.f32 %v9982_v50, %v3874_v49 }
 0x3c6   : > { %4663 = vst [vmem:[%s9002_s17 + $0x58] sm:$0xff] %v4551_v56  ;;  %v4117_v39 = vadd.f32 %v10000_v2, %v3927_v28 }
 0x3c7   : > { %v4256_v23 = vmul.f32 0.2, %v4144_v36 }
 0x3c8   : > { %v4229_v31 = vmul.f32 0.2, %v4117_v39 }
 0x3c9   : > { %v4480_v24 = vadd.f32 %v4368_v44, %v4256_v23  ;;  %v4410_v44 = vld [vmem:[%s8946_s15 + $0x2f0] sm:$0xff] }
 0x3ca   : > { %v4453_v32 = vadd.f32 %v4341_v41, %v4229_v31  ;;  %v3902_v59 = vpop.f32.mrf.mxu0  ;;  %v3876_v35 = vpop.f32.mrf.mxu3  ;;  %v4383_v41 = vld [vmem:[%s8946_s15 + $0x218] sm:$0xff] }
 0x3cb   : > { %v3929_v58 = vpop.f32.mrf.mxu2  ;;  %v4592_v21 = vmax.f32 %v4480_v24, 0.0  ;;  %v3877_v51 = vadd.f32 %v3876_v35, %v3848_v46  ;;  %v3849_v11 = vpop.f32.mrf.mxu1  ;;  %v3903_v53 = vadd.f32 %v3902_v59, %v10297_v38  ;;  %v10303_v38 = vld [vmem:[#allocation62_spill] sm:$0xff] }
 0x3cc   : > { %v4565_v29 = vmax.f32 %v4453_v32, 0.0  ;;  %v3930_v52 = vadd.f32 %v3929_v58, %v3901_v16  ;;  %v3850_v63 = vadd.f32 %v3849_v11, %v10298_v19  ;;  %v10304_v19 = vld [vmem:[#allocation63_spill] sm:$0xff] }
 0x3cd   : > { %4704 = vst [vmem:[%s9002_s17 + $0x1a0] sm:$0xff] %v4592_v21  ;;  %v4158_v15 = vadd.f32 %v9982_v50, %v3877_v51 }
 0x3ce   : > { %4677 = vst [vmem:[%s9002_s17 + $0xc8] sm:$0xff] %v4565_v29  ;;  %v4131_v5 = vadd.f32 %v10000_v2, %v3930_v52 }
 0x3cf   : > { %v4270_v40 = vmul.f32 0.2, %v4158_v15 }
 0x3d0   : > { %v4243_v33 = vmul.f32 0.2, %v4131_v5 }
 0x3d1   : > { %v4494_v6 = vadd.f32 %v4382_v10, %v4270_v40  ;;  %v4424_v10 = vld [vmem:[%s8946_s15 + $0x360] sm:$0xff] }
 0x3d2   : > { %v4467_v17 = vadd.f32 %v4355_v18, %v4243_v33  ;;  %v3905_v60 = vpop.f32.mrf.mxu0  ;;  %v3878_v20 = vpop.f32.mrf.mxu3  ;;  %v4397_v18 = vld [vmem:[%s8946_s15 + $0x288] sm:$0xff] }
 0x3d3   : > { %v3931_v47 = vpop.f32.mrf.mxu2  ;;  %v4606_v3 = vmax.f32 %v4494_v6, 0.0  ;;  %v3879_v4 = vadd.f32 %v3878_v20, %v3850_v63  ;;  %v3852_v45 = vpop.f32.mrf.mxu1  ;;  %v3906_v57 = vadd.f32 %v3905_v60, %v10299_v55  ;;  %v10052_v60 = vperm.slane %v9884_v34, 4  ;;  %v10305_v55 = vld [vmem:[#allocation64_spill] sm:$0xff] }
 0x3d4   : > { %v4579_v13 = vmax.f32 %v4467_v17, 0.0  ;;  %v3932_v25 = vadd.f32 %v3931_v47, %v3903_v53  ;;  %v3853_v42 = vadd.f32 %v3852_v45, %v10300_v61  ;;  %v10306_v61 = vld [vmem:[#allocation65_spill] sm:$0xff] }
 0x3d5   : > { %4718 = vst [vmem:[%s9002_s17 + $0x210] sm:$0xff] %v4606_v3  ;;  %v4172_v22 = vadd.f32 %v9982_v50, %v3879_v4 }
 0x3d6   : > { %4691 = vst [vmem:[%s9002_s17 + $0x138] sm:$0xff] %v4579_v13  ;;  %v4145_v1 = vadd.f32 %v10000_v2, %v3932_v25 }
 0x3d7   : > { %v4284_v27 = vmul.f32 0.2, %v4172_v22  ;;  %v4411_v22 = vld [vmem:[%s8946_s15 + $0x2f8] sm:$0xff] }
 0x3d8   : > { %v4257_v0 = vmul.f32 0.2, %v4145_v1 }
 0x3d9   : > { %v4508_v14 = vadd.f32 %v4396_v30, %v4284_v27 }
 0x3da   : > { %v4481_v26 = vadd.f32 %v4369_v43, %v4257_v0  ;;  %v3907_v54 = vpop.f32.mrf.mxu0  ;;  %v3881_v12 = vpop.f32.mrf.mxu3  ;;  %v4328_v0 = vld [vmem:[%s8946_s15 + $0x60] sm:$0xff] }
 0x3db   : > { %v3934_v9 = vpop.f32.mrf.mxu2  ;;  %v4620_v8 = vmax.f32 %v4508_v14, 0.0  ;;  %v3882_v49 = vadd.f32 %v3881_v12, %v3853_v42  ;;  %v3854_v62 = vpop.f32.mrf.mxu1  ;;  %v3908_v16 = vadd.f32 %v3907_v54, %v10301_v37  ;;  %v10307_v37 = vld [vmem:[#allocation66_spill] sm:$0xff] }
 0x3dc   : > { %v4593_v56 = vmax.f32 %v4481_v26, 0.0  ;;  %v3935_v28 = vadd.f32 %v3934_v9, %v3906_v57  ;;  %v3855_v46 = vadd.f32 %v3854_v62, %v10302_v7 }
 0x3dd   : > { %4732 = vst [vmem:[%s9002_s17 + $0x280] sm:$0xff] %v4620_v8  ;;  %v4186_v36 = vadd.f32 %v9982_v50, %v3882_v49 }
 0x3de   : > { %4705 = vst [vmem:[%s9002_s17 + $0x1a8] sm:$0xff] %v4593_v56  ;;  %v4159_v39 = vadd.f32 %v10000_v2, %v3935_v28 }
 0x3df   : > { %v4298_v23 = vmul.f32 0.2, %v4186_v36  ;;  %v4425_v36 = vld [vmem:[%s8946_s15 + $0x368] sm:$0xff] }
 0x3e0   : > { %v4271_v31 = vmul.f32 0.2, %v4159_v39 }
 0x3e1   : > { %v4522_v24 = vadd.f32 %v4410_v44, %v4298_v23 }
 0x3e2   : > { %v4495_v32 = vadd.f32 %v4383_v41, %v4271_v31  ;;  %v3910_v59 = vpop.f32.mrf.mxu0  ;;  %v3883_v35 = vpop.f32.mrf.mxu3  ;;  %v4342_v31 = vld [vmem:[%s8946_s15 + $0xd0] sm:$0xff] }
 0x3e3   : > { %v3936_v58 = vpop.f32.mrf.mxu2  ;;  %v4634_v21 = vmax.f32 %v4522_v24, 0.0  ;;  %v3884_v51 = vadd.f32 %v3883_v35, %v3855_v46  ;;  %v3953_v11 = vpop.f32.mrf.mxu1  ;;  %v3911_v53 = vadd.f32 %v3910_v59, %v10303_v38  ;;  %v10070_v24 = vperm.slane %v9884_v34, 5  ;;  %v10308_v46 = vld [vmem:[#allocation67_spill] sm:$0xff]  ;;  %v4329_v34 = vld [vmem:[%s8946_s15 + $0x68] sm:$0xff] }
 0x3e4   : > { %v4607_v29 = vmax.f32 %v4495_v32, 0.0  ;;  %v3937_v52 = vadd.f32 %v3936_v58, %v3908_v16  ;;  %v3954_v63 = vadd.f32 %v3953_v11, %v10304_v19 }
 0x3e5   : > { %4746 = vst [vmem:[%s9002_s17 + $0x2f0] sm:$0xff] %v4634_v21  ;;  %v4200_v15 = vadd.f32 %v9982_v50, %v3884_v51 }
 0x3e6   : > { %4719 = vst [vmem:[%s9002_s17 + $0x218] sm:$0xff] %v4607_v29  ;;  %v4173_v5 = vadd.f32 %v10000_v2, %v3937_v52 }
 0x3e7   : > { %v4312_v40 = vmul.f32 0.2, %v4200_v15 }
 0x3e8   : > { %v4285_v33 = vmul.f32 0.2, %v4173_v5 }
 0x3e9   : > { %v4536_v6 = vadd.f32 %v4424_v10, %v4312_v40 }
 0x3ea   : > { %v4509_v17 = vadd.f32 %v4397_v18, %v4285_v33  ;;  %v3912_v13 = vpop.f32.mrf.mxu0  ;;  %v3982_v25 = vpop.f32.mrf.mxu3  ;;  %v4356_v18 = vld [vmem:[%s8946_s15 + $0x140] sm:$0xff] }
 0x3eb   : > { %v3939_v47 = vpop.f32.mrf.mxu2  ;;  %v4648_v3 = vmax.f32 %v4536_v6, 0.0  ;;  %v3983_v4 = vadd.f32 %v3982_v25, %v3954_v63  ;;  %v3955_v45 = vpop.f32.mrf.mxu1  ;;  %v3913_v57 = vadd.f32 %v3912_v13, %v10305_v55  ;;  %v10310_v6 = vld [vmem:[#allocation69_spill] sm:$0xff] }
 0x3ec   : > { %v4621_v50 = vmax.f32 %v4509_v17, 0.0  ;;  %v3940_v20 = vadd.f32 %v3939_v47, %v3911_v53  ;;  %v3956_v42 = vadd.f32 %v3955_v45, %v10306_v61  ;;  %v10309_v17 = vld [vmem:[#allocation68_spill] sm:$0xff] }
 0x3ed   : > { %4760 = vst [vmem:[%s9002_s17 + $0x360] sm:$0xff] %v4648_v3  ;;  %v4104_v43 = vadd.f32 %v10052_v60, %v3983_v4 }
 0x3ee   : > { %4733 = vst [vmem:[%s9002_s17 + $0x288] sm:$0xff] %v4621_v50  ;;  %v4187_v1 = vadd.f32 %v10000_v2, %v3940_v20 }
 0x3ef   : > { %v4216_v27 = vmul.f32 0.2, %v4104_v43  ;;  %v4370_v43 = vld [vmem:[%s8946_s15 + $0x1b0] sm:$0xff] }
 0x3f0   : > { %v4299_v30 = vmul.f32 0.2, %v4187_v1 }
 0x3f1   : > { %v4440_v14 = vadd.f32 %v4328_v0, %v4216_v27 }
 0x3f2   : > { %v4523_v26 = vadd.f32 %v4411_v22, %v4299_v30  ;;  %v4011_v54 = vpop.f32.mrf.mxu0  ;;  %v3984_v28 = vpop.f32.mrf.mxu3  ;;  %v4343_v22 = vld [vmem:[%s8946_s15 + $0xd8] sm:$0xff] }
 0x3f3   : > { %v3941_v9 = vpop.f32.mrf.mxu2  ;;  %v4552_v8 = vmax.f32 %v4440_v14, 0.0  ;;  %v3985_v49 = vadd.f32 %v3984_v28, %v3956_v42  ;;  %v3958_v62 = vpop.f32.mrf.mxu1  ;;  %v4012_v16 = vadd.f32 %v4011_v54, %v10307_v37  ;;  %v10312_v14 = vld [vmem:[#allocation71_spill] sm:$0xff] }
 0x3f4   : > { %v4635_v56 = vmax.f32 %v4523_v26, 0.0  ;;  %v3942_v12 = vadd.f32 %v3941_v9, %v3913_v57  ;;  %v10311_v26 = vld [vmem:[#allocation70_spill] sm:$0xff] }
 0x3f5   : > { %4664 = vst [vmem:[%s9002_s17 + $0x60] sm:$0xff] %v4552_v8  ;;  %v4118_v41 = vadd.f32 %v10052_v60, %v3985_v49 }
 0x3f6   : > { %4747 = vst [vmem:[%s9002_s17 + $0x2f8] sm:$0xff] %v4635_v56  ;;  %v4201_v39 = vadd.f32 %v10000_v2, %v3942_v12  ;;  %v3959_v2 = vadd.f32 %v3958_v62, %v10308_v46 }
 0x3f7   : > { %v4230_v23 = vmul.f32 0.2, %v4118_v41  ;;  %v4384_v41 = vld [vmem:[%s8946_s15 + $0x220] sm:$0xff] }
 0x3f8   : > { %v4313_v44 = vmul.f32 0.2, %v4201_v39 }
 0x3f9   : > { %v4454_v7 = vadd.f32 %v4342_v31, %v4230_v23 }
 0x3fa   : > { %v4537_v32 = vadd.f32 %v4425_v36, %v4313_v44  ;;  %v4013_v59 = vpop.f32.mrf.mxu0  ;;  %v3987_v35 = vpop.f32.mrf.mxu3  ;;  %v4357_v36 = vld [vmem:[%s8946_s15 + $0x148] sm:$0xff] }
 0x3fb   : > { %v4040_v58 = vpop.f32.mrf.mxu2  ;;  %v4566_v21 = vmax.f32 %v4454_v7, 0.0  ;;  %v3988_v51 = vadd.f32 %v3987_v35, %v3959_v2  ;;  %v3960_v11 = vpop.f32.mrf.mxu1  ;;  %v4014_v38 = vadd.f32 %v4013_v59, %v10309_v17  ;;  %v10314_v7 = vld [vmem:[#allocation73_spill] sm:$0xff] }
 0x3fc   : > { %v4649_v29 = vmax.f32 %v4537_v32, 0.0  ;;  %v4041_v52 = vadd.f32 %v4040_v58, %v4012_v16  ;;  %v3961_v19 = vadd.f32 %v3960_v11, %v10310_v6  ;;  %v10313_v32 = vld [vmem:[#allocation72_spill] sm:$0xff] }
 0x3fd   : > { %4678 = vst [vmem:[%s9002_s17 + $0xd0] sm:$0xff] %v4566_v21  ;;  %v4132_v15 = vadd.f32 %v10052_v60, %v3988_v51 }
 0x3fe   : > { %4761 = vst [vmem:[%s9002_s17 + $0x368] sm:$0xff] %v4649_v29  ;;  %v4105_v5 = vadd.f32 %v10070_v24, %v4041_v52 }
 0x3ff   : > { %v4244_v33 = vmul.f32 0.2, %v4132_v15  ;;  %v4371_v15 = vld [vmem:[%s8946_s15 + $0x1b8] sm:$0xff] }
 0x400   : > { %v4217_v10 = vmul.f32 0.2, %v4105_v5 }
 0x401   : > { %v4468_v53 = vadd.f32 %v4356_v18, %v4244_v33 }
 0x402   : > { %v4441_v40 = vadd.f32 %v4329_v34, %v4217_v10  ;;  %v4016_v47 = vpop.f32.mrf.mxu0  ;;  %v3989_v50 = vpop.f32.mrf.mxu3  ;;  %v4398_v34 = vld [vmem:[%s8946_s15 + $0x290] sm:$0xff] }
 0x403   : > { %v4042_v63 = vpop.f32.mrf.mxu2  ;;  %v4580_v25 = vmax.f32 %v4468_v53, 0.0  ;;  %v3990_v3 = vadd.f32 %v3989_v50, %v3961_v19  ;;  %v3963_v4 = vpop.f32.mrf.mxu1  ;;  %v4017_v55 = vadd.f32 %v4016_v47, %v10311_v26  ;;  %v10316_v53 = vld [vmem:[#allocation75_spill] sm:$0xff] }
 0x404   : > { %v4553_v13 = vmax.f32 %v4441_v40, 0.0  ;;  %v4043_v20 = vadd.f32 %v4042_v63, %v4014_v38  ;;  %v3964_v61 = vadd.f32 %v3963_v4, %v10312_v14  ;;  %v10315_v40 = vld [vmem:[#allocation74_spill] sm:$0xff] }
 0x405   : > { %4692 = vst [vmem:[%s9002_s17 + $0x140] sm:$0xff] %v4580_v25  ;;  %v4146_v1 = vadd.f32 %v10052_v60, %v3990_v3 }
 0x406   : > { %4665 = vst [vmem:[%s9002_s17 + $0x68] sm:$0xff] %v4553_v13  ;;  %v4119_v45 = vadd.f32 %v10070_v24, %v4043_v20 }
 0x407   : > { %v4258_v0 = vmul.f32 0.2, %v4146_v1  ;;  %v4412_v1 = vld [vmem:[%s8946_s15 + $0x300] sm:$0xff] }
 0x408   : > { %v4231_v30 = vmul.f32 0.2, %v4119_v45  ;;  %v4385_v45 = vld [vmem:[%s8946_s15 + $0x228] sm:$0xff] }
 0x409   : > { %v4482_v57 = vadd.f32 %v4370_v43, %v4258_v0 }
 0x40a   : > { %v4455_v27 = vadd.f32 %v4343_v22, %v4231_v30  ;;  %v4018_v9 = vpop.f32.mrf.mxu0  ;;  %v3992_v56 = vpop.f32.mrf.mxu3 }
 0x40b   : > { %v4045_v42 = vpop.f32.mrf.mxu2  ;;  %v4594_v28 = vmax.f32 %v4482_v57, 0.0  ;;  %v3993_v8 = vadd.f32 %v3992_v56, %v3964_v61  ;;  %v3965_v49 = vpop.f32.mrf.mxu1  ;;  %v4019_v37 = vadd.f32 %v4018_v9, %v10313_v32  ;;  %v10318_v57 = vld [vmem:[#allocation77_spill] sm:$0xff] }
 0x40c   : > { %v4567_v54 = vmax.f32 %v4455_v27, 0.0  ;;  %v4046_v12 = vadd.f32 %v4045_v42, %v4017_v55  ;;  %v3966_v46 = vadd.f32 %v3965_v49, %v10314_v7  ;;  %v10317_v27 = vld [vmem:[#allocation76_spill] sm:$0xff] }
 0x40d   : > { %4706 = vst [vmem:[%s9002_s17 + $0x1b0] sm:$0xff] %v4594_v28  ;;  %v4160_v39 = vadd.f32 %v10052_v60, %v3993_v8 }
 0x40e   : > { %4679 = vst [vmem:[%s9002_s17 + $0xd8] sm:$0xff] %v4567_v54  ;;  %v4133_v62 = vadd.f32 %v10070_v24, %v4046_v12 }
 0x40f   : > { %v4272_v31 = vmul.f32 0.2, %v4160_v39  ;;  %v4426_v39 = vld [vmem:[%s8946_s15 + $0x370] sm:$0xff] }
 0x410   : > { %v4245_v44 = vmul.f32 0.2, %v4133_v62  ;;  %v4399_v62 = vld [vmem:[%s8946_s15 + $0x298] sm:$0xff] }
 0x411   : > { %v4496_v16 = vadd.f32 %v4384_v41, %v4272_v31  ;;  %v10319_v31 = vld [vmem:[#allocation78_spill] sm:$0xff] }
 0x412   : > { %v4469_v23 = vadd.f32 %v4357_v36, %v4245_v44  ;;  %v4021_v58 = vpop.f32.mrf.mxu0  ;;  %v3994_v29 = vpop.f32.mrf.mxu3 }
 0x413   : > { %v4047_v2 = vpop.f32.mrf.mxu2  ;;  %v4608_v52 = vmax.f32 %v4496_v16, 0.0  ;;  %v3995_v21 = vadd.f32 %v3994_v29, %v3966_v46  ;;  %v3968_v11 = vpop.f32.mrf.mxu1  ;;  %v4022_v17 = vadd.f32 %v4021_v58, %v10315_v40 }
 0x414   : > { %v4581_v59 = vmax.f32 %v4469_v23, 0.0  ;;  %v4048_v35 = vadd.f32 %v4047_v2, %v4019_v37  ;;  %v3969_v6 = vadd.f32 %v3968_v11, %v10316_v53 }
 0x415   : > { %4720 = vst [vmem:[%s9002_s17 + $0x220] sm:$0xff] %v4608_v52  ;;  %v4174_v5 = vadd.f32 %v10052_v60, %v3995_v21 }
 0x416   : > { %4693 = vst [vmem:[%s9002_s17 + $0x148] sm:$0xff] %v4581_v59  ;;  %v4147_v51 = vadd.f32 %v10070_v24, %v4048_v35 }
 0x417   : > { %v4286_v10 = vmul.f32 0.2, %v4174_v5  ;;  %v4427_v5 = vld [vmem:[%s8946_s15 + $0x378] sm:$0xff] }
 0x418   : > { %v4259_v18 = vmul.f32 0.2, %v4147_v51 }
 0x419   : > { %v4510_v38 = vadd.f32 %v4398_v34, %v4286_v10 }
 0x41a   : > { %v4483_v33 = vadd.f32 %v4371_v15, %v4259_v18  ;;  %v4023_v63 = vpop.f32.mrf.mxu0  ;;  %v3997_v13 = vpop.f32.mrf.mxu3 }
 0x41b   : > { %v4050_v19 = vpop.f32.mrf.mxu2  ;;  %v4622_v20 = vmax.f32 %v4510_v38, 0.0  ;;  %v3998_v25 = vadd.f32 %v3997_v13, %v3969_v6  ;;  %v3970_v43 = vpop.f32.mrf.mxu1  ;;  %v4024_v26 = vadd.f32 %v4023_v63, %v10317_v27 }
 0x41c   : > { %v4595_v47 = vmax.f32 %v4483_v33, 0.0  ;;  %v4051_v50 = vadd.f32 %v4050_v19, %v4022_v17  ;;  %v3971_v14 = vadd.f32 %v3970_v43, %v10318_v57 }
 0x41d   : > { %4734 = vst [vmem:[%s9002_s17 + $0x290] sm:$0xff] %v4622_v20  ;;  %v4188_v4 = vadd.f32 %v10052_v60, %v3998_v25 }
 0x41e   : > { %4707 = vst [vmem:[%s9002_s17 + $0x1b8] sm:$0xff] %v4595_v47  ;;  %v4161_v3 = vadd.f32 %v10070_v24, %v4051_v50 }
 0x41f   : > { %v4300_v30 = vmul.f32 0.2, %v4188_v4 }
 0x420   : > { %v4273_v22 = vmul.f32 0.2, %v4161_v3 }
 0x421   : > { %v4524_v55 = vadd.f32 %v4412_v1, %v4300_v30 }
 0x422   : > { %v4497_v0 = vadd.f32 %v4385_v45, %v4273_v22  ;;  %v3999_v9 = vpop.f32.mrf.mxu3  ;;  %v4026_v28 = vpop.f32.mrf.mxu0 }
 0x423   : > { %v4052_v61 = vpop.f32.mrf.mxu2  ;;  %v4636_v56 = vmax.f32 %v4524_v55, 0.0  ;;  %v4000_v12 = vadd.f32 %v3999_v9, %v3971_v14  ;;  %v4027_v23 = vadd.f32 %v4026_v28, %v10319_v31 }
 0x424   : > { %v4609_v42 = vmax.f32 %v4497_v0, 0.0  ;;  %v4053_v54 = vadd.f32 %v4052_v61, %v4024_v26 }
 0x425   : > { %4748 = vst [vmem:[%s9002_s17 + $0x300] sm:$0xff] %v4636_v56  ;;  %v4202_v49 = vadd.f32 %v10052_v60, %v4000_v12  ;;  %v4413_v60 = vld [vmem:[%s8946_s15 + $0x308] sm:$0xff]  ;;  %s6823_s15 = scalar_lea.hbm %s10169_s6, 1792 }
 0x426   : > { %4721 = vst [vmem:[%s9002_s17 + $0x228] sm:$0xff] %v4609_v42  ;;  %v4175_v8 = vadd.f32 %v10070_v24, %v4053_v54  ;;  %p6825_p1 = scmp.lt.s32.totalorder %s6823_s15, %s6819_s9 }
 0x427   : > { %v4314_v41 = vmul.f32 0.2, %v4202_v49 }
 0x428   : > { %v4287_v36 = vmul.f32 0.2, %v4175_v8  ;;  %p6826_p2 = por %p6825_p1, %p6824_p0 }
 0x429   : > { %v4538_v32 = vadd.f32 %v4426_v39, %v4314_v41 }
 0x42a   : > { %v4511_v44 = vadd.f32 %v4399_v62, %v4287_v36  ;;  %v4028_v58 = vpop.f32.mrf.mxu0  ;;  %p6827_p3 = pnand %p6826_p2, %p6822_p13 }
 0x42b   : > { %v4055_v37 = vpop.f32.mrf.mxu2  ;;  %v4650_v46 = vmax.f32 %v4538_v32, 0.0  ;;  %v4029_v35 = vadd.f32 %v4028_v58, %v8998_v48 }
 0x42c   : > { %v4623_v16 = vmax.f32 %v4511_v44, 0.0  ;;  %v4056_v7 = vadd.f32 %v4055_v37, %v4027_v23 }
 0x42d   : > { %4762 = vst [vmem:[%s9002_s17 + $0x370] sm:$0xff] %v4650_v46 }
 0x42e   : > { %4735 = vst [vmem:[%s9002_s17 + $0x298] sm:$0xff] %v4623_v16  ;;  %v4189_v2 = vadd.f32 %v10070_v24, %v4056_v7 }
 0x430   : > { %v4301_v59 = vmul.f32 0.2, %v4189_v2 }
 0x432   : > { %v4525_v29 = vadd.f32 %v4413_v60, %v4301_v59 }
 0x433   : > { %v4057_v52 = vpop.f32.mrf.mxu2 }
 0x434   : > { %v4637_v21 = vmax.f32 %v4525_v29, 0.0  ;;  %v4058_v51 = vadd.f32 %v4057_v52, %v4029_v35 }
 0x436   : > { %4749 = vst [vmem:[%s9002_s17 + $0x308] sm:$0xff] %v4637_v21  ;;  %v4203_v11 = vadd.f32 %v10070_v24, %v4058_v51 }
 0x438   : > { %v4315_v15 = vmul.f32 0.2, %v4203_v11 }
 0x43a   : > { %v4539_v34 = vadd.f32 %v4427_v5, %v4315_v15 }
 0x43c   : > { %v4651_v48 = vmax.f32 %v4539_v34, 0.0 }
 0x43e   : > { %4763 = vst [vmem:[%s9002_s17 + $0x378] sm:$0xff] %v4651_v48 }
 0x43f   : > { %6830 = shalt.err (!%p6827_p3)
}
 0x440   : > { %s6867_s10 = smov 1792   ;;  %s6868_s17 = smov 112  }
 0x441   : > { %6761 = dma.vmem_to_hbm [thread:$0]  (%p6942_p5), %s4779_s28, 14336, %s4781_s25, %s4765_s13, %s6867_s10, %s6867_s10, %s6868_s17  }
 0x442 PF: > { %p6767_p4 = scmp.ge.s32.totalorder %s6865_s24, 2  ;;  %s4795_s18 = sand.u32 1, %s6853_s21  }
 0x443   : > { %s4796_s19 = scalar_lea.sflag [#allocation3], %s4795_s18 }
 0x444   : > { %p6764_p7 = pnand %p6767_p4, %p6946_p6 }
 0x446   : > { %p6765_p8 = pneg %p6764_p7 }
 0x448   : > { %6848 = dma.done.wait (%p6765_p8), %s4796_s19, 14336  }
 0x449   : > { %6850 = vsyncadd (%p6765_p8), %s4796_s19, 4294952960  ;;  %p16_p9 = scmp.ge.s32.totalorder %s6929_s27, 4   ;;  %s10320_s21 = smov %s6857_s22 }
 0x44a   : > { %s10321_s22 = smov %s6861_s23  ;;  %s10322_s23 = smov %s6940_s30 }
 0x44b   : > { %s10323_s24 = smov %s6929_s27  ;;  %18 = sbr.rel (!%p16_p9) target bundleno = 3 (0x3), region = 85 }
 0x450   :  { %4802 = vsyncpa [#allocation3], 1 }
 0x451   :  { %4804 = vsyncpa [#allocation3 + $0x1], 1 }

</bundles_post_ra>
